<compile_context>
chip_gen: v7x
topology: tpu7x:2x2x1
jax: 0.10.0
libtpu: 0.0.40
codegen_flags: <defaults>
</compile_context>

<pallas_src>
import jax
import jax.numpy as jnp
from jax.experimental import pallas as pl
from jax.experimental.pallas import tpu as pltpu


# ---------------------------------------------------------------------------
# Geometry helpers
# ---------------------------------------------------------------------------
def _conv_pool_geometry(h, w, ksize):
    ho, wo = h - ksize + 1, w - ksize + 1
    hp, wp = ho // 2, wo // 2
    nw = hp * wp
    nw_pad = -(-nw // 16) * 16        # 16-aligned rows (bf16 sublane tile)
    return ho, wo, hp, wp, nw, nw_pad


_TB_CONV1 = 8                          # batch elems / grid step, conv1 kernel
_TB_HEAD = 16                          # batch elems / grid step, fused head
_BATCH_ALIGN = 16                      # lcm of the two tile sizes
_NW2 = _conv_pool_geometry(14, 14, 5)[4]      # 25  (5x5 pooled conv2 output)
_NW2_PAD = _conv_pool_geometry(14, 14, 5)[5]  # 32


def _pad_batch(b):
    return -(-b // _BATCH_ALIGN) * _BATCH_ALIGN


# ---------------------------------------------------------------------------
# Pallas kernels
# ---------------------------------------------------------------------------
def _conv_relu_pool_kernel(cols_ref, w_ref, b_ref, o_ref):
    # cols_ref: (TB, 4, NWP, K) bf16 pool-tap-major im2col patches
    #           (tap p = 2*ph+pw holds conv-output pixel (2i+ph, 2j+pw) at
    #            spatial row i*Wp+j; rows >= nw are zero padding).
    # w_ref:    (K, Cout) bf16 ; b_ref: (1, Cout) f32
    # o_ref:    (TB, NWP, Cout) bf16 (padded rows hold relu(bias); caller crops)
    tb, _, nwp, k = cols_ref.shape
    cout = w_ref.shape[1]
    # Fold all 4 pooling taps + TB batch elems into a single MXU issue.
    cols = cols_ref[...].reshape(tb * 4 * nwp, k)
    y = jnp.dot(cols, w_ref[...], preferred_element_type=jnp.float32)
    y = y.reshape(tb, 4, nwp, cout)
    y = jnp.max(y, axis=1)                         # fused 2x2 maxpool
    y = jnp.maximum(y + b_ref[...], 0.0)           # bias+ReLU once, after max
    o_ref[...] = y.astype(o_ref.dtype)


def _conv2_flatten_mlp_kernel(cols_ref, w2_ref, b2_ref,
                              w1_ref, b1_ref, wf2_ref, bf2_ref,
                              wf3_ref, bf3_ref, o_ref):
    # cols_ref: (4, NWP, TB, K2) bf16 spatial-major pool-tap patches of conv2
    # w2_ref:   (K2, C2) bf16 ; b2_ref: (1, C2) f32
    # w1_ref:   (NWP, C2, F1) bf16 fc1 weights pre-permuted to (H,W,C) row
    #           order, spatial rows >= 25 zero-padded.
    # o_ref:    (TB, 10) f32
    nwp, tb, k2 = cols_ref.shape[1], cols_ref.shape[2], cols_ref.shape[3]
    c2 = w2_ref.shape[1]
    # conv2: single tap-folded dot (M = 4*NWP*TB), max over taps, bias+ReLU.
    cols = cols_ref[...].reshape(4 * nwp * tb, k2)
    y = jnp.dot(cols, w2_ref[...], preferred_element_type=jnp.float32)
    y = y.reshape(4, nwp, tb, c2)
    y = jnp.max(y, axis=0)                          # (NWP, TB, C2)
    y = jnp.maximum(y + b2_ref[...], 0.0)
    act = y.astype(jnp.bfloat16)
    # flatten + fc1 as a spatial-batched matmul: padded spatial rows multiply
    # zero weight rows, so no crop / lane-merging reshape is needed in-kernel.
    h = jnp.einsum("pbc,pcf->pbf", act, w1_ref[...],
                   preferred_element_type=jnp.float32)   # (NWP, TB, F1)
    h = jnp.sum(h, axis=0)                               # (TB, F1)
    h = jnp.maximum(h + b1_ref[...], 0.0)
    h = jnp.dot(h.astype(jnp.bfloat16), wf2_ref[...],
                preferred_element_type=jnp.float32)
    h = jnp.maximum(h + bf2_ref[...], 0.0)
    h = jnp.dot(h.astype(jnp.bfloat16), wf3_ref[...],
                preferred_element_type=jnp.float32)
    o_ref[...] = (h + bf3_ref[...]).astype(o_ref.dtype)


# ---------------------------------------------------------------------------
# Wrapper-side im2col (bf16 end-to-end)
# ---------------------------------------------------------------------------
def _tap_stack(x, ksize):
    b, h, w, c = x.shape
    ho, wo = h - ksize + 1, w - ksize + 1
    taps = [x[:, kh:kh + ho, kw:kw + wo, :]
            for kh in range(ksize) for kw in range(ksize)]
    return jnp.concatenate(taps, axis=-1)           # (B, Ho, Wo, k*k*C)


def _pool_tap_patches_batch_major(x, ksize):
    b = x.shape[0]
    _, _, hp, wp, nw, nw_pad = _conv_pool_geometry(x.shape[1], x.shape[2], ksize)
    k = ksize * ksize * x.shape[3]
    p = _tap_stack(x, ksize)[:, :2 * hp, :2 * wp, :]
    p = p.reshape(b, hp, 2, wp, 2, k)
    p = jnp.transpose(p, (0, 2, 4, 1, 3, 5)).reshape(b, 4, nw, k)
    if nw_pad != nw:
        p = jnp.pad(p, ((0, 0), (0, 0), (0, nw_pad - nw), (0, 0)))
    return p, hp, wp, nw, nw_pad


def _pool_tap_patches_spatial_major(x, ksize):
    b = x.shape[0]
    _, _, hp, wp, nw, nw_pad = _conv_pool_geometry(x.shape[1], x.shape[2], ksize)
    k = ksize * ksize * x.shape[3]
    p = _tap_stack(x, ksize)[:, :2 * hp, :2 * wp, :]
    p = p.reshape(b, hp, 2, wp, 2, k)
    p = jnp.transpose(p, (2, 4, 1, 3, 0, 5)).reshape(4, nw, b, k)
    if nw_pad != nw:
        p = jnp.pad(p, ((0, 0), (0, nw_pad - nw), (0, 0), (0, 0)))
    return p, nw, nw_pad


# ---------------------------------------------------------------------------
# pallas_call wrappers
# ---------------------------------------------------------------------------
def conv1_relu_pool(x, wmat, bias, ksize):
    b = x.shape[0]
    cout = wmat.shape[-1]
    cols, hp, wp, nw, nw_pad = _pool_tap_patches_batch_major(x, ksize)
    k = cols.shape[-1]
    out = pl.pallas_call(
        _conv_relu_pool_kernel,
        out_shape=jax.ShapeDtypeStruct((b, nw_pad, cout), jnp.bfloat16),
        grid=(b // _TB_CONV1,),
        in_specs=[
            pl.BlockSpec((_TB_CONV1, 4, nw_pad, k), lambda i: (i, 0, 0, 0)),
            pl.BlockSpec((k, cout), lambda i: (0, 0)),
            pl.BlockSpec((1, cout), lambda i: (0, 0)),
        ],
        out_specs=pl.BlockSpec((_TB_CONV1, nw_pad, cout), lambda i: (i, 0, 0)),
        compiler_params=pltpu.CompilerParams(
            dimension_semantics=("parallel",)),
    )(cols, wmat, bias)
    # Crop padded rows (they hold relu(bias)) and restore NHWC spatial layout.
    return out[:, :nw, :].reshape(b, hp, wp, cout)


def conv2_flatten_mlp(x, params, ksize=5):
    b = x.shape[0]
    cols, nw, nw_pad = _pool_tap_patches_spatial_major(x, ksize)
    k = cols.shape[-1]
    c2 = params["w2"].shape[-1]
    f1 = params["fc1_w"].shape[-1]
    f2 = params["fc2_w"].shape[-1]
    f3 = params["fc3_w"].shape[-1]
    return pl.pallas_call(
        _conv2_flatten_mlp_kernel,
        out_shape=jax.ShapeDtypeStruct((b, f3), jnp.float32),
        grid=(b // _TB_HEAD,),
        in_specs=[
            pl.BlockSpec((4, nw_pad, _TB_HEAD, k), lambda i: (0, 0, i, 0)),
            pl.BlockSpec((k, c2), lambda i: (0, 0)),
            pl.BlockSpec((1, c2), lambda i: (0, 0)),
            pl.BlockSpec((nw_pad, c2, f1), lambda i: (0, 0, 0)),
            pl.BlockSpec((1, f1), lambda i: (0, 0)),
            pl.BlockSpec((f1, f2), lambda i: (0, 0)),
            pl.BlockSpec((1, f2), lambda i: (0, 0)),
            pl.BlockSpec((f2, f3), lambda i: (0, 0)),
            pl.BlockSpec((1, f3), lambda i: (0, 0)),
        ],
        out_specs=pl.BlockSpec((_TB_HEAD, f3), lambda i: (i, 0)),
        compiler_params=pltpu.CompilerParams(
            dimension_semantics=("parallel",)),
    )(cols, params["w2"], params["b2"],
      params["fc1_w"], params["fc1_b"],
      params["fc2_w"], params["fc2_b"],
      params["fc3_w"], params["fc3_b"])


# ---------------------------------------------------------------------------
# Parameters (deterministic, synthetic)
# ---------------------------------------------------------------------------
def init_params(key):
    ks = jax.random.split(key, 10)

    def conv_w(k, kh, kw, cin, cout):
        w = jax.random.normal(k, (kh, kw, cin, cout), jnp.float32)
        w = w * jnp.sqrt(2.0 / (kh * kw * cin))
        return w.reshape(kh * kw * cin, cout).astype(jnp.bfloat16)

    def fc_w(k, din, dout):
        return (jax.random.normal(k, (din, dout), jnp.float32)
                / jnp.sqrt(din)).astype(jnp.bfloat16)

    # torch flattens conv2's NCHW output: fc1 input index = c*25 + h*5 + w.
    # Pre-permute fc1 rows to (h*5+w, c) order and zero-pad the spatial rows to
    # _NW2_PAD so the fused kernel never needs a flatten/transpose.
    fc1_chw = fc_w(ks[4], 16 * 5 * 5, 120)                        # (400, 120)
    fc1_hwc = jnp.transpose(fc1_chw.reshape(16, _NW2, 120), (1, 0, 2))
    fc1_hwc = jnp.pad(fc1_hwc, ((0, _NW2_PAD - _NW2), (0, 0), (0, 0)))

    return {
        "w1": conv_w(ks[0], 5, 5, 3, 6),
        "b1": 0.01 * jax.random.normal(ks[1], (1, 6), jnp.float32),
        "w2": conv_w(ks[2], 5, 5, 6, 16),
        "b2": 0.01 * jax.random.normal(ks[3], (1, 16), jnp.float32),
        "fc1_w": fc1_hwc,                                         # (32,16,120)
        "fc1_b": 0.01 * jax.random.normal(ks[5], (1, 120), jnp.float32),
        "fc2_w": fc_w(ks[6], 120, 84),
        "fc2_b": 0.01 * jax.random.normal(ks[7], (1, 84), jnp.float32),
        "fc3_w": fc_w(ks[8], 84, 10),
        "fc3_b": 0.01 * jax.random.normal(ks[9], (1, 10), jnp.float32),
    }


# ---------------------------------------------------------------------------
# Forward pass (mirrors Net.forward)
# ---------------------------------------------------------------------------
def net_forward(params, x_nchw):
    b = x_nchw.shape[0]
    b_pad = _pad_batch(b)
    # NCHW -> NHWC (channels on lanes); cast to bf16 immediately so all
    # im2col intermediates move half the HBM bytes.
    x = jnp.transpose(x_nchw, (0, 2, 3, 1)).astype(jnp.bfloat16)
    if b_pad != b:
        x = jnp.pad(x, ((0, b_pad - b), (0, 0), (0, 0), (0, 0)))
    x = conv1_relu_pool(x, params["w1"], params["b1"], 5)   # (b_pad,14,14,6)
    logits = conv2_flatten_mlp(x, params)                   # (b_pad, 10) f32
    return logits[:b]


if __name__ == "__main__":
    key = jax.random.PRNGKey(0)
    pkey, xkey = jax.random.split(key)
    params = init_params(pkey)
    # CIFAR-shaped input implied by fc1 = Linear(16*5*5, 120): (B, 3, 32, 32)
    x = jax.random.normal(xkey, (2, 3, 32, 32), jnp.float32)
    logits = jax.jit(net_forward)(params, x)
    jax.block_until_ready(logits)
    assert logits.shape == (2, 10) and bool(jnp.all(jnp.isfinite(logits)))
    print("KERNEL_OK")
</pallas_src>

<mosaic_0001>
module attributes {stable_mosaic.version = 11 : i64} {
  func.func @_conv_relu_pool_kernel(%arg0: i32, %arg1: memref<8x4x208x75xbf16, #tpu.memory_space<vmem>>, %arg2: memref<75x6xbf16, #tpu.memory_space<vmem>>, %arg3: memref<1x6xf32, #tpu.memory_space<vmem>>, %arg4: memref<8x208x6xbf16, #tpu.memory_space<vmem>>) attributes {dimension_semantics = [#tpu.dimension_semantics<parallel>], iteration_bounds = array<i64: 2>, scalar_prefetch = 0 : i64, scratch_operands = 0 : i64, tpu.core_type = #tpu.core_type<tc>, window_params = [{transform_indices = @transform_0, window_bounds = array<i64: 8, 4, 208, 75>}, {pipeline_mode = #tpu.pipeline_mode<synchronous>, transform_indices = @transform_1, window_bounds = array<i64: 75, 6>}, {pipeline_mode = #tpu.pipeline_mode<synchronous>, transform_indices = @transform_2, window_bounds = array<i64: 1, 6>}, {transform_indices = @transform_3, window_bounds = array<i64: 8, 208, 6>}]} {
    %c0 = arith.constant 0 : index
    %c0_0 = arith.constant 0 : index
    %c0_1 = arith.constant 0 : index
    %c0_2 = arith.constant 0 : index
    %0 = vector.load %arg1[%c0, %c0_0, %c0_1, %c0_2] : memref<8x4x208x75xbf16, #tpu.memory_space<vmem>>, vector<8x4x208x75xbf16>
    %1 = vector.shape_cast %0 : vector<8x4x208x75xbf16> to vector<6656x75xbf16>
    %c0_3 = arith.constant 0 : index
    %c0_4 = arith.constant 0 : index
    %2 = vector.load %arg2[%c0_3, %c0_4] : memref<75x6xbf16, #tpu.memory_space<vmem>>, vector<75x6xbf16>
    %cst = arith.constant dense<0.000000e+00> : vector<6656x6xf32>
    %3 = tpu.matmul %1, %2, %cst {dimension_numbers = #tpu.dot_dimension_numbers<[1], [0], [0], [1], [0, 0, 1, 1], [], []>} : vector<6656x75xbf16>, vector<75x6xbf16>, vector<6656x6xf32> -> vector<6656x6xf32>
    %4 = vector.shape_cast %3 : vector<6656x6xf32> to vector<8x4x208x6xf32>
    %cst_5 = arith.constant dense<0xFF800000> : vector<8x208x6xf32>
    %5 = vector.multi_reduction <maximumf>, %4, %cst_5 [1] : vector<8x4x208x6xf32> to vector<8x208x6xf32>
    %c0_6 = arith.constant 0 : index
    %c0_7 = arith.constant 0 : index
    %6 = vector.load %arg3[%c0_6, %c0_7] : memref<1x6xf32, #tpu.memory_space<vmem>>, vector<1x6xf32>
    %7 = vector.shape_cast %6 : vector<1x6xf32> to vector<1x1x6xf32>
    %8 = vector.broadcast %7 : vector<1x1x6xf32> to vector<8x208x6xf32>
    %9 = arith.addf %5, %8 : vector<8x208x6xf32>
    %cst_8 = arith.constant 0.000000e+00 : f32
    %10 = vector.broadcast %cst_8 : f32 to vector<8x208x6xf32>
    %11 = arith.maximumf %9, %10 : vector<8x208x6xf32>
    %12 = arith.truncf %11 : vector<8x208x6xf32> to vector<8x208x6xbf16>
    %c0_9 = arith.constant 0 : index
    %c0_10 = arith.constant 0 : index
    %c0_11 = arith.constant 0 : index
    %13 = vector.load %arg4[%c0_9, %c0_10, %c0_11] : memref<8x208x6xbf16, #tpu.memory_space<vmem>>, vector<8x208x6xbf16>
    tpu.vector_store %arg4[%c0_9, %c0_10, %c0_11], %12 {strides = array<i32>} : memref<8x208x6xbf16, #tpu.memory_space<vmem>>, vector<8x208x6xbf16>,
    return
  }
  func.func @transform_0(%arg0: i32) -> (i32, i32, i32, i32) {
    %c0_i32 = arith.constant 0 : i32
    %c0_i32_0 = arith.constant 0 : i32
    %c0_i32_1 = arith.constant 0 : i32
    %c0_i32_2 = arith.constant 0 : i32
    return %arg0, %c0_i32, %c0_i32_0, %c0_i32_1 : i32, i32, i32, i32
  }
  func.func @transform_1(%arg0: i32) -> (i32, i32) {
    %c0_i32 = arith.constant 0 : i32
    %c0_i32_0 = arith.constant 0 : i32
    %c0_i32_1 = arith.constant 0 : i32
    return %c0_i32, %c0_i32_0 : i32, i32
  }
  func.func @transform_2(%arg0: i32) -> (i32, i32) {
    %c0_i32 = arith.constant 0 : i32
    %c0_i32_0 = arith.constant 0 : i32
    %c0_i32_1 = arith.constant 0 : i32
    return %c0_i32, %c0_i32_0 : i32, i32
  }
  func.func @transform_3(%arg0: i32) -> (i32, i32, i32) {
    %c0_i32 = arith.constant 0 : i32
    %c0_i32_0 = arith.constant 0 : i32
    %c0_i32_1 = arith.constant 0 : i32
    return %arg0, %c0_i32, %c0_i32_0 : i32, i32, i32
  }
}

module attributes {stable_mosaic.version = 11 : i64} {
  func.func @_conv2_flatten_mlp_kernel(%arg0: i32, %arg1: memref<4x32x16x150xbf16, #tpu.memory_space<vmem>>, %arg2: memref<150x16xbf16, #tpu.memory_space<vmem>>, %arg3: memref<1x16xf32, #tpu.memory_space<vmem>>, %arg4: memref<32x16x120xbf16, #tpu.memory_space<vmem>>, %arg5: memref<1x120xf32, #tpu.memory_space<vmem>>, %arg6: memref<120x84xbf16, #tpu.memory_space<vmem>>, %arg7: memref<1x84xf32, #tpu.memory_space<vmem>>, %arg8: memref<84x10xbf16, #tpu.memory_space<vmem>>, %arg9: memref<1x10xf32, #tpu.memory_space<vmem>>, %arg10: memref<16x10xf32, #tpu.memory_space<vmem>>) attributes {dimension_semantics = [#tpu.dimension_semantics<parallel>], iteration_bounds = array<i64: 1>, scalar_prefetch = 0 : i64, scratch_operands = 0 : i64, tpu.core_type = #tpu.core_type<tc>, window_params = [{transform_indices = @transform_0, window_bounds = array<i64: 4, 32, 16, 150>}, {pipeline_mode = #tpu.pipeline_mode<synchronous>, transform_indices = @transform_1, window_bounds = array<i64: 150, 16>}, {pipeline_mode = #tpu.pipeline_mode<synchronous>, transform_indices = @transform_2, window_bounds = array<i64: 1, 16>}, {pipeline_mode = #tpu.pipeline_mode<synchronous>, transform_indices = @transform_3, window_bounds = array<i64: 32, 16, 120>}, {pipeline_mode = #tpu.pipeline_mode<synchronous>, transform_indices = @transform_4, window_bounds = array<i64: 1, 120>}, {pipeline_mode = #tpu.pipeline_mode<synchronous>, transform_indices = @transform_5, window_bounds = array<i64: 120, 84>}, {pipeline_mode = #tpu.pipeline_mode<synchronous>, transform_indices = @transform_6, window_bounds = array<i64: 1, 84>}, {pipeline_mode = #tpu.pipeline_mode<synchronous>, transform_indices = @transform_7, window_bounds = array<i64: 84, 10>}, {pipeline_mode = #tpu.pipeline_mode<synchronous>, transform_indices = @transform_8, window_bounds = array<i64: 1, 10>}, {transform_indices = @transform_9, window_bounds = array<i64: 16, 10>}]} {
    %c0 = arith.constant 0 : index
    %c0_0 = arith.constant 0 : index
    %c0_1 = arith.constant 0 : index
    %c0_2 = arith.constant 0 : index
    %0 = vector.load %arg1[%c0, %c0_0, %c0_1, %c0_2] : memref<4x32x16x150xbf16, #tpu.memory_space<vmem>>, vector<4x32x16x150xbf16>
    %1 = vector.shape_cast %0 : vector<4x32x16x150xbf16> to vector<2048x150xbf16>
    %c0_3 = arith.constant 0 : index
    %c0_4 = arith.constant 0 : index
    %2 = vector.load %arg2[%c0_3, %c0_4] : memref<150x16xbf16, #tpu.memory_space<vmem>>, vector<150x16xbf16>
    %cst = arith.constant dense<0.000000e+00> : vector<2048x16xf32>
    %3 = tpu.matmul %1, %2, %cst {dimension_numbers = #tpu.dot_dimension_numbers<[1], [0], [0], [1], [0, 0, 1, 1], [], []>} : vector<2048x150xbf16>, vector<150x16xbf16>, vector<2048x16xf32> -> vector<2048x16xf32>
    %4 = vector.shape_cast %3 : vector<2048x16xf32> to vector<4x32x16x16xf32>
    %cst_5 = arith.constant dense<0xFF800000> : vector<32x16x16xf32>
    %5 = vector.multi_reduction <maximumf>, %4, %cst_5 [0] : vector<4x32x16x16xf32> to vector<32x16x16xf32>
    %c0_6 = arith.constant 0 : index
    %c0_7 = arith.constant 0 : index
    %6 = vector.load %arg3[%c0_6, %c0_7] : memref<1x16xf32, #tpu.memory_space<vmem>>, vector<1x16xf32>
    %7 = vector.shape_cast %6 : vector<1x16xf32> to vector<1x1x16xf32>
    %8 = vector.broadcast %7 : vector<1x1x16xf32> to vector<32x16x16xf32>
    %9 = arith.addf %5, %8 : vector<32x16x16xf32>
    %cst_8 = arith.constant 0.000000e+00 : f32
    %10 = vector.broadcast %cst_8 : f32 to vector<32x16x16xf32>
    %11 = arith.maximumf %9, %10 : vector<32x16x16xf32>
    %12 = arith.truncf %11 : vector<32x16x16xf32> to vector<32x16x16xbf16>
    %c0_9 = arith.constant 0 : index
    %c0_10 = arith.constant 0 : index
    %c0_11 = arith.constant 0 : index
    %13 = vector.load %arg4[%c0_9, %c0_10, %c0_11] : memref<32x16x120xbf16, #tpu.memory_space<vmem>>, vector<32x16x120xbf16>
    "tpu.trace_start"() <{level = 10 : i32, message = "pbc,pcf->pbf"}> : () -> ()
    %cst_12 = arith.constant dense<0.000000e+00> : vector<32x16x120xf32>
    %14 = tpu.matmul %12, %13, %cst_12 {dimension_numbers = #tpu.dot_dimension_numbers<[2], [1], [1], [2], [0, 0, 0, 1, 1, 2], [0], [0]>} : vector<32x16x16xbf16>, vector<32x16x120xbf16>, vector<32x16x120xf32> -> vector<32x16x120xf32>
    "tpu.trace_stop"() : () -> ()
    %cst_13 = arith.constant dense<0.000000e+00> : vector<16x120xf32>
    %15 = vector.multi_reduction <add>, %14, %cst_13 [0] : vector<32x16x120xf32> to vector<16x120xf32>
    %c0_14 = arith.constant 0 : index
    %c0_15 = arith.constant 0 : index
    %16 = vector.load %arg5[%c0_14, %c0_15] : memref<1x120xf32, #tpu.memory_space<vmem>>, vector<1x120xf32>
    %17 = vector.broadcast %16 : vector<1x120xf32> to vector<16x120xf32>
    %18 = arith.addf %15, %17 : vector<16x120xf32>
    %cst_16 = arith.constant 0.000000e+00 : f32
    %19 = vector.broadcast %cst_16 : f32 to vector<16x120xf32>
    %20 = arith.maximumf %18, %19 : vector<16x120xf32>
    %21 = arith.truncf %20 : vector<16x120xf32> to vector<16x120xbf16>
    %c0_17 = arith.constant 0 : index
    %c0_18 = arith.constant 0 : index
    %22 = vector.load %arg6[%c0_17, %c0_18] : memref<120x84xbf16, #tpu.memory_space<vmem>>, vector<120x84xbf16>
    %cst_19 = arith.constant dense<0.000000e+00> : vector<16x84xf32>
    %23 = tpu.matmul %21, %22, %cst_19 {dimension_numbers = #tpu.dot_dimension_numbers<[1], [0], [0], [1], [0, 0, 1, 1], [], []>} : vector<16x120xbf16>, vector<120x84xbf16>, vector<16x84xf32> -> vector<16x84xf32>
    %c0_20 = arith.constant 0 : index
    %c0_21 = arith.constant 0 : index
    %24 = vector.load %arg7[%c0_20, %c0_21] : memref<1x84xf32, #tpu.memory_space<vmem>>, vector<1x84xf32>
    %25 = vector.broadcast %24 : vector<1x84xf32> to vector<16x84xf32>
    %26 = arith.addf %23, %25 : vector<16x84xf32>
    %cst_22 = arith.constant 0.000000e+00 : f32
    %27 = vector.broadcast %cst_22 : f32 to vector<16x84xf32>
    %28 = arith.maximumf %26, %27 : vector<16x84xf32>
    %29 = arith.truncf %28 : vector<16x84xf32> to vector<16x84xbf16>
    %c0_23 = arith.constant 0 : index
    %c0_24 = arith.constant 0 : index
    %30 = vector.load %arg8[%c0_23, %c0_24] : memref<84x10xbf16, #tpu.memory_space<vmem>>, vector<84x10xbf16>
    %cst_25 = arith.constant dense<0.000000e+00> : vector<16x10xf32>
    %31 = tpu.matmul %29, %30, %cst_25 {dimension_numbers = #tpu.dot_dimension_numbers<[1], [0], [0], [1], [0, 0, 1, 1], [], []>} : vector<16x84xbf16>, vector<84x10xbf16>, vector<16x10xf32> -> vector<16x10xf32>
    %c0_26 = arith.constant 0 : index
    %c0_27 = arith.constant 0 : index
    %32 = vector.load %arg9[%c0_26, %c0_27] : memref<1x10xf32, #tpu.memory_space<vmem>>, vector<1x10xf32>
    %33 = vector.broadcast %32 : vector<1x10xf32> to vector<16x10xf32>
    %34 = arith.addf %31, %33 : vector<16x10xf32>
    %c0_28 = arith.constant 0 : index
    %c0_29 = arith.constant 0 : index
    %35 = vector.load %arg10[%c0_28, %c0_29] : memref<16x10xf32, #tpu.memory_space<vmem>>, vector<16x10xf32>
    tpu.vector_store %arg10[%c0_28, %c0_29], %34 {strides = array<i32>} : memref<16x10xf32, #tpu.memory_space<vmem>>, vector<16x10xf32>,
    return
  }
  func.func @transform_0(%arg0: i32) -> (i32, i32, i32, i32) {
    %c0_i32 = arith.constant 0 : i32
    %c0_i32_0 = arith.constant 0 : i32
    %c0_i32_1 = arith.constant 0 : i32
    %c0_i32_2 = arith.constant 0 : i32
    return %c0_i32, %c0_i32_0, %arg0, %c0_i32_1 : i32, i32, i32, i32
  }
  func.func @transform_1(%arg0: i32) -> (i32, i32) {
    %c0_i32 = arith.constant 0 : i32
    %c0_i32_0 = arith.constant 0 : i32
    %c0_i32_1 = arith.constant 0 : i32
    return %c0_i32, %c0_i32_0 : i32, i32
  }
  func.func @transform_2(%arg0: i32) -> (i32, i32) {
    %c0_i32 = arith.constant 0 : i32
    %c0_i32_0 = arith.constant 0 : i32
    %c0_i32_1 = arith.constant 0 : i32
    return %c0_i32, %c0_i32_0 : i32, i32
  }
  func.func @transform_3(%arg0: i32) -> (i32, i32, i32) {
    %c0_i32 = arith.constant 0 : i32
    %c0_i32_0 = arith.constant 0 : i32
    %c0_i32_1 = arith.constant 0 : i32
    %c0_i32_2 = arith.constant 0 : i32
    return %c0_i32, %c0_i32_0, %c0_i32_1 : i32, i32, i32
  }
  func.func @transform_4(%arg0: i32) -> (i32, i32) {
    %c0_i32 = arith.constant 0 : i32
    %c0_i32_0 = arith.constant 0 : i32
    %c0_i32_1 = arith.constant 0 : i32
    return %c0_i32, %c0_i32_0 : i32, i32
  }
  func.func @transform_5(%arg0: i32) -> (i32, i32) {
    %c0_i32 = arith.constant 0 : i32
    %c0_i32_0 = arith.constant 0 : i32
    %c0_i32_1 = arith.constant 0 : i32
    return %c0_i32, %c0_i32_0 : i32, i32
  }
  func.func @transform_6(%arg0: i32) -> (i32, i32) {
    %c0_i32 = arith.constant 0 : i32
    %c0_i32_0 = arith.constant 0 : i32
    %c0_i32_1 = arith.constant 0 : i32
    return %c0_i32, %c0_i32_0 : i32, i32
  }
  func.func @transform_7(%arg0: i32) -> (i32, i32) {
    %c0_i32 = arith.constant 0 : i32
    %c0_i32_0 = arith.constant 0 : i32
    %c0_i32_1 = arith.constant 0 : i32
    return %c0_i32, %c0_i32_0 : i32, i32
  }
  func.func @transform_8(%arg0: i32) -> (i32, i32) {
    %c0_i32 = arith.constant 0 : i32
    %c0_i32_0 = arith.constant 0 : i32
    %c0_i32_1 = arith.constant 0 : i32
    return %c0_i32, %c0_i32_0 : i32, i32
  }
  func.func @transform_9(%arg0: i32) -> (i32, i32) {
    %c0_i32 = arith.constant 0 : i32
    %c0_i32_0 = arith.constant 0 : i32
    return %arg0, %c0_i32 : i32, i32
  }
}

</mosaic_0001>

<bundles_post_ra>
// kernel: net_forward.2
= control target key start
LH: loop header
LB: loop body
LE: loop exit
PB: predicated region body
PF: predicated region fallthrough
CT: control target
= control target key end

     0   :  { %s13730_s12 = smov 0   ;;  %s19292_s0 = inlined_call_operand.vmem [shape: bf16[16,4,208,75], index: 0, kind: input, shape index: {}]   ;;  %s19293_s1 = inlined_call_operand.vmem [shape: bf16[75,6], index: 1, kind: input, shape index: {}]   ;;  %s19294_s2 = inlined_call_operand.vmem [shape: f32[1,6], index: 2, kind: input, shape index: {}]   ;;  %s19295_s3 = inlined_call_operand.vmem [shape: bf16[16,208,6], index: 3, kind: output, shape index: {}]  }
   0x1 LB: > { %s10727_s13 = sadd.s32 4294967295, %s13707_s12   ;;  %p10731_p0 = scmp.ge.s32.totalorder %s13707_s12, 1  ;;  %s13707_s12 = sphi %s13730_s12, %s13_s12  }
   0x2   : > { %p139_p1 = scmp.lt.s32.totalorder %s13707_s12, 3 }
   0x4   : > { %p140_p2 = pnand %p10731_p0, %p139_p1 }
   0x6   : > { %143 = sbr.rel (%p140_p2) target bundleno = 1098 (0x44a), region = 32 }
   0xd   : > { %v13276_v0 = vld [vmem:[%s19293_s1] sm:$0xff]   ;;  %v13277_v1 = vld [vmem:[%s19293_s1 + $0x8] sm:$0xff]   ;;  %vm4380_vm0 = vcmask 1044480   ;;  %v13278_v2 = vld [vmem:[%s19293_s1 + $0x10] sm:$0xff]   ;;  %s10732_s20 = sshll.u32 %s10727_s13, 3  ;;  %vm4381_vm1 = vcmask 1045504  }
   0xe   : > { %12413 = vmatprep.subr.bf16.mxu0 %v13276_v0  ;;  %13255 = vmatprep.subr.bf16.mxu1 %v13276_v0  ;;  %v13709_v3 = vmov 65535   ;;  %p166_p3 = scmp.lt.s32.totalorder %s10732_s20, 15  ;;  %v13279_v5 = vld [vmem:[%s19293_s1 + $0x18] sm:$0xff]   ;;  %v13280_v6 = vld [vmem:[%s19293_s1 + $0x20] sm:$0x3f]   ;;  %vm3131_vm2 = vcmask 613376  }
   0xf   : > { %12414 = vmatpush3.bf16.msra.mxu0 %v13276_v0  ;;  %13260 = vmatpush3.bf16.msra.mxu1 %v13276_v0  ;;  %v4382_v4 = vsel %vm4380_vm0, 4294967295, %v13709_v3  ;;  %vm7748_vm3 = vcmask 48128   ;;  %vm10460_vm4 = vcmask 44032  }
  0x10   : > { %12415 = vmatprep.subr.bf16.mxu0 %v13277_v1  ;;  %13256 = vmatprep.subr.bf16.mxu1 %v13277_v1  ;;  %s20263_s20 = smov (!%p166_p3, %s10732_s20), 15  ;;  %v4383_v7 = vsel %vm4381_vm1, %v4382_v4, 0 }
  0x11   : > { %s13265_s25 = smul.u32 416, %s20263_s20  ;;  %v4385_v8 = vand.u32 %v13280_v6, %v4383_v7 }
  0x12   : > { %s13266_s29 = smul.u32 104, %s20263_s20 }
  0x13   : > { %12416 = vmatpush3.bf16.msra.mxu0 %v13277_v1  ;;  %13261 = vmatpush3.bf16.msra.mxu1 %v13277_v1  ;;  %s13759_s28 = scalar_lea.vmem %s19292_s0, %s13265_s25 }
  0x14   : > { %12417 = vmatprep.subr.bf16.mxu0 %v13278_v2  ;;  %13257 = vmatprep.subr.bf16.mxu1 %v13278_v2  ;;  %v13281_v9 = vld [vmem:[%s13759_s28] sm:$0xff]   ;;  %v13283_v11 = vld [vmem:[%s13759_s28 + $0x8] sm:$0xff]   ;;  %v13285_v13 = vld [vmem:[%s13759_s28 + $0x10] sm:$0xff]   ;;  %s15038_s7 = scalar_lea.vmem %s19295_s3, %s13266_s29 }
  0x15   : > { %v13282_v10 = vld [vmem:[%s13759_s28 + $0x680] sm:$0xff]   ;;  %12423 = vmatprep.mubr.msk.bf16.mxu0 %vm3131_vm2, %v13281_v9  ;;  %v13284_v12 = vld [vmem:[%s13759_s28 + $0x688] sm:$0xff]   ;;  %v13286_v14 = vld [vmem:[%s13759_s28 + $0x690] sm:$0xff]  }
  0x16   : > { %12839 = vmatprep.mubr.msk.bf16.mxu1 %vm3131_vm2, %v13282_v10  ;;  %v13287_v15 = vld [vmem:[%s13759_s28 + $0x18] sm:$0xff]   ;;  %v13289_v17 = vld [vmem:[%s13759_s28 + $0x20] sm:$0xff]   ;;  %v13291_v19 = vld [vmem:[%s13759_s28 + $0x28] sm:$0xff]  }
  0x17   : > { %12418 = vmatpush3.bf16.msra.mxu0 %v13278_v2  ;;  %13262 = vmatpush3.bf16.msra.mxu1 %v13278_v2  ;;  %v13288_v16 = vld [vmem:[%s13759_s28 + $0x698] sm:$0xff]   ;;  %v13290_v18 = vld [vmem:[%s13759_s28 + $0x6a0] sm:$0xff]   ;;  %v13292_v20 = vld [vmem:[%s13759_s28 + $0x6a8] sm:$0xff]  }
  0x18   : > { %12419 = vmatprep.subr.bf16.mxu0 %v13279_v5  ;;  %13258 = vmatprep.subr.bf16.mxu1 %v13279_v5  ;;  %v13293_v21 = vld [vmem:[%s13759_s28 + $0x30] sm:$0xff]   ;;  %v13295_v23 = vld [vmem:[%s13759_s28 + $0x38] sm:$0xff]   ;;  %v13297_v25 = vld [vmem:[%s13759_s28 + $0x40] sm:$0xff]  }
  0x19   : > { %v13294_v22 = vld [vmem:[%s13759_s28 + $0x6b0] sm:$0xff]   ;;  %v13296_v24 = vld [vmem:[%s13759_s28 + $0x6b8] sm:$0xff]   ;;  %v13298_v26 = vld [vmem:[%s13759_s28 + $0x6c0] sm:$0xff]  }
  0x1a   : > { %v13299_v27 = vld [vmem:[%s13759_s28 + $0x48] sm:$0xff]   ;;  %v13301_v29 = vld [vmem:[%s13759_s28 + $0x50] sm:$0xff]   ;;  %v13303_v31 = vld [vmem:[%s13759_s28 + $0x58] sm:$0xff]  }
  0x1b   : > { %12420 = vmatpush3.bf16.msra.mxu0 %v13279_v5  ;;  %13263 = vmatpush3.bf16.msra.mxu1 %v13279_v5  ;;  %v13300_v28 = vld [vmem:[%s13759_s28 + $0x6c8] sm:$0xff]   ;;  %v13302_v30 = vld [vmem:[%s13759_s28 + $0x6d0] sm:$0xff]   ;;  %v13304_v32 = vld [vmem:[%s13759_s28 + $0x6d8] sm:$0xff]  }
  0x1c   : > { %12421 = vmatprep.subr.bf16.mxu0 %v4385_v8  ;;  %13259 = vmatprep.subr.bf16.mxu1 %v4385_v8  ;;  %v13305_v33 = vld [vmem:[%s13759_s28 + $0x60] sm:$0xff]   ;;  %v13307_v35 = vld [vmem:[%s13759_s28 + $0x68] sm:$0xff]   ;;  %v13309_v37 = vld [vmem:[%s13759_s28 + $0x70] sm:$0xff]  }
  0x1d   : > { %v13306_v34 = vld [vmem:[%s13759_s28 + $0x6e0] sm:$0xff]   ;;  %v13308_v36 = vld [vmem:[%s13759_s28 + $0x6e8] sm:$0xff]   ;;  %v13310_v38 = vld [vmem:[%s13759_s28 + $0x6f0] sm:$0xff]  }
  0x1e   : > { %v13311_v39 = vld [vmem:[%s13759_s28 + $0x78] sm:$0xff]   ;;  %v13313_v41 = vld [vmem:[%s13759_s28 + $0x80] sm:$0xff]   ;;  %v13315_v43 = vld [vmem:[%s13759_s28 + $0x88] sm:$0xff]  }
  0x1f   : > { %12422 = vmatpush3.bf16.msra.mxu0 %v4385_v8  ;;  %13264 = vmatpush3.bf16.msra.mxu1 %v4385_v8  ;;  %v13312_v40 = vld [vmem:[%s13759_s28 + $0x6f8] sm:$0xff]   ;;  %v13314_v42 = vld [vmem:[%s13759_s28 + $0x700] sm:$0xff]   ;;  %v13316_v44 = vld [vmem:[%s13759_s28 + $0x708] sm:$0xff]  }
  0x20   : > { %v13317_v45 = vld [vmem:[%s13759_s28 + $0x90] sm:$0xff]   ;;  %v13319_v47 = vld [vmem:[%s13759_s28 + $0x98] sm:$0xff]   ;;  %v13321_v49 = vld [vmem:[%s13759_s28 + $0xa0] sm:$0xff]  }
  0x21   : > { %v13318_v46 = vld [vmem:[%s13759_s28 + $0x710] sm:$0xff]   ;;  %v13320_v48 = vld [vmem:[%s13759_s28 + $0x718] sm:$0xff]   ;;  %v13322_v50 = vld [vmem:[%s13759_s28 + $0x720] sm:$0xff]  }
  0x22   : > { %12424 = vmatmul.mubr.msk.bf16.vlgmr.msra.gmra.mrb[0].mxu0 %vm3131_vm2, %v13283_v11  ;;  %12840 = vmatmul.mubr.msk.bf16.vlgmr.msra.gmra.mrb[0].mxu1 %vm3131_vm2, %v13284_v12  ;;  %v13323_v51 = vld [vmem:[%s13759_s28 + $0xa8] sm:$0xff]   ;;  %v13325_v53 = vld [vmem:[%s13759_s28 + $0xb0] sm:$0xff]   ;;  %v13327_v55 = vld [vmem:[%s13759_s28 + $0xb8] sm:$0xff]  }
  0x23   : > { %12427 = vmatprep.mubr.msk.bf16.mxu0 %vm3131_vm2, %v13285_v13  ;;  %12843 = vmatprep.mubr.msk.bf16.mxu1 %vm3131_vm2, %v13286_v14  ;;  %v13324_v52 = vld [vmem:[%s13759_s28 + $0x728] sm:$0xff]   ;;  %v13326_v54 = vld [vmem:[%s13759_s28 + $0x730] sm:$0xff]   ;;  %v13328_v56 = vld [vmem:[%s13759_s28 + $0x738] sm:$0xff]  }
  0x24   : > { %v13329_v57 = vld [vmem:[%s13759_s28 + $0xc0] sm:$0xff]   ;;  %v13331_v59 = vld [vmem:[%s13759_s28 + $0xc8] sm:$0xff]   ;;  %v13333_v61 = vld [vmem:[%s13759_s28 + $0xd0] sm:$0xff]  }
  0x25   : > { %v13330_v58 = vld [vmem:[%s13759_s28 + $0x740] sm:$0xff]   ;;  %v13332_v60 = vld [vmem:[%s13759_s28 + $0x748] sm:$0xff]   ;;  %v13334_v62 = vld [vmem:[%s13759_s28 + $0x750] sm:$0xff]  }
  0x26   : > { %v13335_v63 = vld [vmem:[%s13759_s28 + $0xd8] sm:$0xff]   ;;  %v13337_v1 = vld [vmem:[%s13759_s28 + $0xe0] sm:$0xff]   ;;  %v13339_v3 = vld [vmem:[%s13759_s28 + $0xe8] sm:$0xff]  }
  0x27   : > { %v13336_v0 = vld [vmem:[%s13759_s28 + $0x758] sm:$0xff]   ;;  %v13338_v2 = vld [vmem:[%s13759_s28 + $0x760] sm:$0xff]   ;;  %v13340_v4 = vld [vmem:[%s13759_s28 + $0x768] sm:$0xff]  }
  0x28   : > { %v13341_v5 = vld [vmem:[%s13759_s28 + $0xf0] sm:$0xff]   ;;  %v13343_v7 = vld [vmem:[%s13759_s28 + $0xf8] sm:$0xff]   ;;  %v13345_v9 = vld [vmem:[%s13759_s28 + $0x100] sm:$0xff]  }
  0x29   : > { %v13342_v6 = vld [vmem:[%s13759_s28 + $0x770] sm:$0xff]   ;;  %v13344_v8 = vld [vmem:[%s13759_s28 + $0x778] sm:$0xff]   ;;  %v13346_v10 = vld [vmem:[%s13759_s28 + $0x780] sm:$0xff]  }
  0x2a   : > { %12428 = vmatmul.mubr.msk.bf16.gmra.mrb[4].mxu0 %vm3131_vm2, %v13287_v15  ;;  %12844 = vmatmul.mubr.msk.bf16.gmra.mrb[4].mxu1 %vm3131_vm2, %v13288_v16  ;;  %v13347_v11 = vld [vmem:[%s13759_s28 + $0x108] sm:$0xff]   ;;  %v13349_v13 = vld [vmem:[%s13759_s28 + $0x110] sm:$0xff]   ;;  %v13351_v15 = vld [vmem:[%s13759_s28 + $0x118] sm:$0xff]  }
  0x2b   : > { %12431 = vmatprep.mubr.msk.bf16.mxu0 %vm3131_vm2, %v13289_v17  ;;  %12847 = vmatprep.mubr.msk.bf16.mxu1 %vm3131_vm2, %v13290_v18  ;;  %v13348_v12 = vld [vmem:[%s13759_s28 + $0x788] sm:$0xff]   ;;  %v13350_v14 = vld [vmem:[%s13759_s28 + $0x790] sm:$0xff]   ;;  %v13352_v16 = vld [vmem:[%s13759_s28 + $0x798] sm:$0xff]  }
  0x2c   : > { %v13353_v17 = vld [vmem:[%s13759_s28 + $0x120] sm:$0xff]  }
  0x2d   : > { %v13354_v18 = vld [vmem:[%s13759_s28 + $0x7a0] sm:$0xff]  }
  0x32   : > { %12432 = vmatmul.mubr.msk.bf16.gmra.mrb[8].mxu0 %vm3131_vm2, %v13291_v19  ;;  %12848 = vmatmul.mubr.msk.bf16.gmra.mrb[8].mxu1 %vm3131_vm2, %v13292_v20  ;;  %v13355_v19 = vld [vmem:[%s13759_s28 + $0x128] sm:$0xff]  }
  0x33   : > { %12435 = vmatprep.mubr.msk.bf16.mxu0 %vm3131_vm2, %v13293_v21  ;;  %12851 = vmatprep.mubr.msk.bf16.mxu1 %vm3131_vm2, %v13294_v22  ;;  %v13356_v20 = vld [vmem:[%s13759_s28 + $0x7a8] sm:$0xff]   ;;  %v13357_v21 = vld [vmem:[%s13759_s28 + $0x130] sm:$0xff]  }
  0x34   : > { %v13358_v22 = vld [vmem:[%s13759_s28 + $0x7b0] sm:$0xff]  }
  0x3a   : > { %12436 = vmatmul.mubr.msk.bf16.gmra.mrb[12].mxu0 %vm3131_vm2, %v13295_v23  ;;  %12852 = vmatmul.mubr.msk.bf16.gmra.mrb[12].mxu1 %vm3131_vm2, %v13296_v24  ;;  %v13359_v23 = vld [vmem:[%s13759_s28 + $0x138] sm:$0xff]  }
  0x3b   : > { %12439 = vmatprep.mubr.msk.bf16.mxu0 %vm3131_vm2, %v13297_v25  ;;  %12855 = vmatprep.mubr.msk.bf16.mxu1 %vm3131_vm2, %v13298_v26  ;;  %v13360_v24 = vld [vmem:[%s13759_s28 + $0x7b8] sm:$0xff]   ;;  %v13361_v25 = vld [vmem:[%s13759_s28 + $0x140] sm:$0xff]  }
  0x3c   : > { %v13362_v26 = vld [vmem:[%s13759_s28 + $0x7c0] sm:$0xff]  }
  0x42   : > { %12440 = vmatmul.mubr.msk.bf16.gmra.mrb[16].mxu0 %vm3131_vm2, %v13299_v27  ;;  %12856 = vmatmul.mubr.msk.bf16.gmra.mrb[16].mxu1 %vm3131_vm2, %v13300_v28  ;;  %v13363_v27 = vld [vmem:[%s13759_s28 + $0x148] sm:$0xff]  }
  0x43   : > { %12443 = vmatprep.mubr.msk.bf16.mxu0 %vm3131_vm2, %v13301_v29  ;;  %12859 = vmatprep.mubr.msk.bf16.mxu1 %vm3131_vm2, %v13302_v30  ;;  %v13364_v28 = vld [vmem:[%s13759_s28 + $0x7c8] sm:$0xff]   ;;  %v13365_v29 = vld [vmem:[%s13759_s28 + $0x150] sm:$0xff]  }
  0x44   : > { %v13366_v30 = vld [vmem:[%s13759_s28 + $0x7d0] sm:$0xff]  }
  0x4a   : > { %12444 = vmatmul.mubr.msk.bf16.gmra.mrb[20].mxu0 %vm3131_vm2, %v13303_v31  ;;  %12860 = vmatmul.mubr.msk.bf16.gmra.mrb[20].mxu1 %vm3131_vm2, %v13304_v32  ;;  %v13367_v31 = vld [vmem:[%s13759_s28 + $0x158] sm:$0xff]  }
  0x4b   : > { %12447 = vmatprep.mubr.msk.bf16.mxu0 %vm3131_vm2, %v13305_v33  ;;  %12863 = vmatprep.mubr.msk.bf16.mxu1 %vm3131_vm2, %v13306_v34  ;;  %v13368_v32 = vld [vmem:[%s13759_s28 + $0x7d8] sm:$0xff]   ;;  %v13369_v33 = vld [vmem:[%s13759_s28 + $0x160] sm:$0xff]  }
  0x4c   : > { %v13370_v34 = vld [vmem:[%s13759_s28 + $0x7e0] sm:$0xff]  }
  0x52   : > { %12448 = vmatmul.mubr.msk.bf16.gmra.mrb[24].mxu0 %vm3131_vm2, %v13307_v35  ;;  %12864 = vmatmul.mubr.msk.bf16.gmra.mrb[24].mxu1 %vm3131_vm2, %v13308_v36  ;;  %v13371_v35 = vld [vmem:[%s13759_s28 + $0x168] sm:$0xff]  }
  0x53   : > { %12451 = vmatprep.mubr.msk.bf16.mxu0 %vm3131_vm2, %v13309_v37  ;;  %12867 = vmatprep.mubr.msk.bf16.mxu1 %vm3131_vm2, %v13310_v38  ;;  %v13372_v36 = vld [vmem:[%s13759_s28 + $0x7e8] sm:$0xff]   ;;  %v13373_v37 = vld [vmem:[%s13759_s28 + $0x170] sm:$0xff]  }
  0x54   : > { %v13374_v38 = vld [vmem:[%s13759_s28 + $0x7f0] sm:$0xff]  }
  0x5a   : > { %12452 = vmatmul.mubr.msk.bf16.gmra.mrb[28].mxu0 %vm3131_vm2, %v13311_v39  ;;  %12868 = vmatmul.mubr.msk.bf16.gmra.mrb[28].mxu1 %vm3131_vm2, %v13312_v40  ;;  %v13375_v39 = vld [vmem:[%s13759_s28 + $0x178] sm:$0xff]  }
  0x5b   : > { %12455 = vmatprep.mubr.msk.bf16.mxu0 %vm3131_vm2, %v13313_v41  ;;  %12871 = vmatprep.mubr.msk.bf16.mxu1 %vm3131_vm2, %v13314_v42  ;;  %v13376_v40 = vld [vmem:[%s13759_s28 + $0x7f8] sm:$0xff]   ;;  %v13377_v41 = vld [vmem:[%s13759_s28 + $0x180] sm:$0xff]  }
  0x5c   : > { %v13378_v42 = vld [vmem:[%s13759_s28 + $0x800] sm:$0xff]  }
  0x62   : > { %12456 = vmatmul.mubr.msk.bf16.gmra.mrb[32].mxu0 %vm3131_vm2, %v13315_v43  ;;  %12872 = vmatmul.mubr.msk.bf16.gmra.mrb[32].mxu1 %vm3131_vm2, %v13316_v44  ;;  %v13379_v43 = vld [vmem:[%s13759_s28 + $0x188] sm:$0xff]  }
  0x63   : > { %12459 = vmatprep.mubr.msk.bf16.mxu0 %vm3131_vm2, %v13317_v45  ;;  %12875 = vmatprep.mubr.msk.bf16.mxu1 %vm3131_vm2, %v13318_v46  ;;  %v13380_v44 = vld [vmem:[%s13759_s28 + $0x808] sm:$0xff]   ;;  %v13381_v45 = vld [vmem:[%s13759_s28 + $0x190] sm:$0xff]  }
  0x64   : > { %v13382_v46 = vld [vmem:[%s13759_s28 + $0x810] sm:$0xff]  }
  0x6a   : > { %12460 = vmatmul.mubr.msk.bf16.gmra.mrb[36].mxu0 %vm3131_vm2, %v13319_v47  ;;  %12876 = vmatmul.mubr.msk.bf16.gmra.mrb[36].mxu1 %vm3131_vm2, %v13320_v48  ;;  %v13383_v47 = vld [vmem:[%s13759_s28 + $0x198] sm:$0xff]  }
  0x6b   : > { %12463 = vmatprep.mubr.msk.bf16.mxu0 %vm3131_vm2, %v13321_v49  ;;  %12879 = vmatprep.mubr.msk.bf16.mxu1 %vm3131_vm2, %v13322_v50  ;;  %v13384_v48 = vld [vmem:[%s13759_s28 + $0x818] sm:$0xff]   ;;  %v13385_v49 = vld [vmem:[%s13759_s28 + $0x1a0] sm:$0xff]  }
  0x6c   : > { %v13386_v50 = vld [vmem:[%s13759_s28 + $0x820] sm:$0xff]  }
  0x72   : > { %12464 = vmatmul.mubr.msk.bf16.gmra.mrb[40].mxu0 %vm3131_vm2, %v13323_v51  ;;  %12880 = vmatmul.mubr.msk.bf16.gmra.mrb[40].mxu1 %vm3131_vm2, %v13324_v52  ;;  %v13387_v51 = vld [vmem:[%s13759_s28 + $0x1a8] sm:$0xff]  }
  0x73   : > { %12467 = vmatprep.mubr.msk.bf16.mxu0 %vm3131_vm2, %v13325_v53  ;;  %12883 = vmatprep.mubr.msk.bf16.mxu1 %vm3131_vm2, %v13326_v54  ;;  %v13388_v52 = vld [vmem:[%s13759_s28 + $0x828] sm:$0xff]   ;;  %v13389_v53 = vld [vmem:[%s13759_s28 + $0x1b0] sm:$0xff]  }
  0x74   : > { %v13390_v54 = vld [vmem:[%s13759_s28 + $0x830] sm:$0xff]  }
  0x7a   : > { %12468 = vmatmul.mubr.msk.bf16.gmra.mrb[44].mxu0 %vm3131_vm2, %v13327_v55  ;;  %12884 = vmatmul.mubr.msk.bf16.gmra.mrb[44].mxu1 %vm3131_vm2, %v13328_v56 }
  0x7b   : > { %12471 = vmatprep.mubr.msk.bf16.mxu0 %vm3131_vm2, %v13329_v57  ;;  %12887 = vmatprep.mubr.msk.bf16.mxu1 %vm3131_vm2, %v13330_v58 }
  0x82   : > { %12472 = vmatmul.mubr.msk.bf16.gmra.mrb[48].mxu0 %vm3131_vm2, %v13331_v59  ;;  %12888 = vmatmul.mubr.msk.bf16.gmra.mrb[48].mxu1 %vm3131_vm2, %v13332_v60  ;;  %v13391_v59 = vld [vmem:[%s13759_s28 + $0x1b8] sm:$0xff]  }
  0x83   : > { %12475 = vmatprep.mubr.msk.bf16.mxu0 %vm3131_vm2, %v13333_v61  ;;  %12891 = vmatprep.mubr.msk.bf16.mxu1 %vm3131_vm2, %v13334_v62  ;;  %v13392_v60 = vld [vmem:[%s13759_s28 + $0x838] sm:$0xff]  }
  0x8a   : > { %12476 = vmatmul.mubr.msk.bf16.gmra.mrb[52].mxu0 %vm3131_vm2, %v13335_v63  ;;  %12892 = vmatmul.mubr.msk.bf16.gmra.mrb[52].mxu1 %vm3131_vm2, %v13336_v0  ;;  %v13393_v63 = vld [vmem:[%s13759_s28 + $0x1c0] sm:$0xff]  }
  0x8b   : > { %12479 = vmatprep.mubr.msk.bf16.mxu0 %vm3131_vm2, %v13337_v1  ;;  %12895 = vmatprep.mubr.msk.bf16.mxu1 %vm3131_vm2, %v13338_v2  ;;  %v13394_v0 = vld [vmem:[%s13759_s28 + $0x840] sm:$0xff]  }
  0x92   : > { %12480 = vmatmul.mubr.msk.bf16.gmra.mrb[56].mxu0 %vm3131_vm2, %v13339_v3  ;;  %12896 = vmatmul.mubr.msk.bf16.gmra.mrb[56].mxu1 %vm3131_vm2, %v13340_v4 }
  0x93   : > { %12483 = vmatprep.mubr.msk.bf16.mxu0 %vm3131_vm2, %v13341_v5  ;;  %12899 = vmatprep.mubr.msk.bf16.mxu1 %vm3131_vm2, %v13342_v6 }
  0x9a   : > { %12484 = vmatmul.mubr.msk.bf16.gmra.mrb[60].mxu0 %vm3131_vm2, %v13343_v7  ;;  %12900 = vmatmul.mubr.msk.bf16.gmra.mrb[60].mxu1 %vm3131_vm2, %v13344_v8  ;;  %v13395_v7 = vld [vmem:[%s13759_s28 + $0x1c8] sm:$0xff]  }
  0x9b   : > { %12487 = vmatprep.mubr.msk.bf16.mxu0 %vm3131_vm2, %v13345_v9  ;;  %12903 = vmatprep.mubr.msk.bf16.mxu1 %vm3131_vm2, %v13346_v10  ;;  %v13396_v8 = vld [vmem:[%s13759_s28 + $0x848] sm:$0xff]  }
  0xa2   : > { %12488 = vmatmul.mubr.msk.bf16.gmra.mrb[64].mxu0 %vm3131_vm2, %v13347_v11  ;;  %12904 = vmatmul.mubr.msk.bf16.gmra.mrb[64].mxu1 %vm3131_vm2, %v13348_v12  ;;  %v13397_v11 = vld [vmem:[%s13759_s28 + $0x1d0] sm:$0xff]  }
  0xa3   : > { %12491 = vmatprep.mubr.msk.bf16.mxu0 %vm3131_vm2, %v13349_v13  ;;  %12907 = vmatprep.mubr.msk.bf16.mxu1 %vm3131_vm2, %v13350_v14  ;;  %v13398_v12 = vld [vmem:[%s13759_s28 + $0x850] sm:$0xff]  }
  0xaa   : > { %12492 = vmatmul.mubr.msk.bf16.gmra.mrb[68].mxu0 %vm3131_vm2, %v13351_v15  ;;  %12908 = vmatmul.mubr.msk.bf16.gmra.mrb[68].mxu1 %vm3131_vm2, %v13352_v16 }
  0xab   : > { %12495 = vmatprep.mubr.msk.bf16.mxu0 %vm3131_vm2, %v13353_v17  ;;  %12911 = vmatprep.mubr.msk.bf16.mxu1 %vm3131_vm2, %v13354_v18 }
  0xb2   : > { %12496 = vmatmul.mubr.msk.bf16.gmra.mrb[72].mxu0 %vm3131_vm2, %v13355_v19  ;;  %12912 = vmatmul.mubr.msk.bf16.gmra.mrb[72].mxu1 %vm3131_vm2, %v13356_v20  ;;  %v13399_v19 = vld [vmem:[%s13759_s28 + $0x1d8] sm:$0xff]  }
  0xb3   : > { %12499 = vmatprep.mubr.msk.bf16.mxu0 %vm3131_vm2, %v13357_v21  ;;  %12915 = vmatprep.mubr.msk.bf16.mxu1 %vm3131_vm2, %v13358_v22  ;;  %v13400_v20 = vld [vmem:[%s13759_s28 + $0x858] sm:$0xff]  }
  0xba   : > { %12500 = vmatmul.mubr.msk.bf16.gmra.mrb[76].mxu0 %vm3131_vm2, %v13359_v23  ;;  %12916 = vmatmul.mubr.msk.bf16.gmra.mrb[76].mxu1 %vm3131_vm2, %v13360_v24  ;;  %v13401_v23 = vld [vmem:[%s13759_s28 + $0x1e0] sm:$0xff]  }
  0xbb   : > { %12503 = vmatprep.mubr.msk.bf16.mxu0 %vm3131_vm2, %v13361_v25  ;;  %12919 = vmatprep.mubr.msk.bf16.mxu1 %vm3131_vm2, %v13362_v26  ;;  %v13402_v24 = vld [vmem:[%s13759_s28 + $0x860] sm:$0xff]  }
  0xc2   : > { %12504 = vmatmul.mubr.msk.bf16.gmra.mrb[80].mxu0 %vm3131_vm2, %v13363_v27  ;;  %12920 = vmatmul.mubr.msk.bf16.gmra.mrb[80].mxu1 %vm3131_vm2, %v13364_v28 }
  0xc3   : > { %12507 = vmatprep.mubr.msk.bf16.mxu0 %vm3131_vm2, %v13365_v29  ;;  %12923 = vmatprep.mubr.msk.bf16.mxu1 %vm3131_vm2, %v13366_v30 }
  0xca   : > { %12508 = vmatmul.mubr.msk.bf16.gmra.mrb[84].mxu0 %vm3131_vm2, %v13367_v31  ;;  %12924 = vmatmul.mubr.msk.bf16.gmra.mrb[84].mxu1 %vm3131_vm2, %v13368_v32  ;;  %v13403_v31 = vld [vmem:[%s13759_s28 + $0x1e8] sm:$0xff]  }
  0xcb   : > { %12511 = vmatprep.mubr.msk.bf16.mxu0 %vm3131_vm2, %v13369_v33  ;;  %12927 = vmatprep.mubr.msk.bf16.mxu1 %vm3131_vm2, %v13370_v34  ;;  %v13404_v32 = vld [vmem:[%s13759_s28 + $0x868] sm:$0xff]  }
  0xd2   : > { %12512 = vmatmul.mubr.msk.bf16.gmra.mrb[88].mxu0 %vm3131_vm2, %v13371_v35  ;;  %12928 = vmatmul.mubr.msk.bf16.gmra.mrb[88].mxu1 %vm3131_vm2, %v13372_v36  ;;  %v13405_v35 = vld [vmem:[%s13759_s28 + $0x1f0] sm:$0xff]  }
  0xd3   : > { %12515 = vmatprep.mubr.msk.bf16.mxu0 %vm3131_vm2, %v13373_v37  ;;  %12931 = vmatprep.mubr.msk.bf16.mxu1 %vm3131_vm2, %v13374_v38  ;;  %v13406_v36 = vld [vmem:[%s13759_s28 + $0x870] sm:$0xff]  }
  0xda   : > { %12516 = vmatmul.mubr.msk.bf16.gmra.mrb[92].mxu0 %vm3131_vm2, %v13375_v39  ;;  %12932 = vmatmul.mubr.msk.bf16.gmra.mrb[92].mxu1 %vm3131_vm2, %v13376_v40  ;;  %v13407_v39 = vld [vmem:[%s13759_s28 + $0x1f8] sm:$0xff]  }
  0xdb   : > { %12519 = vmatprep.mubr.msk.bf16.mxu0 %vm3131_vm2, %v13377_v41  ;;  %12935 = vmatprep.mubr.msk.bf16.mxu1 %vm3131_vm2, %v13378_v42  ;;  %v13408_v40 = vld [vmem:[%s13759_s28 + $0x878] sm:$0xff]  }
  0xe2   : > { %12520 = vmatmul.mubr.msk.bf16.gmra.mrb[96].mxu0 %vm3131_vm2, %v13379_v43  ;;  %12936 = vmatmul.mubr.msk.bf16.gmra.mrb[96].mxu1 %vm3131_vm2, %v13380_v44  ;;  %v13409_v43 = vld [vmem:[%s13759_s28 + $0x200] sm:$0xff]  }
  0xe3   : > { %12523 = vmatprep.mubr.msk.bf16.mxu0 %vm3131_vm2, %v13381_v45  ;;  %12939 = vmatprep.mubr.msk.bf16.mxu1 %vm3131_vm2, %v13382_v46  ;;  %v13410_v44 = vld [vmem:[%s13759_s28 + $0x880] sm:$0xff]  }
  0xea   : > { %12524 = vmatmul.mubr.msk.bf16.gmra.mrb[100].mxu0 %vm3131_vm2, %v13383_v47  ;;  %12940 = vmatmul.mubr.msk.bf16.gmra.mrb[100].mxu1 %vm3131_vm2, %v13384_v48 }
  0xeb   : > { %12527 = vmatprep.mubr.msk.bf16.mxu0 %vm3131_vm2, %v13385_v49  ;;  %12943 = vmatprep.mubr.msk.bf16.mxu1 %vm3131_vm2, %v13386_v50 }
  0xf2   : > { %12528 = vmatmul.mubr.msk.bf16.gmra.mrb[104].mxu0 %vm3131_vm2, %v13387_v51  ;;  %12944 = vmatmul.mubr.msk.bf16.gmra.mrb[104].mxu1 %vm3131_vm2, %v13388_v52 }
  0xf3   : > { %12531 = vmatprep.mubr.msk.bf16.mxu0 %vm3131_vm2, %v13389_v53  ;;  %12947 = vmatprep.mubr.msk.bf16.mxu1 %vm3131_vm2, %v13390_v54 }
  0xf5   : > { %v13981_v55 = vpop.f32.mrb[0].mxu0  ;;  %v13983_v56 = vpop.f32.mrb[0].mxu1 }
  0xf6   : > { %v13985_v57 = vpop.f32.mrb[1].mxu0  ;;  %v13987_v58 = vpop.f32.mrb[1].mxu1  ;;  %v14087_v45 = vsel %vm7748_vm3, %v13981_v55, -inf  ;;  %v14091_v46 = vsel %vm7748_vm3, %v13983_v56, -inf }
  0xf7   : > { %v13991_v61 = vpop.f32.mrb[2].mxu0  ;;  %v13993_v62 = vpop.f32.mrb[2].mxu1  ;;  %v14099_v49 = vsel %vm7748_vm3, %v13985_v57, -inf  ;;  %v14103_v50 = vsel %vm7748_vm3, %v13987_v58, -inf }
  0xf8   : > { %v13997_v1 = vpop.f32.mrb[3].mxu0  ;;  %v13999_v2 = vpop.f32.mrb[3].mxu1  ;;  %19530 = vst [vmem:[#allocation2_spill] sm:$0xff] %v14103_v50  ;;  %v14111_v53 = vsel %vm7748_vm3, %v13991_v61, -inf  ;;  %v14115_v54 = vsel %vm7748_vm3, %v13993_v62, -inf }
  0xf9   : > { %v14123_v57 = vsel %vm7748_vm3, %v13997_v1, -inf  ;;  %v14127_v58 = vsel %vm7748_vm3, %v13999_v2, -inf  ;;  %v13411_v1 = vld [vmem:[%s13759_s28 + $0x208] sm:$0xff]  }
  0xfa   : > { %12532 = vmatmul.mubr.msk.bf16.gmra.mrb[108].mxu0 %vm3131_vm2, %v13391_v59  ;;  %12948 = vmatmul.mubr.msk.bf16.gmra.mrb[108].mxu1 %vm3131_vm2, %v13392_v60  ;;  %19531 = vst [vmem:[#allocation3_spill] sm:$0xff] %v14123_v57  ;;  %19532 = vst [vmem:[#allocation4_spill] sm:$0xff] %v14127_v58  ;;  %v13412_v2 = vld [vmem:[%s13759_s28 + $0x888] sm:$0xff]   ;;  %v13421_v57 = vld [vmem:[%s13759_s28 + $0x230] sm:$0xff]  }
  0xfb   : > { %12535 = vmatprep.mubr.msk.bf16.mxu0 %vm3131_vm2, %v13393_v63  ;;  %12951 = vmatprep.mubr.msk.bf16.mxu1 %vm3131_vm2, %v13394_v0 }
  0xfd   : > { %v14005_v3 = vpop.f32.mrb[4].mxu0  ;;  %v14007_v4 = vpop.f32.mrb[4].mxu1 }
  0xfe   : > { %v14009_v5 = vpop.f32.mrb[5].mxu0  ;;  %v14011_v6 = vpop.f32.mrb[5].mxu1  ;;  %v14131_v59 = vsel %vm7748_vm3, %v14005_v3, -inf  ;;  %v14135_v60 = vsel %vm7748_vm3, %v14007_v4, -inf }
  0xff   : > { %v14015_v9 = vpop.f32.mrb[6].mxu0  ;;  %v14017_v10 = vpop.f32.mrb[6].mxu1  ;;  %v14139_v61 = vsel %vm7748_vm3, %v14009_v5, -inf  ;;  %v14143_v62 = vsel %vm7748_vm3, %v14011_v6, -inf  ;;  %v13413_v5 = vld [vmem:[%s13759_s28 + $0x210] sm:$0xff]  }
 0x100   : > { %v14021_v13 = vpop.f32.mrb[7].mxu0  ;;  %v14023_v14 = vpop.f32.mrb[7].mxu1  ;;  %19533 = vst [vmem:[#allocation5_spill] sm:$0xff] %v14139_v61  ;;  %19534 = vst [vmem:[#allocation6_spill] sm:$0xff] %v14143_v62  ;;  %v14147_v63 = vsel %vm7748_vm3, %v14015_v9, -inf  ;;  %v14151_v0 = vsel %vm7748_vm3, %v14017_v10, -inf }
 0x101   : > { %v13414_v6 = vld [vmem:[%s13759_s28 + $0x890] sm:$0xff]  }
 0x102   : > { %12536 = vmatmul.mubr.msk.bf16.gmra.mrb[112].mxu0 %vm3131_vm2, %v13395_v7  ;;  %12952 = vmatmul.mubr.msk.bf16.gmra.mrb[112].mxu1 %vm3131_vm2, %v13396_v8  ;;  %v14167_v7 = vsel %vm7748_vm3, %v14021_v13, -inf  ;;  %v14171_v8 = vsel %vm7748_vm3, %v14023_v14, -inf }
 0x103   : > { %12539 = vmatprep.mubr.msk.bf16.mxu0 %vm3131_vm2, %v13397_v11  ;;  %12955 = vmatprep.mubr.msk.bf16.mxu1 %vm3131_vm2, %v13398_v12  ;;  %19535 = vst [vmem:[#allocation7_spill] sm:$0xff] %v14167_v7  ;;  %19536 = vst [vmem:[#allocation8_spill] sm:$0xff] %v14171_v8  ;;  %v13426_v8 = vld [vmem:[%s13759_s28 + $0x8c0] sm:$0xff]  }
 0x105   : > { %v14029_v15 = vpop.f32.mrb[8].mxu0  ;;  %v14031_v16 = vpop.f32.mrb[8].mxu1 }
 0x106   : > { %v14033_v17 = vpop.f32.mrb[9].mxu0  ;;  %v14035_v18 = vpop.f32.mrb[9].mxu1  ;;  %v14179_v11 = vsel %vm7748_vm3, %v14029_v15, -inf  ;;  %v14183_v12 = vsel %vm7748_vm3, %v14031_v16, -inf }
 0x107   : > { %v14039_v21 = vpop.f32.mrb[10].mxu0  ;;  %v14041_v22 = vpop.f32.mrb[10].mxu1  ;;  %v14191_v14 = vsel %vm7748_vm3, %v14033_v17, -inf }
 0x108   : > { %v14045_v25 = vpop.f32.mrb[11].mxu0  ;;  %v14047_v26 = vpop.f32.mrb[11].mxu1  ;;  %19537 = vst [vmem:[#allocation9_spill] sm:$0xff] %v14191_v14  ;;  %v14203_v16 = vsel %vm7748_vm3, %v14039_v21, -inf }
 0x109   : > { %v14215_v17 = vsel %vm7748_vm3, %v14045_v25, -inf }
 0x10a   : > { %12540 = vmatmul.mubr.msk.bf16.gmra.mrb[116].mxu0 %vm3131_vm2, %v13399_v19  ;;  %12956 = vmatmul.mubr.msk.bf16.gmra.mrb[116].mxu1 %vm3131_vm2, %v13400_v20  ;;  %v14195_v20 = vsel %vm7748_vm3, %v14035_v18, -inf  ;;  %19539 = vst [vmem:[#allocation11_spill] sm:$0xff] %v14215_v17  ;;  %v14219_v18 = vsel %vm7748_vm3, %v14047_v26, -inf }
 0x10b   : > { %12543 = vmatprep.mubr.msk.bf16.mxu0 %vm3131_vm2, %v13401_v23  ;;  %12959 = vmatprep.mubr.msk.bf16.mxu1 %vm3131_vm2, %v13402_v24  ;;  %19538 = vst [vmem:[#allocation10_spill] sm:$0xff] %v14195_v20  ;;  %v14207_v24 = vsel %vm7748_vm3, %v14041_v22, -inf  ;;  %19540 = vst [vmem:[#allocation12_spill] sm:$0xff] %v14219_v18  ;;  %v13430_v18 = vld [vmem:[%s13759_s28 + $0x8d0] sm:$0xff]  }
 0x10d   : > { %v14053_v27 = vpop.f32.mrb[12].mxu0  ;;  %v14055_v28 = vpop.f32.mrb[12].mxu1 }
 0x10e   : > { %v14057_v29 = vpop.f32.mrb[13].mxu0  ;;  %v14059_v30 = vpop.f32.mrb[13].mxu1  ;;  %v14223_v21 = vsel %vm7748_vm3, %v14053_v27, -inf  ;;  %v14227_v22 = vsel %vm7748_vm3, %v14055_v28, -inf }
 0x10f   : > { %v14063_v33 = vpop.f32.mrb[14].mxu0  ;;  %v14065_v34 = vpop.f32.mrb[14].mxu1  ;;  %v14237_v25 = vsel %vm7748_vm3, %v14059_v30, -inf }
 0x110   : > { %v14069_v37 = vpop.f32.mrb[15].mxu0  ;;  %v14071_v38 = vpop.f32.mrb[15].mxu1  ;;  %19542 = vst [vmem:[#allocation14_spill] sm:$0xff] %v14237_v25  ;;  %v14257_v30 = vsel %vm7748_vm3, %v14065_v34, -inf }
 0x112   : > { %12544 = vmatmul.mubr.msk.bf16.gmra.mrb[120].mxu0 %vm3131_vm2, %v13403_v31  ;;  %12960 = vmatmul.mubr.msk.bf16.gmra.mrb[120].mxu1 %vm3131_vm2, %v13404_v32  ;;  %v13415_v31 = vld [vmem:[%s13759_s28 + $0x218] sm:$0xff]  }
 0x113   : > { %12547 = vmatprep.mubr.msk.bf16.mxu0 %vm3131_vm2, %v13405_v35  ;;  %12963 = vmatprep.mubr.msk.bf16.mxu1 %vm3131_vm2, %v13406_v36  ;;  %v13416_v32 = vld [vmem:[%s13759_s28 + $0x898] sm:$0xff]   ;;  %v14233_v35 = vsel %vm7748_vm3, %v14057_v29, -inf  ;;  %v14253_v29 = vsel %vm7748_vm3, %v14063_v33, -inf }
 0x114   : > { %19541 = vst [vmem:[#allocation13_spill] sm:$0xff] %v14233_v35 }
 0x115   : > { %v14079_v41 = vpop.f32.mrb[16].mxu0  ;;  %v14081_v42 = vpop.f32.mrb[16].mxu1 }
 0x116   : > { %v14093_v47 = vpop.f32.mrb[17].mxu0  ;;  %v14095_v48 = vpop.f32.mrb[17].mxu1 }
 0x117   : > { %v14105_v51 = vpop.f32.mrb[18].mxu0  ;;  %v14107_v52 = vpop.f32.mrb[18].mxu1 }
 0x118   : > { %v14117_v55 = vpop.f32.mrb[19].mxu0  ;;  %v14119_v56 = vpop.f32.mrb[19].mxu1 }
 0x11a   : > { %12548 = vmatmul.mubr.msk.bf16.gmra.mrb[124].mxu0 %vm3131_vm2, %v13407_v39  ;;  %12964 = vmatmul.mubr.msk.bf16.gmra.mrb[124].mxu1 %vm3131_vm2, %v13408_v40  ;;  %v13417_v39 = vld [vmem:[%s13759_s28 + $0x220] sm:$0xff]  }
 0x11b   : > { %12551 = vmatprep.mubr.msk.bf16.mxu0 %vm3131_vm2, %v13409_v43  ;;  %12967 = vmatprep.mubr.msk.bf16.mxu1 %vm3131_vm2, %v13410_v44  ;;  %v13418_v40 = vld [vmem:[%s13759_s28 + $0x8a0] sm:$0xff]  }
 0x11d   : > { %v14159_v3 = vpop.f32.mrb[20].mxu0  ;;  %v14161_v4 = vpop.f32.mrb[20].mxu1 }
 0x11e   : > { %v14173_v9 = vpop.f32.mrb[21].mxu0  ;;  %v14175_v10 = vpop.f32.mrb[21].mxu1 }
 0x11f   : > { %v14185_v19 = vpop.f32.mrb[22].mxu0  ;;  %v14187_v13 = vpop.f32.mrb[22].mxu1 }
 0x120   : > { %v14197_v15 = vpop.f32.mrb[23].mxu0  ;;  %v14199_v23 = vpop.f32.mrb[23].mxu1 }
 0x122   : > { %12552 = vmatmul.mubr.msk.bf16.gmra.mrb[128].mxu0 %vm3131_vm2, %v13411_v1  ;;  %12968 = vmatmul.mubr.msk.bf16.gmra.mrb[128].mxu1 %vm3131_vm2, %v13412_v2  ;;  %v14275_v1 = vsel %vm7748_vm3, %v14069_v37, -inf  ;;  %v14279_v2 = vsel %vm7748_vm3, %v14071_v38, -inf  ;;  %v13419_v37 = vld [vmem:[%s13759_s28 + $0x228] sm:$0xff]  }
 0x123   : > { %12555 = vmatprep.mubr.msk.bf16.mxu0 %vm3131_vm2, %v13413_v5  ;;  %12971 = vmatprep.mubr.msk.bf16.mxu1 %vm3131_vm2, %v13414_v6  ;;  %19547 = vst [vmem:[#allocation19_spill] sm:$0xff] %v14275_v1  ;;  %19548 = vst [vmem:[#allocation20_spill] sm:$0xff] %v14279_v2 }
 0x125   : > { %v12449_v26 = vpop.f32.mrb[24].mxu0  ;;  %v12865_v36 = vpop.f32.mrb[24].mxu1 }
 0x126   : > { %v14242_v27 = vsel %vm7748_vm3, %v12449_v26, -inf  ;;  %v14245_v28 = vsel %vm7748_vm3, %v12865_v36, -inf  ;;  %v14247_v43 = vpop.f32.mrb[25].mxu0  ;;  %v14249_v44 = vpop.f32.mrb[25].mxu1 }
 0x127   : > { %19543 = vst [vmem:[#allocation15_spill] sm:$0xff] %v14242_v27  ;;  %19544 = vst [vmem:[#allocation16_spill] sm:$0xff] %v14245_v28  ;;  %v12450_v5 = vpop.f32.mrb[26].mxu0  ;;  %v12866_v6 = vpop.f32.mrb[26].mxu1  ;;  %v14293_v28 = vsel %vm7748_vm3, %v14079_v41, -inf  ;;  %v13422_v27 = vld [vmem:[%s13759_s28 + $0x8b0] sm:$0xff]  }
 0x128   : > { %v14264_v26 = vsel %vm7748_vm3, %v12450_v5, -inf  ;;  %v14267_v33 = vsel %vm7748_vm3, %v12866_v6, -inf  ;;  %v14269_v36 = vpop.f32.mrb[27].mxu0  ;;  %v14271_v34 = vpop.f32.mrb[27].mxu1  ;;  %v13420_v6 = vld [vmem:[%s13759_s28 + $0x8a8] sm:$0xff]   ;;  %v14297_v5 = vsel %vm7748_vm3, %v14081_v42, -inf }
 0x129   : > { %19545 = vst [vmem:[#allocation17_spill] sm:$0xff] %v14264_v26  ;;  %19546 = vst [vmem:[#allocation18_spill] sm:$0xff] %v14267_v33 }
 0x12a   : > { %12556 = vmatmul.mubr.msk.bf16.gmra.mrb[132].mxu0 %vm3131_vm2, %v13415_v31  ;;  %12972 = vmatmul.mubr.msk.bf16.gmra.mrb[132].mxu1 %vm3131_vm2, %v13416_v32 }
 0x12b   : > { %12559 = vmatprep.mubr.msk.bf16.mxu0 %vm3131_vm2, %v13417_v39  ;;  %12975 = vmatprep.mubr.msk.bf16.mxu1 %vm3131_vm2, %v13418_v40 }
 0x12d   : > { %v12453_v38 = vpop.f32.mrb[28].mxu0  ;;  %v12869_v50 = vpop.f32.mrb[28].mxu1 }
 0x12e   : > { %v14300_v31 = vsel %vm7748_vm3, %v12453_v38, -inf  ;;  %v14303_v32 = vsel %vm7748_vm3, %v12869_v50, -inf  ;;  %v4533_v39 = vpop.f32.mrb[29].mxu0  ;;  %v6197_v40 = vpop.f32.mrb[29].mxu1  ;;  %v13423_v50 = vld [vmem:[%s13759_s28 + $0x238] sm:$0xff]  }
 0x12f   : > { %19549 = vst [vmem:[#allocation21_spill] sm:$0xff] %v14300_v31  ;;  %19550 = vst [vmem:[#allocation22_spill] sm:$0xff] %v14303_v32  ;;  %v14310_v41 = vsel %vm7748_vm3, %v4533_v39, -inf  ;;  %v14313_v42 = vsel %vm7748_vm3, %v6197_v40, -inf  ;;  %v12454_v26 = vpop.f32.mrb[30].mxu0  ;;  %v12870_v38 = vpop.f32.mrb[30].mxu1 }
 0x130   : > { %v14322_v58 = vsel %vm7748_vm3, %v12454_v26, -inf  ;;  %v14325_v39 = vsel %vm7748_vm3, %v12870_v38, -inf  ;;  %v4536_v40 = vpop.f32.mrb[31].mxu0  ;;  %v6200_v32 = vpop.f32.mrb[31].mxu1 }
 0x131   : > { %19551 = vst [vmem:[#allocation23_spill] sm:$0xff] %v14322_v58  ;;  %19552 = vst [vmem:[#allocation24_spill] sm:$0xff] %v14325_v39  ;;  %v14332_v31 = vsel %vm7748_vm3, %v4536_v40, -inf  ;;  %v14335_v33 = vsel %vm7748_vm3, %v6200_v32, -inf  ;;  %v13424_v40 = vld [vmem:[%s13759_s28 + $0x8b8] sm:$0xff]   ;;  %v13425_v32 = vld [vmem:[%s13759_s28 + $0x240] sm:$0xff]  }
 0x132   : > { %19553 = vst [vmem:[#allocation25_spill] sm:$0xff] %v14335_v33  ;;  %12560 = vmatmul.mubr.msk.bf16.gmra.mrb[136].mxu0 %vm3131_vm2, %v13419_v37  ;;  %12976 = vmatmul.mubr.msk.bf16.gmra.mrb[136].mxu1 %vm3131_vm2, %v13420_v6 }
 0x133   : > { %12563 = vmatprep.mubr.msk.bf16.mxu0 %vm3131_vm2, %v13421_v57  ;;  %12979 = vmatprep.mubr.msk.bf16.mxu1 %vm3131_vm2, %v13422_v27 }
 0x135   : > { %v12457_v62 = vpop.f32.mrb[32].mxu0  ;;  %v12873_v39 = vpop.f32.mrb[32].mxu1 }
 0x136   : > { %v14350_v58 = vsel %vm7748_vm3, %v12457_v62, -inf  ;;  %v14353_v26 = vsel %vm7748_vm3, %v12873_v39, -inf  ;;  %v4549_v38 = vpop.f32.mrb[33].mxu0  ;;  %v6213_v37 = vpop.f32.mrb[33].mxu1  ;;  %v13427_v39 = vld [vmem:[%s13759_s28 + $0x248] sm:$0xff]  }
 0x137   : > { %19554 = vst [vmem:[#allocation26_spill] sm:$0xff] %v14350_v58  ;;  %19555 = vst [vmem:[#allocation27_spill] sm:$0xff] %v14353_v26  ;;  %v14360_v27 = vsel %vm7748_vm3, %v4549_v38, -inf  ;;  %v14363_v7 = vsel %vm7748_vm3, %v6213_v37, -inf  ;;  %v12458_v61 = vpop.f32.mrb[34].mxu0  ;;  %v12874_v62 = vpop.f32.mrb[34].mxu1 }
 0x138   : > { %v14370_v6 = vsel %vm7748_vm3, %v12458_v61, -inf  ;;  %v14373_v57 = vsel %vm7748_vm3, %v12874_v62, -inf  ;;  %v4552_v38 = vpop.f32.mrb[35].mxu0  ;;  %v6216_v37 = vpop.f32.mrb[35].mxu1 }
 0x139   : > { %19556 = vst [vmem:[#allocation28_spill] sm:$0xff] %v14370_v6  ;;  %19557 = vst [vmem:[#allocation29_spill] sm:$0xff] %v14373_v57  ;;  %v14380_v20 = vsel %vm7748_vm3, %v4552_v38, -inf  ;;  %v14383_v33 = vsel %vm7748_vm3, %v6216_v37, -inf  ;;  %v13428_v38 = vld [vmem:[%s13759_s28 + $0x8c8] sm:$0xff]   ;;  %v13429_v37 = vld [vmem:[%s13759_s28 + $0x250] sm:$0xff]  }
 0x13a   : > { %19558 = vst [vmem:[#allocation30_spill] sm:$0xff] %v14383_v33  ;;  %12564 = vmatmul.mubr.msk.bf16.gmra.mrb[140].mxu0 %vm3131_vm2, %v13423_v50  ;;  %12980 = vmatmul.mubr.msk.bf16.gmra.mrb[140].mxu1 %vm3131_vm2, %v13424_v40 }
 0x13b   : > { %12567 = vmatprep.mubr.msk.bf16.mxu0 %vm3131_vm2, %v13425_v32  ;;  %12983 = vmatprep.mubr.msk.bf16.mxu1 %vm3131_vm2, %v13426_v8 }
 0x13d   : > { %v12461_v26 = vpop.f32.mrb[36].mxu0  ;;  %v12877_v57 = vpop.f32.mrb[36].mxu1 }
 0x13e   : > { %v14398_v6 = vsel %vm7748_vm3, %v12461_v26, -inf  ;;  %v14401_v61 = vsel %vm7748_vm3, %v12877_v57, -inf  ;;  %v4565_v62 = vpop.f32.mrb[37].mxu0  ;;  %v6229_v50 = vpop.f32.mrb[37].mxu1 }
 0x13f   : > { %19559 = vst [vmem:[#allocation31_spill] sm:$0xff] %v14398_v6  ;;  %19560 = vst [vmem:[#allocation32_spill] sm:$0xff] %v14401_v61  ;;  %v14408_v32 = vsel %vm7748_vm3, %v4565_v62, -inf  ;;  %v14411_v17 = vsel %vm7748_vm3, %v6229_v50, -inf  ;;  %v12462_v58 = vpop.f32.mrb[38].mxu0  ;;  %v12878_v26 = vpop.f32.mrb[38].mxu1 }
 0x140   : > { %v14418_v33 = vsel %vm7748_vm3, %v12462_v58, -inf  ;;  %v14421_v40 = vsel %vm7748_vm3, %v12878_v26, -inf  ;;  %v4568_v8 = vpop.f32.mrb[39].mxu0  ;;  %v6232_v62 = vpop.f32.mrb[39].mxu1  ;;  %v14435_v58 = vsel %vm7748_vm3, %v14093_v47, -inf  ;;  %v14439_v26 = vsel %vm7748_vm3, %v14095_v48, -inf }
 0x141   : > { %19561 = vst [vmem:[#allocation33_spill] sm:$0xff] %v14418_v33  ;;  %19562 = vst [vmem:[#allocation34_spill] sm:$0xff] %v14421_v40  ;;  %v14428_v57 = vsel %vm7748_vm3, %v4568_v8, -inf  ;;  %v14431_v14 = vsel %vm7748_vm3, %v6232_v62, -inf  ;;  %v14449_v47 = vsel %vm7748_vm3, %v14105_v51, -inf  ;;  %v14453_v62 = vsel %vm7748_vm3, %v14107_v52, -inf }
 0x142   : > { %19563 = vst [vmem:[#allocation35_spill] sm:$0xff] %v14435_v58  ;;  %19564 = vst [vmem:[#allocation36_spill] sm:$0xff] %v14439_v26  ;;  %12568 = vmatmul.mubr.msk.bf16.gmra.mrb[144].mxu0 %vm3131_vm2, %v13427_v39  ;;  %12984 = vmatmul.mubr.msk.bf16.gmra.mrb[144].mxu1 %vm3131_vm2, %v13428_v38  ;;  %v14457_v48 = vsel %vm7748_vm3, %v14117_v55, -inf  ;;  %v14461_v50 = vsel %vm7748_vm3, %v14119_v56, -inf  ;;  %v13431_v39 = vld [vmem:[%s13759_s28 + $0x258] sm:$0xff]   ;;  %v13433_v61 = vld [vmem:[%s13759_s28 + $0x260] sm:$0xff]  }
 0x143   : > { %19565 = vst [vmem:[#allocation37_spill] sm:$0xff] %v14457_v48  ;;  %19566 = vst [vmem:[#allocation38_spill] sm:$0xff] %v14461_v50  ;;  %12571 = vmatprep.mubr.msk.bf16.mxu0 %vm3131_vm2, %v13429_v37  ;;  %12987 = vmatprep.mubr.msk.bf16.mxu1 %vm3131_vm2, %v13430_v18  ;;  %v13432_v38 = vld [vmem:[%s13759_s28 + $0x8d8] sm:$0xff]   ;;  %v13434_v40 = vld [vmem:[%s13759_s28 + $0x8e0] sm:$0xff]  }
 0x145   : > { %v12465_v51 = vpop.f32.mrb[40].mxu0  ;;  %v12881_v8 = vpop.f32.mrb[40].mxu1 }
 0x146   : > { %v14470_v52 = vsel %vm7748_vm3, %v12465_v51, -inf  ;;  %v14473_v55 = vsel %vm7748_vm3, %v12881_v8, -inf  ;;  %v4581_v2 = vpop.f32.mrb[41].mxu0  ;;  %v6245_v33 = vpop.f32.mrb[41].mxu1 }
 0x147   : > { %19567 = vst [vmem:[#allocation39_spill] sm:$0xff] %v14470_v52  ;;  %19568 = vst [vmem:[#allocation40_spill] sm:$0xff] %v14473_v55  ;;  %v14480_v37 = vsel %vm7748_vm3, %v4581_v2, -inf  ;;  %v14483_v1 = vsel %vm7748_vm3, %v6245_v33, -inf  ;;  %v12466_v25 = vpop.f32.mrb[42].mxu0  ;;  %v12882_v51 = vpop.f32.mrb[42].mxu1 }
 0x148   : > { %v14490_v35 = vsel %vm7748_vm3, %v12466_v25, -inf  ;;  %v14493_v56 = vsel %vm7748_vm3, %v12882_v51, -inf  ;;  %v4584_v18 = vpop.f32.mrb[43].mxu0  ;;  %v6248_v2 = vpop.f32.mrb[43].mxu1  ;;  %v14523_v55 = vsel %vm7748_vm3, %v14173_v9, -inf  ;;  %v13437_v51 = vld [vmem:[%s13759_s28 + $0x270] sm:$0xff]  }
 0x149   : > { %19569 = vst [vmem:[#allocation41_spill] sm:$0xff] %v14490_v35  ;;  %19570 = vst [vmem:[#allocation42_spill] sm:$0xff] %v14493_v56  ;;  %v14500_v8 = vsel %vm7748_vm3, %v4584_v18, -inf  ;;  %v14503_v6 = vsel %vm7748_vm3, %v6248_v2, -inf  ;;  %v14515_v18 = vsel %vm7748_vm3, %v14159_v3, -inf  ;;  %v14519_v2 = vsel %vm7748_vm3, %v14161_v4, -inf }
 0x14a   : > { %12572 = vmatmul.mubr.msk.bf16.gmra.mrb[148].mxu0 %vm3131_vm2, %v13431_v39  ;;  %12988 = vmatmul.mubr.msk.bf16.gmra.mrb[148].mxu1 %vm3131_vm2, %v13432_v38  ;;  %v14527_v39 = vsel %vm7748_vm3, %v14175_v10, -inf  ;;  %v13435_v38 = vld [vmem:[%s13759_s28 + $0x268] sm:$0xff]   ;;  %v14537_v3 = vsel %vm7748_vm3, %v14199_v23, -inf  ;;  %v13438_v25 = vld [vmem:[%s13759_s28 + $0x8f0] sm:$0xff]  }
 0x14b   : > { %12575 = vmatprep.mubr.msk.bf16.mxu0 %vm3131_vm2, %v13433_v61  ;;  %12991 = vmatprep.mubr.msk.bf16.mxu1 %vm3131_vm2, %v13434_v40  ;;  %19571 = vst [vmem:[#allocation43_spill] sm:$0xff] %v14527_v39  ;;  %v13436_v61 = vld [vmem:[%s13759_s28 + $0x8e8] sm:$0xff]   ;;  %v14533_v40 = vsel %vm7748_vm3, %v14197_v15, -inf  ;;  %19573 = vst [vmem:[#allocation45_spill] sm:$0xff] %v14537_v3  ;;  %v13442_v39 = vld [vmem:[%s13759_s28 + $0x900] sm:$0xff]  }
 0x14c   : > { %19572 = vst [vmem:[#allocation44_spill] sm:$0xff] %v14533_v40  ;;  %v13441_v40 = vld [vmem:[%s13759_s28 + $0x280] sm:$0xff]  }
 0x14d   : > { %v12469_v4 = vpop.f32.mrb[44].mxu0  ;;  %v12885_v33 = vpop.f32.mrb[44].mxu1 }
 0x14e   : > { %v14542_v9 = vsel %vm7748_vm3, %v12469_v4, -inf  ;;  %v14545_v10 = vsel %vm7748_vm3, %v12885_v33, -inf  ;;  %v4597_v56 = vpop.f32.mrb[45].mxu0  ;;  %v6261_v50 = vpop.f32.mrb[45].mxu1 }
 0x14f   : > { %19574 = vst [vmem:[#allocation46_spill] sm:$0xff] %v14542_v9  ;;  %19575 = vst [vmem:[#allocation47_spill] sm:$0xff] %v14545_v10  ;;  %v14552_v23 = vsel %vm7748_vm3, %v4597_v56, -inf  ;;  %v14555_v48 = vsel %vm7748_vm3, %v6261_v50, -inf  ;;  %v12470_v26 = vpop.f32.mrb[46].mxu0  ;;  %v12886_v4 = vpop.f32.mrb[46].mxu1 }
 0x150   : > { %v14562_v58 = vsel %vm7748_vm3, %v12470_v26, -inf  ;;  %v14565_v15 = vsel %vm7748_vm3, %v12886_v4, -inf  ;;  %v4600_v35 = vpop.f32.mrb[47].mxu0  ;;  %v6264_v56 = vpop.f32.mrb[47].mxu1  ;;  %v14595_v10 = vsel %vm7748_vm3, %v14247_v43, -inf  ;;  %v19594_v9 = vld [vmem:[#allocation2_spill] sm:$0xff] }
 0x151   : > { %19576 = vst [vmem:[#allocation48_spill] sm:$0xff] %v14562_v58  ;;  %19577 = vst [vmem:[#allocation49_spill] sm:$0xff] %v14565_v15  ;;  %v14572_v33 = vsel %vm7748_vm3, %v4600_v35, -inf  ;;  %v14575_v52 = vsel %vm7748_vm3, %v6264_v56, -inf  ;;  %v14587_v35 = vsel %vm7748_vm3, %v14185_v19, -inf  ;;  %v14591_v56 = vsel %vm7748_vm3, %v14187_v13, -inf }
 0x152   : > { %12576 = vmatmul.mubr.msk.bf16.gmra.mrb[152].mxu0 %vm3131_vm2, %v13435_v38  ;;  %12992 = vmatmul.mubr.msk.bf16.gmra.mrb[152].mxu1 %vm3131_vm2, %v13436_v61  ;;  %19578 = vst [vmem:[#allocation50_spill] sm:$0xff] %v14587_v35  ;;  %19579 = vst [vmem:[#allocation51_spill] sm:$0xff] %v14591_v56  ;;  %v14599_v38 = vsel %vm7748_vm3, %v14249_v44, -inf  ;;  %v13439_v61 = vld [vmem:[%s13759_s28 + $0x278] sm:$0xff]   ;;  %v14605_v19 = vsel %vm7748_vm3, %v14269_v36, -inf  ;;  %v14609_v13 = vsel %vm7748_vm3, %v14271_v34, -inf }
 0x153   : > { %12579 = vmatprep.mubr.msk.bf16.mxu0 %vm3131_vm2, %v13437_v51  ;;  %12995 = vmatprep.mubr.msk.bf16.mxu1 %vm3131_vm2, %v13438_v25  ;;  %19580 = vst [vmem:[#allocation52_spill] sm:$0xff] %v14595_v10  ;;  %19581 = vst [vmem:[#allocation53_spill] sm:$0xff] %v14599_v38  ;;  %v13440_v51 = vld [vmem:[%s13759_s28 + $0x8f8] sm:$0xff]  }
 0x154   : > { %19582 = vst [vmem:[#allocation54_spill] sm:$0xff] %v14605_v19  ;;  %19583 = vst [vmem:[#allocation55_spill] sm:$0xff] %v14609_v13  ;;  %v13446_v13 = vld [vmem:[%s13759_s28 + $0x910] sm:$0xff]  }
 0x155   : > { %v12473_v25 = vpop.f32.mrb[48].mxu0  ;;  %v12889_v50 = vpop.f32.mrb[48].mxu1 }
 0x156   : > { %v14612_v43 = vsel %vm7748_vm3, %v12473_v25, -inf  ;;  %v14615_v44 = vsel %vm7748_vm3, %v12889_v50, -inf  ;;  %v4613_v4 = vpop.f32.mrb[49].mxu0  ;;  %v6277_v26 = vpop.f32.mrb[49].mxu1  ;;  %v13443_v50 = vld [vmem:[%s13759_s28 + $0x288] sm:$0xff]  }
 0x157   : > { %19584 = vst [vmem:[#allocation56_spill] sm:$0xff] %v14612_v43  ;;  %19585 = vst [vmem:[#allocation57_spill] sm:$0xff] %v14615_v44  ;;  %v14622_v3 = vsel %vm7748_vm3, %v4613_v4, -inf  ;;  %v14625_v34 = vsel %vm7748_vm3, %v6277_v26, -inf  ;;  %v12474_v58 = vpop.f32.mrb[50].mxu0  ;;  %v12890_v25 = vpop.f32.mrb[50].mxu1 }
 0x158   : > { %v14634_v36 = vsel %vm7748_vm3, %v12474_v58, -inf  ;;  %v14637_v4 = vsel %vm7748_vm3, %v12890_v25, -inf  ;;  %v4616_v26 = vpop.f32.mrb[51].mxu0  ;;  %v6280_v44 = vpop.f32.mrb[51].mxu1 }
 0x159   : > { %19586 = vst [vmem:[#allocation58_spill] sm:$0xff] %v14634_v36  ;;  %19587 = vst [vmem:[#allocation59_spill] sm:$0xff] %v14637_v4  ;;  %v14644_v43 = vsel %vm7748_vm3, %v4616_v26, -inf  ;;  %v14647_v15 = vsel %vm7748_vm3, %v6280_v44, -inf  ;;  %v13444_v26 = vld [vmem:[%s13759_s28 + $0x908] sm:$0xff]   ;;  %v13445_v44 = vld [vmem:[%s13759_s28 + $0x290] sm:$0xff]  }
 0x15a   : > { %19588 = vst [vmem:[#allocation60_spill] sm:$0xff] %v14644_v43  ;;  %19589 = vst [vmem:[#allocation61_spill] sm:$0xff] %v14647_v15  ;;  %12580 = vmatmul.mubr.msk.bf16.gmra.mrb[156].mxu0 %vm3131_vm2, %v13439_v61  ;;  %12996 = vmatmul.mubr.msk.bf16.gmra.mrb[156].mxu1 %vm3131_vm2, %v13440_v51  ;;  %v19590_v61 = vmax.f32 %v14087_v45, %v14310_v41  ;;  %v19595_v45 = vld [vmem:[#allocation16_spill] sm:$0xff] }
 0x15b   : > { %12583 = vmatprep.mubr.msk.bf16.mxu0 %vm3131_vm2, %v13441_v40  ;;  %12999 = vmatprep.mubr.msk.bf16.mxu1 %vm3131_vm2, %v13442_v39  ;;  %v19591_v39 = vmax.f32 %v14091_v46, %v14313_v42  ;;  %v19596_v41 = vmax.f32 %v19594_v9, %v19595_v45  ;;  %v19604_v45 = vld [vmem:[#allocation4_spill] sm:$0xff] }
 0x15d   : > { %v12477_v38 = vpop.f32.mrb[52].mxu0  ;;  %v12893_v4 = vpop.f32.mrb[52].mxu1 }
 0x15e   : > { %v7766_v36 = vsel %vm7748_vm3, %v12477_v38, -inf  ;;  %v8494_v58 = vsel %vm7748_vm3, %v12893_v4, -inf  ;;  %v4629_v19 = vpop.f32.mrb[53].mxu0  ;;  %v6293_v25 = vpop.f32.mrb[53].mxu1  ;;  %v19592_v4 = vld [vmem:[#allocation15_spill] sm:$0xff] }
 0x15f   : > { %v14666_v51 = vmax.f32 %v19590_v61, %v7766_v36  ;;  %v14671_v40 = vmax.f32 %v19591_v39, %v8494_v58  ;;  %v7752_v10 = vsel %vm7748_vm3, %v4629_v19, -inf  ;;  %v8480_v15 = vsel %vm7748_vm3, %v6293_v25, -inf  ;;  %v12478_v56 = vpop.f32.mrb[54].mxu0  ;;  %v12894_v38 = vpop.f32.mrb[54].mxu1  ;;  %v19601_v61 = vld [vmem:[#allocation3_spill] sm:$0xff]  ;;  %v19602_v39 = vld [vmem:[#allocation17_spill] sm:$0xff] }
 0x160   : > { %v19593_v43 = vmax.f32 %v14099_v49, %v19592_v4  ;;  %v14683_v36 = vmax.f32 %v19596_v41, %v8480_v15  ;;  %v7773_v46 = vsel %vm7748_vm3, %v12478_v56, -inf  ;;  %v8501_v42 = vsel %vm7748_vm3, %v12894_v38, -inf  ;;  %v4632_v19 = vpop.f32.mrb[55].mxu0  ;;  %v6296_v58 = vpop.f32.mrb[55].mxu1  ;;  %v19605_v41 = vld [vmem:[#allocation18_spill] sm:$0xff] }
 0x161   : > { %v19597_v25 = vmax.f32 %v14111_v53, %v14332_v31  ;;  %v7759_v15 = vsel %vm7748_vm3, %v4632_v19, -inf  ;;  %v8487_v56 = vsel %vm7748_vm3, %v6296_v58, -inf  ;;  %v19603_v38 = vmax.f32 %v19601_v61, %v19602_v39  ;;  %v13449_v58 = vld [vmem:[%s13759_s28 + $0x2a0] sm:$0xff]  }
 0x162   : > { %v14678_v35 = vmax.f32 %v19593_v43, %v7752_v10  ;;  %v19598_v10 = vld [vmem:[#allocation25_spill] sm:$0xff]  ;;  %v19606_v53 = vmax.f32 %v19604_v45, %v19605_v41  ;;  %12584 = vmatmul.mubr.msk.bf16.gmra.mrb[160].mxu0 %vm3131_vm2, %v13443_v50  ;;  %13000 = vmatmul.mubr.msk.bf16.gmra.mrb[160].mxu1 %vm3131_vm2, %v13444_v26  ;;  %v19607_v50 = vmax.f32 %v14131_v59, %v14360_v27  ;;  %v19613_v59 = vld [vmem:[#allocation22_spill] sm:$0xff] }
 0x163   : > { %v14690_v49 = vmax.f32 %v19597_v25, %v7773_v46  ;;  %v19599_v9 = vmax.f32 %v14115_v54, %v19598_v10  ;;  %v14702_v4 = vmax.f32 %v19603_v38, %v7759_v15  ;;  %12587 = vmatprep.mubr.msk.bf16.mxu0 %vm3131_vm2, %v13445_v44  ;;  %13003 = vmatprep.mubr.msk.bf16.mxu1 %vm3131_vm2, %v13446_v13  ;;  %v13447_v54 = vld [vmem:[%s13759_s28 + $0x298] sm:$0xff]   ;;  %v13450_v25 = vld [vmem:[%s13759_s28 + $0x920] sm:$0xff]  }
 0x164   : > { %v14707_v31 = vmax.f32 %v19606_v53, %v8487_v56  ;;  %v13448_v46 = vld [vmem:[%s13759_s28 + $0x918] sm:$0xff]   ;;  %v19608_v13 = vmax.f32 %v14135_v60, %v14363_v7 }
 0x165   : > { %v14695_v43 = vmax.f32 %v19599_v9, %v8501_v42  ;;  %v12481_v42 = vpop.f32.mrb[56].mxu0  ;;  %v12897_v19 = vpop.f32.mrb[56].mxu1  ;;  %v19609_v41 = vld [vmem:[#allocation5_spill] sm:$0xff] }
 0x166   : > { %v7794_v10 = vsel %vm7748_vm3, %v12481_v42, -inf  ;;  %v8522_v9 = vsel %vm7748_vm3, %v12897_v19, -inf  ;;  %v4645_v15 = vpop.f32.mrb[57].mxu0  ;;  %v6309_v56 = vpop.f32.mrb[57].mxu1  ;;  %v19610_v53 = vld [vmem:[#allocation21_spill] sm:$0xff] }
 0x167   : > { %19600 = vst [vmem:[#allocation15_spill] sm:$0xff] %v14695_v43  ;;  %v14722_v26 = vmax.f32 %v19607_v50, %v7794_v10  ;;  %v14727_v44 = vmax.f32 %v19608_v13, %v8522_v9  ;;  %v7780_v61 = vsel %vm7748_vm3, %v4645_v15, -inf  ;;  %v8508_v39 = vsel %vm7748_vm3, %v6309_v56, -inf  ;;  %v12482_v38 = vpop.f32.mrb[58].mxu0  ;;  %v12898_v45 = vpop.f32.mrb[58].mxu1  ;;  %v19612_v43 = vld [vmem:[#allocation6_spill] sm:$0xff] }
 0x168   : > { %v19611_v42 = vmax.f32 %v19609_v41, %v19610_v53  ;;  %v19614_v27 = vmax.f32 %v19612_v43, %v19613_v59  ;;  %v7801_v60 = vsel %vm7748_vm3, %v12482_v38, -inf  ;;  %v8529_v7 = vsel %vm7748_vm3, %v12898_v45, -inf  ;;  %v4648_v9 = vpop.f32.mrb[59].mxu0  ;;  %v6312_v15 = vpop.f32.mrb[59].mxu1  ;;  %v19616_v13 = vld [vmem:[#allocation30_spill] sm:$0xff]  ;;  %v19619_v41 = vld [vmem:[#allocation7_spill] sm:$0xff] }
 0x169   : > { %v19615_v56 = vmax.f32 %v14147_v63, %v14380_v20  ;;  %v19617_v43 = vmax.f32 %v14151_v0, %v19616_v13  ;;  %v8515_v38 = vsel %vm7748_vm3, %v6312_v15, -inf  ;;  %v19620_v45 = vld [vmem:[#allocation23_spill] sm:$0xff]  ;;  %v19622_v59 = vld [vmem:[#allocation8_spill] sm:$0xff] }
 0x16a   : > { %v14734_v19 = vmax.f32 %v19611_v42, %v7780_v61  ;;  %v14739_v10 = vmax.f32 %v19614_v27, %v8508_v39  ;;  %v7787_v39 = vsel %vm7748_vm3, %v4648_v9, -inf  ;;  %v19621_v53 = vmax.f32 %v19619_v41, %v19620_v45  ;;  %v19623_v27 = vld [vmem:[#allocation24_spill] sm:$0xff]  ;;  %12588 = vmatmul.mubr.msk.bf16.gmra.mrb[164].mxu0 %vm3131_vm2, %v13447_v54  ;;  %13004 = vmatmul.mubr.msk.bf16.gmra.mrb[164].mxu1 %vm3131_vm2, %v13448_v46  ;;  %v13451_v0 = vld [vmem:[%s13759_s28 + $0x2a8] sm:$0xff]  }
 0x16b   : > { %v14746_v50 = vmax.f32 %v19615_v56, %v7801_v60  ;;  %v14751_v61 = vmax.f32 %v19617_v43, %v8529_v7  ;;  %v19624_v63 = vmax.f32 %v19622_v59, %v19623_v27  ;;  %12591 = vmatprep.mubr.msk.bf16.mxu0 %vm3131_vm2, %v13449_v58  ;;  %13007 = vmatprep.mubr.msk.bf16.mxu1 %vm3131_vm2, %v13450_v25  ;;  %v13452_v60 = vld [vmem:[%s13759_s28 + $0x928] sm:$0xff]   ;;  %v13453_v15 = vld [vmem:[%s13759_s28 + $0x2b0] sm:$0xff]   ;;  %v19627_v27 = vld [vmem:[#allocation9_spill] sm:$0xff] }
 0x16c   : > { %v14758_v42 = vmax.f32 %v19621_v53, %v7787_v39  ;;  %v13454_v56 = vld [vmem:[%s13759_s28 + $0x930] sm:$0xff]   ;;  %v19625_v54 = vmax.f32 %v14179_v11, %v14408_v32  ;;  %v19626_v58 = vmax.f32 %v14183_v12, %v14411_v17  ;;  %v19631_v11 = vld [vmem:[#allocation27_spill] sm:$0xff] }
 0x16d   : > { %19618 = vst [vmem:[#allocation2_spill] sm:$0xff] %v14751_v61  ;;  %v14763_v20 = vmax.f32 %v19624_v63, %v8515_v38  ;;  %v12485_v7 = vpop.f32.mrb[60].mxu0  ;;  %v12901_v9 = vpop.f32.mrb[60].mxu1  ;;  %v19628_v63 = vld [vmem:[#allocation26_spill] sm:$0xff] }
 0x16e   : > { %v7822_v13 = vsel %vm7748_vm3, %v12485_v7, -inf  ;;  %v8550_v43 = vsel %vm7748_vm3, %v12901_v9, -inf  ;;  %v4661_v39 = vpop.f32.mrb[61].mxu0  ;;  %v6325_v38 = vpop.f32.mrb[61].mxu1  ;;  %v19629_v7 = vmax.f32 %v19627_v27, %v19628_v63  ;;  %v19630_v61 = vld [vmem:[#allocation10_spill] sm:$0xff] }
 0x16f   : > { %v14778_v46 = vmax.f32 %v19625_v54, %v7822_v13  ;;  %v14783_v25 = vmax.f32 %v19626_v58, %v8550_v43  ;;  %v7808_v41 = vsel %vm7748_vm3, %v4661_v39, -inf  ;;  %v8536_v45 = vsel %vm7748_vm3, %v6325_v38, -inf  ;;  %v12486_v53 = vpop.f32.mrb[62].mxu0  ;;  %v12902_v59 = vpop.f32.mrb[62].mxu1 }
 0x170   : > { %v14790_v9 = vmax.f32 %v19629_v7, %v7808_v41  ;;  %v19632_v32 = vmax.f32 %v19630_v61, %v19631_v11  ;;  %v7829_v12 = vsel %vm7748_vm3, %v12486_v53, -inf  ;;  %v8557_v17 = vsel %vm7748_vm3, %v12902_v59, -inf  ;;  %v4664_v43 = vpop.f32.mrb[63].mxu0  ;;  %v6328_v39 = vpop.f32.mrb[63].mxu1  ;;  %v19635_v53 = vld [vmem:[#allocation11_spill] sm:$0xff]  ;;  %v19636_v59 = vld [vmem:[#allocation28_spill] sm:$0xff] }
 0x171   : > { %v19633_v38 = vmax.f32 %v14203_v16, %v14428_v57  ;;  %v19634_v61 = vmax.f32 %v14207_v24, %v14431_v14  ;;  %v7815_v41 = vsel %vm7748_vm3, %v4664_v43, -inf  ;;  %v19637_v27 = vmax.f32 %v19635_v53, %v19636_v59  ;;  %v19638_v7 = vld [vmem:[#allocation12_spill] sm:$0xff]  ;;  %v19639_v11 = vld [vmem:[#allocation29_spill] sm:$0xff]  ;;  %v13458_v43 = vld [vmem:[%s13759_s28 + $0x940] sm:$0xff]  }
 0x172   : > { %v14795_v13 = vmax.f32 %v19632_v32, %v8536_v45  ;;  %v8543_v45 = vsel %vm7748_vm3, %v6328_v39, -inf  ;;  %v19640_v16 = vmax.f32 %v19638_v7, %v19639_v11  ;;  %12592 = vmatmul.mubr.msk.bf16.gmra.mrb[168].mxu0 %vm3131_vm2, %v13451_v0  ;;  %13008 = vmatmul.mubr.msk.bf16.gmra.mrb[168].mxu1 %vm3131_vm2, %v13452_v60  ;;  %v13455_v14 = vld [vmem:[%s13759_s28 + $0x2b8] sm:$0xff]   ;;  %v19641_v0 = vmax.f32 %v14223_v21, %v14480_v37  ;;  %v19644_v11 = vld [vmem:[#allocation31_spill] sm:$0xff]  ;;  %v19647_v21 = vld [vmem:[#allocation32_spill] sm:$0xff] }
 0x173   : > { %v14802_v54 = vmax.f32 %v19633_v38, %v7829_v12  ;;  %v14807_v58 = vmax.f32 %v19634_v61, %v8557_v17  ;;  %v14814_v63 = vmax.f32 %v19637_v27, %v7815_v41  ;;  %12595 = vmatprep.mubr.msk.bf16.mxu0 %vm3131_vm2, %v13453_v15  ;;  %13011 = vmatprep.mubr.msk.bf16.mxu1 %vm3131_vm2, %v13454_v56  ;;  %v13456_v24 = vld [vmem:[%s13759_s28 + $0x938] sm:$0xff]   ;;  %v13457_v17 = vld [vmem:[%s13759_s28 + $0x2c0] sm:$0xff]  }
 0x174   : > { %v14819_v57 = vmax.f32 %v19640_v16, %v8543_v45  ;;  %v19642_v15 = vmax.f32 %v14227_v22, %v14483_v1  ;;  %v19643_v7 = vld [vmem:[#allocation13_spill] sm:$0xff] }
 0x175   : > { %v12489_v32 = vpop.f32.mrb[64].mxu0  ;;  %v12905_v12 = vpop.f32.mrb[64].mxu1  ;;  %v19645_v16 = vmax.f32 %v19643_v7, %v19644_v11  ;;  %v19651_v7 = vld [vmem:[#allocation19_spill] sm:$0xff] }
 0x176   : > { %v7850_v39 = vsel %vm7748_vm3, %v12489_v32, -inf  ;;  %v8578_v38 = vsel %vm7748_vm3, %v12905_v12, -inf  ;;  %v4677_v61 = vpop.f32.mrb[65].mxu0  ;;  %v6341_v41 = vpop.f32.mrb[65].mxu1  ;;  %v19646_v12 = vld [vmem:[#allocation14_spill] sm:$0xff] }
 0x177   : > { %v14834_v60 = vmax.f32 %v19641_v0, %v7850_v39  ;;  %v14839_v56 = vmax.f32 %v19642_v15, %v8578_v38  ;;  %v7836_v45 = vsel %vm7748_vm3, %v4677_v61, -inf  ;;  %v8564_v53 = vsel %vm7748_vm3, %v6341_v41, -inf  ;;  %v12490_v59 = vpop.f32.mrb[66].mxu0  ;;  %v12906_v27 = vpop.f32.mrb[66].mxu1 }
 0x178   : > { %v14846_v32 = vmax.f32 %v19645_v16, %v7836_v45  ;;  %v19648_v37 = vmax.f32 %v19646_v12, %v19647_v21  ;;  %v7857_v22 = vsel %vm7748_vm3, %v12490_v59, -inf  ;;  %v8585_v1 = vsel %vm7748_vm3, %v12906_v27, -inf  ;;  %v4680_v38 = vpop.f32.mrb[67].mxu0  ;;  %v6344_v61 = vpop.f32.mrb[67].mxu1  ;;  %v19652_v27 = vld [vmem:[#allocation33_spill] sm:$0xff]  ;;  %v19654_v12 = vld [vmem:[#allocation20_spill] sm:$0xff] }
 0x179   : > { %v19649_v41 = vmax.f32 %v14253_v29, %v14500_v8  ;;  %v19650_v15 = vmax.f32 %v14257_v30, %v14503_v6  ;;  %v8571_v59 = vsel %vm7748_vm3, %v6344_v61, -inf  ;;  %v19653_v11 = vmax.f32 %v19651_v7, %v19652_v27  ;;  %v19655_v21 = vld [vmem:[#allocation34_spill] sm:$0xff]  ;;  %v13459_v30 = vld [vmem:[%s13759_s28 + $0x2c8] sm:$0xff]  }
 0x17a   : > { %v14851_v39 = vmax.f32 %v19648_v37, %v8564_v53  ;;  %v7843_v53 = vsel %vm7748_vm3, %v4680_v38, -inf  ;;  %v19656_v29 = vmax.f32 %v19654_v12, %v19655_v21  ;;  %12596 = vmatmul.mubr.msk.bf16.gmra.mrb[172].mxu0 %vm3131_vm2, %v13455_v14  ;;  %13012 = vmatmul.mubr.msk.bf16.gmra.mrb[172].mxu1 %vm3131_vm2, %v13456_v24  ;;  %v13460_v6 = vld [vmem:[%s13759_s28 + $0x948] sm:$0xff]   ;;  %v13462_v38 = vld [vmem:[%s13759_s28 + $0x950] sm:$0xff]   ;;  %v19657_v14 = vmax.f32 %v14293_v28, %v14552_v23 }
 0x17b   : > { %v14858_v0 = vmax.f32 %v19649_v41, %v7857_v22  ;;  %v14863_v45 = vmax.f32 %v19650_v15, %v8585_v1  ;;  %v14870_v16 = vmax.f32 %v19653_v11, %v7843_v53  ;;  %12599 = vmatprep.mubr.msk.bf16.mxu0 %vm3131_vm2, %v13457_v17  ;;  %13015 = vmatprep.mubr.msk.bf16.mxu1 %vm3131_vm2, %v13458_v43  ;;  %v13461_v1 = vld [vmem:[%s13759_s28 + $0x2d0] sm:$0xff]   ;;  %v19659_v12 = vld [vmem:[#allocation35_spill] sm:$0xff] }
 0x17c   : > { %v14875_v8 = vmax.f32 %v19656_v29, %v8571_v59  ;;  %v19658_v17 = vmax.f32 %v14297_v5, %v14555_v48  ;;  %v19660_v21 = vld [vmem:[#allocation39_spill] sm:$0xff]  ;;  %v19663_v28 = vld [vmem:[#allocation40_spill] sm:$0xff] }
 0x17d   : > { %v12493_v37 = vpop.f32.mrb[68].mxu0  ;;  %v12909_v22 = vpop.f32.mrb[68].mxu1  ;;  %v19661_v29 = vmax.f32 %v19659_v12, %v19660_v21  ;;  %v19668_v12 = vld [vmem:[#allocation37_spill] sm:$0xff] }
 0x17e   : > { %v7878_v61 = vsel %vm7748_vm3, %v12493_v37, -inf  ;;  %v8606_v41 = vsel %vm7748_vm3, %v12909_v22, -inf  ;;  %v4693_v15 = vpop.f32.mrb[69].mxu0  ;;  %v6357_v53 = vpop.f32.mrb[69].mxu1  ;;  %v19662_v22 = vld [vmem:[#allocation36_spill] sm:$0xff] }
 0x17f   : > { %v14890_v24 = vmax.f32 %v19657_v14, %v7878_v61  ;;  %v14895_v43 = vmax.f32 %v19658_v17, %v8606_v41  ;;  %v7864_v59 = vsel %vm7748_vm3, %v4693_v15, -inf  ;;  %v8592_v7 = vsel %vm7748_vm3, %v6357_v53, -inf  ;;  %v12494_v27 = vpop.f32.mrb[70].mxu0  ;;  %v12910_v11 = vpop.f32.mrb[70].mxu1 }
 0x180   : > { %v14902_v37 = vmax.f32 %v19661_v29, %v7864_v59  ;;  %v19664_v23 = vmax.f32 %v19662_v22, %v19663_v28  ;;  %v7885_v5 = vsel %vm7748_vm3, %v12494_v27, -inf  ;;  %v8613_v48 = vsel %vm7748_vm3, %v12910_v11, -inf  ;;  %v4696_v41 = vpop.f32.mrb[71].mxu0  ;;  %v6360_v15 = vpop.f32.mrb[71].mxu1  ;;  %v19669_v11 = vld [vmem:[#allocation41_spill] sm:$0xff]  ;;  %v19671_v22 = vld [vmem:[#allocation38_spill] sm:$0xff] }
 0x181   : > { %v19665_v53 = vmax.f32 %v14449_v47, %v14572_v33  ;;  %v19666_v17 = vmax.f32 %v14453_v62, %v14575_v52  ;;  %v8599_v27 = vsel %vm7748_vm3, %v6360_v15, -inf  ;;  %v19670_v21 = vmax.f32 %v19668_v12, %v19669_v11  ;;  %v19672_v28 = vld [vmem:[#allocation42_spill] sm:$0xff]  ;;  %v13463_v62 = vld [vmem:[%s13759_s28 + $0x2d8] sm:$0xff]  }
 0x182   : > { %v14907_v61 = vmax.f32 %v19664_v23, %v8592_v7  ;;  %v7871_v7 = vsel %vm7748_vm3, %v4696_v41, -inf  ;;  %v19673_v47 = vmax.f32 %v19671_v22, %v19672_v28  ;;  %12600 = vmatmul.mubr.msk.bf16.gmra.mrb[176].mxu0 %vm3131_vm2, %v13459_v30  ;;  %13016 = vmatmul.mubr.msk.bf16.gmra.mrb[176].mxu1 %vm3131_vm2, %v13460_v6  ;;  %v13464_v52 = vld [vmem:[%s13759_s28 + $0x958] sm:$0xff]   ;;  %v13466_v41 = vld [vmem:[%s13759_s28 + $0x960] sm:$0xff]   ;;  %v19674_v30 = vmax.f32 %v14515_v18, %v14622_v3  ;;  %v19680_v18 = vld [vmem:[#allocation43_spill] sm:$0xff] }
 0x183   : > { %v14914_v14 = vmax.f32 %v19665_v53, %v7885_v5  ;;  %v14919_v59 = vmax.f32 %v19666_v17, %v8613_v48  ;;  %v14926_v29 = vmax.f32 %v19670_v21, %v7871_v7  ;;  %12603 = vmatprep.mubr.msk.bf16.mxu0 %vm3131_vm2, %v13461_v1  ;;  %13019 = vmatprep.mubr.msk.bf16.mxu1 %vm3131_vm2, %v13462_v38  ;;  %v13465_v48 = vld [vmem:[%s13759_s28 + $0x2e0] sm:$0xff]   ;;  %v19681_v3 = vld [vmem:[#allocation47_spill] sm:$0xff] }
 0x184   : > { %v14931_v33 = vmax.f32 %v19673_v47, %v8599_v27  ;;  %v19676_v1 = vmax.f32 %v14519_v2, %v14625_v34  ;;  %v19678_v22 = vld [vmem:[#allocation46_spill] sm:$0xff] }
 0x185   : > { %19667 = vst [vmem:[#allocation16_spill] sm:$0xff] %v14919_v59  ;;  %v12497_v23 = vpop.f32.mrb[72].mxu0  ;;  %v12913_v5 = vpop.f32.mrb[72].mxu1  ;;  %v19679_v28 = vmax.f32 %v14523_v55, %v19678_v22  ;;  %v19687_v55 = vld [vmem:[#allocation51_spill] sm:$0xff] }
 0x186   : > { %v7906_v15 = vsel %vm7748_vm3, %v12497_v23, -inf  ;;  %v8634_v53 = vsel %vm7748_vm3, %v12913_v5, -inf  ;;  %v4709_v17 = vpop.f32.mrb[73].mxu0  ;;  %v6373_v7 = vpop.f32.mrb[73].mxu1  ;;  %v19682_v23 = vmax.f32 %v19680_v18, %v19681_v3  ;;  %v19692_v18 = vld [vmem:[#allocation48_spill] sm:$0xff] }
 0x187   : > { %v14946_v6 = vmax.f32 %v19674_v30, %v7906_v15  ;;  %v14951_v38 = vmax.f32 %v19676_v1, %v8634_v53  ;;  %v7892_v27 = vsel %vm7748_vm3, %v4709_v17, -inf  ;;  %v8620_v12 = vsel %vm7748_vm3, %v6373_v7, -inf  ;;  %v12498_v11 = vpop.f32.mrb[74].mxu0  ;;  %v12914_v21 = vpop.f32.mrb[74].mxu1  ;;  %v19683_v17 = vld [vmem:[#allocation50_spill] sm:$0xff]  ;;  %v19684_v7 = vld [vmem:[#allocation60_spill] sm:$0xff] }
 0x188   : > { %v14958_v47 = vmax.f32 %v19679_v28, %v7892_v27  ;;  %v14963_v5 = vmax.f32 %v19682_v23, %v8620_v12  ;;  %v7913_v2 = vsel %vm7748_vm3, %v12498_v11, -inf  ;;  %v8641_v34 = vsel %vm7748_vm3, %v12914_v21, -inf  ;;  %v4712_v15 = vpop.f32.mrb[75].mxu0  ;;  %v6376_v53 = vpop.f32.mrb[75].mxu1  ;;  %v19688_v27 = vld [vmem:[#allocation61_spill] sm:$0xff]  ;;  %v19691_v21 = vld [vmem:[#allocation44_spill] sm:$0xff] }
 0x189   : > { %19675 = vst [vmem:[#allocation25_spill] sm:$0xff] %v14946_v6  ;;  %19677 = vst [vmem:[#allocation3_spill] sm:$0xff] %v14951_v38  ;;  %v19685_v30 = vmax.f32 %v19683_v17, %v19684_v7  ;;  %v19689_v22 = vmax.f32 %v19687_v55, %v19688_v27  ;;  %v7899_v12 = vsel %vm7748_vm3, %v4712_v15, -inf  ;;  %v8627_v11 = vsel %vm7748_vm3, %v6376_v53, -inf  ;;  %v19694_v38 = vld [vmem:[#allocation45_spill] sm:$0xff]  ;;  %v13467_v15 = vld [vmem:[%s13759_s28 + $0x2e8] sm:$0xff]  }
 0x18a   : > { %v19693_v3 = vmax.f32 %v19691_v21, %v19692_v18  ;;  %v19695_v17 = vld [vmem:[#allocation49_spill] sm:$0xff]  ;;  %12604 = vmatmul.mubr.msk.bf16.gmra.mrb[180].mxu0 %vm3131_vm2, %v13463_v62  ;;  %13020 = vmatmul.mubr.msk.bf16.gmra.mrb[180].mxu1 %vm3131_vm2, %v13464_v52  ;;  %v13468_v53 = vld [vmem:[%s13759_s28 + $0x968] sm:$0xff]   ;;  %v13469_v55 = vld [vmem:[%s13759_s28 + $0x2f0] sm:$0xff]  }
 0x18b   : > { %v14970_v1 = vmax.f32 %v19685_v30, %v7913_v2  ;;  %v14975_v28 = vmax.f32 %v19689_v22, %v8641_v34  ;;  %v19696_v2 = vmax.f32 %v19694_v38, %v19695_v17  ;;  %12607 = vmatprep.mubr.msk.bf16.mxu0 %vm3131_vm2, %v13465_v48  ;;  %13023 = vmatprep.mubr.msk.bf16.mxu1 %vm3131_vm2, %v13466_v41  ;;  %v14997_v34 = vld [vmem:[%s19294_s2] ss:$0 sm:$0xff]  ;;  %v13470_v27 = vld [vmem:[%s13759_s28 + $0x970] sm:$0xff]   ;;  %v19701_v6 = vld [vmem:[#allocation57_spill] sm:$0xff] }
 0x18c   : > { %v14982_v23 = vmax.f32 %v19693_v3, %v7899_v12  ;;  %v19697_v17 = vld [vmem:[#allocation52_spill] sm:$0xff] }
 0x18d   : > { %19686 = vst [vmem:[#allocation17_spill] sm:$0xff] %v14970_v1  ;;  %19690 = vst [vmem:[#allocation4_spill] sm:$0xff] %v14975_v28  ;;  %v14987_v7 = vmax.f32 %v19696_v2, %v8627_v11  ;;  %v12501_v30 = vpop.f32.mrb[76].mxu0  ;;  %v12917_v38 = vpop.f32.mrb[76].mxu1  ;;  %v19698_v2 = vld [vmem:[#allocation56_spill] sm:$0xff] }
 0x18e   : > { %v7754_v62 = vsel %vm7748_vm3, %v12501_v30, -inf  ;;  %v8482_v52 = vsel %vm7748_vm3, %v12917_v38, -inf  ;;  %v4725_v22 = vpop.f32.mrb[77].mxu0  ;;  %v6389_v12 = vpop.f32.mrb[77].mxu1  ;;  %v19699_v28 = vmax.f32 %v19697_v17, %v19698_v2  ;;  %v19700_v30 = vld [vmem:[#allocation53_spill] sm:$0xff]  ;;  %v19707_v2 = vld [vmem:[#allocation59_spill] sm:$0xff] }
 0x18f   : > { %v7755_v48 = vmax.f32 %v14678_v35, %v7754_v62  ;;  %v8483_v41 = vmax.f32 %v14683_v36, %v8482_v52  ;;  %v7920_v11 = vsel %vm7748_vm3, %v4725_v22, -inf  ;;  %v8648_v21 = vsel %vm7748_vm3, %v6389_v12, -inf  ;;  %v12502_v18 = vpop.f32.mrb[78].mxu0  ;;  %v12918_v3 = vpop.f32.mrb[78].mxu1 }
 0x190   : > { %v15012_v1 = vmax.f32 %v19699_v28, %v7920_v11  ;;  %v19702_v38 = vmax.f32 %v19700_v30, %v19701_v6  ;;  %v7761_v35 = vsel %vm7748_vm3, %v12502_v18, -inf  ;;  %v8489_v36 = vsel %vm7748_vm3, %v12918_v3, -inf  ;;  %v4728_v62 = vpop.f32.mrb[79].mxu0  ;;  %v6392_v52 = vpop.f32.mrb[79].mxu1  ;;  %v19706_v3 = vld [vmem:[#allocation55_spill] sm:$0xff] }
 0x191   : > { %v9212_v22 = vadd.f32 %v14997_v34, %v7755_v48  ;;  %v9316_v12 = vadd.f32 %v14997_v34, %v8483_v41  ;;  %v7762_v17 = vmax.f32 %v14702_v4, %v7761_v35  ;;  %v8490_v28 = vmax.f32 %v14707_v31, %v8489_v36  ;;  %v19703_v31 = vld [vmem:[#allocation54_spill] sm:$0xff] }
 0x192   : > { %v15017_v59 = vmax.f32 %v19702_v38, %v8648_v21  ;;  %v7927_v6 = vsel %vm7748_vm3, %v4728_v62, -inf  ;;  %v8655_v11 = vsel %vm7748_vm3, %v6392_v52, -inf  ;;  %12608 = vmatmul.mubr.msk.bf16.gmra.mrb[184].mxu0 %vm3131_vm2, %v13467_v15  ;;  %13024 = vmatmul.mubr.msk.bf16.gmra.mrb[184].mxu1 %vm3131_vm2, %v13468_v53  ;;  %v19704_v15 = vld [vmem:[#allocation58_spill] sm:$0xff]  ;;  %v19708_v30 = vmax.f32 %v19706_v3, %v19707_v2 }
 0x193   : > { %v9420_v21 = vmax.f32 %v9212_v22, 0.0  ;;  %v9524_v18 = vmax.f32 %v9316_v12, 0.0  ;;  %v9213_v48 = vadd.f32 %v14997_v34, %v7762_v17  ;;  %v9317_v4 = vadd.f32 %v14997_v34, %v8490_v28  ;;  %12611 = vmatprep.mubr.msk.bf16.mxu0 %vm3131_vm2, %v13469_v55  ;;  %13027 = vmatprep.mubr.msk.bf16.mxu1 %vm3131_vm2, %v13470_v27  ;;  %v13471_v55 = vld [vmem:[%s13759_s28 + $0x2f8] sm:$0xff]   ;;  %v13473_v17 = vld [vmem:[%s13759_s28 + $0x300] sm:$0xff]  }
 0x194   : > { %v19705_v53 = vmax.f32 %v19703_v31, %v19704_v15  ;;  %v15048_v38 = vmax.f32 %v19708_v30, %v8655_v11  ;;  %v13472_v27 = vld [vmem:[%s13759_s28 + $0x978] sm:$0xff]   ;;  %v13474_v28 = vld [vmem:[%s13759_s28 + $0x980] sm:$0xff]  }
 0x195   : > { %v11784_v35 = vpack.c.bf16 %v9420_v21, %v9420_v21  ;;  %v11888_v36 = vpack.c.bf16 %v9524_v18, %v9524_v18  ;;  %v9421_v62 = vmax.f32 %v9213_v48, 0.0  ;;  %v9525_v52 = vmax.f32 %v9317_v4, 0.0  ;;  %v12505_v22 = vpop.f32.mrb[80].mxu0  ;;  %v12921_v12 = vpop.f32.mrb[80].mxu1 }
 0x196   : > { %v15043_v41 = vmax.f32 %v19705_v53, %v7927_v6  ;;  %19709 = vst [vmem:[#allocation18_spill] sm:$0xff] %v15048_v38  ;;  %v7782_v6 = vsel %vm7748_vm3, %v12505_v22, -inf  ;;  %v8510_v31 = vsel %vm7748_vm3, %v12921_v12, -inf  ;;  %v4741_v15 = vpop.f32.mrb[81].mxu0  ;;  %v6405_v53 = vpop.f32.mrb[81].mxu1 }
 0x197   : > { %10461 = vst.msk [vmem:[%s15038_s7] sm:$0xf] %vm10460_vm4, %v11784_v35  ;;  %10565 = vst.msk [vmem:[%s15038_s7 + $0x1a0] sm:$0xf] %vm10460_vm4, %v11888_v36  ;;  %v11785_v11 = vpack.c.bf16 %v9421_v62, %v9421_v62  ;;  %v11889_v21 = vpack.c.bf16 %v9525_v52, %v9525_v52  ;;  %v7783_v18 = vmax.f32 %v14734_v19, %v7782_v6  ;;  %v12506_v4 = vpop.f32.mrb[82].mxu0  ;;  %v12922_v3 = vpop.f32.mrb[82].mxu1 }
 0x198   : > { %v8511_v48 = vmax.f32 %v14739_v10, %v8510_v31  ;;  %v7768_v2 = vsel %vm7748_vm3, %v4741_v15, -inf  ;;  %v8496_v30 = vsel %vm7748_vm3, %v6405_v53, -inf  ;;  %v7789_v22 = vsel %vm7748_vm3, %v12506_v4, -inf  ;;  %v4744_v38 = vpop.f32.mrb[83].mxu0  ;;  %v6408_v35 = vpop.f32.mrb[83].mxu1 }
 0x199   : > { %v8517_v12 = vsel %vm7748_vm3, %v12922_v3, -inf  ;;  %10462 = vst.msk [vmem:[%s15038_s7 + $0x4] sm:$0xf] %vm10460_vm4, %v11785_v11  ;;  %10566 = vst.msk [vmem:[%s15038_s7 + $0x1a4] sm:$0xf] %vm10460_vm4, %v11889_v21  ;;  %v9216_v19 = vadd.f32 %v14997_v34, %v7783_v18  ;;  %v7769_v36 = vmax.f32 %v14666_v51, %v7768_v2  ;;  %v8497_v62 = vmax.f32 %v14671_v40, %v8496_v30  ;;  %v13475_v21 = vld [vmem:[%s13759_s28 + $0x308] sm:$0xff]  }
 0x19a   : > { %v9320_v10 = vadd.f32 %v14997_v34, %v8511_v48  ;;  %v7790_v52 = vmax.f32 %v14758_v42, %v7789_v22  ;;  %v8518_v6 = vmax.f32 %v14763_v20, %v8517_v12  ;;  %v7775_v31 = vsel %vm7748_vm3, %v4744_v38, -inf  ;;  %12612 = vmatmul.mubr.msk.bf16.gmra.mrb[188].mxu0 %vm3131_vm2, %v13471_v55  ;;  %13028 = vmatmul.mubr.msk.bf16.gmra.mrb[188].mxu1 %vm3131_vm2, %v13472_v27  ;;  %v19710_v55 = vld [vmem:[#allocation15_spill] sm:$0xff] }
 0x19b   : > { %v8503_v15 = vsel %vm7748_vm3, %v6408_v35, -inf  ;;  %v9424_v53 = vmax.f32 %v9216_v19, 0.0  ;;  %v9214_v51 = vadd.f32 %v14997_v34, %v7769_v36  ;;  %v9318_v40 = vadd.f32 %v14997_v34, %v8497_v62  ;;  %12615 = vmatprep.mubr.msk.bf16.mxu0 %vm3131_vm2, %v13473_v17  ;;  %13031 = vmatprep.mubr.msk.bf16.mxu1 %vm3131_vm2, %v13474_v28  ;;  %v13476_v30 = vld [vmem:[%s13759_s28 + $0x988] sm:$0xff]   ;;  %v13477_v28 = vld [vmem:[%s13759_s28 + $0x310] sm:$0xff]  }
 0x19c   : > { %v9528_v11 = vmax.f32 %v9320_v10, 0.0  ;;  %v9217_v42 = vadd.f32 %v14997_v34, %v7790_v52  ;;  %v9321_v20 = vadd.f32 %v14997_v34, %v8518_v6  ;;  %v7776_v38 = vmax.f32 %v14690_v49, %v7775_v31  ;;  %v13478_v36 = vld [vmem:[%s13759_s28 + $0x990] sm:$0xff]  }
 0x19d   : > { %v8504_v27 = vmax.f32 %v19710_v55, %v8503_v15  ;;  %v11788_v18 = vpack.c.bf16 %v9424_v53, %v9424_v53  ;;  %v9422_v4 = vmax.f32 %v9214_v51, 0.0  ;;  %v9526_v3 = vmax.f32 %v9318_v40, 0.0  ;;  %v12509_v2 = vpop.f32.mrb[84].mxu0  ;;  %v12925_v17 = vpop.f32.mrb[84].mxu1 }
 0x19e   : > { %v11892_v48 = vpack.c.bf16 %v9528_v11, %v9528_v11  ;;  %v9425_v22 = vmax.f32 %v9217_v42, 0.0  ;;  %v9529_v12 = vmax.f32 %v9321_v20, 0.0  ;;  %v9215_v35 = vadd.f32 %v14997_v34, %v7776_v38  ;;  %v4757_v19 = vpop.f32.mrb[85].mxu0  ;;  %v6421_v10 = vpop.f32.mrb[85].mxu1 }
 0x19f   : > { %v9319_v49 = vadd.f32 %v14997_v34, %v8504_v27  ;;  %10465 = vst.msk [vmem:[%s15038_s7 + $0x10] sm:$0xf] %vm10460_vm4, %v11788_v18  ;;  %v11786_v62 = vpack.c.bf16 %v9422_v4, %v9422_v4  ;;  %v11890_v52 = vpack.c.bf16 %v9526_v3, %v9526_v3  ;;  %v7810_v6 = vsel %vm7748_vm3, %v12509_v2, -inf  ;;  %v12510_v15 = vpop.f32.mrb[86].mxu0  ;;  %v12926_v53 = vpop.f32.mrb[86].mxu1 }
 0x1a0   : > { %10569 = vst.msk [vmem:[%s15038_s7 + $0x1b0] sm:$0xf] %vm10460_vm4, %v11892_v48  ;;  %v8538_v31 = vsel %vm7748_vm3, %v12925_v17, -inf  ;;  %v11789_v11 = vpack.c.bf16 %v9425_v22, %v9425_v22  ;;  %v11893_v51 = vpack.c.bf16 %v9529_v12, %v9529_v12  ;;  %v9423_v40 = vmax.f32 %v9215_v35, 0.0  ;;  %v4760_v20 = vpop.f32.mrb[87].mxu0  ;;  %v6424_v38 = vpop.f32.mrb[87].mxu1 }
 0x1a1   : > { %v9527_v42 = vmax.f32 %v9319_v49, 0.0  ;;  %10463 = vst.msk [vmem:[%s15038_s7 + $0x8] sm:$0xf] %vm10460_vm4, %v11786_v62  ;;  %10567 = vst.msk [vmem:[%s15038_s7 + $0x1a8] sm:$0xf] %vm10460_vm4, %v11890_v52  ;;  %v7811_v55 = vmax.f32 %v14790_v9, %v7810_v6  ;;  %v8539_v27 = vmax.f32 %v14795_v13, %v8538_v31  ;;  %v7796_v18 = vsel %vm7748_vm3, %v4757_v19, -inf }
 0x1a2   : > { %v8524_v48 = vsel %vm7748_vm3, %v6421_v10, -inf  ;;  %10466 = vst.msk [vmem:[%s15038_s7 + $0x14] sm:$0xf] %vm10460_vm4, %v11789_v11  ;;  %10570 = vst.msk [vmem:[%s15038_s7 + $0x1b4] sm:$0xf] %vm10460_vm4, %v11893_v51  ;;  %v11787_v4 = vpack.c.bf16 %v9423_v40, %v9423_v40  ;;  %v7797_v2 = vmax.f32 %v14722_v26, %v7796_v18  ;;  %12616 = vmatmul.mubr.msk.bf16.gmra.mrb[192].mxu0 %vm3131_vm2, %v13475_v21  ;;  %v7817_v22 = vsel %vm7748_vm3, %v12510_v15, -inf }
 0x1a3   : > { %v11891_v3 = vpack.c.bf16 %v9527_v42, %v9527_v42  ;;  %v8525_v17 = vmax.f32 %v14727_v44, %v8524_v48  ;;  %v9220_v9 = vadd.f32 %v14997_v34, %v7811_v55  ;;  %v9324_v13 = vadd.f32 %v14997_v34, %v8539_v27  ;;  %13032 = vmatmul.mubr.msk.bf16.gmra.mrb[192].mxu1 %vm3131_vm2, %v13476_v30  ;;  %v13479_v30 = vld [vmem:[%s13759_s28 + $0x318] sm:$0xff]   ;;  %v13481_v31 = vld [vmem:[%s13759_s28 + $0x320] sm:$0xff]  }
 0x1a4   : > { %v8545_v12 = vsel %vm7748_vm3, %v12926_v53, -inf  ;;  %12619 = vmatprep.mubr.msk.bf16.mxu0 %vm3131_vm2, %v13477_v28  ;;  %10464 = vst.msk [vmem:[%s15038_s7 + $0xc] sm:$0xf] %vm10460_vm4, %v11787_v4  ;;  %v9218_v26 = vadd.f32 %v14997_v34, %v7797_v2  ;;  %v7818_v21 = vmax.f32 %v14814_v63, %v7817_v22  ;;  %13035 = vmatprep.mubr.msk.bf16.mxu1 %vm3131_vm2, %v13478_v36  ;;  %v7803_v28 = vsel %vm7748_vm3, %v4760_v20, -inf  ;;  %v13480_v6 = vld [vmem:[%s13759_s28 + $0x998] sm:$0xff]   ;;  %v13482_v51 = vld [vmem:[%s13759_s28 + $0x9a0] sm:$0xff]  }
 0x1a5   : > { %10568 = vst.msk [vmem:[%s15038_s7 + $0x1ac] sm:$0xf] %vm10460_vm4, %v11891_v3  ;;  %v9322_v44 = vadd.f32 %v14997_v34, %v8525_v17  ;;  %v8546_v35 = vmax.f32 %v14819_v57, %v8545_v12  ;;  %v9428_v49 = vmax.f32 %v9220_v9, 0.0  ;;  %v9532_v19 = vmax.f32 %v9324_v13, 0.0  ;;  %v12513_v62 = vpop.f32.mrb[88].mxu0  ;;  %v12929_v52 = vpop.f32.mrb[88].mxu1 }
 0x1a6   : > { %v8531_v10 = vsel %vm7748_vm3, %v6424_v38, -inf  ;;  %v9426_v15 = vmax.f32 %v9218_v26, 0.0  ;;  %v9221_v63 = vadd.f32 %v14997_v34, %v7818_v21  ;;  %v4773_v36 = vpop.f32.mrb[89].mxu0  ;;  %v6437_v11 = vpop.f32.mrb[89].mxu1  ;;  %v7804_v20 = vmax.f32 %v14746_v50, %v7803_v28  ;;  %v19711_v38 = vld [vmem:[#allocation2_spill] sm:$0xff] }
 0x1a7   : > { %v9530_v53 = vmax.f32 %v9322_v44, 0.0  ;;  %v9325_v57 = vadd.f32 %v14997_v34, %v8546_v35  ;;  %v11792_v40 = vpack.c.bf16 %v9428_v49, %v9428_v49  ;;  %v11896_v42 = vpack.c.bf16 %v9532_v19, %v9532_v19  ;;  %v12514_v27 = vpop.f32.mrb[90].mxu0  ;;  %v12930_v18 = vpop.f32.mrb[90].mxu1 }
 0x1a8   : > { %v8532_v55 = vmax.f32 %v19711_v38, %v8531_v10  ;;  %v11790_v48 = vpack.c.bf16 %v9426_v15, %v9426_v15  ;;  %v9429_v3 = vmax.f32 %v9221_v63, 0.0  ;;  %v4776_v17 = vpop.f32.mrb[91].mxu0  ;;  %v6440_v9 = vpop.f32.mrb[91].mxu1  ;;  %v9219_v13 = vadd.f32 %v14997_v34, %v7804_v20  ;;  %v13486_v38 = vld [vmem:[%s13759_s28 + $0x9b0] sm:$0xff]  }
 0x1a9   : > { %v11894_v4 = vpack.c.bf16 %v9530_v53, %v9530_v53  ;;  %v9533_v2 = vmax.f32 %v9325_v57, 0.0  ;;  %10469 = vst.msk [vmem:[%s15038_s7 + $0x20] sm:$0xf] %vm10460_vm4, %v11792_v40  ;;  %10573 = vst.msk [vmem:[%s15038_s7 + $0x1c0] sm:$0xf] %vm10460_vm4, %v11896_v42  ;;  %v7838_v22 = vsel %vm7748_vm3, %v12513_v62, -inf }
 0x1aa   : > { %v9323_v50 = vadd.f32 %v14997_v34, %v8532_v55  ;;  %v8566_v12 = vsel %vm7748_vm3, %v12929_v52, -inf  ;;  %10467 = vst.msk [vmem:[%s15038_s7 + $0x18] sm:$0xf] %vm10460_vm4, %v11790_v48  ;;  %v11793_v26 = vpack.c.bf16 %v9429_v3, %v9429_v3  ;;  %v7839_v21 = vmax.f32 %v14846_v32, %v7838_v22  ;;  %12620 = vmatmul.mubr.msk.bf16.gmra.mrb[196].mxu0 %vm3131_vm2, %v13479_v30  ;;  %v13483_v52 = vld [vmem:[%s13759_s28 + $0x328] sm:$0xff]  }
 0x1ab   : > { %10571 = vst.msk [vmem:[%s15038_s7 + $0x1b8] sm:$0xf] %vm10460_vm4, %v11894_v4  ;;  %v11897_v44 = vpack.c.bf16 %v9533_v2, %v9533_v2  ;;  %v8567_v35 = vmax.f32 %v14851_v39, %v8566_v12  ;;  %v9427_v49 = vmax.f32 %v9219_v13, 0.0  ;;  %v7824_v28 = vsel %vm7748_vm3, %v4773_v36, -inf  ;;  %13036 = vmatmul.mubr.msk.bf16.gmra.mrb[196].mxu1 %vm3131_vm2, %v13480_v6  ;;  %12623 = vmatprep.mubr.msk.bf16.mxu0 %vm3131_vm2, %v13481_v31  ;;  %v13484_v36 = vld [vmem:[%s13759_s28 + $0x9a8] sm:$0xff]  }
 0x1ac   : > { %v9531_v19 = vmax.f32 %v9323_v50, 0.0  ;;  %v8552_v10 = vsel %vm7748_vm3, %v6437_v11, -inf  ;;  %10470 = vst.msk [vmem:[%s15038_s7 + $0x24] sm:$0xf] %vm10460_vm4, %v11793_v26  ;;  %v9224_v32 = vadd.f32 %v14997_v34, %v7839_v21  ;;  %v7825_v30 = vmax.f32 %v14778_v46, %v7824_v28  ;;  %13039 = vmatprep.mubr.msk.bf16.mxu1 %vm3131_vm2, %v13482_v51  ;;  %v13485_v11 = vld [vmem:[%s13759_s28 + $0x330] sm:$0xff]  }
 0x1ad   : > { %10574 = vst.msk [vmem:[%s15038_s7 + $0x1c4] sm:$0xf] %vm10460_vm4, %v11897_v44  ;;  %v9328_v39 = vadd.f32 %v14997_v34, %v8567_v35  ;;  %v8553_v62 = vmax.f32 %v14783_v25, %v8552_v10  ;;  %v11791_v6 = vpack.c.bf16 %v9427_v49, %v9427_v49  ;;  %v7845_v15 = vsel %vm7748_vm3, %v12514_v27, -inf  ;;  %v12517_v63 = vpop.f32.mrb[92].mxu0  ;;  %v12933_v57 = vpop.f32.mrb[92].mxu1 }
 0x1ae   : > { %v11895_v31 = vpack.c.bf16 %v9531_v19, %v9531_v19  ;;  %v8573_v53 = vsel %vm7748_vm3, %v12930_v18, -inf  ;;  %v9432_v40 = vmax.f32 %v9224_v32, 0.0  ;;  %v9222_v25 = vadd.f32 %v14997_v34, %v7825_v30  ;;  %v4789_v42 = vpop.f32.mrb[93].mxu0  ;;  %v6453_v20 = vpop.f32.mrb[93].mxu1 }
 0x1af   : > { %v9536_v46 = vmax.f32 %v9328_v39, 0.0  ;;  %v9326_v51 = vadd.f32 %v14997_v34, %v8553_v62  ;;  %10468 = vst.msk [vmem:[%s15038_s7 + $0x1c] sm:$0xf] %vm10460_vm4, %v11791_v6  ;;  %v7846_v55 = vmax.f32 %v14870_v16, %v7845_v15  ;;  %v8574_v27 = vmax.f32 %v14875_v8, %v8573_v53  ;;  %v12518_v4 = vpop.f32.mrb[94].mxu0  ;;  %v12934_v3 = vpop.f32.mrb[94].mxu1  ;;  %v13487_v62 = vld [vmem:[%s13759_s28 + $0x338] sm:$0xff]  }
 0x1b0   : > { %10572 = vst.msk [vmem:[%s15038_s7 + $0x1bc] sm:$0xf] %vm10460_vm4, %v11895_v31  ;;  %v7831_v18 = vsel %vm7748_vm3, %v4776_v17, -inf  ;;  %v8559_v48 = vsel %vm7748_vm3, %v6440_v9, -inf  ;;  %v11796_v2 = vpack.c.bf16 %v9432_v40, %v9432_v40  ;;  %v9430_v50 = vmax.f32 %v9222_v25, 0.0  ;;  %v4792_v12 = vpop.f32.mrb[95].mxu0 }
 0x1b1   : > { %v11900_v13 = vpack.c.bf16 %v9536_v46, %v9536_v46  ;;  %v9534_v22 = vmax.f32 %v9326_v51, 0.0  ;;  %v6456_v26 = vpop.f32.mrb[95].mxu1  ;;  %v9225_v44 = vadd.f32 %v14997_v34, %v7846_v55  ;;  %v9329_v16 = vadd.f32 %v14997_v34, %v8574_v27  ;;  %v13489_v25 = vld [vmem:[%s13759_s28 + $0x340] sm:$0xff]  }
 0x1b2   : > { %v7832_v8 = vmax.f32 %v14802_v54, %v7831_v18  ;;  %v8560_v17 = vmax.f32 %v14807_v58, %v8559_v48  ;;  %10473 = vst.msk [vmem:[%s15038_s7 + $0x30] sm:$0xf] %vm10460_vm4, %v11796_v2  ;;  %v11794_v9 = vpack.c.bf16 %v9430_v50, %v9430_v50  ;;  %v7866_v35 = vsel %vm7748_vm3, %v12517_v63, -inf  ;;  %12624 = vmatmul.mubr.msk.bf16.gmra.mrb[200].mxu0 %vm3131_vm2, %v13483_v52  ;;  %v13490_v51 = vld [vmem:[%s13759_s28 + $0x9c0] sm:$0xff]  }
 0x1b3   : > { %10577 = vst.msk [vmem:[%s15038_s7 + $0x1d0] sm:$0xf] %vm10460_vm4, %v11900_v13  ;;  %v11898_v21 = vpack.c.bf16 %v9534_v22, %v9534_v22  ;;  %v8594_v49 = vsel %vm7748_vm3, %v12933_v57, -inf  ;;  %v9433_v19 = vmax.f32 %v9225_v44, 0.0  ;;  %v9537_v28 = vmax.f32 %v9329_v16, 0.0  ;;  %13040 = vmatmul.mubr.msk.bf16.gmra.mrb[200].mxu1 %vm3131_vm2, %v13484_v36  ;;  %12627 = vmatprep.mubr.msk.bf16.mxu0 %vm3131_vm2, %v13485_v11 }
 0x1b4   : > { %v9223_v54 = vadd.f32 %v14997_v34, %v7832_v8  ;;  %v9327_v10 = vadd.f32 %v14997_v34, %v8560_v17  ;;  %10471 = vst.msk [vmem:[%s15038_s7 + $0x28] sm:$0xf] %vm10460_vm4, %v11794_v9  ;;  %v7867_v58 = vmax.f32 %v14902_v37, %v7866_v35  ;;  %v8595_v32 = vmax.f32 %v14907_v61, %v8594_v49  ;;  %v13488_v37 = vld [vmem:[%s13759_s28 + $0x9b8] sm:$0xff]  }
 0x1b5   : > { %10575 = vst.msk [vmem:[%s15038_s7 + $0x1c8] sm:$0xf] %vm10460_vm4, %v11898_v21  ;;  %v7852_v39 = vsel %vm7748_vm3, %v4789_v42, -inf  ;;  %v8580_v30 = vsel %vm7748_vm3, %v6453_v20, -inf  ;;  %13043 = vmatprep.mubr.msk.bf16.mxu1 %vm3131_vm2, %v13486_v38  ;;  %v11797_v52 = vpack.c.bf16 %v9433_v19, %v9433_v19  ;;  %v11901_v6 = vpack.c.bf16 %v9537_v28, %v9537_v28  ;;  %v12521_v53 = vpop.f32.mrb[96].mxu0  ;;  %v12937_v63 = vpop.f32.mrb[96].mxu1 }
 0x1b6   : > { %v9431_v31 = vmax.f32 %v9223_v54, 0.0  ;;  %v9535_v15 = vmax.f32 %v9327_v10, 0.0  ;;  %v9228_v61 = vadd.f32 %v14997_v34, %v7867_v58  ;;  %v9332_v57 = vadd.f32 %v14997_v34, %v8595_v32  ;;  %v4805_v40 = vpop.f32.mrb[97].mxu0  ;;  %v6469_v46 = vpop.f32.mrb[97].mxu1 }
 0x1b7   : > { %v7853_v36 = vmax.f32 %v14834_v60, %v7852_v39  ;;  %v8581_v11 = vmax.f32 %v14839_v56, %v8580_v30  ;;  %10474 = vst.msk [vmem:[%s15038_s7 + $0x34] sm:$0xf] %vm10460_vm4, %v11797_v52  ;;  %10578 = vst.msk [vmem:[%s15038_s7 + $0x1d4] sm:$0xf] %vm10460_vm4, %v11901_v6  ;;  %v7873_v38 = vsel %vm7748_vm3, %v12518_v4, -inf  ;;  %v8601_v55 = vsel %vm7748_vm3, %v12934_v3, -inf }
 0x1b8   : > { %v11795_v42 = vpack.c.bf16 %v9431_v31, %v9431_v31  ;;  %v11899_v20 = vpack.c.bf16 %v9535_v15, %v9535_v15  ;;  %v15222_v27 = vpop.f32.mrb[98].mxu0  ;;  %v15224_v60 = vpop.f32.mrb[98].mxu1  ;;  %v9436_v56 = vmax.f32 %v9228_v61, 0.0  ;;  %v9540_v18 = vmax.f32 %v9332_v57, 0.0  ;;  %v13492_v39 = vld [vmem:[%s13759_s28 + $0x9c8] sm:$0xff]   ;;  %v13493_v30 = vld [vmem:[%s13759_s28 + $0x350] sm:$0xff]  }
 0x1b9   : > { %v9226_v48 = vadd.f32 %v14997_v34, %v7853_v36  ;;  %v9330_v2 = vadd.f32 %v14997_v34, %v8581_v11  ;;  %v15228_v13 = vpop.f32.mrb[99].mxu0  ;;  %v15230_v50 = vpop.f32.mrb[99].mxu1  ;;  %v7874_v4 = vmax.f32 %v14926_v29, %v7873_v38  ;;  %v8602_v3 = vmax.f32 %v14931_v33, %v8601_v55 }
 0x1ba   : > { %10472 = vst.msk [vmem:[%s15038_s7 + $0x2c] sm:$0xf] %vm10460_vm4, %v11795_v42  ;;  %10576 = vst.msk [vmem:[%s15038_s7 + $0x1cc] sm:$0xf] %vm10460_vm4, %v11899_v20  ;;  %v7859_v22 = vsel %vm7748_vm3, %v4792_v12, -inf  ;;  %v8587_v44 = vsel %vm7748_vm3, %v6456_v26, -inf  ;;  %v11800_v16 = vpack.c.bf16 %v9436_v56, %v9436_v56  ;;  %v11904_v8 = vpack.c.bf16 %v9540_v18, %v9540_v18  ;;  %12628 = vmatmul.mubr.msk.bf16.gmra.mrb[204].mxu0 %vm3131_vm2, %v13487_v62 }
 0x1bb   : > { %v9434_v17 = vmax.f32 %v9226_v48, 0.0  ;;  %v9538_v9 = vmax.f32 %v9330_v2, 0.0  ;;  %v9229_v21 = vadd.f32 %v14997_v34, %v7874_v4  ;;  %v9333_v35 = vadd.f32 %v14997_v34, %v8602_v3  ;;  %13044 = vmatmul.mubr.msk.bf16.gmra.mrb[204].mxu1 %vm3131_vm2, %v13488_v37  ;;  %12631 = vmatprep.mubr.msk.bf16.mxu0 %vm3131_vm2, %v13489_v25 }
 0x1bc   : > { %v7860_v49 = vmax.f32 %v14858_v0, %v7859_v22  ;;  %v8588_v29 = vmax.f32 %v14863_v45, %v8587_v44  ;;  %10477 = vst.msk [vmem:[%s15038_s7 + $0x40] sm:$0xf] %vm10460_vm4, %v11800_v16  ;;  %10581 = vst.msk [vmem:[%s15038_s7 + $0x1e0] sm:$0xf] %vm10460_vm4, %v11904_v8  ;;  %v7894_v26 = vsel %vm7748_vm3, %v12521_v53, -inf  ;;  %v8622_v19 = vsel %vm7748_vm3, %v12937_v63, -inf  ;;  %13047 = vmatprep.mubr.msk.bf16.mxu1 %vm3131_vm2, %v13490_v51 }
 0x1bd   : > { %v11798_v33 = vpack.c.bf16 %v9434_v17, %v9434_v17  ;;  %v11902_v12 = vpack.c.bf16 %v9538_v9, %v9538_v9  ;;  %v13491_v0 = vld [vmem:[%s13759_s28 + $0x348] sm:$0xff]   ;;  %v9437_v45 = vmax.f32 %v9229_v21, 0.0  ;;  %v9541_v28 = vmax.f32 %v9333_v35, 0.0  ;;  %v12525_v58 = vpop.f32.mrb[100].mxu0  ;;  %v12941_v32 = vpop.f32.mrb[100].mxu1  ;;  %v13494_v63 = vld [vmem:[%s13759_s28 + $0x9d0] sm:$0xff]  }
 0x1be   : > { %v9227_v54 = vadd.f32 %v14997_v34, %v7860_v49  ;;  %v9331_v10 = vadd.f32 %v14997_v34, %v8588_v29  ;;  %v7895_v62 = vmax.f32 %v14958_v47, %v7894_v26  ;;  %v8623_v52 = vmax.f32 %v14963_v5, %v8622_v19  ;;  %v15267_v15 = vpop.f32.mrb[101].mxu0  ;;  %v15269_v53 = vpop.f32.mrb[101].mxu1  ;;  %v19712_v8 = vld [vmem:[#allocation16_spill] sm:$0xff]  ;;  %v13496_v35 = vld [vmem:[%s13759_s28 + $0x9d8] sm:$0xff]   ;;  %v13497_v49 = vld [vmem:[%s13759_s28 + $0x360] sm:$0xff]  }
 0x1bf   : > { %10475 = vst.msk [vmem:[%s15038_s7 + $0x38] sm:$0xf] %vm10460_vm4, %v11798_v33  ;;  %10579 = vst.msk [vmem:[%s15038_s7 + $0x1d8] sm:$0xf] %vm10460_vm4, %v11902_v12  ;;  %v7880_v6 = vsel %vm7748_vm3, %v4805_v40, -inf  ;;  %v8608_v31 = vsel %vm7748_vm3, %v6469_v46, -inf  ;;  %v11801_v37 = vpack.c.bf16 %v9437_v45, %v9437_v45  ;;  %v11905_v61 = vpack.c.bf16 %v9541_v28, %v9541_v28 }
 0x1c0   : > { %v9435_v57 = vmax.f32 %v9227_v54, 0.0  ;;  %v9539_v36 = vmax.f32 %v9331_v10, 0.0  ;;  %v15272_v11 = vpop.f32.mrb[102].mxu0  ;;  %v15274_v47 = vpop.f32.mrb[102].mxu1  ;;  %v9232_v5 = vadd.f32 %v14997_v34, %v7895_v62  ;;  %v9336_v40 = vadd.f32 %v14997_v34, %v8623_v52 }
 0x1c1   : > { %v7881_v46 = vmax.f32 %v14890_v24, %v7880_v6  ;;  %v8609_v25 = vmax.f32 %v14895_v43, %v8608_v31  ;;  %v15280_v51 = vpop.f32.mrb[103].mxu0  ;;  %v15282_v42 = vpop.f32.mrb[103].mxu1  ;;  %10478 = vst.msk [vmem:[%s15038_s7 + $0x44] sm:$0xf] %vm10460_vm4, %v11801_v37  ;;  %10582 = vst.msk [vmem:[%s15038_s7 + $0x1e4] sm:$0xf] %vm10460_vm4, %v11905_v61 }
 0x1c2   : > { %v11799_v20 = vpack.c.bf16 %v9435_v57, %v9435_v57  ;;  %v11903_v38 = vpack.c.bf16 %v9539_v36, %v9539_v36  ;;  %v7901_v55 = vsel %vm7748_vm3, %v15222_v27, -inf  ;;  %v8629_v56 = vsel %vm7748_vm3, %v15224_v60, -inf  ;;  %12632 = vmatmul.mubr.msk.bf16.gmra.mrb[208].mxu0 %vm3131_vm2, %v13491_v0  ;;  %v13498_v0 = vld [vmem:[%s13759_s28 + $0x9e0] sm:$0xff]  }
 0x1c3   : > { %v9440_v24 = vmax.f32 %v9232_v5, 0.0  ;;  %v9544_v18 = vmax.f32 %v9336_v40, 0.0  ;;  %v9230_v43 = vadd.f32 %v14997_v34, %v7881_v46  ;;  %v9334_v48 = vadd.f32 %v14997_v34, %v8609_v25  ;;  %13048 = vmatmul.mubr.msk.bf16.gmra.mrb[208].mxu1 %vm3131_vm2, %v13492_v39  ;;  %12635 = vmatprep.mubr.msk.bf16.mxu0 %vm3131_vm2, %v13493_v30  ;;  %v19713_v5 = vld [vmem:[#allocation25_spill] sm:$0xff]  ;;  %v19714_v40 = vld [vmem:[#allocation3_spill] sm:$0xff] }
 0x1c4   : > { %10476 = vst.msk [vmem:[%s15038_s7 + $0x3c] sm:$0xf] %vm10460_vm4, %v11799_v20  ;;  %10580 = vst.msk [vmem:[%s15038_s7 + $0x1dc] sm:$0xf] %vm10460_vm4, %v11903_v38  ;;  %v7902_v2 = vmax.f32 %v14982_v23, %v7901_v55  ;;  %v8630_v27 = vmax.f32 %v14987_v7, %v8629_v56  ;;  %v7887_v60 = vsel %vm7748_vm3, %v15228_v13, -inf  ;;  %v8615_v4 = vsel %vm7748_vm3, %v15230_v50, -inf  ;;  %13051 = vmatprep.mubr.msk.bf16.mxu1 %vm3131_vm2, %v13494_v63 }
 0x1c5   : > { %v11804_v3 = vpack.c.bf16 %v9440_v24, %v9440_v24  ;;  %v11908_v22 = vpack.c.bf16 %v9544_v18, %v9544_v18  ;;  %v9438_v44 = vmax.f32 %v9230_v43, 0.0  ;;  %v9542_v23 = vmax.f32 %v9334_v48, 0.0  ;;  %v13495_v7 = vld [vmem:[%s13759_s28 + $0x358] sm:$0xff]   ;;  %v15313_v9 = vpop.f32.mrb[104].mxu0  ;;  %v15315_v21 = vpop.f32.mrb[104].mxu1  ;;  %v13499_v18 = vld [vmem:[%s13759_s28 + $0x368] sm:$0xff]  }
 0x1c6   : > { %v9233_v13 = vadd.f32 %v14997_v34, %v7902_v2  ;;  %v9337_v16 = vadd.f32 %v14997_v34, %v8630_v27  ;;  %v7888_v50 = vmax.f32 %v14914_v14, %v7887_v60  ;;  %v8616_v17 = vmax.f32 %v19712_v8, %v8615_v4  ;;  %v15325_v26 = vpop.f32.mrb[105].mxu0  ;;  %v15327_v19 = vpop.f32.mrb[105].mxu1  ;;  %v13500_v60 = vld [vmem:[%s13759_s28 + $0x9e8] sm:$0xff]   ;;  %v13501_v4 = vld [vmem:[%s13759_s28 + $0x370] sm:$0xff]  }
 0x1c7   : > { %10481 = vst.msk [vmem:[%s15038_s7 + $0x50] sm:$0xf] %vm10460_vm4, %v11804_v3  ;;  %10585 = vst.msk [vmem:[%s15038_s7 + $0x1f0] sm:$0xf] %vm10460_vm4, %v11908_v22  ;;  %v11802_v29 = vpack.c.bf16 %v9438_v44, %v9438_v44  ;;  %v11906_v33 = vpack.c.bf16 %v9542_v23, %v9542_v23  ;;  %v7922_v12 = vsel %vm7748_vm3, %v12525_v58, -inf  ;;  %v8650_v14 = vsel %vm7748_vm3, %v12941_v32, -inf }
 0x1c8   : > { %v9441_v45 = vmax.f32 %v9233_v13, 0.0  ;;  %v9545_v28 = vmax.f32 %v9337_v16, 0.0  ;;  %v9231_v54 = vadd.f32 %v14997_v34, %v7888_v50  ;;  %v9335_v10 = vadd.f32 %v14997_v34, %v8616_v17  ;;  %v15332_v39 = vpop.f32.mrb[106].mxu0  ;;  %v15334_v30 = vpop.f32.mrb[106].mxu1  ;;  %v19716_v16 = vld [vmem:[#allocation17_spill] sm:$0xff]  ;;  %v19717_v8 = vld [vmem:[#allocation4_spill] sm:$0xff] }
 0x1c9   : > { %10479 = vst.msk [vmem:[%s15038_s7 + $0x48] sm:$0xf] %vm10460_vm4, %v11802_v29  ;;  %10583 = vst.msk [vmem:[%s15038_s7 + $0x1e8] sm:$0xf] %vm10460_vm4, %v11906_v33  ;;  %v7923_v58 = vmax.f32 %v15012_v1, %v7922_v12  ;;  %v8651_v32 = vmax.f32 %v15017_v59, %v8650_v14  ;;  %v7908_v62 = vsel %vm7748_vm3, %v15267_v15, -inf  ;;  %v8636_v52 = vsel %vm7748_vm3, %v15269_v53, -inf }
 0x1ca   : > { %v15346_v6 = vpop.f32.mrb[107].mxu0  ;;  %v15348_v31 = vpop.f32.mrb[107].mxu1  ;;  %v11805_v63 = vpack.c.bf16 %v9441_v45, %v9441_v45  ;;  %v11909_v37 = vpack.c.bf16 %v9545_v28, %v9545_v28  ;;  %v9439_v61 = vmax.f32 %v9231_v54, 0.0  ;;  %v9543_v57 = vmax.f32 %v9335_v10, 0.0  ;;  %12636 = vmatmul.mubr.msk.bf16.gmra.mrb[212].mxu0 %vm3131_vm2, %v13495_v7 }
 0x1cb   : > { %v9236_v36 = vadd.f32 %v14997_v34, %v7923_v58  ;;  %v9340_v1 = vadd.f32 %v14997_v34, %v8651_v32  ;;  %v7909_v59 = vmax.f32 %v19713_v5, %v7908_v62  ;;  %v8637_v15 = vmax.f32 %v19714_v40, %v8636_v52  ;;  %13052 = vmatmul.mubr.msk.bf16.gmra.mrb[212].mxu1 %vm3131_vm2, %v13496_v35  ;;  %v13503_v5 = vld [vmem:[%s13759_s28 + $0x378] sm:$0xff]  }
 0x1cc   : > { %10482 = vst.msk [vmem:[%s15038_s7 + $0x54] sm:$0xf] %vm10460_vm4, %v11805_v63  ;;  %10586 = vst.msk [vmem:[%s15038_s7 + $0x1f4] sm:$0xf] %vm10460_vm4, %v11909_v37  ;;  %v11803_v53 = vpack.c.bf16 %v9439_v61, %v9439_v61  ;;  %v11907_v46 = vpack.c.bf16 %v9543_v57, %v9543_v57  ;;  %v7929_v25 = vsel %vm7748_vm3, %v15272_v11, -inf  ;;  %v8657_v20 = vsel %vm7748_vm3, %v15274_v47, -inf  ;;  %12639 = vmatprep.mubr.msk.bf16.mxu0 %vm3131_vm2, %v13497_v49 }
 0x1cd   : > { %v9444_v38 = vmax.f32 %v9236_v36, 0.0  ;;  %v9548_v55 = vmax.f32 %v9340_v1, 0.0  ;;  %v9234_v56 = vadd.f32 %v14997_v34, %v7909_v59  ;;  %v9338_v24 = vadd.f32 %v14997_v34, %v8637_v15  ;;  %13055 = vmatprep.mubr.msk.bf16.mxu1 %vm3131_vm2, %v13498_v0  ;;  %v19715_v47 = vld [vmem:[#allocation18_spill] sm:$0xff]  ;;  %v15379_v27 = vpop.f32.mrb[108].mxu0  ;;  %v15381_v34 = vpop.f32.mrb[108].mxu1  ;;  %v13502_v0 = vld [vmem:[%s13759_s28 + $0x9f0] sm:$0xff]  }
 0x1ce   : > { %10480 = vst.msk [vmem:[%s15038_s7 + $0x4c] sm:$0xf] %vm10460_vm4, %v11803_v53  ;;  %10584 = vst.msk [vmem:[%s15038_s7 + $0x1ec] sm:$0xf] %vm10460_vm4, %v11907_v46  ;;  %v7930_v11 = vmax.f32 %v15043_v41, %v7929_v25  ;;  %v8658_v43 = vmax.f32 %v19715_v47, %v8657_v20  ;;  %v7915_v48 = vsel %vm7748_vm3, %v15280_v51, -inf  ;;  %v8643_v2 = vsel %vm7748_vm3, %v15282_v42, -inf }
 0x1cf   : > { %v11808_v3 = vpack.c.bf16 %v9444_v38, %v9444_v38  ;;  %v11912_v22 = vpack.c.bf16 %v9548_v55, %v9548_v55  ;;  %v9442_v44 = vmax.f32 %v9234_v56, 0.0  ;;  %v9546_v41 = vmax.f32 %v9338_v24, 0.0  ;;  %v15385_v23 = vpop.f32.mrb[109].mxu0  ;;  %v15387_v7 = vpop.f32.mrb[109].mxu1  ;;  %v13697_v51 = vld [vmem:[%s19294_s2] ss:$0 sm:$0xff] }
 0x1d0   : > { %v9237_v42 = vadd.f32 %v13697_v51, %v7930_v11  ;;  %v9341_v13 = vadd.f32 %v13697_v51, %v8658_v43  ;;  %v7916_v50 = vmax.f32 %v19716_v16, %v7915_v48  ;;  %v8644_v17 = vmax.f32 %v19717_v8, %v8643_v2  ;;  %v15394_v35 = vpop.f32.mrb[110].mxu0  ;;  %v15396_v49 = vpop.f32.mrb[110].mxu1  ;;  %v13504_v15 = vld [vmem:[%s13759_s28 + $0x9f8] sm:$0xff]   ;;  %v13505_v53 = vld [vmem:[%s13759_s28 + $0x380] sm:$0xff]   ;;  %v13508_v43 = vld [vmem:[%s13759_s28 + $0xa08] sm:$0xff]  }
 0x1d1   : > { %10485 = vst.msk [vmem:[%s15038_s7 + $0x60] sm:$0xf] %vm10460_vm4, %v11808_v3  ;;  %10589 = vst.msk [vmem:[%s15038_s7 + $0x200] sm:$0xf] %vm10460_vm4, %v11912_v22  ;;  %v11806_v29 = vpack.c.bf16 %v9442_v44, %v9442_v44  ;;  %v11910_v33 = vpack.c.bf16 %v9546_v41, %v9546_v41  ;;  %v15402_v12 = vpop.f32.mrb[111].mxu0  ;;  %v15404_v14 = vpop.f32.mrb[111].mxu1 }
 0x1d2   : > { %v9445_v45 = vmax.f32 %v9237_v42, 0.0  ;;  %v9549_v28 = vmax.f32 %v9341_v13, 0.0  ;;  %v9235_v54 = vadd.f32 %v13697_v51, %v7916_v50  ;;  %v9339_v10 = vadd.f32 %v13697_v51, %v8644_v17  ;;  %12640 = vmatmul.mubr.msk.bf16.gmra.mrb[216].mxu0 %vm3131_vm2, %v13499_v18  ;;  %v13506_v20 = vld [vmem:[%s13759_s28 + $0xa00] sm:$0xff]   ;;  %v13507_v18 = vld [vmem:[%s13759_s28 + $0x388] sm:$0xff]   ;;  %v13509_v48 = vld [vmem:[%s13759_s28 + $0x390] sm:$0xff]  }
 0x1d3   : > { %10483 = vst.msk [vmem:[%s15038_s7 + $0x58] sm:$0xf] %vm10460_vm4, %v11806_v29  ;;  %10587 = vst.msk [vmem:[%s15038_s7 + $0x1f8] sm:$0xf] %vm10460_vm4, %v11910_v33  ;;  %13056 = vmatmul.mubr.msk.bf16.gmra.mrb[216].mxu1 %vm3131_vm2, %v13500_v60  ;;  %12643 = vmatprep.mubr.msk.bf16.mxu0 %vm3131_vm2, %v13501_v4  ;;  %v13510_v4 = vld [vmem:[%s13759_s28 + $0xa10] sm:$0xff]   ;;  %v13511_v51 = vld [vmem:[%s13759_s28 + $0x398] sm:$0xff]  }
 0x1d4   : > { %v11809_v58 = vpack.c.bf16 %v9445_v45, %v9445_v45  ;;  %v11913_v32 = vpack.c.bf16 %v9549_v28, %v9549_v28  ;;  %v9443_v62 = vmax.f32 %v9235_v54, 0.0  ;;  %v9547_v52 = vmax.f32 %v9339_v10, 0.0  ;;  %13059 = vmatprep.mubr.msk.bf16.mxu1 %vm3131_vm2, %v13502_v0  ;;  %v13512_v16 = vld [vmem:[%s13759_s28 + $0xa18] sm:$0xff]   ;;  %v13513_v50 = vld [vmem:[%s13759_s28 + $0x3a0] sm:$0xff]   ;;  %v13515_v54 = vld [vmem:[%s13759_s28 + $0x3a8] sm:$0xff]  }
 0x1d5   : > { %v15419_v61 = vpop.f32.mrb[112].mxu0  ;;  %v15421_v57 = vpop.f32.mrb[112].mxu1  ;;  %v13514_v29 = vld [vmem:[%s13759_s28 + $0xa20] sm:$0xff]  }
 0x1d6   : > { %10486 = vst.msk [vmem:[%s15038_s7 + $0x64] sm:$0xf] %vm10460_vm4, %v11809_v58  ;;  %10590 = vst.msk [vmem:[%s15038_s7 + $0x204] sm:$0xf] %vm10460_vm4, %v11913_v32  ;;  %v11807_v63 = vpack.c.bf16 %v9443_v62, %v9443_v62  ;;  %v11911_v37 = vpack.c.bf16 %v9547_v52, %v9547_v52  ;;  %v15423_v36 = vpop.f32.mrb[113].mxu0  ;;  %v15425_v1 = vpop.f32.mrb[113].mxu1 }
 0x1d7   : > { %v15432_v59 = vpop.f32.mrb[114].mxu0  ;;  %v15434_v40 = vpop.f32.mrb[114].mxu1  ;;  %v13516_v32 = vld [vmem:[%s13759_s28 + $0xa28] sm:$0xff]   ;;  %v13517_v62 = vld [vmem:[%s13759_s28 + $0x3b0] sm:$0xff]  }
 0x1d8   : > { %10484 = vst.msk [vmem:[%s15038_s7 + $0x5c] sm:$0xf] %vm10460_vm4, %v11807_v63  ;;  %10588 = vst.msk [vmem:[%s15038_s7 + $0x1fc] sm:$0xf] %vm10460_vm4, %v11911_v37  ;;  %v15438_v46 = vpop.f32.mrb[115].mxu0  ;;  %v15440_v25 = vpop.f32.mrb[115].mxu1 }
 0x1d9   : > { %v13518_v37 = vld [vmem:[%s13759_s28 + $0xa30] sm:$0xff]  }
 0x1da   : > { %12644 = vmatmul.mubr.msk.bf16.gmra.mrb[220].mxu0 %vm3131_vm2, %v13503_v5 }
 0x1db   : > { %13060 = vmatmul.mubr.msk.bf16.gmra.mrb[220].mxu1 %vm3131_vm2, %v13504_v15  ;;  %12647 = vmatprep.mubr.msk.bf16.mxu0 %vm3131_vm2, %v13505_v53  ;;  %v13519_v53 = vld [vmem:[%s13759_s28 + $0x3b8] sm:$0xff]  }
 0x1dc   : > { %13063 = vmatprep.mubr.msk.bf16.mxu1 %vm3131_vm2, %v13506_v20  ;;  %v15522_v20 = vsel %vm7748_vm3, %v15325_v26, -inf }
 0x1dd   : > { %v15447_v38 = vpop.f32.mrb[116].mxu0  ;;  %v15449_v55 = vpop.f32.mrb[116].mxu1  ;;  %19718 = vst [vmem:[#allocation5_spill] sm:$0xff] %v15522_v20 }
 0x1de   : > { %v15451_v56 = vpop.f32.mrb[117].mxu0  ;;  %v15453_v24 = vpop.f32.mrb[117].mxu1 }
 0x1df   : > { %v15456_v11 = vpop.f32.mrb[118].mxu0  ;;  %v15458_v47 = vpop.f32.mrb[118].mxu1 }
 0x1e0   : > { %v15462_v2 = vpop.f32.mrb[119].mxu0  ;;  %v15464_v60 = vpop.f32.mrb[119].mxu1 }
 0x1e2   : > { %12648 = vmatmul.mubr.msk.bf16.gmra.mrb[224].mxu0 %vm3131_vm2, %v13507_v18  ;;  %v15526_v18 = vsel %vm7748_vm3, %v15327_v19, -inf  ;;  %v13520_v19 = vld [vmem:[%s13759_s28 + $0xa38] sm:$0xff]  }
 0x1e3   : > { %13064 = vmatmul.mubr.msk.bf16.gmra.mrb[224].mxu1 %vm3131_vm2, %v13508_v43  ;;  %12651 = vmatprep.mubr.msk.bf16.mxu0 %vm3131_vm2, %v13509_v48  ;;  %19719 = vst [vmem:[#allocation21_spill] sm:$0xff] %v15526_v18  ;;  %v15662_v18 = vsel %vm7748_vm3, %v15394_v35, -inf  ;;  %v15678_v35 = vsel %vm7748_vm3, %v15438_v46, -inf }
 0x1e4   : > { %13067 = vmatprep.mubr.msk.bf16.mxu1 %vm3131_vm2, %v13510_v4  ;;  %19738 = vst [vmem:[#allocation32_spill] sm:$0xff] %v15678_v35 }
 0x1e5   : > { %v15471_v3 = vpop.f32.mrb[120].mxu0  ;;  %v15473_v22 = vpop.f32.mrb[120].mxu1 }
 0x1e6   : > { %v15475_v44 = vpop.f32.mrb[121].mxu0  ;;  %v15477_v41 = vpop.f32.mrb[121].mxu1 }
 0x1e7   : > { %v15480_v42 = vpop.f32.mrb[122].mxu0  ;;  %v15482_v13 = vpop.f32.mrb[122].mxu1 }
 0x1e8   : > { %v15486_v8 = vpop.f32.mrb[123].mxu0  ;;  %v15488_v17 = vpop.f32.mrb[123].mxu1 }
 0x1ea   : > { %12652 = vmatmul.mubr.msk.bf16.gmra.mrb[228].mxu0 %vm3131_vm2, %v13511_v51 }
 0x1eb   : > { %13068 = vmatmul.mubr.msk.bf16.gmra.mrb[228].mxu1 %vm3131_vm2, %v13512_v16  ;;  %12655 = vmatprep.mubr.msk.bf16.mxu0 %vm3131_vm2, %v13513_v50 }
 0x1ec   : > { %13071 = vmatprep.mubr.msk.bf16.mxu1 %vm3131_vm2, %v13514_v29 }
 0x1ed   : > { %v15495_v33 = vpop.f32.mrb[124].mxu0  ;;  %v15497_v0 = vpop.f32.mrb[124].mxu1 }
 0x1ee   : > { %v15499_v45 = vpop.f32.mrb[125].mxu0  ;;  %v15501_v28 = vpop.f32.mrb[125].mxu1 }
 0x1ef   : > { %v15504_v10 = vpop.f32.mrb[126].mxu0  ;;  %v15506_v58 = vpop.f32.mrb[126].mxu1 }
 0x1f0   : > { %v15510_v52 = vpop.f32.mrb[127].mxu0  ;;  %v15512_v63 = vpop.f32.mrb[127].mxu1 }
 0x1f2   : > { %12656 = vmatmul.mubr.msk.bf16.gmra.mrb[232].mxu0 %vm3131_vm2, %v13515_v54  ;;  %v13521_v54 = vld [vmem:[%s13759_s28 + $0x3c0] sm:$0xff]  }
 0x1f3   : > { %13072 = vmatmul.mubr.msk.bf16.gmra.mrb[232].mxu1 %vm3131_vm2, %v13516_v32  ;;  %12659 = vmatprep.mubr.msk.bf16.mxu0 %vm3131_vm2, %v13517_v62  ;;  %v13522_v32 = vld [vmem:[%s13759_s28 + $0xa40] sm:$0xff]   ;;  %v15547_v62 = vsel %vm7748_vm3, %v15346_v6, -inf  ;;  %v15582_v6 = vsel %vm7748_vm3, %v15332_v39, -inf  ;;  %v15598_v39 = vsel %vm7748_vm3, %v15402_v12, -inf }
 0x1f4   : > { %13075 = vmatprep.mubr.msk.bf16.mxu1 %vm3131_vm2, %v13518_v37  ;;  %19722 = vst [vmem:[#allocation30_spill] sm:$0xff] %v15547_v62  ;;  %v15551_v37 = vsel %vm7748_vm3, %v15348_v31, -inf  ;;  %v15572_v31 = vsel %vm7748_vm3, %v15313_v9, -inf  ;;  %v15590_v9 = vsel %vm7748_vm3, %v15385_v23, -inf  ;;  %19730 = vst [vmem:[#allocation27_spill] sm:$0xff] %v15598_v39  ;;  %v13524_v62 = vld [vmem:[%s13759_s28 + $0xa48] sm:$0xff]  }
 0x1f5   : > { %v12553_v5 = vpop.f32.mrb[128].mxu0  ;;  %v12969_v15 = vpop.f32.mrb[128].mxu1  ;;  %19723 = vst [vmem:[#allocation7_spill] sm:$0xff] %v15551_v37  ;;  %19728 = vst [vmem:[#allocation26_spill] sm:$0xff] %v15590_v9 }
 0x1f6   : > { %v15529_v43 = vsel %vm7748_vm3, %v12553_v5, -inf  ;;  %v15532_v48 = vsel %vm7748_vm3, %v12969_v15, -inf  ;;  %v15534_v4 = vpop.f32.mrb[129].mxu0  ;;  %v15536_v51 = vpop.f32.mrb[129].mxu1 }
 0x1f7   : > { %19720 = vst [vmem:[#allocation6_spill] sm:$0xff] %v15529_v43  ;;  %19721 = vst [vmem:[#allocation22_spill] sm:$0xff] %v15532_v48  ;;  %v12554_v50 = vpop.f32.mrb[130].mxu0  ;;  %v12970_v29 = vpop.f32.mrb[130].mxu1 }
 0x1f8   : > { %v15554_v5 = vsel %vm7748_vm3, %v12554_v50, -inf  ;;  %v15557_v15 = vsel %vm7748_vm3, %v12970_v29, -inf  ;;  %v15559_v26 = vpop.f32.mrb[131].mxu0  ;;  %v15561_v16 = vpop.f32.mrb[131].mxu1  ;;  %v15576_v50 = vsel %vm7748_vm3, %v15315_v21, -inf  ;;  %v13523_v29 = vld [vmem:[%s13759_s28 + $0x3c8] sm:$0xff]  }
 0x1f9   : > { %19724 = vst [vmem:[#allocation23_spill] sm:$0xff] %v15554_v5  ;;  %19725 = vst [vmem:[#allocation8_spill] sm:$0xff] %v15557_v15  ;;  %v15594_v21 = vsel %vm7748_vm3, %v15387_v7, -inf }
 0x1fa   : > { %19726 = vst [vmem:[#allocation24_spill] sm:$0xff] %v15559_v26  ;;  %19727 = vst [vmem:[#allocation9_spill] sm:$0xff] %v15561_v16  ;;  %12660 = vmatmul.mubr.msk.bf16.gmra.mrb[236].mxu0 %vm3131_vm2, %v13519_v53  ;;  %v15586_v53 = vsel %vm7748_vm3, %v15334_v30, -inf  ;;  %v13526_v26 = vld [vmem:[%s13759_s28 + $0xa50] sm:$0xff]  }
 0x1fb   : > { %13076 = vmatmul.mubr.msk.bf16.gmra.mrb[236].mxu1 %vm3131_vm2, %v13520_v19  ;;  %12663 = vmatprep.mubr.msk.bf16.mxu0 %vm3131_vm2, %v13521_v54  ;;  %19729 = vst [vmem:[#allocation10_spill] sm:$0xff] %v15594_v21 }
 0x1fc   : > { %13079 = vmatprep.mubr.msk.bf16.mxu1 %vm3131_vm2, %v13522_v32  ;;  %v15602_v32 = vsel %vm7748_vm3, %v15404_v14, -inf  ;;  %v13525_v14 = vld [vmem:[%s13759_s28 + $0x3d0] sm:$0xff]  }
 0x1fd   : > { %v12557_v19 = vpop.f32.mrb[132].mxu0  ;;  %v12973_v54 = vpop.f32.mrb[132].mxu1  ;;  %19731 = vst [vmem:[#allocation11_spill] sm:$0xff] %v15602_v32 }
 0x1fe   : > { %v15605_v30 = vsel %vm7748_vm3, %v12557_v19, -inf  ;;  %v15608_v23 = vsel %vm7748_vm3, %v12973_v54, -inf  ;;  %v4949_v48 = vpop.f32.mrb[133].mxu0  ;;  %v6613_v7 = vpop.f32.mrb[133].mxu1 }
 0x1ff   : > { %19732 = vst [vmem:[#allocation28_spill] sm:$0xff] %v15605_v30  ;;  %19733 = vst [vmem:[#allocation12_spill] sm:$0xff] %v15608_v23  ;;  %v15611_v15 = vsel %vm7748_vm3, %v4949_v48, -inf  ;;  %v15614_v37 = vsel %vm7748_vm3, %v6613_v7, -inf  ;;  %v12558_v12 = vpop.f32.mrb[134].mxu0  ;;  %v12974_v5 = vpop.f32.mrb[134].mxu1 }
 0x200   : > { %v15627_v43 = vsel %vm7748_vm3, %v12558_v12, -inf  ;;  %v15630_v7 = vsel %vm7748_vm3, %v12974_v5, -inf  ;;  %v4952_v20 = vpop.f32.mrb[135].mxu0  ;;  %v6616_v16 = vpop.f32.mrb[135].mxu1  ;;  %v13527_v12 = vld [vmem:[%s13759_s28 + $0x3d8] sm:$0xff]  }
 0x201   : > { %19734 = vst [vmem:[#allocation29_spill] sm:$0xff] %v15627_v43  ;;  %19735 = vst [vmem:[#allocation13_spill] sm:$0xff] %v15630_v7  ;;  %v15634_v19 = vsel %vm7748_vm3, %v4952_v20, -inf  ;;  %v15637_v54 = vsel %vm7748_vm3, %v6616_v16, -inf  ;;  %v15652_v20 = vsel %vm7748_vm3, %v15379_v27, -inf  ;;  %v15656_v16 = vsel %vm7748_vm3, %v15381_v34, -inf }
 0x202   : > { %12664 = vmatmul.mubr.msk.bf16.gmra.mrb[240].mxu0 %vm3131_vm2, %v13523_v29  ;;  %v15670_v27 = vsel %vm7748_vm3, %v15423_v36, -inf  ;;  %v15674_v34 = vsel %vm7748_vm3, %v15425_v1, -inf  ;;  %v13528_v43 = vld [vmem:[%s13759_s28 + $0xa58] sm:$0xff]  }
 0x203   : > { %13080 = vmatmul.mubr.msk.bf16.gmra.mrb[240].mxu1 %vm3131_vm2, %v13524_v62  ;;  %12667 = vmatprep.mubr.msk.bf16.mxu0 %vm3131_vm2, %v13525_v14  ;;  %v15666_v62 = vsel %vm7748_vm3, %v15396_v49, -inf  ;;  %19736 = vst [vmem:[#allocation31_spill] sm:$0xff] %v15670_v27  ;;  %19737 = vst [vmem:[#allocation14_spill] sm:$0xff] %v15674_v34  ;;  %v15682_v14 = vsel %vm7748_vm3, %v15440_v25, -inf  ;;  %v13529_v25 = vld [vmem:[%s13759_s28 + $0x3e0] sm:$0xff]  }
 0x204   : > { %13083 = vmatprep.mubr.msk.bf16.mxu1 %vm3131_vm2, %v13526_v26  ;;  %19739 = vst [vmem:[#allocation19_spill] sm:$0xff] %v15682_v14 }
 0x205   : > { %v12561_v26 = vpop.f32.mrb[136].mxu0  ;;  %v12977_v29 = vpop.f32.mrb[136].mxu1 }
 0x206   : > { %v15685_v49 = vsel %vm7748_vm3, %v12561_v26, -inf  ;;  %v15688_v36 = vsel %vm7748_vm3, %v12977_v29, -inf  ;;  %v4965_v48 = vpop.f32.mrb[137].mxu0  ;;  %v6629_v1 = vpop.f32.mrb[137].mxu1 }
 0x207   : > { %19740 = vst [vmem:[#allocation33_spill] sm:$0xff] %v15685_v49  ;;  %19741 = vst [vmem:[#allocation20_spill] sm:$0xff] %v15688_v36  ;;  %v15691_v5 = vsel %vm7748_vm3, %v4965_v48, -inf  ;;  %v15694_v7 = vsel %vm7748_vm3, %v6629_v1, -inf  ;;  %v12562_v46 = vpop.f32.mrb[138].mxu0  ;;  %v12978_v32 = vpop.f32.mrb[138].mxu1 }
 0x208   : > { %v15703_v29 = vsel %vm7748_vm3, %v12562_v46, -inf  ;;  %v15706_v23 = vsel %vm7748_vm3, %v12978_v32, -inf  ;;  %v4968_v48 = vpop.f32.mrb[139].mxu0  ;;  %v6632_v21 = vpop.f32.mrb[139].mxu1  ;;  %v13530_v1 = vld [vmem:[%s13759_s28 + $0xa60] sm:$0xff]   ;;  %v15742_v46 = vsel %vm7748_vm3, %v15432_v59, -inf }
 0x209   : > { %19742 = vst [vmem:[#allocation34_spill] sm:$0xff] %v15703_v29  ;;  %19743 = vst [vmem:[#allocation35_spill] sm:$0xff] %v15706_v23  ;;  %v15714_v26 = vsel %vm7748_vm3, %v4968_v48, -inf  ;;  %v15717_v39 = vsel %vm7748_vm3, %v6632_v21, -inf  ;;  %v15732_v21 = vsel %vm7748_vm3, %v15419_v61, -inf  ;;  %v15736_v48 = vsel %vm7748_vm3, %v15421_v57, -inf }
 0x20a   : > { %12668 = vmatmul.mubr.msk.bf16.gmra.mrb[244].mxu0 %vm3131_vm2, %v13527_v12  ;;  %v13531_v12 = vld [vmem:[%s13759_s28 + $0x3e8] sm:$0xff]   ;;  %v15750_v61 = vsel %vm7748_vm3, %v15451_v56, -inf  ;;  %v15754_v57 = vsel %vm7748_vm3, %v15453_v24, -inf  ;;  %v15758_v59 = vsel %vm7748_vm3, %v15462_v2, -inf  ;;  %v15762_v32 = vsel %vm7748_vm3, %v15464_v60, -inf  ;;  %v13533_v60 = vld [vmem:[%s13759_s28 + $0x3f0] sm:$0xff]  }
 0x20b   : > { %13084 = vmatmul.mubr.msk.bf16.gmra.mrb[244].mxu1 %vm3131_vm2, %v13528_v43  ;;  %12671 = vmatprep.mubr.msk.bf16.mxu0 %vm3131_vm2, %v13529_v25  ;;  %v15746_v43 = vsel %vm7748_vm3, %v15434_v40, -inf  ;;  %19744 = vst [vmem:[#allocation39_spill] sm:$0xff] %v15750_v61  ;;  %19745 = vst [vmem:[#allocation36_spill] sm:$0xff] %v15754_v57  ;;  %v13532_v29 = vld [vmem:[%s13759_s28 + $0xa68] sm:$0xff]  }
 0x20c   : > { %13087 = vmatprep.mubr.msk.bf16.mxu1 %vm3131_vm2, %v13530_v1  ;;  %19746 = vst [vmem:[#allocation40_spill] sm:$0xff] %v15758_v59  ;;  %19747 = vst [vmem:[#allocation37_spill] sm:$0xff] %v15762_v32 }
 0x20d   : > { %v12565_v25 = vpop.f32.mrb[140].mxu0  ;;  %v12981_v1 = vpop.f32.mrb[140].mxu1 }
 0x20e   : > { %v15765_v40 = vsel %vm7748_vm3, %v12565_v25, -inf  ;;  %v15768_v56 = vsel %vm7748_vm3, %v12981_v1, -inf  ;;  %v4981_v9 = vpop.f32.mrb[141].mxu0  ;;  %v6645_v24 = vpop.f32.mrb[141].mxu1 }
 0x20f   : > { %19748 = vst [vmem:[#allocation41_spill] sm:$0xff] %v15765_v40  ;;  %19749 = vst [vmem:[#allocation38_spill] sm:$0xff] %v15768_v56  ;;  %v15771_v30 = vsel %vm7748_vm3, %v4981_v9, -inf  ;;  %v15774_v23 = vsel %vm7748_vm3, %v6645_v24, -inf  ;;  %v12566_v2 = vpop.f32.mrb[142].mxu0  ;;  %v12982_v14 = vpop.f32.mrb[142].mxu1 }
 0x210   : > { %v15783_v1 = vsel %vm7748_vm3, %v12566_v2, -inf  ;;  %v15786_v36 = vsel %vm7748_vm3, %v12982_v14, -inf  ;;  %v4984_v9 = vpop.f32.mrb[143].mxu0  ;;  %v6648_v34 = vpop.f32.mrb[143].mxu1  ;;  %v13534_v24 = vld [vmem:[%s13759_s28 + $0xa70] sm:$0xff]   ;;  %v15822_v2 = vsel %vm7748_vm3, %v15456_v11, -inf }
 0x211   : > { %19750 = vst [vmem:[#allocation42_spill] sm:$0xff] %v15783_v1  ;;  %19751 = vst [vmem:[#allocation46_spill] sm:$0xff] %v15786_v36  ;;  %v15794_v25 = vsel %vm7748_vm3, %v4984_v9, -inf  ;;  %v15797_v35 = vsel %vm7748_vm3, %v6648_v34, -inf  ;;  %v15812_v34 = vsel %vm7748_vm3, %v15447_v38, -inf  ;;  %v15816_v9 = vsel %vm7748_vm3, %v15449_v55, -inf }
 0x212   : > { %12672 = vmatmul.mubr.msk.bf16.gmra.mrb[248].mxu0 %vm3131_vm2, %v13531_v12  ;;  %v13535_v12 = vld [vmem:[%s13759_s28 + $0x3f8] sm:$0xff]   ;;  %v15830_v38 = vsel %vm7748_vm3, %v15475_v44, -inf  ;;  %v15834_v55 = vsel %vm7748_vm3, %v15477_v41, -inf  ;;  %v15838_v11 = vsel %vm7748_vm3, %v15486_v8, -inf  ;;  %v15842_v14 = vsel %vm7748_vm3, %v15488_v17, -inf  ;;  %v13537_v17 = vld [vmem:[%s13759_s28 + $0x400] sm:$0xff]  }
 0x213   : > { %13088 = vmatmul.mubr.msk.bf16.gmra.mrb[248].mxu1 %vm3131_vm2, %v13532_v29  ;;  %12675 = vmatprep.mubr.msk.bf16.mxu0 %vm3131_vm2, %v13533_v60  ;;  %v15826_v29 = vsel %vm7748_vm3, %v15458_v47, -inf  ;;  %19752 = vst [vmem:[#allocation43_spill] sm:$0xff] %v15830_v38  ;;  %19753 = vst [vmem:[#allocation47_spill] sm:$0xff] %v15834_v55  ;;  %v13536_v1 = vld [vmem:[%s13759_s28 + $0xa78] sm:$0xff]  }
 0x214   : > { %13091 = vmatprep.mubr.msk.bf16.mxu1 %vm3131_vm2, %v13534_v24  ;;  %19754 = vst [vmem:[#allocation50_spill] sm:$0xff] %v15838_v11  ;;  %19755 = vst [vmem:[#allocation60_spill] sm:$0xff] %v15842_v14  ;;  %v19776_v38 = vld [vmem:[#allocation9_spill] sm:$0xff] }
 0x215   : > { %v12569_v60 = vpop.f32.mrb[144].mxu0  ;;  %v12985_v24 = vpop.f32.mrb[144].mxu1 }
 0x216   : > { %v15845_v47 = vsel %vm7748_vm3, %v12569_v60, -inf  ;;  %v15848_v44 = vsel %vm7748_vm3, %v12985_v24, -inf  ;;  %v4997_v27 = vpop.f32.mrb[145].mxu0  ;;  %v6661_v41 = vpop.f32.mrb[145].mxu1 }
 0x217   : > { %19756 = vst [vmem:[#allocation51_spill] sm:$0xff] %v15845_v47  ;;  %19757 = vst [vmem:[#allocation61_spill] sm:$0xff] %v15848_v44  ;;  %v15851_v49 = vsel %vm7748_vm3, %v4997_v27, -inf  ;;  %v15854_v36 = vsel %vm7748_vm3, %v6661_v41, -inf  ;;  %v12570_v8 = vpop.f32.mrb[146].mxu0  ;;  %v12986_v32 = vpop.f32.mrb[146].mxu1 }
 0x218   : > { %v15863_v24 = vsel %vm7748_vm3, %v12570_v8, -inf  ;;  %v15866_v56 = vsel %vm7748_vm3, %v12986_v32, -inf  ;;  %v5000_v27 = vpop.f32.mrb[147].mxu0  ;;  %v6664_v57 = vpop.f32.mrb[147].mxu1  ;;  %v13538_v41 = vld [vmem:[%s13759_s28 + $0xa80] sm:$0xff]   ;;  %v15902_v8 = vsel %vm7748_vm3, %v15480_v42, -inf }
 0x219   : > { %19758 = vst [vmem:[#allocation44_spill] sm:$0xff] %v15863_v24  ;;  %19759 = vst [vmem:[#allocation48_spill] sm:$0xff] %v15866_v56  ;;  %v15874_v60 = vsel %vm7748_vm3, %v5000_v27, -inf  ;;  %v15877_v59 = vsel %vm7748_vm3, %v6664_v57, -inf  ;;  %v15892_v57 = vsel %vm7748_vm3, %v15471_v3, -inf  ;;  %v15896_v27 = vsel %vm7748_vm3, %v15473_v22, -inf }
 0x21a   : > { %12676 = vmatmul.mubr.msk.bf16.gmra.mrb[252].mxu0 %vm3131_vm2, %v13535_v12  ;;  %v13539_v12 = vld [vmem:[%s13759_s28 + $0x408] sm:$0xff]   ;;  %v15910_v3 = vsel %vm7748_vm3, %v15499_v45, -inf  ;;  %v15914_v22 = vsel %vm7748_vm3, %v15501_v28, -inf  ;;  %v15918_v42 = vsel %vm7748_vm3, %v15510_v52, -inf  ;;  %v15922_v32 = vsel %vm7748_vm3, %v15512_v63, -inf  ;;  %v13541_v63 = vld [vmem:[%s13759_s28 + $0x410] sm:$0xff]  }
 0x21b   : > { %13092 = vmatmul.mubr.msk.bf16.gmra.mrb[252].mxu1 %vm3131_vm2, %v13536_v1  ;;  %12679 = vmatprep.mubr.msk.bf16.mxu0 %vm3131_vm2, %v13537_v17  ;;  %v15906_v1 = vsel %vm7748_vm3, %v15482_v13, -inf  ;;  %19761 = vst [vmem:[#allocation49_spill] sm:$0xff] %v15910_v3  ;;  %19762 = vst [vmem:[#allocation52_spill] sm:$0xff] %v15914_v22  ;;  %v13540_v24 = vld [vmem:[%s13759_s28 + $0xa88] sm:$0xff]   ;;  %v16002_v47 = vsel %vm7748_vm3, %v19776_v38, -inf  ;;  %v13545_v38 = vld [vmem:[%s13759_s28 + $0x420] sm:$0xff]  }
 0x21c   : > { %13095 = vmatprep.mubr.msk.bf16.mxu1 %vm3131_vm2, %v13538_v41  ;;  %19760 = vst [vmem:[#allocation45_spill] sm:$0xff] %v15906_v1  ;;  %19763 = vst [vmem:[#allocation56_spill] sm:$0xff] %v15918_v42 }
 0x21d   : > { %v12573_v17 = vpop.f32.mrb[148].mxu0  ;;  %v12989_v41 = vpop.f32.mrb[148].mxu1  ;;  %19764 = vst [vmem:[#allocation53_spill] sm:$0xff] %v15922_v32  ;;  %19777 = vst [vmem:[#allocation18_spill] sm:$0xff] %v16002_v47 }
 0x21e   : > { %v15925_v13 = vsel %vm7748_vm3, %v12573_v17, -inf  ;;  %v15928_v45 = vsel %vm7748_vm3, %v12989_v41, -inf  ;;  %v5013_v61 = vpop.f32.mrb[149].mxu0  ;;  %v6677_v28 = vpop.f32.mrb[149].mxu1 }
 0x21f   : > { %19765 = vst [vmem:[#allocation57_spill] sm:$0xff] %v15925_v13  ;;  %19766 = vst [vmem:[#allocation54_spill] sm:$0xff] %v15928_v45  ;;  %v15931_v40 = vsel %vm7748_vm3, %v5013_v61, -inf  ;;  %v15934_v56 = vsel %vm7748_vm3, %v6677_v28, -inf  ;;  %v12574_v52 = vpop.f32.mrb[150].mxu0  ;;  %v12990_v14 = vpop.f32.mrb[150].mxu1 }
 0x220   : > { %v15943_v41 = vsel %vm7748_vm3, %v12574_v52, -inf  ;;  %v15946_v44 = vsel %vm7748_vm3, %v12990_v14, -inf  ;;  %v5016_v61 = vpop.f32.mrb[151].mxu0  ;;  %v6680_v55 = vpop.f32.mrb[151].mxu1  ;;  %v13542_v28 = vld [vmem:[%s13759_s28 + $0xa90] sm:$0xff]   ;;  %v15982_v52 = vsel %vm7748_vm3, %v15504_v10, -inf }
 0x221   : > { %19767 = vst [vmem:[#allocation58_spill] sm:$0xff] %v15943_v41  ;;  %19768 = vst [vmem:[#allocation55_spill] sm:$0xff] %v15946_v44  ;;  %v15954_v17 = vsel %vm7748_vm3, %v5016_v61, -inf  ;;  %v15957_v11 = vsel %vm7748_vm3, %v6680_v55, -inf  ;;  %v15972_v55 = vsel %vm7748_vm3, %v15495_v33, -inf  ;;  %v15976_v61 = vsel %vm7748_vm3, %v15497_v0, -inf }
 0x222   : > { %19769 = vst [vmem:[#allocation59_spill] sm:$0xff] %v15957_v11  ;;  %12680 = vmatmul.mubr.msk.bf16.gmra.mrb[0].mxu0 %vm3131_vm2, %v13539_v12  ;;  %v13543_v12 = vld [vmem:[%s13759_s28 + $0x418] sm:$0xff]   ;;  %19770 = vst [vmem:[#allocation15_spill] sm:$0xff] %v15982_v52  ;;  %v15990_v33 = vsel %vm7748_vm3, %v15534_v4, -inf  ;;  %v15994_v0 = vsel %vm7748_vm3, %v15536_v51, -inf  ;;  %v19774_v14 = vld [vmem:[#allocation24_spill] sm:$0xff] }
 0x223   : > { %13096 = vmatmul.mubr.msk.bf16.gmra.mrb[0].mxu1 %vm3131_vm2, %v13540_v24  ;;  %12683 = vmatprep.mubr.msk.bf16.mxu0 %vm3131_vm2, %v13541_v63  ;;  %v15986_v24 = vsel %vm7748_vm3, %v15506_v58, -inf  ;;  %19772 = vst [vmem:[#allocation16_spill] sm:$0xff] %v15990_v33  ;;  %19773 = vst [vmem:[#allocation25_spill] sm:$0xff] %v15994_v0  ;;  %v15998_v10 = vsel %vm7748_vm3, %v19774_v14, -inf  ;;  %v13544_v45 = vld [vmem:[%s13759_s28 + $0xa98] sm:$0xff]   ;;  %v13550_v33 = vld [vmem:[%s13759_s28 + $0xab0] sm:$0xff]  }
 0x224   : > { %13099 = vmatprep.mubr.msk.bf16.mxu1 %vm3131_vm2, %v13542_v28  ;;  %19771 = vst [vmem:[#allocation2_spill] sm:$0xff] %v15986_v24  ;;  %19775 = vst [vmem:[#allocation3_spill] sm:$0xff] %v15998_v10  ;;  %v13548_v10 = vld [vmem:[%s13759_s28 + $0xaa8] sm:$0xff]   ;;  %v19787_v24 = vld [vmem:[#allocation6_spill] sm:$0xff] }
 0x225   : > { %v12577_v63 = vpop.f32.mrb[152].mxu0  ;;  %v12993_v28 = vpop.f32.mrb[152].mxu1 }
 0x226   : > { %v16005_v58 = vsel %vm7748_vm3, %v12577_v63, -inf  ;;  %v16008_v4 = vsel %vm7748_vm3, %v12993_v28, -inf  ;;  %v5029_v44 = vpop.f32.mrb[153].mxu0  ;;  %v6693_v51 = vpop.f32.mrb[153].mxu1 }
 0x227   : > { %19778 = vst [vmem:[#allocation17_spill] sm:$0xff] %v16005_v58  ;;  %19779 = vst [vmem:[#allocation4_spill] sm:$0xff] %v16008_v4  ;;  %v16011_v32 = vsel %vm7748_vm3, %v5029_v44, -inf  ;;  %v16014_v41 = vsel %vm7748_vm3, %v6693_v51, -inf  ;;  %v12578_v14 = vpop.f32.mrb[154].mxu0  ;;  %v12994_v42 = vpop.f32.mrb[154].mxu1 }
 0x228   : > { %v16023_v28 = vsel %vm7748_vm3, %v12578_v14, -inf  ;;  %v16026_v13 = vsel %vm7748_vm3, %v12994_v42, -inf  ;;  %v5032_v44 = vpop.f32.mrb[155].mxu0  ;;  %v6696_v3 = vpop.f32.mrb[155].mxu1  ;;  %v13546_v51 = vld [vmem:[%s13759_s28 + $0xaa0] sm:$0xff]  }
 0x229   : > { %19780 = vst [vmem:[#allocation24_spill] sm:$0xff] %v16023_v28  ;;  %19781 = vst [vmem:[#allocation9_spill] sm:$0xff] %v16026_v13  ;;  %v16034_v63 = vsel %vm7748_vm3, %v5032_v44, -inf  ;;  %v16037_v22 = vsel %vm7748_vm3, %v6696_v3, -inf  ;;  %v13547_v13 = vld [vmem:[%s13759_s28 + $0x428] sm:$0xff]  }
 0x22a   : > { %19782 = vst [vmem:[#allocation62_spill] sm:$0xff] %v16034_v63  ;;  %19783 = vst [vmem:[#allocation63_spill] sm:$0xff] %v16037_v22  ;;  %12684 = vmatmul.mubr.msk.bf16.gmra.mrb[4].mxu0 %vm3131_vm2, %v13543_v12  ;;  %v19786_v22 = vld [vmem:[#allocation5_spill] sm:$0xff] }
 0x22b   : > { %13100 = vmatmul.mubr.msk.bf16.gmra.mrb[4].mxu1 %vm3131_vm2, %v13544_v45  ;;  %12687 = vmatprep.mubr.msk.bf16.mxu0 %vm3131_vm2, %v13545_v38  ;;  %v13549_v38 = vld [vmem:[%s13759_s28 + $0x430] sm:$0xff]   ;;  %v19788_v63 = vmax.f32 %v19786_v22, %v19787_v24  ;;  %v19793_v22 = vmax.f32 %v15586_v53, %v15637_v54  ;;  %v19794_v24 = vld [vmem:[#allocation30_spill] sm:$0xff] }
 0x22c   : > { %13103 = vmatprep.mubr.msk.bf16.mxu1 %vm3131_vm2, %v13546_v51  ;;  %v19784_v51 = vmax.f32 %v15572_v31, %v15611_v15  ;;  %v19789_v15 = vld [vmem:[#allocation21_spill] sm:$0xff]  ;;  %v19790_v31 = vld [vmem:[#allocation22_spill] sm:$0xff] }
 0x22d   : > { %v12581_v3 = vpop.f32.mrb[156].mxu0  ;;  %v12997_v42 = vpop.f32.mrb[156].mxu1 }
 0x22e   : > { %v7948_v14 = vsel %vm7748_vm3, %v12581_v3, -inf  ;;  %v8676_v12 = vsel %vm7748_vm3, %v12997_v42, -inf  ;;  %v5045_v1 = vpop.f32.mrb[157].mxu0  ;;  %v6709_v11 = vpop.f32.mrb[157].mxu1  ;;  %v19785_v42 = vmax.f32 %v15576_v50, %v15614_v37 }
 0x22f   : > { %v7934_v47 = vsel %vm7748_vm3, %v5045_v1, -inf  ;;  %v8662_v44 = vsel %vm7748_vm3, %v6709_v11, -inf  ;;  %v12582_v28 = vpop.f32.mrb[158].mxu0  ;;  %v12998_v45 = vpop.f32.mrb[158].mxu1  ;;  %v16061_v4 = vmax.f32 %v19784_v51, %v7948_v14  ;;  %v19791_v14 = vmax.f32 %v19789_v15, %v19790_v31 }
 0x230   : > { %v16066_v3 = vmax.f32 %v19785_v42, %v8676_v12  ;;  %v7955_v0 = vsel %vm7748_vm3, %v12582_v28, -inf  ;;  %v8683_v1 = vsel %vm7748_vm3, %v12998_v45, -inf  ;;  %v5048_v58 = vpop.f32.mrb[159].mxu0  ;;  %v6712_v11 = vpop.f32.mrb[159].mxu1  ;;  %v16074_v52 = vmax.f32 %v19788_v63, %v7934_v47  ;;  %v19795_v63 = vld [vmem:[#allocation23_spill] sm:$0xff]  ;;  %v19798_v42 = vld [vmem:[#allocation8_spill] sm:$0xff] }
 0x231   : > { %v16079_v51 = vmax.f32 %v19791_v14, %v8662_v44  ;;  %v7941_v37 = vsel %vm7748_vm3, %v5048_v58, -inf  ;;  %v8669_v50 = vsel %vm7748_vm3, %v6712_v11, -inf  ;;  %v19792_v28 = vmax.f32 %v15582_v6, %v15634_v19  ;;  %v19797_v58 = vld [vmem:[#allocation7_spill] sm:$0xff] }
 0x232   : > { %v16091_v47 = vmax.f32 %v19793_v22, %v8683_v1  ;;  %12688 = vmatmul.mubr.msk.bf16.gmra.mrb[8].mxu0 %vm3131_vm2, %v13547_v13  ;;  %v19796_v44 = vmax.f32 %v19794_v24, %v19795_v63  ;;  %v19799_v11 = vmax.f32 %v19797_v58, %v19798_v42  ;;  %v13551_v1 = vld [vmem:[%s13759_s28 + $0x438] sm:$0xff]   ;;  %v19800_v31 = vmax.f32 %v15652_v20, %v15691_v5  ;;  %v13553_v24 = vld [vmem:[%s13759_s28 + $0x440] sm:$0xff]   ;;  %v19806_v20 = vld [vmem:[#allocation12_spill] sm:$0xff] }
 0x233   : > { %v16086_v12 = vmax.f32 %v19792_v28, %v7955_v0  ;;  %13104 = vmatmul.mubr.msk.bf16.gmra.mrb[8].mxu1 %vm3131_vm2, %v13548_v10  ;;  %12691 = vmatprep.mubr.msk.bf16.mxu0 %vm3131_vm2, %v13549_v38  ;;  %v19801_v38 = vmax.f32 %v15656_v16, %v15694_v7  ;;  %v13552_v22 = vld [vmem:[%s13759_s28 + $0xab8] sm:$0xff]   ;;  %v19802_v63 = vld [vmem:[#allocation26_spill] sm:$0xff] }
 0x234   : > { %v16097_v45 = vmax.f32 %v19796_v44, %v7941_v37  ;;  %v16102_v15 = vmax.f32 %v19799_v11, %v8669_v50  ;;  %13107 = vmatprep.mubr.msk.bf16.mxu1 %vm3131_vm2, %v13550_v33  ;;  %v19803_v44 = vld [vmem:[#allocation28_spill] sm:$0xff]  ;;  %v19805_v5 = vld [vmem:[#allocation10_spill] sm:$0xff] }
 0x235   : > { %v12585_v6 = vpop.f32.mrb[160].mxu0  ;;  %v13001_v53 = vpop.f32.mrb[160].mxu1  ;;  %v19804_v58 = vmax.f32 %v19802_v63, %v19803_v44  ;;  %v19807_v11 = vmax.f32 %v19805_v5, %v19806_v20  ;;  %v19814_v5 = vld [vmem:[#allocation13_spill] sm:$0xff] }
 0x236   : > { %v7976_v19 = vsel %vm7748_vm3, %v12585_v6, -inf  ;;  %v8704_v54 = vsel %vm7748_vm3, %v13001_v53, -inf  ;;  %v5061_v13 = vpop.f32.mrb[161].mxu0  ;;  %v6725_v0 = vpop.f32.mrb[161].mxu1 }
 0x237   : > { %v16113_v10 = vmax.f32 %v19800_v31, %v7976_v19  ;;  %v16118_v14 = vmax.f32 %v19801_v38, %v8704_v54  ;;  %v7962_v33 = vsel %vm7748_vm3, %v5061_v13, -inf  ;;  %v8690_v37 = vsel %vm7748_vm3, %v6725_v0, -inf  ;;  %v12586_v50 = vpop.f32.mrb[162].mxu0  ;;  %v13002_v28 = vpop.f32.mrb[162].mxu1  ;;  %v13554_v54 = vld [vmem:[%s13759_s28 + $0xac0] sm:$0xff]  }
 0x238   : > { %v16127_v42 = vmax.f32 %v19804_v58, %v7962_v33  ;;  %v16132_v6 = vmax.f32 %v19807_v11, %v8690_v37  ;;  %v7983_v7 = vsel %vm7748_vm3, %v12586_v50, -inf  ;;  %v8711_v16 = vsel %vm7748_vm3, %v13002_v28, -inf  ;;  %v5064_v53 = vpop.f32.mrb[163].mxu0  ;;  %v6728_v19 = vpop.f32.mrb[163].mxu1  ;;  %v19810_v50 = vld [vmem:[#allocation27_spill] sm:$0xff]  ;;  %v19811_v28 = vld [vmem:[#allocation29_spill] sm:$0xff] }
 0x239   : > { %v19808_v13 = vmax.f32 %v15662_v18, %v15714_v26  ;;  %v19809_v31 = vmax.f32 %v15666_v62, %v15717_v39  ;;  %v7969_v33 = vsel %vm7748_vm3, %v5064_v53, -inf  ;;  %v8697_v37 = vsel %vm7748_vm3, %v6728_v19, -inf  ;;  %v19813_v58 = vld [vmem:[#allocation11_spill] sm:$0xff] }
 0x23a   : > { %v19812_v63 = vmax.f32 %v19810_v50, %v19811_v28  ;;  %v19815_v18 = vmax.f32 %v19813_v58, %v19814_v5  ;;  %12692 = vmatmul.mubr.msk.bf16.gmra.mrb[12].mxu0 %vm3131_vm2, %v13551_v1  ;;  %v13555_v53 = vld [vmem:[%s13759_s28 + $0x448] sm:$0xff]   ;;  %v19816_v1 = vmax.f32 %v15732_v21, %v15771_v30  ;;  %v13557_v50 = vld [vmem:[%s13759_s28 + $0x450] sm:$0xff]   ;;  %v19821_v30 = vld [vmem:[#allocation14_spill] sm:$0xff] }
 0x23b   : > { %v16140_v0 = vmax.f32 %v19808_v13, %v7983_v7  ;;  %v16145_v38 = vmax.f32 %v19809_v31, %v8711_v16  ;;  %13108 = vmatmul.mubr.msk.bf16.gmra.mrb[12].mxu1 %vm3131_vm2, %v13552_v22  ;;  %12695 = vmatprep.mubr.msk.bf16.mxu0 %vm3131_vm2, %v13553_v24  ;;  %v19817_v24 = vmax.f32 %v15736_v48, %v15774_v23  ;;  %v19818_v28 = vld [vmem:[#allocation31_spill] sm:$0xff]  ;;  %v19822_v21 = vld [vmem:[#allocation20_spill] sm:$0xff] }
 0x23c   : > { %v16152_v44 = vmax.f32 %v19812_v63, %v7969_v33  ;;  %v16157_v26 = vmax.f32 %v19815_v18, %v8697_v37  ;;  %13111 = vmatprep.mubr.msk.bf16.mxu1 %vm3131_vm2, %v13554_v54  ;;  %v13556_v37 = vld [vmem:[%s13759_s28 + $0xac8] sm:$0xff]   ;;  %v19819_v63 = vld [vmem:[#allocation33_spill] sm:$0xff]  ;;  %v19823_v18 = vmax.f32 %v19821_v30, %v19822_v21 }
 0x23d   : > { %v12589_v39 = vpop.f32.mrb[164].mxu0  ;;  %v13005_v62 = vpop.f32.mrb[164].mxu1  ;;  %v19820_v58 = vmax.f32 %v19818_v28, %v19819_v63  ;;  %v19830_v30 = vld [vmem:[#allocation35_spill] sm:$0xff] }
 0x23e   : > { %v8004_v20 = vsel %vm7748_vm3, %v12589_v39, -inf  ;;  %v8732_v11 = vsel %vm7748_vm3, %v13005_v62, -inf  ;;  %v5077_v7 = vpop.f32.mrb[165].mxu0  ;;  %v6741_v16 = vpop.f32.mrb[165].mxu1 }
 0x23f   : > { %v16169_v22 = vmax.f32 %v19816_v1, %v8004_v20  ;;  %v16174_v19 = vmax.f32 %v19817_v24, %v8732_v11  ;;  %v7990_v54 = vsel %vm7748_vm3, %v5077_v7, -inf  ;;  %v8718_v13 = vsel %vm7748_vm3, %v6741_v16, -inf  ;;  %v12590_v31 = vpop.f32.mrb[166].mxu0  ;;  %v13006_v33 = vpop.f32.mrb[166].mxu1  ;;  %v13558_v11 = vld [vmem:[%s13759_s28 + $0xad0] sm:$0xff]  }
 0x240   : > { %v16183_v5 = vmax.f32 %v19820_v58, %v7990_v54  ;;  %v16188_v39 = vmax.f32 %v19823_v18, %v8718_v13  ;;  %v8011_v23 = vsel %vm7748_vm3, %v12590_v31, -inf  ;;  %v8739_v48 = vsel %vm7748_vm3, %v13006_v33, -inf  ;;  %v5080_v62 = vpop.f32.mrb[167].mxu0  ;;  %v6744_v20 = vpop.f32.mrb[167].mxu1  ;;  %v19826_v31 = vld [vmem:[#allocation32_spill] sm:$0xff]  ;;  %v19827_v33 = vld [vmem:[#allocation34_spill] sm:$0xff] }
 0x241   : > { %v19824_v7 = vmax.f32 %v15742_v46, %v15794_v25  ;;  %v19825_v1 = vmax.f32 %v15746_v43, %v15797_v35  ;;  %v7997_v54 = vsel %vm7748_vm3, %v5080_v62, -inf  ;;  %v8725_v13 = vsel %vm7748_vm3, %v6744_v20, -inf  ;;  %v19829_v58 = vld [vmem:[#allocation19_spill] sm:$0xff]  ;;  %v13559_v62 = vld [vmem:[%s13759_s28 + $0x458] sm:$0xff]  }
 0x242   : > { %v19828_v28 = vmax.f32 %v19826_v31, %v19827_v33  ;;  %v19831_v46 = vmax.f32 %v19829_v58, %v19830_v30  ;;  %12696 = vmatmul.mubr.msk.bf16.gmra.mrb[16].mxu0 %vm3131_vm2, %v13555_v53  ;;  %v19832_v53 = vmax.f32 %v15812_v34, %v15851_v49  ;;  %v13561_v31 = vld [vmem:[%s13759_s28 + $0x460] sm:$0xff]   ;;  %v19834_v33 = vld [vmem:[#allocation39_spill] sm:$0xff]  ;;  %v19837_v49 = vld [vmem:[#allocation36_spill] sm:$0xff] }
 0x243   : > { %v16196_v16 = vmax.f32 %v19824_v7, %v8011_v23  ;;  %v16201_v24 = vmax.f32 %v19825_v1, %v8739_v48  ;;  %13112 = vmatmul.mubr.msk.bf16.gmra.mrb[16].mxu1 %vm3131_vm2, %v13556_v37  ;;  %12699 = vmatprep.mubr.msk.bf16.mxu0 %vm3131_vm2, %v13557_v50  ;;  %v19833_v50 = vmax.f32 %v15816_v9, %v15854_v36  ;;  %v19838_v34 = vld [vmem:[#allocation38_spill] sm:$0xff] }
 0x244   : > { %v16208_v63 = vmax.f32 %v19828_v28, %v7997_v54  ;;  %v16213_v25 = vmax.f32 %v19831_v46, %v8725_v13  ;;  %13115 = vmatprep.mubr.msk.bf16.mxu1 %vm3131_vm2, %v13558_v11  ;;  %v13560_v13 = vld [vmem:[%s13759_s28 + $0xad8] sm:$0xff]   ;;  %v19839_v46 = vmax.f32 %v19837_v49, %v19838_v34  ;;  %v19846_v49 = vld [vmem:[#allocation46_spill] sm:$0xff] }
 0x245   : > { %v12593_v35 = vpop.f32.mrb[168].mxu0  ;;  %v13009_v43 = vpop.f32.mrb[168].mxu1  ;;  %v19835_v28 = vld [vmem:[#allocation41_spill] sm:$0xff] }
 0x246   : > { %v8032_v21 = vsel %vm7748_vm3, %v12593_v35, -inf  ;;  %v8760_v18 = vsel %vm7748_vm3, %v13009_v43, -inf  ;;  %v5093_v23 = vpop.f32.mrb[169].mxu0  ;;  %v6757_v48 = vpop.f32.mrb[169].mxu1  ;;  %v19836_v58 = vmax.f32 %v19834_v33, %v19835_v28 }
 0x247   : > { %v16225_v37 = vmax.f32 %v19832_v53, %v8032_v21  ;;  %v16230_v20 = vmax.f32 %v19833_v50, %v8760_v18  ;;  %v8018_v11 = vsel %vm7748_vm3, %v5093_v23, -inf  ;;  %v8746_v7 = vsel %vm7748_vm3, %v6757_v48, -inf  ;;  %v12594_v1 = vpop.f32.mrb[170].mxu0  ;;  %v13010_v54 = vpop.f32.mrb[170].mxu1  ;;  %v13562_v18 = vld [vmem:[%s13759_s28 + $0xae0] sm:$0xff]  }
 0x248   : > { %v16239_v30 = vmax.f32 %v19836_v58, %v8018_v11  ;;  %v16244_v35 = vmax.f32 %v19839_v46, %v8746_v7  ;;  %v8039_v36 = vsel %vm7748_vm3, %v12594_v1, -inf  ;;  %v8767_v9 = vsel %vm7748_vm3, %v13010_v54, -inf  ;;  %v5096_v43 = vpop.f32.mrb[171].mxu0  ;;  %v6760_v21 = vpop.f32.mrb[171].mxu1  ;;  %v19842_v1 = vld [vmem:[#allocation40_spill] sm:$0xff]  ;;  %v19843_v54 = vld [vmem:[#allocation42_spill] sm:$0xff] }
 0x249   : > { %v19840_v23 = vmax.f32 %v15822_v2, %v15874_v60  ;;  %v19841_v53 = vmax.f32 %v15826_v29, %v15877_v59  ;;  %v8025_v11 = vsel %vm7748_vm3, %v5096_v43, -inf  ;;  %v8753_v7 = vsel %vm7748_vm3, %v6760_v21, -inf  ;;  %v19845_v58 = vld [vmem:[#allocation37_spill] sm:$0xff]  ;;  %v13563_v43 = vld [vmem:[%s13759_s28 + $0x468] sm:$0xff]  }
 0x24a   : > { %v19844_v33 = vmax.f32 %v19842_v1, %v19843_v54  ;;  %v19847_v2 = vmax.f32 %v19845_v58, %v19846_v49  ;;  %12700 = vmatmul.mubr.msk.bf16.gmra.mrb[20].mxu0 %vm3131_vm2, %v13559_v62  ;;  %v19848_v62 = vmax.f32 %v15892_v57, %v15931_v40  ;;  %v13565_v1 = vld [vmem:[%s13759_s28 + $0x470] sm:$0xff]   ;;  %v19850_v54 = vld [vmem:[#allocation43_spill] sm:$0xff]  ;;  %v19854_v57 = vld [vmem:[#allocation61_spill] sm:$0xff] }
 0x24b   : > { %v16252_v48 = vmax.f32 %v19840_v23, %v8039_v36  ;;  %v16257_v50 = vmax.f32 %v19841_v53, %v8767_v9  ;;  %13116 = vmatmul.mubr.msk.bf16.gmra.mrb[20].mxu1 %vm3131_vm2, %v13560_v13  ;;  %12703 = vmatprep.mubr.msk.bf16.mxu0 %vm3131_vm2, %v13561_v31  ;;  %v19849_v31 = vmax.f32 %v15896_v27, %v15934_v56  ;;  %v19853_v40 = vld [vmem:[#allocation47_spill] sm:$0xff] }
 0x24c   : > { %v16264_v28 = vmax.f32 %v19844_v33, %v8025_v11  ;;  %v16269_v60 = vmax.f32 %v19847_v2, %v8753_v7  ;;  %13119 = vmatprep.mubr.msk.bf16.mxu1 %vm3131_vm2, %v13562_v18  ;;  %v13564_v7 = vld [vmem:[%s13759_s28 + $0xae8] sm:$0xff]   ;;  %v19855_v2 = vmax.f32 %v19853_v40, %v19854_v57  ;;  %v19865_v57 = vld [vmem:[#allocation60_spill] sm:$0xff] }
 0x24d   : > { %v12597_v59 = vpop.f32.mrb[172].mxu0  ;;  %v13013_v29 = vpop.f32.mrb[172].mxu1  ;;  %v19851_v33 = vld [vmem:[#allocation51_spill] sm:$0xff] }
 0x24e   : > { %v8060_v34 = vsel %vm7748_vm3, %v12597_v59, -inf  ;;  %v8788_v46 = vsel %vm7748_vm3, %v13013_v29, -inf  ;;  %v5109_v36 = vpop.f32.mrb[173].mxu0  ;;  %v6773_v9 = vpop.f32.mrb[173].mxu1  ;;  %v19852_v58 = vmax.f32 %v19850_v54, %v19851_v33  ;;  %v19862_v33 = vld [vmem:[#allocation50_spill] sm:$0xff] }
 0x24f   : > { %v16281_v13 = vmax.f32 %v19848_v62, %v8060_v34  ;;  %v16286_v21 = vmax.f32 %v19849_v31, %v8788_v46  ;;  %v8046_v18 = vsel %vm7748_vm3, %v5109_v36, -inf  ;;  %v8774_v23 = vsel %vm7748_vm3, %v6773_v9, -inf  ;;  %v12598_v53 = vpop.f32.mrb[174].mxu0  ;;  %v13014_v11 = vpop.f32.mrb[174].mxu1  ;;  %v13566_v46 = vld [vmem:[%s13759_s28 + $0xaf0] sm:$0xff]   ;;  %v19858_v62 = vld [vmem:[#allocation45_spill] sm:$0xff] }
 0x250   : > { %v16295_v49 = vmax.f32 %v19852_v58, %v8046_v18  ;;  %v16300_v59 = vmax.f32 %v19855_v2, %v8774_v23  ;;  %v8067_v56 = vsel %vm7748_vm3, %v12598_v53, -inf  ;;  %v8795_v27 = vsel %vm7748_vm3, %v13014_v11, -inf  ;;  %v5112_v29 = vpop.f32.mrb[175].mxu0  ;;  %v6776_v34 = vpop.f32.mrb[175].mxu1  ;;  %v19859_v31 = vld [vmem:[#allocation59_spill] sm:$0xff]  ;;  %v19863_v11 = vld [vmem:[#allocation44_spill] sm:$0xff] }
 0x251   : > { %v19856_v36 = vmax.f32 %v15902_v8, %v15954_v17  ;;  %v19860_v18 = vmax.f32 %v19858_v62, %v19859_v31  ;;  %v8053_v23 = vsel %vm7748_vm3, %v5112_v29, -inf  ;;  %v8781_v53 = vsel %vm7748_vm3, %v6776_v34, -inf  ;;  %v19866_v2 = vld [vmem:[#allocation48_spill] sm:$0xff]  ;;  %v13567_v31 = vld [vmem:[%s13759_s28 + $0x478] sm:$0xff]  }
 0x252   : > { %v19864_v58 = vmax.f32 %v19862_v33, %v19863_v11  ;;  %v19867_v8 = vmax.f32 %v19865_v57, %v19866_v2  ;;  %12704 = vmatmul.mubr.msk.bf16.gmra.mrb[24].mxu0 %vm3131_vm2, %v13563_v43  ;;  %v19868_v43 = vmax.f32 %v15972_v55, %v16011_v32  ;;  %v13568_v11 = vld [vmem:[%s13759_s28 + $0xaf8] sm:$0xff]   ;;  %v19875_v32 = vld [vmem:[#allocation52_spill] sm:$0xff]  ;;  %v19876_v55 = vld [vmem:[#allocation54_spill] sm:$0xff] }
 0x253   : > { %v16308_v9 = vmax.f32 %v19856_v36, %v8067_v56  ;;  %v16313_v54 = vmax.f32 %v19860_v18, %v8795_v27  ;;  %13120 = vmatmul.mubr.msk.bf16.gmra.mrb[24].mxu1 %vm3131_vm2, %v13564_v7  ;;  %12707 = vmatprep.mubr.msk.bf16.mxu0 %vm3131_vm2, %v13565_v1  ;;  %v19870_v1 = vmax.f32 %v15976_v61, %v16014_v41  ;;  %v19872_v57 = vld [vmem:[#allocation49_spill] sm:$0xff] }
 0x254   : > { %v16320_v40 = vmax.f32 %v19864_v58, %v8053_v23  ;;  %v16325_v17 = vmax.f32 %v19867_v8, %v8781_v53  ;;  %13123 = vmatprep.mubr.msk.bf16.mxu1 %vm3131_vm2, %v13566_v46  ;;  %v13569_v58 = vld [vmem:[%s13759_s28 + $0x480] sm:$0xff]   ;;  %v19873_v2 = vld [vmem:[#allocation57_spill] sm:$0xff] }
 0x255   : > { %19857 = vst [vmem:[#allocation5_spill] sm:$0xff] %v16308_v9  ;;  %19861 = vst [vmem:[#allocation6_spill] sm:$0xff] %v16313_v54  ;;  %v12601_v56 = vpop.f32.mrb[176].mxu0  ;;  %v13017_v27 = vpop.f32.mrb[176].mxu1  ;;  %v19874_v8 = vmax.f32 %v19872_v57, %v19873_v2  ;;  %v19882_v57 = vld [vmem:[#allocation2_spill] sm:$0xff]  ;;  %v19889_v54 = vld [vmem:[#allocation53_spill] sm:$0xff] }
 0x256   : > { %v8088_v29 = vsel %vm7748_vm3, %v12601_v56, -inf  ;;  %v8816_v34 = vsel %vm7748_vm3, %v13017_v27, -inf  ;;  %v5125_v36 = vpop.f32.mrb[177].mxu0  ;;  %v6789_v62 = vpop.f32.mrb[177].mxu1  ;;  %v19877_v27 = vmax.f32 %v19875_v32, %v19876_v55  ;;  %v19886_v32 = vld [vmem:[#allocation56_spill] sm:$0xff]  ;;  %v19890_v9 = vld [vmem:[#allocation55_spill] sm:$0xff] }
 0x257   : > { %v16337_v7 = vmax.f32 %v19868_v43, %v8088_v29  ;;  %v16342_v18 = vmax.f32 %v19870_v1, %v8816_v34  ;;  %v8074_v46 = vsel %vm7748_vm3, %v5125_v36, -inf  ;;  %v8802_v23 = vsel %vm7748_vm3, %v6789_v62, -inf  ;;  %v12602_v53 = vpop.f32.mrb[178].mxu0  ;;  %v13018_v33 = vpop.f32.mrb[178].mxu1  ;;  %v13570_v62 = vld [vmem:[%s13759_s28 + $0xb00] sm:$0xff]   ;;  %v19878_v43 = vld [vmem:[#allocation15_spill] sm:$0xff] }
 0x258   : > { %v16351_v56 = vmax.f32 %v19874_v8, %v8074_v46  ;;  %v16356_v29 = vmax.f32 %v19877_v27, %v8802_v23  ;;  %v8095_v41 = vsel %vm7748_vm3, %v12602_v53, -inf  ;;  %v8823_v61 = vsel %vm7748_vm3, %v13018_v33, -inf  ;;  %v5128_v34 = vpop.f32.mrb[179].mxu0  ;;  %v6792_v36 = vpop.f32.mrb[179].mxu1  ;;  %v19879_v1 = vld [vmem:[#allocation62_spill] sm:$0xff]  ;;  %v19883_v46 = vld [vmem:[#allocation63_spill] sm:$0xff] }
 0x259   : > { %19869 = vst [vmem:[#allocation21_spill] sm:$0xff] %v16337_v7  ;;  %19871 = vst [vmem:[#allocation22_spill] sm:$0xff] %v16342_v18  ;;  %v19880_v18 = vmax.f32 %v19878_v43, %v19879_v1  ;;  %v19884_v2 = vmax.f32 %v19882_v57, %v19883_v46  ;;  %v8081_v23 = vsel %vm7748_vm3, %v5128_v34, -inf  ;;  %v8809_v53 = vsel %vm7748_vm3, %v6792_v36, -inf  ;;  %v19887_v33 = vld [vmem:[#allocation58_spill] sm:$0xff] }
 0x25a   : > { %v19888_v55 = vmax.f32 %v19886_v32, %v19887_v33  ;;  %v19891_v43 = vmax.f32 %v19889_v54, %v19890_v9  ;;  %12708 = vmatmul.mubr.msk.bf16.gmra.mrb[28].mxu0 %vm3131_vm2, %v13567_v31  ;;  %v13571_v54 = vld [vmem:[%s13759_s28 + $0x488] sm:$0xff]   ;;  %v19893_v32 = vld [vmem:[#allocation17_spill] sm:$0xff] }
 0x25b   : > { %v16364_v7 = vmax.f32 %v19880_v18, %v8095_v41  ;;  %v16369_v8 = vmax.f32 %v19884_v2, %v8823_v61  ;;  %13124 = vmatmul.mubr.msk.bf16.gmra.mrb[28].mxu1 %vm3131_vm2, %v13568_v11  ;;  %12711 = vmatprep.mubr.msk.bf16.mxu0 %vm3131_vm2, %v13569_v58  ;;  %v13572_v2 = vld [vmem:[%s13759_s28 + $0xb08] sm:$0xff]  }
 0x25c   : > { %v16376_v27 = vmax.f32 %v19888_v55, %v8081_v23  ;;  %v16381_v18 = vmax.f32 %v19891_v43, %v8809_v53  ;;  %13127 = vmatprep.mubr.msk.bf16.mxu1 %vm3131_vm2, %v13570_v62  ;;  %v13573_v23 = vld [vmem:[%s13759_s28 + $0x490] sm:$0xff]   ;;  %v19895_v43 = vld [vmem:[#allocation25_spill] sm:$0xff] }
 0x25d   : > { %19881 = vst [vmem:[#allocation30_spill] sm:$0xff] %v16364_v7  ;;  %19885 = vst [vmem:[#allocation23_spill] sm:$0xff] %v16369_v8  ;;  %v12605_v41 = vpop.f32.mrb[180].mxu0  ;;  %v13021_v61 = vpop.f32.mrb[180].mxu1  ;;  %v19892_v53 = vld [vmem:[#allocation16_spill] sm:$0xff] }
 0x25e   : > { %v7936_v34 = vsel %vm7748_vm3, %v12605_v41, -inf  ;;  %v8664_v36 = vsel %vm7748_vm3, %v13021_v61, -inf  ;;  %v5141_v1 = vpop.f32.mrb[181].mxu0  ;;  %v6805_v9 = vpop.f32.mrb[181].mxu1  ;;  %v19894_v33 = vmax.f32 %v19892_v53, %v19893_v32  ;;  %v19896_v41 = vld [vmem:[#allocation4_spill] sm:$0xff] }
 0x25f   : > { %v7937_v31 = vmax.f32 %v16074_v52, %v7936_v34  ;;  %v8665_v11 = vmax.f32 %v16079_v51, %v8664_v36  ;;  %v8102_v57 = vsel %vm7748_vm3, %v5141_v1, -inf  ;;  %v8830_v58 = vsel %vm7748_vm3, %v6805_v9, -inf  ;;  %v12606_v46 = vpop.f32.mrb[182].mxu0  ;;  %v13022_v62 = vpop.f32.mrb[182].mxu1  ;;  %v13574_v1 = vld [vmem:[%s13759_s28 + $0xb10] sm:$0xff]  }
 0x260   : > { %v16399_v55 = vmax.f32 %v19894_v33, %v8102_v57  ;;  %v19897_v61 = vmax.f32 %v19895_v43, %v19896_v41  ;;  %v7943_v52 = vsel %vm7748_vm3, %v12606_v46, -inf  ;;  %v8671_v51 = vsel %vm7748_vm3, %v13022_v62, -inf  ;;  %v5144_v34 = vpop.f32.mrb[183].mxu0  ;;  %v6808_v36 = vpop.f32.mrb[183].mxu1  ;;  %v16412_v9 = vld [vmem:[%s19294_s2] ss:$0 sm:$0xff] }
 0x261   : > { %v9238_v57 = vadd.f32 %v16412_v9, %v7937_v31  ;;  %v9342_v53 = vadd.f32 %v16412_v9, %v8665_v11  ;;  %v7944_v32 = vmax.f32 %v16097_v45, %v7943_v52  ;;  %v8109_v46 = vsel %vm7748_vm3, %v5144_v34, -inf  ;;  %v19898_v45 = vld [vmem:[#allocation3_spill] sm:$0xff]  ;;  %v19901_v52 = vld [vmem:[#allocation18_spill] sm:$0xff] }
 0x262   : > { %v16404_v8 = vmax.f32 %v19897_v61, %v8830_v58  ;;  %v8672_v58 = vmax.f32 %v16102_v15, %v8671_v51  ;;  %v8837_v62 = vsel %vm7748_vm3, %v6808_v36, -inf  ;;  %12712 = vmatmul.mubr.msk.bf16.gmra.mrb[32].mxu0 %vm3131_vm2, %v13571_v54  ;;  %v19899_v15 = vld [vmem:[#allocation24_spill] sm:$0xff]  ;;  %v19902_v54 = vld [vmem:[#allocation9_spill] sm:$0xff] }
 0x263   : > { %v9446_v33 = vmax.f32 %v9238_v57, 0.0  ;;  %v9550_v43 = vmax.f32 %v9342_v53, 0.0  ;;  %v9239_v41 = vadd.f32 %v16412_v9, %v7944_v32  ;;  %13128 = vmatmul.mubr.msk.bf16.gmra.mrb[32].mxu1 %vm3131_vm2, %v13572_v2  ;;  %12715 = vmatprep.mubr.msk.bf16.mxu0 %vm3131_vm2, %v13573_v23  ;;  %v19900_v31 = vmax.f32 %v19898_v45, %v19899_v15 }
 0x264   : > { %v9343_v61 = vadd.f32 %v16412_v9, %v8672_v58  ;;  %v19903_v51 = vmax.f32 %v19901_v52, %v19902_v54  ;;  %13131 = vmatprep.mubr.msk.bf16.mxu1 %vm3131_vm2, %v13574_v1  ;;  %v13576_v52 = vld [vmem:[%s13759_s28 + $0xb18] sm:$0xff]   ;;  %v13577_v54 = vld [vmem:[%s13759_s28 + $0x4a0] sm:$0xff]  }
 0x265   : > { %v16428_v11 = vmax.f32 %v19900_v31, %v8109_v46  ;;  %v11810_v36 = vpack.c.bf16 %v9446_v33, %v9446_v33  ;;  %v11914_v57 = vpack.c.bf16 %v9550_v43, %v9550_v43  ;;  %v9447_v53 = vmax.f32 %v9239_v41, 0.0  ;;  %v12609_v32 = vpop.f32.mrb[184].mxu0  ;;  %v13025_v23 = vpop.f32.mrb[184].mxu1  ;;  %v13575_v31 = vld [vmem:[%s13759_s28 + $0x498] sm:$0xff]  }
 0x266   : > { %v16433_v34 = vmax.f32 %v19903_v51, %v8837_v62  ;;  %v9551_v2 = vmax.f32 %v9343_v61, 0.0  ;;  %v7964_v58 = vsel %vm7748_vm3, %v12609_v32, -inf  ;;  %v8692_v46 = vsel %vm7748_vm3, %v13025_v23, -inf  ;;  %v5157_v45 = vpop.f32.mrb[185].mxu0  ;;  %v6821_v15 = vpop.f32.mrb[185].mxu1  ;;  %v13578_v51 = vld [vmem:[%s13759_s28 + $0xb20] sm:$0xff]  }
 0x267   : > { %10487 = vst.msk [vmem:[%s15038_s7 + $0x68] sm:$0xf] %vm10460_vm4, %v11810_v36  ;;  %10591 = vst.msk [vmem:[%s15038_s7 + $0x208] sm:$0xf] %vm10460_vm4, %v11914_v57  ;;  %v11811_v1 = vpack.c.bf16 %v9447_v53, %v9447_v53  ;;  %v7965_v33 = vmax.f32 %v16127_v42, %v7964_v58  ;;  %v8693_v43 = vmax.f32 %v16132_v6, %v8692_v46  ;;  %v12610_v41 = vpop.f32.mrb[186].mxu0  ;;  %v13026_v61 = vpop.f32.mrb[186].mxu1 }
 0x268   : > { %v11915_v62 = vpack.c.bf16 %v9551_v2, %v9551_v2  ;;  %v7950_v32 = vsel %vm7748_vm3, %v5157_v45, -inf  ;;  %v8678_v23 = vsel %vm7748_vm3, %v6821_v15, -inf  ;;  %v7971_v36 = vsel %vm7748_vm3, %v12610_v41, -inf  ;;  %v5160_v53 = vpop.f32.mrb[187].mxu0  ;;  %v6824_v7 = vpop.f32.mrb[187].mxu1 }
 0x269   : > { %v8699_v57 = vsel %vm7748_vm3, %v13026_v61, -inf  ;;  %10488 = vst.msk [vmem:[%s15038_s7 + $0x6c] sm:$0xf] %vm10460_vm4, %v11811_v1  ;;  %v9242_v42 = vadd.f32 %v16412_v9, %v7965_v33  ;;  %v9346_v6 = vadd.f32 %v16412_v9, %v8693_v43  ;;  %v7951_v2 = vmax.f32 %v16061_v4, %v7950_v32 }
 0x26a   : > { %10592 = vst.msk [vmem:[%s15038_s7 + $0x20c] sm:$0xf] %vm10460_vm4, %v11915_v62  ;;  %v8679_v58 = vmax.f32 %v16066_v3, %v8678_v23  ;;  %v7972_v46 = vmax.f32 %v16152_v44, %v7971_v36  ;;  %v8700_v45 = vmax.f32 %v16157_v26, %v8699_v57  ;;  %v7957_v15 = vsel %vm7748_vm3, %v5160_v53, -inf  ;;  %12716 = vmatmul.mubr.msk.bf16.gmra.mrb[36].mxu0 %vm3131_vm2, %v13575_v31 }
 0x26b   : > { %v8685_v41 = vsel %vm7748_vm3, %v6824_v7, -inf  ;;  %v9450_v1 = vmax.f32 %v9242_v42, 0.0  ;;  %v9554_v62 = vmax.f32 %v9346_v6, 0.0  ;;  %v9240_v33 = vadd.f32 %v16412_v9, %v7951_v2  ;;  %13132 = vmatmul.mubr.msk.bf16.gmra.mrb[36].mxu1 %vm3131_vm2, %v13576_v52  ;;  %12719 = vmatprep.mubr.msk.bf16.mxu0 %vm3131_vm2, %v13577_v54 }
 0x26c   : > { %v9344_v43 = vadd.f32 %v16412_v9, %v8679_v58  ;;  %v9243_v4 = vadd.f32 %v16412_v9, %v7972_v46  ;;  %v9347_v3 = vadd.f32 %v16412_v9, %v8700_v45  ;;  %v7958_v44 = vmax.f32 %v16086_v12, %v7957_v15  ;;  %13135 = vmatprep.mubr.msk.bf16.mxu1 %vm3131_vm2, %v13578_v51  ;;  %v13580_v15 = vld [vmem:[%s13759_s28 + $0xb28] sm:$0xff]  }
 0x26d   : > { %v8686_v26 = vmax.f32 %v16091_v47, %v8685_v41  ;;  %v11814_v7 = vpack.c.bf16 %v9450_v1, %v9450_v1  ;;  %v11918_v31 = vpack.c.bf16 %v9554_v62, %v9554_v62  ;;  %v9448_v61 = vmax.f32 %v9240_v33, 0.0  ;;  %v12613_v52 = vpop.f32.mrb[188].mxu0  ;;  %v13029_v23 = vpop.f32.mrb[188].mxu1  ;;  %v13579_v47 = vld [vmem:[%s13759_s28 + $0x4a8] sm:$0xff]   ;;  %v13581_v41 = vld [vmem:[%s13759_s28 + $0x4b0] sm:$0xff]  }
 0x26e   : > { %v9552_v32 = vmax.f32 %v9344_v43, 0.0  ;;  %v9451_v54 = vmax.f32 %v9243_v4, 0.0  ;;  %v9555_v36 = vmax.f32 %v9347_v3, 0.0  ;;  %v9241_v57 = vadd.f32 %v16412_v9, %v7958_v44  ;;  %v5173_v53 = vpop.f32.mrb[189].mxu0  ;;  %v6837_v42 = vpop.f32.mrb[189].mxu1  ;;  %v13582_v44 = vld [vmem:[%s13759_s28 + $0xb30] sm:$0xff]  }
 0x26f   : > { %v9345_v12 = vadd.f32 %v16412_v9, %v8686_v26  ;;  %10491 = vst.msk [vmem:[%s15038_s7 + $0x78] sm:$0xf] %vm10460_vm4, %v11814_v7  ;;  %10595 = vst.msk [vmem:[%s15038_s7 + $0x218] sm:$0xf] %vm10460_vm4, %v11918_v31  ;;  %v11812_v51 = vpack.c.bf16 %v9448_v61, %v9448_v61  ;;  %v7992_v2 = vsel %vm7748_vm3, %v12613_v52, -inf  ;;  %v8720_v58 = vsel %vm7748_vm3, %v13029_v23, -inf }
 0x270   : > { %v11916_v6 = vpack.c.bf16 %v9552_v32, %v9552_v32  ;;  %v12614_v46 = vpop.f32.mrb[190].mxu0  ;;  %v13030_v45 = vpop.f32.mrb[190].mxu1  ;;  %v11815_v1 = vpack.c.bf16 %v9451_v54, %v9451_v54  ;;  %v11919_v62 = vpack.c.bf16 %v9555_v36, %v9555_v36  ;;  %v9449_v33 = vmax.f32 %v9241_v57, 0.0 }
 0x271   : > { %v9553_v43 = vmax.f32 %v9345_v12, 0.0  ;;  %v5176_v4 = vpop.f32.mrb[191].mxu0  ;;  %v6840_v3 = vpop.f32.mrb[191].mxu1  ;;  %10489 = vst.msk [vmem:[%s15038_s7 + $0x70] sm:$0xf] %vm10460_vm4, %v11812_v51  ;;  %v7993_v26 = vmax.f32 %v16183_v5, %v7992_v2  ;;  %v8721_v7 = vmax.f32 %v16188_v39, %v8720_v58  ;;  %v7978_v31 = vsel %vm7748_vm3, %v5173_v53, -inf }
 0x272   : > { %10593 = vst.msk [vmem:[%s15038_s7 + $0x210] sm:$0xf] %vm10460_vm4, %v11916_v6  ;;  %v8706_v61 = vsel %vm7748_vm3, %v6837_v42, -inf  ;;  %10492 = vst.msk [vmem:[%s15038_s7 + $0x7c] sm:$0xf] %vm10460_vm4, %v11815_v1  ;;  %v11813_v32 = vpack.c.bf16 %v9449_v33, %v9449_v33  ;;  %v7979_v23 = vmax.f32 %v16113_v10, %v7978_v31  ;;  %12720 = vmatmul.mubr.msk.bf16.gmra.mrb[40].mxu0 %vm3131_vm2, %v13579_v47  ;;  %v7999_v36 = vsel %vm7748_vm3, %v12614_v46, -inf }
 0x273   : > { %10596 = vst.msk [vmem:[%s15038_s7 + $0x21c] sm:$0xf] %vm10460_vm4, %v11919_v62  ;;  %v11917_v52 = vpack.c.bf16 %v9553_v43, %v9553_v43  ;;  %v8707_v54 = vmax.f32 %v16118_v14, %v8706_v61  ;;  %v9246_v5 = vadd.f32 %v16412_v9, %v7993_v26  ;;  %v9350_v39 = vadd.f32 %v16412_v9, %v8721_v7  ;;  %v13585_v26 = vld [vmem:[%s13759_s28 + $0x4c0] sm:$0xff]  }
 0x274   : > { %v8727_v57 = vsel %vm7748_vm3, %v13030_v45, -inf  ;;  %13136 = vmatmul.mubr.msk.bf16.gmra.mrb[40].mxu1 %vm3131_vm2, %v13580_v15  ;;  %12723 = vmatprep.mubr.msk.bf16.mxu0 %vm3131_vm2, %v13581_v41  ;;  %10490 = vst.msk [vmem:[%s15038_s7 + $0x74] sm:$0xf] %vm10460_vm4, %v11813_v32  ;;  %v9244_v10 = vadd.f32 %v16412_v9, %v7979_v23  ;;  %v8000_v12 = vmax.f32 %v16208_v63, %v7999_v36  ;;  %v7985_v51 = vsel %vm7748_vm3, %v5176_v4, -inf }
 0x275   : > { %10594 = vst.msk [vmem:[%s15038_s7 + $0x214] sm:$0xf] %vm10460_vm4, %v11917_v52  ;;  %v9348_v14 = vadd.f32 %v16412_v9, %v8707_v54  ;;  %v8728_v53 = vmax.f32 %v16213_v25, %v8727_v57  ;;  %13139 = vmatprep.mubr.msk.bf16.mxu1 %vm3131_vm2, %v13582_v44  ;;  %v9454_v42 = vmax.f32 %v9246_v5, 0.0  ;;  %v9558_v47 = vmax.f32 %v9350_v39, 0.0  ;;  %v12617_v2 = vpop.f32.mrb[192].mxu0  ;;  %v13583_v25 = vld [vmem:[%s13759_s28 + $0x4b8] sm:$0xff]  }
 0x276   : > { %v8713_v6 = vsel %vm7748_vm3, %v6840_v3, -inf  ;;  %v9452_v58 = vmax.f32 %v9244_v10, 0.0  ;;  %v9247_v45 = vadd.f32 %v16412_v9, %v8000_v12  ;;  %v13033_v63 = vpop.f32.mrb[192].mxu1  ;;  %v5189_v41 = vpop.f32.mrb[193].mxu0  ;;  %v7986_v33 = vmax.f32 %v16140_v0, %v7985_v51  ;;  %v13584_v44 = vld [vmem:[%s13759_s28 + $0xb38] sm:$0xff]   ;;  %v13586_v54 = vld [vmem:[%s13759_s28 + $0xb40] sm:$0xff]  }
 0x277   : > { %v9556_v46 = vmax.f32 %v9348_v14, 0.0  ;;  %v9351_v15 = vadd.f32 %v16412_v9, %v8728_v53  ;;  %v11818_v1 = vpack.c.bf16 %v9454_v42, %v9454_v42  ;;  %v11922_v62 = vpack.c.bf16 %v9558_v47, %v9558_v47  ;;  %v6853_v4 = vpop.f32.mrb[193].mxu1  ;;  %v12618_v3 = vpop.f32.mrb[194].mxu0 }
 0x278   : > { %v8714_v43 = vmax.f32 %v16145_v38, %v8713_v6  ;;  %v11816_v7 = vpack.c.bf16 %v9452_v58, %v9452_v58  ;;  %v9455_v61 = vmax.f32 %v9247_v45, 0.0  ;;  %v13034_v52 = vpop.f32.mrb[194].mxu1  ;;  %v5192_v23 = vpop.f32.mrb[195].mxu0  ;;  %v9245_v0 = vadd.f32 %v16412_v9, %v7986_v33 }
 0x279   : > { %v11920_v31 = vpack.c.bf16 %v9556_v46, %v9556_v46  ;;  %v9559_v32 = vmax.f32 %v9351_v15, 0.0  ;;  %10495 = vst.msk [vmem:[%s15038_s7 + $0x88] sm:$0xf] %vm10460_vm4, %v11818_v1  ;;  %10599 = vst.msk [vmem:[%s15038_s7 + $0x228] sm:$0xf] %vm10460_vm4, %v11922_v62  ;;  %v8020_v5 = vsel %vm7748_vm3, %v12617_v2, -inf }
 0x27a   : > { %v9349_v38 = vadd.f32 %v16412_v9, %v8714_v43  ;;  %v8748_v39 = vsel %vm7748_vm3, %v13033_v63, -inf  ;;  %v6856_v36 = vpop.f32.mrb[195].mxu1  ;;  %10493 = vst.msk [vmem:[%s15038_s7 + $0x80] sm:$0xf] %vm10460_vm4, %v11816_v7  ;;  %v11819_v57 = vpack.c.bf16 %v9455_v61, %v9455_v61  ;;  %v8021_v14 = vmax.f32 %v16239_v30, %v8020_v5  ;;  %12724 = vmatmul.mubr.msk.bf16.gmra.mrb[44].mxu0 %vm3131_vm2, %v13583_v25  ;;  %v13589_v61 = vld [vmem:[%s13759_s28 + $0x4d0] sm:$0xff]  }
 0x27b   : > { %10597 = vst.msk [vmem:[%s15038_s7 + $0x220] sm:$0xf] %vm10460_vm4, %v11920_v31  ;;  %v11923_v10 = vpack.c.bf16 %v9559_v32, %v9559_v32  ;;  %v8749_v12 = vmax.f32 %v16244_v35, %v8748_v39  ;;  %v9453_v53 = vmax.f32 %v9245_v0, 0.0  ;;  %v8006_v47 = vsel %vm7748_vm3, %v5189_v41, -inf  ;;  %12727 = vmatprep.mubr.msk.bf16.mxu0 %vm3131_vm2, %v13585_v26  ;;  %v13588_v31 = vld [vmem:[%s13759_s28 + $0xb48] sm:$0xff]   ;;  %v13590_v39 = vld [vmem:[%s13759_s28 + $0xb50] sm:$0xff]  }
 0x27c   : > { %v9557_v42 = vmax.f32 %v9349_v38, 0.0  ;;  %v8734_v51 = vsel %vm7748_vm3, %v6853_v4, -inf  ;;  %13140 = vmatmul.mubr.msk.bf16.gmra.mrb[44].mxu1 %vm3131_vm2, %v13584_v44  ;;  %10496 = vst.msk [vmem:[%s15038_s7 + $0x8c] sm:$0xf] %vm10460_vm4, %v11819_v57  ;;  %v9250_v30 = vadd.f32 %v16412_v9, %v8021_v14  ;;  %v8007_v6 = vmax.f32 %v16169_v22, %v8006_v47 }
 0x27d   : > { %10600 = vst.msk [vmem:[%s15038_s7 + $0x22c] sm:$0xf] %vm10460_vm4, %v11923_v10  ;;  %v9354_v35 = vadd.f32 %v16412_v9, %v8749_v12  ;;  %v8735_v2 = vmax.f32 %v16174_v19, %v8734_v51  ;;  %13143 = vmatprep.mubr.msk.bf16.mxu1 %vm3131_vm2, %v13586_v54  ;;  %v11817_v58 = vpack.c.bf16 %v9453_v53, %v9453_v53  ;;  %v8027_v45 = vsel %vm7748_vm3, %v12618_v3, -inf  ;;  %v12621_v63 = vpop.f32.mrb[196].mxu0  ;;  %v13587_v19 = vld [vmem:[%s13759_s28 + $0x4c8] sm:$0xff]  }
 0x27e   : > { %v11921_v46 = vpack.c.bf16 %v9557_v42, %v9557_v42  ;;  %v8755_v15 = vsel %vm7748_vm3, %v13034_v52, -inf  ;;  %v9458_v41 = vmax.f32 %v9250_v30, 0.0  ;;  %v9248_v1 = vadd.f32 %v16412_v9, %v8007_v6  ;;  %v13037_v62 = vpop.f32.mrb[196].mxu1  ;;  %v5205_v33 = vpop.f32.mrb[197].mxu0 }
 0x27f   : > { %v9562_v25 = vmax.f32 %v9354_v35, 0.0  ;;  %v9352_v22 = vadd.f32 %v16412_v9, %v8735_v2  ;;  %10494 = vst.msk [vmem:[%s15038_s7 + $0x84] sm:$0xf] %vm10460_vm4, %v11817_v58  ;;  %v8028_v43 = vmax.f32 %v16264_v28, %v8027_v45  ;;  %v8756_v4 = vmax.f32 %v16269_v60, %v8755_v15  ;;  %v6869_v26 = vpop.f32.mrb[197].mxu1  ;;  %v12622_v7 = vpop.f32.mrb[198].mxu0 }
 0x280   : > { %10598 = vst.msk [vmem:[%s15038_s7 + $0x224] sm:$0xf] %vm10460_vm4, %v11921_v46  ;;  %v8013_v3 = vsel %vm7748_vm3, %v5192_v23, -inf  ;;  %v8741_v44 = vsel %vm7748_vm3, %v6856_v36, -inf  ;;  %v11822_v32 = vpack.c.bf16 %v9458_v41, %v9458_v41  ;;  %v9456_v54 = vmax.f32 %v9248_v1, 0.0  ;;  %v13038_v38 = vpop.f32.mrb[198].mxu1 }
 0x281   : > { %v11926_v52 = vpack.c.bf16 %v9562_v25, %v9562_v25  ;;  %v9560_v0 = vmax.f32 %v9352_v22, 0.0  ;;  %v5208_v5 = vpop.f32.mrb[199].mxu0  ;;  %v9251_v28 = vadd.f32 %v16412_v9, %v8028_v43  ;;  %v9355_v60 = vadd.f32 %v16412_v9, %v8756_v4  ;;  %v6872_v57 = vpop.f32.mrb[199].mxu1  ;;  %v13591_v22 = vld [vmem:[%s13759_s28 + $0x4d8] sm:$0xff]  }
 0x282   : > { %v8014_v23 = vmax.f32 %v16196_v16, %v8013_v3  ;;  %v8742_v36 = vmax.f32 %v16201_v24, %v8741_v44  ;;  %10499 = vst.msk [vmem:[%s15038_s7 + $0x98] sm:$0xf] %vm10460_vm4, %v11822_v32  ;;  %v11820_v10 = vpack.c.bf16 %v9456_v54, %v9456_v54  ;;  %v8048_v12 = vsel %vm7748_vm3, %v12621_v63, -inf  ;;  %12728 = vmatmul.mubr.msk.bf16.gmra.mrb[48].mxu0 %vm3131_vm2, %v13587_v19  ;;  %v13594_v54 = vld [vmem:[%s13759_s28 + $0xb60] sm:$0xff]  }
 0x283   : > { %10603 = vst.msk [vmem:[%s15038_s7 + $0x238] sm:$0xf] %vm10460_vm4, %v11926_v52  ;;  %v11924_v14 = vpack.c.bf16 %v9560_v0, %v9560_v0  ;;  %v8776_v53 = vsel %vm7748_vm3, %v13037_v62, -inf  ;;  %v9459_v42 = vmax.f32 %v9251_v28, 0.0  ;;  %v9563_v47 = vmax.f32 %v9355_v60, 0.0  ;;  %12731 = vmatprep.mubr.msk.bf16.mxu0 %vm3131_vm2, %v13589_v61  ;;  %v13593_v52 = vld [vmem:[%s13759_s28 + $0x4e0] sm:$0xff]  }
 0x284   : > { %v9249_v16 = vadd.f32 %v16412_v9, %v8014_v23  ;;  %v9353_v24 = vadd.f32 %v16412_v9, %v8742_v36  ;;  %13144 = vmatmul.mubr.msk.bf16.gmra.mrb[48].mxu1 %vm3131_vm2, %v13588_v31  ;;  %10497 = vst.msk [vmem:[%s15038_s7 + $0x90] sm:$0xf] %vm10460_vm4, %v11820_v10  ;;  %v8049_v51 = vmax.f32 %v16295_v49, %v8048_v12  ;;  %v8034_v35 = vsel %vm7748_vm3, %v5205_v33, -inf }
 0x285   : > { %10601 = vst.msk [vmem:[%s15038_s7 + $0x230] sm:$0xf] %vm10460_vm4, %v11924_v14  ;;  %v8777_v30 = vmax.f32 %v16300_v59, %v8776_v53  ;;  %v8762_v6 = vsel %vm7748_vm3, %v6869_v26, -inf  ;;  %13147 = vmatprep.mubr.msk.bf16.mxu1 %vm3131_vm2, %v13590_v39  ;;  %v11823_v2 = vpack.c.bf16 %v9459_v42, %v9459_v42  ;;  %v11927_v58 = vpack.c.bf16 %v9563_v47, %v9563_v47  ;;  %v12625_v15 = vpop.f32.mrb[200].mxu0 }
 0x286   : > { %v9457_v46 = vmax.f32 %v9249_v16, 0.0  ;;  %v9561_v45 = vmax.f32 %v9353_v24, 0.0  ;;  %v9254_v63 = vadd.f32 %v16412_v9, %v8049_v51  ;;  %v8035_v59 = vmax.f32 %v16225_v37, %v8034_v35  ;;  %v13041_v25 = vpop.f32.mrb[200].mxu1  ;;  %v5221_v1 = vpop.f32.mrb[201].mxu0 }
 0x287   : > { %v9358_v49 = vadd.f32 %v16412_v9, %v8777_v30  ;;  %v8763_v41 = vmax.f32 %v16230_v20, %v8762_v6  ;;  %10500 = vst.msk [vmem:[%s15038_s7 + $0x9c] sm:$0xf] %vm10460_vm4, %v11823_v2  ;;  %10604 = vst.msk [vmem:[%s15038_s7 + $0x23c] sm:$0xf] %vm10460_vm4, %v11927_v58  ;;  %v8055_v19 = vsel %vm7748_vm3, %v12622_v7, -inf  ;;  %v8783_v43 = vsel %vm7748_vm3, %v13038_v38, -inf }
 0x288   : > { %v11821_v62 = vpack.c.bf16 %v9457_v46, %v9457_v46  ;;  %v11925_v33 = vpack.c.bf16 %v9561_v45, %v9561_v45  ;;  %v6885_v37 = vpop.f32.mrb[201].mxu1  ;;  %v16605_v4 = vpop.f32.mrb[202].mxu0  ;;  %v13592_v20 = vld [vmem:[%s13759_s28 + $0xb58] sm:$0xff]   ;;  %v9462_v3 = vmax.f32 %v9254_v63, 0.0  ;;  %v9252_v26 = vadd.f32 %v16412_v9, %v8035_v59  ;;  %v13595_v46 = vld [vmem:[%s13759_s28 + $0x4e8] sm:$0xff]  }
 0x289   : > { %v9566_v44 = vmax.f32 %v9358_v49, 0.0  ;;  %v9356_v31 = vadd.f32 %v16412_v9, %v8763_v41  ;;  %v16610_v61 = vpop.f32.mrb[202].mxu1  ;;  %v16612_v32 = vpop.f32.mrb[203].mxu0  ;;  %v8056_v7 = vmax.f32 %v16320_v40, %v8055_v19  ;;  %v8784_v0 = vmax.f32 %v16325_v17, %v8783_v43  ;;  %v13597_v41 = vld [vmem:[%s13759_s28 + $0x4f0] sm:$0xff]  }
 0x28a   : > { %10498 = vst.msk [vmem:[%s15038_s7 + $0x94] sm:$0xf] %vm10460_vm4, %v11821_v62  ;;  %10602 = vst.msk [vmem:[%s15038_s7 + $0x234] sm:$0xf] %vm10460_vm4, %v11925_v33  ;;  %v8041_v38 = vsel %vm7748_vm3, %v5208_v5, -inf  ;;  %v8769_v39 = vsel %vm7748_vm3, %v6872_v57, -inf  ;;  %v11826_v60 = vpack.c.bf16 %v9462_v3, %v9462_v3  ;;  %12732 = vmatmul.mubr.msk.bf16.gmra.mrb[52].mxu0 %vm3131_vm2, %v13591_v22 }
 0x28b   : > { %v16624_v28 = vpop.f32.mrb[203].mxu1  ;;  %v11930_v23 = vpack.c.bf16 %v9566_v44, %v9566_v44  ;;  %v9460_v36 = vmax.f32 %v9252_v26, 0.0  ;;  %v9564_v10 = vmax.f32 %v9356_v31, 0.0  ;;  %v9255_v14 = vadd.f32 %v16412_v9, %v8056_v7  ;;  %12735 = vmatprep.mubr.msk.bf16.mxu0 %vm3131_vm2, %v13593_v52  ;;  %v13598_v43 = vld [vmem:[%s13759_s28 + $0xb70] sm:$0xff]  }
 0x28c   : > { %v9359_v12 = vadd.f32 %v16412_v9, %v8784_v0  ;;  %v8042_v40 = vmax.f32 %v16252_v48, %v8041_v38  ;;  %v8770_v17 = vmax.f32 %v16257_v50, %v8769_v39  ;;  %13148 = vmatmul.mubr.msk.bf16.gmra.mrb[52].mxu1 %vm3131_vm2, %v13592_v20  ;;  %10503 = vst.msk [vmem:[%s15038_s7 + $0xa8] sm:$0xf] %vm10460_vm4, %v11826_v60  ;;  %v8076_v53 = vsel %vm7748_vm3, %v12625_v15, -inf }
 0x28d   : > { %10607 = vst.msk [vmem:[%s15038_s7 + $0x248] sm:$0xf] %vm10460_vm4, %v11930_v23  ;;  %v11824_v5 = vpack.c.bf16 %v9460_v36, %v9460_v36  ;;  %v11928_v57 = vpack.c.bf16 %v9564_v10, %v9564_v10  ;;  %v8804_v42 = vsel %vm7748_vm3, %v13041_v25, -inf  ;;  %13151 = vmatprep.mubr.msk.bf16.mxu1 %vm3131_vm2, %v13594_v54  ;;  %v9463_v48 = vmax.f32 %v9255_v14, 0.0  ;;  %v12629_v24 = vpop.f32.mrb[204].mxu0  ;;  %v19904_v23 = vld [vmem:[#allocation5_spill] sm:$0xff] }
 0x28e   : > { %v9567_v50 = vmax.f32 %v9359_v12, 0.0  ;;  %v9253_v47 = vadd.f32 %v16412_v9, %v8042_v40  ;;  %v9357_v16 = vadd.f32 %v16412_v9, %v8770_v17  ;;  %v8077_v51 = vmax.f32 %v16351_v56, %v8076_v53  ;;  %v13045_v2 = vpop.f32.mrb[204].mxu1  ;;  %v16650_v58 = vpop.f32.mrb[205].mxu0  ;;  %v19905_v36 = vld [vmem:[#allocation6_spill] sm:$0xff]  ;;  %v13599_v53 = vld [vmem:[%s13759_s28 + $0x4f8] sm:$0xff]  }
 0x28f   : > { %10501 = vst.msk [vmem:[%s15038_s7 + $0xa0] sm:$0xf] %vm10460_vm4, %v11824_v5  ;;  %10605 = vst.msk [vmem:[%s15038_s7 + $0x240] sm:$0xf] %vm10460_vm4, %v11928_v57  ;;  %v8805_v30 = vmax.f32 %v16356_v29, %v8804_v42  ;;  %v8062_v35 = vsel %vm7748_vm3, %v5221_v1, -inf  ;;  %v8790_v6 = vsel %vm7748_vm3, %v6885_v37, -inf  ;;  %v11827_v45 = vpack.c.bf16 %v9463_v48, %v9463_v48 }
 0x290   : > { %v11931_v15 = vpack.c.bf16 %v9567_v50, %v9567_v50  ;;  %v9461_v63 = vmax.f32 %v9253_v47, 0.0  ;;  %v9565_v49 = vmax.f32 %v9357_v16, 0.0  ;;  %v16653_v59 = vpop.f32.mrb[205].mxu1  ;;  %v16655_v56 = vpop.f32.mrb[206].mxu0  ;;  %v13596_v29 = vld [vmem:[%s13759_s28 + $0xb68] sm:$0xff]   ;;  %v9258_v25 = vadd.f32 %v16412_v9, %v8077_v51 }
 0x291   : > { %v9362_v1 = vadd.f32 %v16412_v9, %v8805_v30  ;;  %v8063_v22 = vmax.f32 %v16281_v13, %v8062_v35  ;;  %v8791_v62 = vmax.f32 %v16286_v21, %v8790_v6  ;;  %v16663_v33 = vpop.f32.mrb[206].mxu1  ;;  %v16665_v19 = vpop.f32.mrb[207].mxu0  ;;  %10504 = vst.msk [vmem:[%s15038_s7 + $0xac] sm:$0xf] %vm10460_vm4, %v11827_v45  ;;  %v8083_v3 = vsel %vm7748_vm3, %v16605_v4, -inf  ;;  %v13600_v30 = vld [vmem:[%s13759_s28 + $0xb78] sm:$0xff]  }
 0x292   : > { %10608 = vst.msk [vmem:[%s15038_s7 + $0x24c] sm:$0xf] %vm10460_vm4, %v11931_v15  ;;  %v11825_v37 = vpack.c.bf16 %v9461_v63, %v9461_v63  ;;  %v11929_v20 = vpack.c.bf16 %v9565_v49, %v9565_v49  ;;  %v8811_v13 = vsel %vm7748_vm3, %v16610_v61, -inf  ;;  %v16676_v21 = vpop.f32.mrb[207].mxu1  ;;  %v9466_v44 = vmax.f32 %v9258_v25, 0.0  ;;  %12736 = vmatmul.mubr.msk.bf16.gmra.mrb[56].mxu0 %vm3131_vm2, %v13595_v46  ;;  %v13602_v63 = vld [vmem:[%s13759_s28 + $0xb80] sm:$0xff]  }
 0x293   : > { %v9570_v26 = vmax.f32 %v9362_v1, 0.0  ;;  %v9256_v31 = vadd.f32 %v16412_v9, %v8063_v22  ;;  %v9360_v52 = vadd.f32 %v16412_v9, %v8791_v62  ;;  %v8084_v54 = vmax.f32 %v16376_v27, %v8083_v3  ;;  %12739 = vmatprep.mubr.msk.bf16.mxu0 %vm3131_vm2, %v13597_v41  ;;  %v19907_v62 = vld [vmem:[#allocation22_spill] sm:$0xff] }
 0x294   : > { %10502 = vst.msk [vmem:[%s15038_s7 + $0xa4] sm:$0xf] %vm10460_vm4, %v11825_v37  ;;  %10606 = vst.msk [vmem:[%s15038_s7 + $0x244] sm:$0xf] %vm10460_vm4, %v11929_v20  ;;  %v8812_v4 = vmax.f32 %v16381_v18, %v8811_v13  ;;  %v8069_v61 = vsel %vm7748_vm3, %v16612_v32, -inf  ;;  %v8797_v7 = vsel %vm7748_vm3, %v16624_v28, -inf  ;;  %13152 = vmatmul.mubr.msk.bf16.gmra.mrb[56].mxu1 %vm3131_vm2, %v13596_v29  ;;  %v11830_v0 = vpack.c.bf16 %v9466_v44, %v9466_v44 }
 0x295   : > { %v11934_v38 = vpack.c.bf16 %v9570_v26, %v9570_v26  ;;  %v9464_v39 = vmax.f32 %v9256_v31, 0.0  ;;  %v9568_v60 = vmax.f32 %v9360_v52, 0.0  ;;  %13155 = vmatprep.mubr.msk.bf16.mxu1 %vm3131_vm2, %v13598_v43  ;;  %v9259_v27 = vadd.f32 %v16412_v9, %v8084_v54  ;;  %v16698_v28 = vpop.f32.mrb[208].mxu0 }
 0x296   : > { %v9363_v18 = vadd.f32 %v16412_v9, %v8812_v4  ;;  %v8070_v32 = vmax.f32 %v19904_v23, %v8069_v61  ;;  %v8798_v10 = vmax.f32 %v19905_v36, %v8797_v7  ;;  %10507 = vst.msk [vmem:[%s15038_s7 + $0xb8] sm:$0xf] %vm10460_vm4, %v11830_v0  ;;  %v8104_v40 = vsel %vm7748_vm3, %v12629_v24, -inf  ;;  %v16706_v5 = vpop.f32.mrb[208].mxu1  ;;  %v16708_v57 = vpop.f32.mrb[209].mxu0  ;;  %v13601_v24 = vld [vmem:[%s13759_s28 + $0x500] sm:$0xff]  }
 0x297   : > { %10611 = vst.msk [vmem:[%s15038_s7 + $0x258] sm:$0xf] %vm10460_vm4, %v11934_v38  ;;  %v11828_v14 = vpack.c.bf16 %v9464_v39, %v9464_v39  ;;  %v11932_v12 = vpack.c.bf16 %v9568_v60, %v9568_v60  ;;  %v8832_v17 = vsel %vm7748_vm3, %v13045_v2, -inf  ;;  %v9467_v42 = vmax.f32 %v9259_v27, 0.0  ;;  %v16713_v16 = vpop.f32.mrb[209].mxu1  ;;  %v16715_v51 = vpop.f32.mrb[210].mxu0 }
 0x298   : > { %v9571_v48 = vmax.f32 %v9363_v18, 0.0  ;;  %v9257_v50 = vadd.f32 %v16412_v9, %v8070_v32  ;;  %v9361_v47 = vadd.f32 %v16412_v9, %v8798_v10  ;;  %v8105_v35 = vmax.f32 %v16399_v55, %v8104_v40  ;;  %v16729_v45 = vpop.f32.mrb[210].mxu1  ;;  %v16731_v15 = vpop.f32.mrb[211].mxu0  ;;  %v19909_v18 = vld [vmem:[#allocation23_spill] sm:$0xff] }
 0x299   : > { %10505 = vst.msk [vmem:[%s15038_s7 + $0xb0] sm:$0xf] %vm10460_vm4, %v11828_v14  ;;  %10609 = vst.msk [vmem:[%s15038_s7 + $0x250] sm:$0xf] %vm10460_vm4, %v11932_v12  ;;  %v8833_v6 = vmax.f32 %v16404_v8, %v8832_v17  ;;  %v8090_v2 = vsel %vm7748_vm3, %v16650_v58, -inf  ;;  %v8818_v46 = vsel %vm7748_vm3, %v16653_v59, -inf  ;;  %v11831_v49 = vpack.c.bf16 %v9467_v42, %v9467_v42 }
 0x29a   : > { %v11935_v29 = vpack.c.bf16 %v9571_v48, %v9571_v48  ;;  %v9465_v41 = vmax.f32 %v9257_v50, 0.0  ;;  %v9569_v25 = vmax.f32 %v9361_v47, 0.0  ;;  %v16734_v55 = vpop.f32.mrb[211].mxu1  ;;  %v9262_v8 = vadd.f32 %v16412_v9, %v8105_v35  ;;  %v19906_v58 = vld [vmem:[#allocation21_spill] sm:$0xff]  ;;  %12740 = vmatmul.mubr.msk.bf16.gmra.mrb[60].mxu0 %vm3131_vm2, %v13599_v53  ;;  %v13604_v10 = vld [vmem:[%s13759_s28 + $0xb88] sm:$0xff]   ;;  %v13605_v14 = vld [vmem:[%s13759_s28 + $0x510] sm:$0xff]  }
 0x29b   : > { %v9366_v1 = vadd.f32 %v16412_v9, %v8833_v6  ;;  %v8091_v22 = vmax.f32 %v19906_v58, %v8090_v2  ;;  %v8819_v59 = vmax.f32 %v19907_v62, %v8818_v46  ;;  %10508 = vst.msk [vmem:[%s15038_s7 + $0xbc] sm:$0xf] %vm10460_vm4, %v11831_v49  ;;  %v8111_v20 = vsel %vm7748_vm3, %v16655_v56, -inf  ;;  %12743 = vmatprep.mubr.msk.bf16.mxu0 %vm3131_vm2, %v13601_v24  ;;  %v13606_v42 = vld [vmem:[%s13759_s28 + $0xb90] sm:$0xff]   ;;  %v13608_v58 = vld [vmem:[%s13759_s28 + $0xb98] sm:$0xff]  }
 0x29c   : > { %10612 = vst.msk [vmem:[%s15038_s7 + $0x25c] sm:$0xf] %vm10460_vm4, %v11935_v29  ;;  %v11829_v43 = vpack.c.bf16 %v9465_v41, %v9465_v41  ;;  %v11933_v37 = vpack.c.bf16 %v9569_v25, %v9569_v25  ;;  %v8839_v3 = vsel %vm7748_vm3, %v16663_v33, -inf  ;;  %13156 = vmatmul.mubr.msk.bf16.gmra.mrb[60].mxu1 %vm3131_vm2, %v13600_v30  ;;  %v9470_v13 = vmax.f32 %v9262_v8, 0.0  ;;  %v13607_v25 = vld [vmem:[%s13759_s28 + $0x518] sm:$0xff]  }
 0x29d   : > { %v9574_v44 = vmax.f32 %v9366_v1, 0.0  ;;  %v9260_v26 = vadd.f32 %v16412_v9, %v8091_v22  ;;  %v9364_v31 = vadd.f32 %v16412_v9, %v8819_v59  ;;  %13159 = vmatprep.mubr.msk.bf16.mxu1 %vm3131_vm2, %v13602_v63  ;;  %v8112_v56 = vmax.f32 %v16428_v11, %v8111_v20  ;;  %v16764_v4 = vpop.f32.mrb[212].mxu0  ;;  %v13609_v22 = vld [vmem:[%s13759_s28 + $0x520] sm:$0xff]  }
 0x29e   : > { %10506 = vst.msk [vmem:[%s15038_s7 + $0xb4] sm:$0xf] %vm10460_vm4, %v11829_v43  ;;  %10610 = vst.msk [vmem:[%s15038_s7 + $0x254] sm:$0xf] %vm10460_vm4, %v11933_v37  ;;  %v8840_v33 = vmax.f32 %v16433_v34, %v8839_v3  ;;  %v8097_v52 = vsel %vm7748_vm3, %v16665_v19, -inf  ;;  %v8825_v54 = vsel %vm7748_vm3, %v16676_v21, -inf  ;;  %v11834_v61 = vpack.c.bf16 %v9470_v13, %v9470_v13 }
 0x29f   : > { %v11938_v7 = vpack.c.bf16 %v9574_v44, %v9574_v44  ;;  %v9468_v0 = vmax.f32 %v9260_v26, 0.0  ;;  %v9572_v38 = vmax.f32 %v9364_v31, 0.0  ;;  %v16766_v39 = vpop.f32.mrb[212].mxu1  ;;  %v16768_v11 = vpop.f32.mrb[213].mxu0  ;;  %v13603_v34 = vld [vmem:[%s13759_s28 + $0x508] sm:$0xff]   ;;  %v9263_v19 = vadd.f32 %v16412_v9, %v8112_v56  ;;  %v19908_v21 = vld [vmem:[#allocation30_spill] sm:$0xff] }
 0x2a0   : > { %v9367_v60 = vadd.f32 %v16412_v9, %v8840_v33  ;;  %v8098_v27 = vmax.f32 %v19908_v21, %v8097_v52  ;;  %v8826_v23 = vmax.f32 %v19909_v18, %v8825_v54  ;;  %v16775_v32 = vpop.f32.mrb[213].mxu1  ;;  %v16777_v36 = vpop.f32.mrb[214].mxu0  ;;  %10511 = vst.msk [vmem:[%s15038_s7 + $0xc8] sm:$0xf] %vm10460_vm4, %v11834_v61  ;;  %v13610_v43 = vld [vmem:[%s13759_s28 + $0xba0] sm:$0xff]   ;;  %v13611_v44 = vld [vmem:[%s13759_s28 + $0x528] sm:$0xff]  }
 0x2a1   : > { %10615 = vst.msk [vmem:[%s15038_s7 + $0x268] sm:$0xf] %vm10460_vm4, %v11938_v7  ;;  %v11832_v12 = vpack.c.bf16 %v9468_v0, %v9468_v0  ;;  %v11936_v40 = vpack.c.bf16 %v9572_v38, %v9572_v38  ;;  %v16785_v17 = vpop.f32.mrb[214].mxu1  ;;  %v16787_v53 = vpop.f32.mrb[215].mxu0  ;;  %v9471_v48 = vmax.f32 %v9263_v19, 0.0  ;;  %v13612_v56 = vld [vmem:[%s13759_s28 + $0xba8] sm:$0xff]  }
 0x2a2   : > { %v9575_v50 = vmax.f32 %v9367_v60, 0.0  ;;  %v9261_v47 = vadd.f32 %v16412_v9, %v8098_v27  ;;  %v9365_v30 = vadd.f32 %v16412_v9, %v8826_v23  ;;  %v16792_v24 = vpop.f32.mrb[215].mxu1  ;;  %12744 = vmatmul.mubr.msk.bf16.gmra.mrb[64].mxu0 %vm3131_vm2, %v13603_v34  ;;  %v13613_v33 = vld [vmem:[%s13759_s28 + $0x530] sm:$0xff]   ;;  %v13615_v19 = vld [vmem:[%s13759_s28 + $0x538] sm:$0xff]   ;;  %v13617_v18 = vld [vmem:[%s13759_s28 + $0x540] sm:$0xff]  }
 0x2a3   : > { %10509 = vst.msk [vmem:[%s15038_s7 + $0xc0] sm:$0xf] %vm10460_vm4, %v11832_v12  ;;  %10613 = vst.msk [vmem:[%s15038_s7 + $0x260] sm:$0xf] %vm10460_vm4, %v11936_v40  ;;  %v11835_v35 = vpack.c.bf16 %v9471_v48, %v9471_v48  ;;  %12747 = vmatprep.mubr.msk.bf16.mxu0 %vm3131_vm2, %v13605_v14  ;;  %v13614_v61 = vld [vmem:[%s13759_s28 + $0xbb0] sm:$0xff]   ;;  %v13616_v27 = vld [vmem:[%s13759_s28 + $0xbb8] sm:$0xff]  }
 0x2a4   : > { %v11939_v6 = vpack.c.bf16 %v9575_v50, %v9575_v50  ;;  %v9469_v2 = vmax.f32 %v9261_v47, 0.0  ;;  %v9573_v46 = vmax.f32 %v9365_v30, 0.0  ;;  %13160 = vmatmul.mubr.msk.bf16.gmra.mrb[64].mxu1 %vm3131_vm2, %v13604_v10  ;;  %v13618_v14 = vld [vmem:[%s13759_s28 + $0xbc0] sm:$0xff]   ;;  %v13619_v50 = vld [vmem:[%s13759_s28 + $0x548] sm:$0xff]  }
 0x2a5   : > { %13163 = vmatprep.mubr.msk.bf16.mxu1 %vm3131_vm2, %v13606_v42  ;;  %10512 = vst.msk [vmem:[%s15038_s7 + $0xcc] sm:$0xf] %vm10460_vm4, %v11835_v35  ;;  %v16806_v49 = vpop.f32.mrb[216].mxu0  ;;  %v13620_v35 = vld [vmem:[%s13759_s28 + $0xbc8] sm:$0xff]  }
 0x2a6   : > { %10616 = vst.msk [vmem:[%s15038_s7 + $0x26c] sm:$0xf] %vm10460_vm4, %v11939_v6  ;;  %v11833_v9 = vpack.c.bf16 %v9469_v2, %v9469_v2  ;;  %v11937_v63 = vpack.c.bf16 %v9573_v46, %v9573_v46  ;;  %v16808_v29 = vpop.f32.mrb[216].mxu1  ;;  %v16810_v41 = vpop.f32.mrb[217].mxu0  ;;  %v13621_v6 = vld [vmem:[%s13759_s28 + $0x550] sm:$0xff]  }
 0x2a7   : > { %v16817_v8 = vpop.f32.mrb[217].mxu1  ;;  %v16819_v1 = vpop.f32.mrb[218].mxu0 }
 0x2a8   : > { %10510 = vst.msk [vmem:[%s15038_s7 + $0xc4] sm:$0xf] %vm10460_vm4, %v11833_v9  ;;  %10614 = vst.msk [vmem:[%s15038_s7 + $0x264] sm:$0xf] %vm10460_vm4, %v11937_v63  ;;  %v16823_v62 = vpop.f32.mrb[218].mxu1  ;;  %v16825_v59 = vpop.f32.mrb[219].mxu0 }
 0x2a9   : > { %v16828_v37 = vpop.f32.mrb[219].mxu1  ;;  %v13622_v9 = vld [vmem:[%s13759_s28 + $0xbd0] sm:$0xff]  }
 0x2aa   : > { %12748 = vmatmul.mubr.msk.bf16.gmra.mrb[68].mxu0 %vm3131_vm2, %v13607_v25 }
 0x2ab   : > { %12751 = vmatprep.mubr.msk.bf16.mxu0 %vm3131_vm2, %v13609_v22 }
 0x2ac   : > { %13164 = vmatmul.mubr.msk.bf16.gmra.mrb[68].mxu1 %vm3131_vm2, %v13608_v58  ;;  %v16908_v58 = vsel %vm7748_vm3, %v16708_v57, -inf }
 0x2ad   : > { %13167 = vmatprep.mubr.msk.bf16.mxu1 %vm3131_vm2, %v13610_v43  ;;  %v16834_v20 = vpop.f32.mrb[220].mxu0 }
 0x2ae   : > { %v16836_v3 = vpop.f32.mrb[220].mxu1  ;;  %v16838_v13 = vpop.f32.mrb[221].mxu0 }
 0x2af   : > { %v16841_v26 = vpop.f32.mrb[221].mxu1  ;;  %v16843_v31 = vpop.f32.mrb[222].mxu0 }
 0x2b0   : > { %v16847_v52 = vpop.f32.mrb[222].mxu1  ;;  %v16849_v54 = vpop.f32.mrb[223].mxu0 }
 0x2b1   : > { %v16852_v7 = vpop.f32.mrb[223].mxu1 }
 0x2b2   : > { %12752 = vmatmul.mubr.msk.bf16.gmra.mrb[72].mxu0 %vm3131_vm2, %v13611_v44 }
 0x2b3   : > { %12755 = vmatprep.mubr.msk.bf16.mxu0 %vm3131_vm2, %v13613_v33  ;;  %v16918_v33 = vsel %vm7748_vm3, %v16713_v16, -inf }
 0x2b4   : > { %13168 = vmatmul.mubr.msk.bf16.gmra.mrb[72].mxu1 %vm3131_vm2, %v13612_v56  ;;  %v13623_v56 = vld [vmem:[%s13759_s28 + $0x558] sm:$0xff]   ;;  %19911 = vst [vmem:[#allocation8_spill] sm:$0xff] %v16918_v33 }
 0x2b5   : > { %13171 = vmatprep.mubr.msk.bf16.mxu1 %vm3131_vm2, %v13614_v61  ;;  %v16858_v0 = vpop.f32.mrb[224].mxu0 }
 0x2b6   : > { %v16860_v38 = vpop.f32.mrb[224].mxu1  ;;  %v16862_v34 = vpop.f32.mrb[225].mxu0 }
 0x2b7   : > { %v16865_v60 = vpop.f32.mrb[225].mxu1  ;;  %v16867_v21 = vpop.f32.mrb[226].mxu0 }
 0x2b8   : > { %v16871_v23 = vpop.f32.mrb[226].mxu1  ;;  %v16873_v10 = vpop.f32.mrb[227].mxu0 }
 0x2b9   : > { %v16876_v12 = vpop.f32.mrb[227].mxu1 }
 0x2ba   : > { %12756 = vmatmul.mubr.msk.bf16.gmra.mrb[76].mxu0 %vm3131_vm2, %v13615_v19 }
 0x2bb   : > { %12759 = vmatprep.mubr.msk.bf16.mxu0 %vm3131_vm2, %v13617_v18  ;;  %v13624_v18 = vld [vmem:[%s13759_s28 + $0xbd8] sm:$0xff]  }
 0x2bc   : > { %13172 = vmatmul.mubr.msk.bf16.gmra.mrb[76].mxu1 %vm3131_vm2, %v13616_v27 }
 0x2bd   : > { %13175 = vmatprep.mubr.msk.bf16.mxu1 %vm3131_vm2, %v13618_v14  ;;  %v16882_v40 = vpop.f32.mrb[228].mxu0  ;;  %v13625_v14 = vld [vmem:[%s13759_s28 + $0x560] sm:$0xff]  }
 0x2be   : > { %v16884_v42 = vpop.f32.mrb[228].mxu1  ;;  %v16886_v48 = vpop.f32.mrb[229].mxu0 }
 0x2bf   : > { %v16889_v47 = vpop.f32.mrb[229].mxu1  ;;  %v16891_v30 = vpop.f32.mrb[230].mxu0 }
 0x2c0   : > { %v16895_v2 = vpop.f32.mrb[230].mxu1  ;;  %v16897_v46 = vpop.f32.mrb[231].mxu0 }
 0x2c1   : > { %v16900_v63 = vpop.f32.mrb[231].mxu1 }
 0x2c2   : > { %12760 = vmatmul.mubr.msk.bf16.gmra.mrb[80].mxu0 %vm3131_vm2, %v13619_v50  ;;  %v16931_v50 = vsel %vm7748_vm3, %v16731_v15, -inf  ;;  %v16968_v15 = vsel %vm7748_vm3, %v16715_v51, -inf }
 0x2c3   : > { %12763 = vmatprep.mubr.msk.bf16.mxu0 %vm3131_vm2, %v13621_v6  ;;  %19913 = vst [vmem:[#allocation28_spill] sm:$0xff] %v16931_v50 }
 0x2c4   : > { %13176 = vmatmul.mubr.msk.bf16.gmra.mrb[80].mxu1 %vm3131_vm2, %v13620_v35 }
 0x2c5   : > { %13179 = vmatprep.mubr.msk.bf16.mxu1 %vm3131_vm2, %v13622_v9  ;;  %v12657_v25 = vpop.f32.mrb[232].mxu0 }
 0x2c6   : > { %v16911_v22 = vsel %vm7748_vm3, %v12657_v25, -inf  ;;  %v13073_v43 = vpop.f32.mrb[232].mxu1  ;;  %v16913_v44 = vpop.f32.mrb[233].mxu0  ;;  %v13626_v25 = vld [vmem:[%s13759_s28 + $0xbe0] sm:$0xff]  }
 0x2c7   : > { %19910 = vst [vmem:[#allocation7_spill] sm:$0xff] %v16911_v22  ;;  %v16923_v19 = vsel %vm7748_vm3, %v13073_v43, -inf  ;;  %v16925_v57 = vpop.f32.mrb[233].mxu1  ;;  %v12658_v27 = vpop.f32.mrb[234].mxu0  ;;  %v16943_v43 = vsel %vm7748_vm3, %v16734_v55, -inf  ;;  %v16960_v55 = vsel %vm7748_vm3, %v16698_v28, -inf }
 0x2c8   : > { %19912 = vst [vmem:[#allocation26_spill] sm:$0xff] %v16923_v19  ;;  %v16936_v16 = vsel %vm7748_vm3, %v12658_v27, -inf  ;;  %v13074_v6 = vpop.f32.mrb[234].mxu1  ;;  %v16938_v9 = vpop.f32.mrb[235].mxu0  ;;  %19915 = vst [vmem:[#allocation12_spill] sm:$0xff] %v16943_v43  ;;  %v13627_v27 = vld [vmem:[%s13759_s28 + $0x568] sm:$0xff]  }
 0x2c9   : > { %19914 = vst [vmem:[#allocation10_spill] sm:$0xff] %v16936_v16  ;;  %v16948_v61 = vsel %vm7748_vm3, %v13074_v6, -inf  ;;  %v16950_v35 = vpop.f32.mrb[235].mxu1  ;;  %v16964_v6 = vsel %vm7748_vm3, %v16706_v5, -inf  ;;  %v16978_v28 = vsel %vm7748_vm3, %v16775_v32, -inf  ;;  %v16982_v5 = vsel %vm7748_vm3, %v16787_v53, -inf }
 0x2ca   : > { %19916 = vst [vmem:[#allocation27_spill] sm:$0xff] %v16948_v61  ;;  %12764 = vmatmul.mubr.msk.bf16.gmra.mrb[84].mxu0 %vm3131_vm2, %v13623_v56  ;;  %19918 = vst [vmem:[#allocation11_spill] sm:$0xff] %v16978_v28  ;;  %v16989_v43 = vsel %vm7748_vm3, %v16792_v24, -inf }
 0x2cb   : > { %12767 = vmatprep.mubr.msk.bf16.mxu0 %vm3131_vm2, %v13625_v14  ;;  %v16974_v14 = vsel %vm7748_vm3, %v16768_v11, -inf  ;;  %19919 = vst [vmem:[#allocation13_spill] sm:$0xff] %v16982_v5  ;;  %19921 = vst [vmem:[#allocation33_spill] sm:$0xff] %v16989_v43 }
 0x2cc   : > { %13180 = vmatmul.mubr.msk.bf16.gmra.mrb[84].mxu1 %vm3131_vm2, %v13624_v18  ;;  %v13628_v18 = vld [vmem:[%s13759_s28 + $0xbe8] sm:$0xff]   ;;  %19917 = vst [vmem:[#allocation29_spill] sm:$0xff] %v16974_v14  ;;  %v13630_v14 = vld [vmem:[%s13759_s28 + $0xbf0] sm:$0xff]  }
 0x2cd   : > { %13183 = vmatprep.mubr.msk.bf16.mxu1 %vm3131_vm2, %v13626_v25  ;;  %v12661_v56 = vpop.f32.mrb[236].mxu0 }
 0x2ce   : > { %v16985_v25 = vsel %vm7748_vm3, %v12661_v56, -inf  ;;  %v13077_v51 = vpop.f32.mrb[236].mxu1  ;;  %v5365_v61 = vpop.f32.mrb[237].mxu0  ;;  %v13629_v56 = vld [vmem:[%s13759_s28 + $0x570] sm:$0xff]  }
 0x2cf   : > { %19920 = vst [vmem:[#allocation31_spill] sm:$0xff] %v16985_v25  ;;  %v16994_v32 = vsel %vm7748_vm3, %v13077_v51, -inf  ;;  %v16997_v16 = vsel %vm7748_vm3, %v5365_v61, -inf  ;;  %v7029_v53 = vpop.f32.mrb[237].mxu1  ;;  %v12662_v50 = vpop.f32.mrb[238].mxu0  ;;  %v17069_v61 = vsel %vm7748_vm3, %v16828_v37, -inf }
 0x2d0   : > { %19922 = vst [vmem:[#allocation14_spill] sm:$0xff] %v16994_v32  ;;  %v17005_v24 = vsel %vm7748_vm3, %v7029_v53, -inf  ;;  %v17008_v11 = vsel %vm7748_vm3, %v12662_v50, -inf  ;;  %v13078_v51 = vpop.f32.mrb[238].mxu1  ;;  %v5368_v25 = vpop.f32.mrb[239].mxu0  ;;  %v17023_v50 = vsel %vm7748_vm3, %v16729_v45, -inf }
 0x2d1   : > { %19923 = vst [vmem:[#allocation20_spill] sm:$0xff] %v17008_v11  ;;  %v17016_v19 = vsel %vm7748_vm3, %v13078_v51, -inf  ;;  %v17019_v33 = vsel %vm7748_vm3, %v5368_v25, -inf  ;;  %v7032_v53 = vpop.f32.mrb[239].mxu1  ;;  %v17040_v45 = vsel %vm7748_vm3, %v16764_v4, -inf  ;;  %v17044_v51 = vsel %vm7748_vm3, %v16766_v39, -inf }
 0x2d2   : > { %19924 = vst [vmem:[#allocation32_spill] sm:$0xff] %v17016_v19  ;;  %v17030_v22 = vsel %vm7748_vm3, %v7032_v53, -inf  ;;  %12768 = vmatmul.mubr.msk.bf16.gmra.mrb[88].mxu0 %vm3131_vm2, %v13627_v27  ;;  %v17048_v27 = vsel %vm7748_vm3, %v16777_v36, -inf  ;;  %v13631_v32 = vld [vmem:[%s13759_s28 + $0x578] sm:$0xff]   ;;  %v17058_v4 = vsel %vm7748_vm3, %v16817_v8, -inf  ;;  %v17062_v39 = vsel %vm7748_vm3, %v16825_v59, -inf }
 0x2d3   : > { %12771 = vmatprep.mubr.msk.bf16.mxu0 %vm3131_vm2, %v13629_v56  ;;  %v17054_v56 = vsel %vm7748_vm3, %v16810_v41, -inf  ;;  %19926 = vst [vmem:[#allocation19_spill] sm:$0xff] %v17058_v4  ;;  %19927 = vst [vmem:[#allocation35_spill] sm:$0xff] %v17062_v39 }
 0x2d4   : > { %13184 = vmatmul.mubr.msk.bf16.gmra.mrb[88].mxu1 %vm3131_vm2, %v13628_v18  ;;  %v13632_v18 = vld [vmem:[%s13759_s28 + $0xbf8] sm:$0xff]   ;;  %19925 = vst [vmem:[#allocation34_spill] sm:$0xff] %v17054_v56  ;;  %19929 = vst [vmem:[#allocation41_spill] sm:$0xff] %v17069_v61  ;;  %v13634_v56 = vld [vmem:[%s13759_s28 + $0xc00] sm:$0xff]  }
 0x2d5   : > { %13187 = vmatprep.mubr.msk.bf16.mxu1 %vm3131_vm2, %v13630_v14  ;;  %v12665_v53 = vpop.f32.mrb[240].mxu0 }
 0x2d6   : > { %v17065_v14 = vsel %vm7748_vm3, %v12665_v53, -inf  ;;  %v13081_v36 = vpop.f32.mrb[240].mxu1  ;;  %v5381_v25 = vpop.f32.mrb[241].mxu0  ;;  %v13633_v53 = vld [vmem:[%s13759_s28 + $0x580] sm:$0xff]  }
 0x2d7   : > { %19928 = vst [vmem:[#allocation39_spill] sm:$0xff] %v17065_v14  ;;  %v17074_v8 = vsel %vm7748_vm3, %v13081_v36, -inf  ;;  %v17077_v19 = vsel %vm7748_vm3, %v5381_v25, -inf  ;;  %v7045_v59 = vpop.f32.mrb[241].mxu1  ;;  %v12666_v43 = vpop.f32.mrb[242].mxu0  ;;  %v17149_v25 = vsel %vm7748_vm3, %v16852_v7, -inf }
 0x2d8   : > { %19930 = vst [vmem:[#allocation36_spill] sm:$0xff] %v17074_v8  ;;  %v17085_v37 = vsel %vm7748_vm3, %v7045_v59, -inf  ;;  %v17088_v41 = vsel %vm7748_vm3, %v12666_v43, -inf  ;;  %v13082_v36 = vpop.f32.mrb[242].mxu1  ;;  %v5384_v14 = vpop.f32.mrb[243].mxu0  ;;  %v17103_v43 = vsel %vm7748_vm3, %v16785_v17, -inf }
 0x2d9   : > { %19931 = vst [vmem:[#allocation38_spill] sm:$0xff] %v17088_v41  ;;  %v17096_v11 = vsel %vm7748_vm3, %v13082_v36, -inf  ;;  %v17099_v5 = vsel %vm7748_vm3, %v5384_v14, -inf  ;;  %v7048_v59 = vpop.f32.mrb[243].mxu1  ;;  %v17120_v17 = vsel %vm7748_vm3, %v16806_v49, -inf  ;;  %v17124_v36 = vsel %vm7748_vm3, %v16808_v29, -inf }
 0x2da   : > { %19932 = vst [vmem:[#allocation40_spill] sm:$0xff] %v17096_v11  ;;  %v17110_v28 = vsel %vm7748_vm3, %v7048_v59, -inf  ;;  %12772 = vmatmul.mubr.msk.bf16.gmra.mrb[92].mxu0 %vm3131_vm2, %v13631_v32  ;;  %v17128_v32 = vsel %vm7748_vm3, %v16819_v1, -inf  ;;  %v13635_v8 = vld [vmem:[%s13759_s28 + $0x588] sm:$0xff]   ;;  %v17138_v49 = vsel %vm7748_vm3, %v16841_v26, -inf  ;;  %v17142_v29 = vsel %vm7748_vm3, %v16849_v54, -inf }
 0x2db   : > { %12775 = vmatprep.mubr.msk.bf16.mxu0 %vm3131_vm2, %v13633_v53  ;;  %v17134_v53 = vsel %vm7748_vm3, %v16838_v13, -inf  ;;  %19934 = vst [vmem:[#allocation37_spill] sm:$0xff] %v17138_v49  ;;  %19935 = vst [vmem:[#allocation46_spill] sm:$0xff] %v17142_v29 }
 0x2dc   : > { %13188 = vmatmul.mubr.msk.bf16.gmra.mrb[92].mxu1 %vm3131_vm2, %v13632_v18  ;;  %v13636_v18 = vld [vmem:[%s13759_s28 + $0xc08] sm:$0xff]   ;;  %19933 = vst [vmem:[#allocation42_spill] sm:$0xff] %v17134_v53  ;;  %19937 = vst [vmem:[#allocation51_spill] sm:$0xff] %v17149_v25  ;;  %v13638_v53 = vld [vmem:[%s13759_s28 + $0xc10] sm:$0xff]  }
 0x2dd   : > { %13191 = vmatprep.mubr.msk.bf16.mxu1 %vm3131_vm2, %v13634_v56  ;;  %v12669_v59 = vpop.f32.mrb[244].mxu0 }
 0x2de   : > { %v17145_v56 = vsel %vm7748_vm3, %v12669_v59, -inf  ;;  %v13085_v1 = vpop.f32.mrb[244].mxu1  ;;  %v5397_v14 = vpop.f32.mrb[245].mxu0  ;;  %v13637_v59 = vld [vmem:[%s13759_s28 + $0x590] sm:$0xff]  }
 0x2df   : > { %19936 = vst [vmem:[#allocation43_spill] sm:$0xff] %v17145_v56  ;;  %v17154_v26 = vsel %vm7748_vm3, %v13085_v1, -inf  ;;  %v17157_v11 = vsel %vm7748_vm3, %v5397_v14, -inf  ;;  %v7061_v54 = vpop.f32.mrb[245].mxu1  ;;  %v12670_v61 = vpop.f32.mrb[246].mxu0  ;;  %v17229_v14 = vsel %vm7748_vm3, %v16876_v12, -inf }
 0x2e0   : > { %19938 = vst [vmem:[#allocation47_spill] sm:$0xff] %v17154_v26  ;;  %v17165_v7 = vsel %vm7748_vm3, %v7061_v54, -inf  ;;  %v17168_v13 = vsel %vm7748_vm3, %v12670_v61, -inf  ;;  %v13086_v1 = vpop.f32.mrb[246].mxu1  ;;  %v5400_v56 = vpop.f32.mrb[247].mxu0  ;;  %v17183_v61 = vsel %vm7748_vm3, %v16823_v62, -inf }
 0x2e1   : > { %19939 = vst [vmem:[#allocation61_spill] sm:$0xff] %v17168_v13  ;;  %v17176_v41 = vsel %vm7748_vm3, %v13086_v1, -inf  ;;  %v17179_v39 = vsel %vm7748_vm3, %v5400_v56, -inf  ;;  %v7064_v54 = vpop.f32.mrb[247].mxu1  ;;  %v17200_v62 = vsel %vm7748_vm3, %v16834_v20, -inf  ;;  %v17204_v1 = vsel %vm7748_vm3, %v16836_v3, -inf }
 0x2e2   : > { %19940 = vst [vmem:[#allocation45_spill] sm:$0xff] %v17176_v41  ;;  %v17190_v4 = vsel %vm7748_vm3, %v7064_v54, -inf  ;;  %12776 = vmatmul.mubr.msk.bf16.gmra.mrb[96].mxu0 %vm3131_vm2, %v13635_v8  ;;  %v17208_v8 = vsel %vm7748_vm3, %v16843_v31, -inf  ;;  %v13639_v26 = vld [vmem:[%s13759_s28 + $0x598] sm:$0xff]   ;;  %v17218_v20 = vsel %vm7748_vm3, %v16865_v60, -inf  ;;  %v17222_v3 = vsel %vm7748_vm3, %v16873_v10, -inf }
 0x2e3   : > { %12779 = vmatprep.mubr.msk.bf16.mxu0 %vm3131_vm2, %v13637_v59  ;;  %v17214_v59 = vsel %vm7748_vm3, %v16862_v34, -inf  ;;  %19942 = vst [vmem:[#allocation50_spill] sm:$0xff] %v17218_v20  ;;  %19943 = vst [vmem:[#allocation44_spill] sm:$0xff] %v17222_v3 }
 0x2e4   : > { %13192 = vmatmul.mubr.msk.bf16.gmra.mrb[96].mxu1 %vm3131_vm2, %v13636_v18  ;;  %v13640_v18 = vld [vmem:[%s13759_s28 + $0xc18] sm:$0xff]   ;;  %19941 = vst [vmem:[#allocation59_spill] sm:$0xff] %v17214_v59  ;;  %19945 = vst [vmem:[#allocation48_spill] sm:$0xff] %v17229_v14  ;;  %v13642_v59 = vld [vmem:[%s13759_s28 + $0xc20] sm:$0xff]  }
 0x2e5   : > { %13195 = vmatprep.mubr.msk.bf16.mxu1 %vm3131_vm2, %v13638_v53  ;;  %v12673_v54 = vpop.f32.mrb[248].mxu0 }
 0x2e6   : > { %v17225_v53 = vsel %vm7748_vm3, %v12673_v54, -inf  ;;  %v13089_v31 = vpop.f32.mrb[248].mxu1  ;;  %v5413_v56 = vpop.f32.mrb[249].mxu0  ;;  %v13641_v54 = vld [vmem:[%s13759_s28 + $0x5a0] sm:$0xff]  }
 0x2e7   : > { %19944 = vst [vmem:[#allocation60_spill] sm:$0xff] %v17225_v53  ;;  %v17234_v60 = vsel %vm7748_vm3, %v13089_v31, -inf  ;;  %v17237_v41 = vsel %vm7748_vm3, %v5413_v56, -inf  ;;  %v7077_v10 = vpop.f32.mrb[249].mxu1  ;;  %v12674_v25 = vpop.f32.mrb[250].mxu0  ;;  %v17309_v56 = vsel %vm7748_vm3, %v16900_v63, -inf }
 0x2e8   : > { %19946 = vst [vmem:[#allocation49_spill] sm:$0xff] %v17234_v60  ;;  %v17245_v12 = vsel %vm7748_vm3, %v7077_v10, -inf  ;;  %v17248_v34 = vsel %vm7748_vm3, %v12674_v25, -inf  ;;  %v13090_v31 = vpop.f32.mrb[250].mxu1  ;;  %v5416_v53 = vpop.f32.mrb[251].mxu0  ;;  %v17263_v25 = vsel %vm7748_vm3, %v16847_v52, -inf }
 0x2e9   : > { %19947 = vst [vmem:[#allocation57_spill] sm:$0xff] %v17248_v34  ;;  %v17256_v13 = vsel %vm7748_vm3, %v13090_v31, -inf  ;;  %v17259_v29 = vsel %vm7748_vm3, %v5416_v53, -inf  ;;  %v7080_v10 = vpop.f32.mrb[251].mxu1  ;;  %v17280_v52 = vsel %vm7748_vm3, %v16858_v0, -inf  ;;  %v17284_v31 = vsel %vm7748_vm3, %v16860_v38, -inf }
 0x2ea   : > { %19948 = vst [vmem:[#allocation52_spill] sm:$0xff] %v17256_v13  ;;  %v17270_v49 = vsel %vm7748_vm3, %v7080_v10, -inf  ;;  %12780 = vmatmul.mubr.msk.bf16.gmra.mrb[100].mxu0 %vm3131_vm2, %v13639_v26  ;;  %v17288_v26 = vsel %vm7748_vm3, %v16867_v21, -inf  ;;  %v13643_v60 = vld [vmem:[%s13759_s28 + $0x5a8] sm:$0xff]   ;;  %v17298_v0 = vsel %vm7748_vm3, %v16889_v47, -inf  ;;  %v17302_v38 = vsel %vm7748_vm3, %v16897_v46, -inf }
 0x2eb   : > { %12783 = vmatprep.mubr.msk.bf16.mxu0 %vm3131_vm2, %v13641_v54  ;;  %v17294_v54 = vsel %vm7748_vm3, %v16886_v48, -inf  ;;  %19950 = vst [vmem:[#allocation15_spill] sm:$0xff] %v17298_v0  ;;  %19951 = vst [vmem:[#allocation62_spill] sm:$0xff] %v17302_v38 }
 0x2ec   : > { %13196 = vmatmul.mubr.msk.bf16.gmra.mrb[100].mxu1 %vm3131_vm2, %v13640_v18  ;;  %v13644_v18 = vld [vmem:[%s13759_s28 + $0xc28] sm:$0xff]   ;;  %19949 = vst [vmem:[#allocation54_spill] sm:$0xff] %v17294_v54  ;;  %19953 = vst [vmem:[#allocation63_spill] sm:$0xff] %v17309_v56  ;;  %v13646_v54 = vld [vmem:[%s13759_s28 + $0xc30] sm:$0xff]  }
 0x2ed   : > { %13199 = vmatprep.mubr.msk.bf16.mxu1 %vm3131_vm2, %v13642_v59  ;;  %v12677_v10 = vpop.f32.mrb[252].mxu0 }
 0x2ee   : > { %v17305_v59 = vsel %vm7748_vm3, %v12677_v10, -inf  ;;  %v13093_v21 = vpop.f32.mrb[252].mxu1  ;;  %v5429_v53 = vpop.f32.mrb[253].mxu0  ;;  %v13645_v10 = vld [vmem:[%s13759_s28 + $0x5b0] sm:$0xff]  }
 0x2ef   : > { %19952 = vst [vmem:[#allocation2_spill] sm:$0xff] %v17305_v59  ;;  %v17314_v47 = vsel %vm7748_vm3, %v13093_v21, -inf  ;;  %v17317_v13 = vsel %vm7748_vm3, %v5429_v53, -inf  ;;  %v7093_v46 = vpop.f32.mrb[253].mxu1  ;;  %v12678_v14 = vpop.f32.mrb[254].mxu0  ;;  %v17389_v53 = vsel %vm7748_vm3, %v16950_v35, -inf }
 0x2f0   : > { %19954 = vst [vmem:[#allocation56_spill] sm:$0xff] %v17314_v47  ;;  %v17325_v63 = vsel %vm7748_vm3, %v7093_v46, -inf  ;;  %v17328_v48 = vsel %vm7748_vm3, %v12678_v14, -inf  ;;  %v13094_v21 = vpop.f32.mrb[254].mxu1  ;;  %v5432_v59 = vpop.f32.mrb[255].mxu0  ;;  %v17343_v14 = vsel %vm7748_vm3, %v16871_v23, -inf }
 0x2f1   : > { %19955 = vst [vmem:[#allocation58_spill] sm:$0xff] %v17328_v48  ;;  %v17336_v34 = vsel %vm7748_vm3, %v13094_v21, -inf  ;;  %v17339_v3 = vsel %vm7748_vm3, %v5432_v59, -inf  ;;  %v7096_v46 = vpop.f32.mrb[255].mxu1  ;;  %v17360_v23 = vsel %vm7748_vm3, %v16882_v40, -inf  ;;  %v17364_v21 = vsel %vm7748_vm3, %v16884_v42, -inf }
 0x2f2   : > { %19956 = vst [vmem:[#allocation53_spill] sm:$0xff] %v17336_v34  ;;  %v17350_v20 = vsel %vm7748_vm3, %v7096_v46, -inf  ;;  %12784 = vmatmul.mubr.msk.bf16.gmra.mrb[104].mxu0 %vm3131_vm2, %v13643_v60  ;;  %v17368_v60 = vsel %vm7748_vm3, %v16891_v30, -inf  ;;  %v13647_v47 = vld [vmem:[%s13759_s28 + $0x5b8] sm:$0xff]   ;;  %v17378_v40 = vsel %vm7748_vm3, %v16925_v57, -inf  ;;  %v17382_v42 = vsel %vm7748_vm3, %v16938_v9, -inf }
 0x2f3   : > { %12787 = vmatprep.mubr.msk.bf16.mxu0 %vm3131_vm2, %v13645_v10  ;;  %19957 = vst [vmem:[#allocation55_spill] sm:$0xff] %v17368_v60  ;;  %v17374_v10 = vsel %vm7748_vm3, %v16913_v44, -inf  ;;  %19959 = vst [vmem:[#allocation17_spill] sm:$0xff] %v17378_v40  ;;  %v19972_v40 = vld [vmem:[#allocation7_spill] sm:$0xff] }
 0x2f4   : > { %13200 = vmatmul.mubr.msk.bf16.gmra.mrb[104].mxu1 %vm3131_vm2, %v13644_v18  ;;  %v13648_v18 = vld [vmem:[%s13759_s28 + $0xc38] sm:$0xff]   ;;  %19958 = vst [vmem:[#allocation16_spill] sm:$0xff] %v17374_v10  ;;  %19960 = vst [vmem:[#allocation25_spill] sm:$0xff] %v17382_v42  ;;  %v13650_v10 = vld [vmem:[%s13759_s28 + $0xc40] sm:$0xff]  }
 0x2f5   : > { %13203 = vmatprep.mubr.msk.bf16.mxu1 %vm3131_vm2, %v13646_v54  ;;  %v12681_v46 = vpop.f32.mrb[0].mxu0  ;;  %19962 = vst [vmem:[#allocation3_spill] sm:$0xff] %v17389_v53 }
 0x2f6   : > { %v17385_v54 = vsel %vm7748_vm3, %v12681_v46, -inf  ;;  %v13097_v30 = vpop.f32.mrb[0].mxu1  ;;  %v5445_v59 = vpop.f32.mrb[1].mxu0  ;;  %v13649_v46 = vld [vmem:[%s13759_s28 + $0x5c0] sm:$0xff]  }
 0x2f7   : > { %19961 = vst [vmem:[#allocation4_spill] sm:$0xff] %v17385_v54  ;;  %v17394_v57 = vsel %vm7748_vm3, %v13097_v30, -inf  ;;  %v17397_v34 = vsel %vm7748_vm3, %v5445_v59, -inf  ;;  %v7109_v9 = vpop.f32.mrb[1].mxu1  ;;  %v12682_v56 = vpop.f32.mrb[2].mxu0  ;;  %v13651_v59 = vld [vmem:[%s13759_s28 + $0x5c8] sm:$0xff]  }
 0x2f8   : > { %19963 = vst [vmem:[#allocation24_spill] sm:$0xff] %v17394_v57  ;;  %v17405_v35 = vsel %vm7748_vm3, %v7109_v9, -inf  ;;  %v17408_v44 = vsel %vm7748_vm3, %v12682_v56, -inf  ;;  %v13098_v30 = vpop.f32.mrb[2].mxu1  ;;  %v5448_v54 = vpop.f32.mrb[3].mxu0  ;;  %v17423_v56 = vsel %vm7748_vm3, %v16895_v2, -inf }
 0x2f9   : > { %19964 = vst [vmem:[#allocation18_spill] sm:$0xff] %v17408_v44  ;;  %v17416_v48 = vsel %vm7748_vm3, %v13098_v30, -inf  ;;  %v17419_v38 = vsel %vm7748_vm3, %v5448_v54, -inf  ;;  %v7112_v9 = vpop.f32.mrb[3].mxu1  ;;  %19967 = vst [vmem:[#allocation6_spill] sm:$0xff] %v17423_v56  ;;  %v13652_v44 = vld [vmem:[%s13759_s28 + $0xc48] sm:$0xff]  }
 0x2fa   : > { %19965 = vst [vmem:[#allocation9_spill] sm:$0xff] %v17416_v48  ;;  %19966 = vst [vmem:[#allocation5_spill] sm:$0xff] %v17419_v38  ;;  %v17430_v0 = vsel %vm7748_vm3, %v7112_v9, -inf  ;;  %12788 = vmatmul.mubr.msk.bf16.gmra.mrb[108].mxu0 %vm3131_vm2, %v13647_v47  ;;  %v19969_v47 = vmax.f32 %v16960_v55, %v16997_v16 }
 0x2fb   : > { %19968 = vst [vmem:[#allocation21_spill] sm:$0xff] %v17430_v0  ;;  %12791 = vmatprep.mubr.msk.bf16.mxu0 %vm3131_vm2, %v13649_v46  ;;  %v19973_v0 = vmax.f32 %v16908_v58, %v19972_v40  ;;  %v19978_v40 = vmax.f32 %v17023_v50, %v17030_v22 }
 0x2fc   : > { %13204 = vmatmul.mubr.msk.bf16.gmra.mrb[108].mxu1 %vm3131_vm2, %v13648_v18 }
 0x2fd   : > { %13207 = vmatprep.mubr.msk.bf16.mxu1 %vm3131_vm2, %v13650_v10  ;;  %v12685_v2 = vpop.f32.mrb[4].mxu0  ;;  %v13653_v10 = vld [vmem:[%s13759_s28 + $0x5d0] sm:$0xff]  }
 0x2fe   : > { %v8130_v30 = vsel %vm7748_vm3, %v12685_v2, -inf  ;;  %v13101_v57 = vpop.f32.mrb[4].mxu1  ;;  %v5461_v9 = vpop.f32.mrb[5].mxu0  ;;  %v19971_v2 = vmax.f32 %v16964_v6, %v17005_v24  ;;  %v19977_v6 = vmax.f32 %v16968_v15, %v17019_v33  ;;  %v19982_v15 = vld [vmem:[#allocation12_spill] sm:$0xff] }
 0x2ff   : > { %v17443_v48 = vmax.f32 %v19969_v47, %v8130_v30  ;;  %v8858_v54 = vsel %vm7748_vm3, %v13101_v57, -inf  ;;  %v8116_v18 = vsel %vm7748_vm3, %v5461_v9, -inf  ;;  %v7125_v53 = vpop.f32.mrb[5].mxu1  ;;  %v12686_v46 = vpop.f32.mrb[6].mxu0  ;;  %v13654_v9 = vld [vmem:[%s13759_s28 + $0xc50] sm:$0xff]  }
 0x300   : > { %v17452_v42 = vmax.f32 %v19971_v2, %v8858_v54  ;;  %v17457_v56 = vmax.f32 %v19973_v0, %v8116_v18  ;;  %v8844_v16 = vsel %vm7748_vm3, %v7125_v53, -inf  ;;  %v8137_v55 = vsel %vm7748_vm3, %v12686_v46, -inf  ;;  %v13102_v57 = vpop.f32.mrb[6].mxu1  ;;  %v5464_v30 = vpop.f32.mrb[7].mxu0  ;;  %v19974_v47 = vld [vmem:[#allocation8_spill] sm:$0xff]  ;;  %v19983_v2 = vld [vmem:[#allocation27_spill] sm:$0xff] }
 0x301   : > { %19970 = vst [vmem:[#allocation22_spill] sm:$0xff] %v17443_v48  ;;  %v19975_v48 = vld [vmem:[#allocation26_spill] sm:$0xff]  ;;  %v17470_v24 = vmax.f32 %v19977_v6, %v8137_v55  ;;  %v8865_v58 = vsel %vm7748_vm3, %v13102_v57, -inf  ;;  %v8123_v0 = vsel %vm7748_vm3, %v5464_v30, -inf  ;;  %v7128_v53 = vpop.f32.mrb[7].mxu1  ;;  %v19979_v18 = vld [vmem:[#allocation28_spill] sm:$0xff] }
 0x302   : > { %v19976_v38 = vmax.f32 %v19974_v47, %v19975_v48  ;;  %v17477_v54 = vmax.f32 %v19978_v40, %v8865_v58  ;;  %v19980_v48 = vld [vmem:[#allocation10_spill] sm:$0xff]  ;;  %v8851_v33 = vsel %vm7748_vm3, %v7128_v53, -inf  ;;  %12792 = vmatmul.mubr.msk.bf16.gmra.mrb[112].mxu0 %vm3131_vm2, %v13651_v59  ;;  %v13655_v47 = vld [vmem:[%s13759_s28 + $0x5d8] sm:$0xff]   ;;  %v19985_v59 = vmax.f32 %v17040_v45, %v17077_v19 }
 0x303   : > { %12795 = vmatprep.mubr.msk.bf16.mxu0 %vm3131_vm2, %v13653_v10  ;;  %v13656_v53 = vld [vmem:[%s13759_s28 + $0xc58] sm:$0xff]   ;;  %v19986_v40 = vmax.f32 %v17044_v51, %v17085_v37  ;;  %v19993_v51 = vmax.f32 %v17048_v27, %v17099_v5 }
 0x304   : > { %v17465_v60 = vmax.f32 %v19976_v38, %v8844_v16  ;;  %v19981_v38 = vmax.f32 %v19979_v18, %v19980_v48  ;;  %v19984_v16 = vmax.f32 %v19982_v15, %v19983_v2  ;;  %13208 = vmatmul.mubr.msk.bf16.gmra.mrb[112].mxu1 %vm3131_vm2, %v13652_v44  ;;  %v19987_v48 = vld [vmem:[#allocation29_spill] sm:$0xff] }
 0x305   : > { %13211 = vmatprep.mubr.msk.bf16.mxu1 %vm3131_vm2, %v13654_v9  ;;  %v12689_v22 = vpop.f32.mrb[8].mxu0  ;;  %v13657_v9 = vld [vmem:[%s13759_s28 + $0x5e0] sm:$0xff]   ;;  %v19998_v27 = vld [vmem:[#allocation33_spill] sm:$0xff] }
 0x306   : > { %v17482_v46 = vmax.f32 %v19981_v38, %v8123_v0  ;;  %v17489_v55 = vmax.f32 %v19984_v16, %v8851_v33  ;;  %v8158_v50 = vsel %vm7748_vm3, %v12689_v22, -inf  ;;  %v13105_v57 = vpop.f32.mrb[8].mxu1  ;;  %v5477_v30 = vpop.f32.mrb[9].mxu0  ;;  %v19988_v38 = vld [vmem:[#allocation31_spill] sm:$0xff]  ;;  %v13658_v22 = vld [vmem:[%s13759_s28 + $0xc60] sm:$0xff]  }
 0x307   : > { %v17499_v6 = vmax.f32 %v19985_v59, %v8158_v50  ;;  %v8886_v58 = vsel %vm7748_vm3, %v13105_v57, -inf  ;;  %v8144_v44 = vsel %vm7748_vm3, %v5477_v30, -inf  ;;  %v7141_v0 = vpop.f32.mrb[9].mxu1  ;;  %v12690_v10 = vpop.f32.mrb[10].mxu0  ;;  %v19989_v33 = vmax.f32 %v19987_v48, %v19988_v38  ;;  %v19990_v50 = vld [vmem:[#allocation11_spill] sm:$0xff]  ;;  %v19991_v57 = vld [vmem:[#allocation14_spill] sm:$0xff] }
 0x308   : > { %v17508_v18 = vmax.f32 %v19986_v40, %v8886_v58  ;;  %v8872_v19 = vsel %vm7748_vm3, %v7141_v0, -inf  ;;  %v8165_v45 = vsel %vm7748_vm3, %v12690_v10, -inf  ;;  %v13106_v2 = vpop.f32.mrb[10].mxu1  ;;  %v5480_v16 = vpop.f32.mrb[11].mxu0  ;;  %v19992_v30 = vmax.f32 %v19990_v50, %v19991_v57  ;;  %v19995_v48 = vld [vmem:[#allocation13_spill] sm:$0xff]  ;;  %v19996_v38 = vld [vmem:[#allocation20_spill] sm:$0xff] }
 0x309   : > { %v17513_v15 = vmax.f32 %v19989_v33, %v8144_v44  ;;  %v17526_v37 = vmax.f32 %v19993_v51, %v8165_v45  ;;  %v8893_v58 = vsel %vm7748_vm3, %v13106_v2, -inf  ;;  %v8151_v44 = vsel %vm7748_vm3, %v5480_v16, -inf  ;;  %v7144_v0 = vpop.f32.mrb[11].mxu1  ;;  %v19999_v45 = vld [vmem:[#allocation32_spill] sm:$0xff] }
 0x30a   : > { %v17521_v59 = vmax.f32 %v19992_v30, %v8872_v19  ;;  %v19994_v10 = vmax.f32 %v17103_v43, %v17110_v28  ;;  %v19997_v33 = vmax.f32 %v19995_v48, %v19996_v38  ;;  %v8879_v5 = vsel %vm7748_vm3, %v7144_v0, -inf  ;;  %12796 = vmatmul.mubr.msk.bf16.gmra.mrb[116].mxu0 %vm3131_vm2, %v13655_v47  ;;  %v13659_v30 = vld [vmem:[%s13759_s28 + $0x5e8] sm:$0xff]   ;;  %v20003_v38 = vld [vmem:[#allocation34_spill] sm:$0xff] }
 0x30b   : > { %v20000_v2 = vmax.f32 %v19998_v27, %v19999_v45  ;;  %12799 = vmatprep.mubr.msk.bf16.mxu0 %vm3131_vm2, %v13657_v9  ;;  %v20001_v47 = vmax.f32 %v17120_v17, %v17157_v11  ;;  %v13660_v0 = vld [vmem:[%s13759_s28 + $0xc68] sm:$0xff]  }
 0x30c   : > { %v17533_v40 = vmax.f32 %v19994_v10, %v8893_v58  ;;  %v17538_v19 = vmax.f32 %v19997_v33, %v8151_v44  ;;  %13212 = vmatmul.mubr.msk.bf16.gmra.mrb[116].mxu1 %vm3131_vm2, %v13656_v53  ;;  %v20002_v10 = vmax.f32 %v17124_v36, %v17165_v7  ;;  %v20004_v33 = vld [vmem:[#allocation39_spill] sm:$0xff]  ;;  %v20009_v36 = vmax.f32 %v17128_v32, %v17179_v39  ;;  %v20014_v32 = vld [vmem:[#allocation41_spill] sm:$0xff] }
 0x30d   : > { %v17545_v16 = vmax.f32 %v20000_v2, %v8879_v5  ;;  %13215 = vmatprep.mubr.msk.bf16.mxu1 %vm3131_vm2, %v13658_v22  ;;  %v12693_v28 = vpop.f32.mrb[12].mxu0  ;;  %v13661_v22 = vld [vmem:[%s13759_s28 + $0x5f0] sm:$0xff]   ;;  %v20005_v5 = vmax.f32 %v20003_v38, %v20004_v33  ;;  %v20011_v38 = vld [vmem:[#allocation35_spill] sm:$0xff]  ;;  %v20012_v33 = vld [vmem:[#allocation38_spill] sm:$0xff] }
 0x30e   : > { %v8186_v43 = vsel %vm7748_vm3, %v12693_v28, -inf  ;;  %v13109_v50 = vpop.f32.mrb[12].mxu1  ;;  %v5493_v57 = vpop.f32.mrb[13].mxu0  ;;  %v13662_v28 = vld [vmem:[%s13759_s28 + $0xc70] sm:$0xff]  }
 0x30f   : > { %v17555_v51 = vmax.f32 %v20001_v47, %v8186_v43  ;;  %v8914_v58 = vsel %vm7748_vm3, %v13109_v50, -inf  ;;  %v8172_v53 = vsel %vm7748_vm3, %v5493_v57, -inf  ;;  %v7157_v44 = vpop.f32.mrb[13].mxu1  ;;  %v12694_v9 = vpop.f32.mrb[14].mxu0  ;;  %v20006_v43 = vld [vmem:[#allocation19_spill] sm:$0xff]  ;;  %v20007_v50 = vld [vmem:[#allocation36_spill] sm:$0xff] }
 0x310   : > { %v17564_v48 = vmax.f32 %v20002_v10, %v8914_v58  ;;  %v17569_v27 = vmax.f32 %v20005_v5, %v8172_v53  ;;  %v8900_v11 = vsel %vm7748_vm3, %v7157_v44, -inf  ;;  %v8193_v17 = vsel %vm7748_vm3, %v12694_v9, -inf  ;;  %v13110_v45 = vpop.f32.mrb[14].mxu1  ;;  %v5496_v2 = vpop.f32.mrb[15].mxu0 }
 0x311   : > { %v20008_v57 = vmax.f32 %v20006_v43, %v20007_v50  ;;  %v17582_v7 = vmax.f32 %v20009_v36, %v8193_v17  ;;  %v8921_v58 = vsel %vm7748_vm3, %v13110_v45, -inf  ;;  %v8179_v53 = vsel %vm7748_vm3, %v5496_v2, -inf  ;;  %v7160_v44 = vpop.f32.mrb[15].mxu1  ;;  %v20015_v17 = vld [vmem:[#allocation40_spill] sm:$0xff] }
 0x312   : > { %v20010_v9 = vmax.f32 %v17183_v61, %v17190_v4  ;;  %v20013_v5 = vmax.f32 %v20011_v38, %v20012_v33  ;;  %v8907_v39 = vsel %vm7748_vm3, %v7160_v44, -inf  ;;  %12800 = vmatmul.mubr.msk.bf16.gmra.mrb[120].mxu0 %vm3131_vm2, %v13659_v30  ;;  %v20016_v45 = vmax.f32 %v20014_v32, %v20015_v17  ;;  %v13664_v44 = vld [vmem:[%s13759_s28 + $0xc78] sm:$0xff]   ;;  %v20019_v33 = vld [vmem:[#allocation42_spill] sm:$0xff] }
 0x313   : > { %v17577_v47 = vmax.f32 %v20008_v57, %v8900_v11  ;;  %12803 = vmatprep.mubr.msk.bf16.mxu0 %vm3131_vm2, %v13661_v22  ;;  %v13663_v57 = vld [vmem:[%s13759_s28 + $0x5f8] sm:$0xff]   ;;  %v20017_v30 = vmax.f32 %v17200_v62, %v17237_v41 }
 0x314   : > { %v17589_v10 = vmax.f32 %v20010_v9, %v8921_v58  ;;  %v17594_v11 = vmax.f32 %v20013_v5, %v8179_v53  ;;  %v17601_v2 = vmax.f32 %v20016_v45, %v8907_v39  ;;  %13216 = vmatmul.mubr.msk.bf16.gmra.mrb[120].mxu1 %vm3131_vm2, %v13660_v0  ;;  %v20018_v9 = vmax.f32 %v17204_v1, %v17245_v12  ;;  %v20020_v5 = vld [vmem:[#allocation43_spill] sm:$0xff] }
 0x315   : > { %13219 = vmatprep.mubr.msk.bf16.mxu1 %vm3131_vm2, %v13662_v28  ;;  %v12697_v4 = vpop.f32.mrb[16].mxu0  ;;  %v13665_v28 = vld [vmem:[%s13759_s28 + $0x600] sm:$0xff]   ;;  %v20021_v39 = vmax.f32 %v20019_v33, %v20020_v5  ;;  %v20025_v1 = vmax.f32 %v17208_v8, %v17259_v29  ;;  %v20028_v5 = vld [vmem:[#allocation61_spill] sm:$0xff]  ;;  %v20030_v8 = vld [vmem:[#allocation51_spill] sm:$0xff] }
 0x316   : > { %v8214_v61 = vsel %vm7748_vm3, %v12697_v4, -inf  ;;  %v13113_v43 = vpop.f32.mrb[16].mxu1  ;;  %v5509_v50 = vpop.f32.mrb[17].mxu0  ;;  %v13666_v4 = vld [vmem:[%s13759_s28 + $0xc80] sm:$0xff]  }
 0x317   : > { %v17611_v36 = vmax.f32 %v20017_v30, %v8214_v61  ;;  %v8942_v58 = vsel %vm7748_vm3, %v13113_v43, -inf  ;;  %v8200_v0 = vsel %vm7748_vm3, %v5509_v50, -inf  ;;  %v7173_v53 = vpop.f32.mrb[17].mxu1  ;;  %v12698_v22 = vpop.f32.mrb[18].mxu0  ;;  %v20022_v61 = vld [vmem:[#allocation37_spill] sm:$0xff]  ;;  %v20023_v43 = vld [vmem:[#allocation47_spill] sm:$0xff] }
 0x318   : > { %v17620_v38 = vmax.f32 %v20018_v9, %v8942_v58  ;;  %v17625_v32 = vmax.f32 %v20021_v39, %v8200_v0  ;;  %v8928_v41 = vsel %vm7748_vm3, %v7173_v53, -inf  ;;  %v8221_v62 = vsel %vm7748_vm3, %v12698_v22, -inf  ;;  %v13114_v17 = vpop.f32.mrb[18].mxu1  ;;  %v5512_v45 = vpop.f32.mrb[19].mxu0  ;;  %v20027_v33 = vld [vmem:[#allocation46_spill] sm:$0xff] }
 0x319   : > { %v20024_v50 = vmax.f32 %v20022_v61, %v20023_v43  ;;  %v17638_v12 = vmax.f32 %v20025_v1, %v8221_v62  ;;  %v8949_v58 = vsel %vm7748_vm3, %v13114_v17, -inf  ;;  %v8207_v0 = vsel %vm7748_vm3, %v5512_v45, -inf  ;;  %v7176_v53 = vpop.f32.mrb[19].mxu1  ;;  %v20031_v62 = vld [vmem:[#allocation45_spill] sm:$0xff] }
 0x31a   : > { %v20026_v22 = vmax.f32 %v17263_v25, %v17270_v49  ;;  %v20029_v39 = vmax.f32 %v20027_v33, %v20028_v5  ;;  %v8935_v29 = vsel %vm7748_vm3, %v7176_v53, -inf  ;;  %12804 = vmatmul.mubr.msk.bf16.gmra.mrb[124].mxu0 %vm3131_vm2, %v13663_v57  ;;  %v20032_v17 = vmax.f32 %v20030_v8, %v20031_v62  ;;  %v13668_v53 = vld [vmem:[%s13759_s28 + $0xc88] sm:$0xff]  }
 0x31b   : > { %v17633_v30 = vmax.f32 %v20024_v50, %v8928_v41  ;;  %12807 = vmatprep.mubr.msk.bf16.mxu0 %vm3131_vm2, %v13665_v28  ;;  %v13667_v50 = vld [vmem:[%s13759_s28 + $0x608] sm:$0xff]   ;;  %v20033_v57 = vmax.f32 %v17280_v52, %v17317_v13 }
 0x31c   : > { %v17645_v9 = vmax.f32 %v20026_v22, %v8949_v58  ;;  %v17650_v41 = vmax.f32 %v20029_v39, %v8207_v0  ;;  %v17657_v45 = vmax.f32 %v20032_v17, %v8935_v29  ;;  %13220 = vmatmul.mubr.msk.bf16.gmra.mrb[124].mxu1 %vm3131_vm2, %v13664_v44  ;;  %v20034_v22 = vmax.f32 %v17284_v31, %v17325_v63  ;;  %v20035_v5 = vld [vmem:[#allocation59_spill] sm:$0xff]  ;;  %v20036_v39 = vld [vmem:[#allocation60_spill] sm:$0xff] }
 0x31d   : > { %13223 = vmatprep.mubr.msk.bf16.mxu1 %vm3131_vm2, %v13666_v4  ;;  %v12701_v49 = vpop.f32.mrb[20].mxu0  ;;  %v13669_v4 = vld [vmem:[%s13759_s28 + $0x610] sm:$0xff]   ;;  %v20037_v29 = vmax.f32 %v20035_v5, %v20036_v39  ;;  %v20041_v31 = vmax.f32 %v17288_v26, %v17339_v3  ;;  %v20044_v39 = vld [vmem:[#allocation57_spill] sm:$0xff] }
 0x31e   : > { %v8242_v25 = vsel %vm7748_vm3, %v12701_v49, -inf  ;;  %v13117_v61 = vpop.f32.mrb[20].mxu1  ;;  %v5525_v43 = vpop.f32.mrb[21].mxu0  ;;  %v13670_v49 = vld [vmem:[%s13759_s28 + $0xc90] sm:$0xff]  }
 0x31f   : > { %v17667_v1 = vmax.f32 %v20033_v57, %v8242_v25  ;;  %v8970_v58 = vsel %vm7748_vm3, %v13117_v61, -inf  ;;  %v8228_v44 = vsel %vm7748_vm3, %v5525_v43, -inf  ;;  %v7189_v0 = vpop.f32.mrb[21].mxu1  ;;  %v12702_v28 = vpop.f32.mrb[22].mxu0  ;;  %v20038_v25 = vld [vmem:[#allocation50_spill] sm:$0xff]  ;;  %v20039_v61 = vld [vmem:[#allocation49_spill] sm:$0xff] }
 0x320   : > { %v17676_v33 = vmax.f32 %v20034_v22, %v8970_v58  ;;  %v17681_v8 = vmax.f32 %v20037_v29, %v8228_v44  ;;  %v8956_v13 = vsel %vm7748_vm3, %v7189_v0, -inf  ;;  %v8249_v52 = vsel %vm7748_vm3, %v12702_v28, -inf  ;;  %v13118_v62 = vpop.f32.mrb[22].mxu1  ;;  %v5528_v17 = vpop.f32.mrb[23].mxu0  ;;  %v20043_v5 = vld [vmem:[#allocation44_spill] sm:$0xff] }
 0x321   : > { %v20040_v43 = vmax.f32 %v20038_v25, %v20039_v61  ;;  %v17694_v63 = vmax.f32 %v20041_v31, %v8249_v52  ;;  %v8977_v58 = vsel %vm7748_vm3, %v13118_v62, -inf  ;;  %v8235_v44 = vsel %vm7748_vm3, %v5528_v17, -inf  ;;  %v7192_v0 = vpop.f32.mrb[23].mxu1  ;;  %v20046_v26 = vld [vmem:[#allocation48_spill] sm:$0xff] }
 0x322   : > { %v20042_v28 = vmax.f32 %v17343_v14, %v17350_v20  ;;  %v20045_v29 = vmax.f32 %v20043_v5, %v20044_v39  ;;  %v8963_v3 = vsel %vm7748_vm3, %v7192_v0, -inf  ;;  %12808 = vmatmul.mubr.msk.bf16.gmra.mrb[128].mxu0 %vm3131_vm2, %v13667_v50  ;;  %v20047_v52 = vld [vmem:[#allocation52_spill] sm:$0xff]  ;;  %v20049_v50 = vmax.f32 %v17360_v23, %v17397_v34  ;;  %v13672_v0 = vld [vmem:[%s13759_s28 + $0xc98] sm:$0xff]   ;;  %v20053_v39 = vld [vmem:[#allocation54_spill] sm:$0xff] }
 0x323   : > { %v17689_v57 = vmax.f32 %v20040_v43, %v8956_v13  ;;  %v20048_v62 = vmax.f32 %v20046_v26, %v20047_v52  ;;  %12811 = vmatprep.mubr.msk.bf16.mxu0 %vm3131_vm2, %v13669_v4  ;;  %v13671_v43 = vld [vmem:[%s13759_s28 + $0x618] sm:$0xff]  }
 0x324   : > { %v17701_v22 = vmax.f32 %v20042_v28, %v8977_v58  ;;  %v17706_v13 = vmax.f32 %v20045_v29, %v8235_v44  ;;  %13224 = vmatmul.mubr.msk.bf16.gmra.mrb[128].mxu1 %vm3131_vm2, %v13668_v53  ;;  %v20051_v28 = vmax.f32 %v17364_v21, %v17405_v35  ;;  %v20054_v29 = vld [vmem:[#allocation2_spill] sm:$0xff]  ;;  %v20059_v21 = vld [vmem:[#allocation55_spill] sm:$0xff]  ;;  %v20060_v35 = vld [vmem:[#allocation5_spill] sm:$0xff] }
 0x325   : > { %v17713_v17 = vmax.f32 %v20048_v62, %v8963_v3  ;;  %13227 = vmatprep.mubr.msk.bf16.mxu1 %vm3131_vm2, %v13670_v49  ;;  %v12705_v20 = vpop.f32.mrb[24].mxu0  ;;  %v13673_v49 = vld [vmem:[%s13759_s28 + $0x620] sm:$0xff]   ;;  %v20055_v3 = vmax.f32 %v20053_v39, %v20054_v29  ;;  %v20064_v29 = vld [vmem:[#allocation21_spill] sm:$0xff] }
 0x326   : > { %v8270_v14 = vsel %vm7748_vm3, %v12705_v20, -inf  ;;  %v13121_v25 = vpop.f32.mrb[24].mxu1  ;;  %v5541_v61 = vpop.f32.mrb[25].mxu0  ;;  %v13674_v20 = vld [vmem:[%s13759_s28 + $0xca0] sm:$0xff]  }
 0x327   : > { %v17723_v31 = vmax.f32 %v20049_v50, %v8270_v14  ;;  %v8998_v58 = vsel %vm7748_vm3, %v13121_v25, -inf  ;;  %v8256_v53 = vsel %vm7748_vm3, %v5541_v61, -inf  ;;  %v7205_v44 = vpop.f32.mrb[25].mxu1  ;;  %v12706_v4 = vpop.f32.mrb[26].mxu0  ;;  %v20056_v14 = vld [vmem:[#allocation15_spill] sm:$0xff]  ;;  %v20057_v25 = vld [vmem:[#allocation56_spill] sm:$0xff] }
 0x328   : > { %v17732_v5 = vmax.f32 %v20051_v28, %v8998_v58  ;;  %v17737_v26 = vmax.f32 %v20055_v3, %v8256_v53  ;;  %v8984_v34 = vsel %vm7748_vm3, %v7205_v44, -inf  ;;  %v8277_v23 = vsel %vm7748_vm3, %v12706_v4, -inf  ;;  %v13122_v52 = vpop.f32.mrb[26].mxu1  ;;  %v5544_v62 = vpop.f32.mrb[27].mxu0  ;;  %v20063_v4 = vld [vmem:[#allocation6_spill] sm:$0xff] }
 0x329   : > { %20050 = vst [vmem:[#allocation30_spill] sm:$0xff] %v17723_v31  ;;  %v20058_v61 = vmax.f32 %v20056_v14, %v20057_v25  ;;  %v20061_v58 = vmax.f32 %v20059_v21, %v20060_v35  ;;  %v9005_v53 = vsel %vm7748_vm3, %v13122_v52, -inf  ;;  %v8263_v44 = vsel %vm7748_vm3, %v5544_v62, -inf  ;;  %v7208_v39 = vpop.f32.mrb[27].mxu1  ;;  %v20067_v31 = vld [vmem:[#allocation62_spill] sm:$0xff]  ;;  %v20071_v52 = vld [vmem:[#allocation53_spill] sm:$0xff] }
 0x32a   : > { %20052 = vst [vmem:[#allocation23_spill] sm:$0xff] %v17732_v5  ;;  %v20065_v3 = vmax.f32 %v20063_v4, %v20064_v29  ;;  %v20068_v14 = vld [vmem:[#allocation58_spill] sm:$0xff]  ;;  %12812 = vmatmul.mubr.msk.bf16.gmra.mrb[132].mxu0 %vm3131_vm2, %v13671_v43 }
 0x32b   : > { %v17745_v50 = vmax.f32 %v20058_v61, %v8984_v34  ;;  %v17750_v28 = vmax.f32 %v20061_v58, %v8277_v23  ;;  %v20069_v34 = vmax.f32 %v20067_v31, %v20068_v14  ;;  %v8991_v61 = vsel %vm7748_vm3, %v7208_v39, -inf  ;;  %v20070_v23 = vld [vmem:[#allocation63_spill] sm:$0xff]  ;;  %12815 = vmatprep.mubr.msk.bf16.mxu0 %vm3131_vm2, %v13673_v49  ;;  %v13677_v14 = vld [vmem:[%s13759_s28 + $0x630] sm:$0xff]  }
 0x32c   : > { %v17757_v5 = vmax.f32 %v20065_v3, %v9005_v53  ;;  %v20072_v21 = vmax.f32 %v20070_v23, %v20071_v52  ;;  %13228 = vmatmul.mubr.msk.bf16.gmra.mrb[132].mxu1 %vm3131_vm2, %v13672_v0  ;;  %v13676_v0 = vld [vmem:[%s13759_s28 + $0xca8] sm:$0xff]  }
 0x32d   : > { %20062 = vst [vmem:[#allocation7_spill] sm:$0xff] %v17750_v28  ;;  %v17762_v25 = vmax.f32 %v20069_v34, %v8263_v44  ;;  %13231 = vmatprep.mubr.msk.bf16.mxu1 %vm3131_vm2, %v13674_v20  ;;  %v12709_v31 = vpop.f32.mrb[28].mxu0  ;;  %v13675_v44 = vld [vmem:[%s13759_s28 + $0x628] sm:$0xff]   ;;  %v20073_v20 = vld [vmem:[#allocation16_spill] sm:$0xff] }
 0x32e   : > { %20066 = vst [vmem:[#allocation8_spill] sm:$0xff] %v17757_v5  ;;  %v17769_v62 = vmax.f32 %v20072_v21, %v8991_v61  ;;  %v8118_v35 = vsel %vm7748_vm3, %v12709_v31, -inf  ;;  %v13125_v58 = vpop.f32.mrb[28].mxu1  ;;  %v5557_v53 = vpop.f32.mrb[29].mxu0  ;;  %v20074_v34 = vld [vmem:[#allocation4_spill] sm:$0xff] }
 0x32f   : > { %v8119_v43 = vmax.f32 %v17457_v56, %v8118_v35  ;;  %v8846_v39 = vsel %vm7748_vm3, %v13125_v58, -inf  ;;  %v8284_v4 = vsel %vm7748_vm3, %v5557_v53, -inf  ;;  %v7221_v29 = vpop.f32.mrb[29].mxu1  ;;  %v12710_v3 = vpop.f32.mrb[30].mxu0  ;;  %v20075_v61 = vmax.f32 %v20073_v20, %v20074_v34  ;;  %v13678_v35 = vld [vmem:[%s13759_s28 + $0xcb0] sm:$0xff]  }
 0x330   : > { %v8847_v49 = vmax.f32 %v17465_v60, %v8846_v39  ;;  %v9012_v52 = vsel %vm7748_vm3, %v7221_v29, -inf  ;;  %v8125_v21 = vsel %vm7748_vm3, %v12710_v3, -inf  ;;  %v13126_v56 = vpop.f32.mrb[30].mxu1  ;;  %v5560_v31 = vpop.f32.mrb[31].mxu0  ;;  %v17793_v58 = vld [vmem:[%s19294_s2] ss:$0 sm:$0xff] }
 0x331   : > { %v17785_v23 = vmax.f32 %v20075_v61, %v8284_v4  ;;  %v9264_v53 = vadd.f32 %v17793_v58, %v8119_v43  ;;  %v20077_v60 = vld [vmem:[#allocation17_spill] sm:$0xff]  ;;  %v20078_v39 = vld [vmem:[#allocation24_spill] sm:$0xff]  ;;  %v8126_v4 = vmax.f32 %v17482_v46, %v8125_v21  ;;  %v8853_v29 = vsel %vm7748_vm3, %v13126_v56, -inf  ;;  %v7224_v3 = vpop.f32.mrb[31].mxu1  ;;  %v20083_v21 = vld [vmem:[#allocation3_spill] sm:$0xff] }
 0x332   : > { %v20079_v5 = vmax.f32 %v20077_v60, %v20078_v39  ;;  %v9368_v34 = vadd.f32 %v17793_v58, %v8847_v49  ;;  %v8854_v61 = vmax.f32 %v17489_v55, %v8853_v29  ;;  %v8291_v28 = vsel %vm7748_vm3, %v5560_v31, -inf  ;;  %12816 = vmatmul.mubr.msk.bf16.gmra.mrb[136].mxu0 %vm3131_vm2, %v13675_v44  ;;  %v20084_v56 = vld [vmem:[#allocation9_spill] sm:$0xff] }
 0x333   : > { %20076 = vst [vmem:[#allocation26_spill] sm:$0xff] %v17785_v23  ;;  %v9019_v23 = vsel %vm7748_vm3, %v7224_v3, -inf  ;;  %v9472_v43 = vmax.f32 %v9264_v53, 0.0  ;;  %v9265_v60 = vadd.f32 %v17793_v58, %v8126_v4  ;;  %v20085_v49 = vmax.f32 %v20083_v21, %v20084_v56  ;;  %12819 = vmatprep.mubr.msk.bf16.mxu0 %vm3131_vm2, %v13677_v14  ;;  %v13681_v21 = vld [vmem:[%s13759_s28 + $0x640] sm:$0xff]  }
 0x334   : > { %v17799_v20 = vmax.f32 %v20079_v5, %v9012_v52  ;;  %v20080_v5 = vld [vmem:[#allocation25_spill] sm:$0xff]  ;;  %v20081_v52 = vld [vmem:[#allocation18_spill] sm:$0xff]  ;;  %13232 = vmatmul.mubr.msk.bf16.gmra.mrb[136].mxu1 %vm3131_vm2, %v13676_v0  ;;  %v9576_v44 = vmax.f32 %v9368_v34, 0.0  ;;  %v9369_v31 = vadd.f32 %v17793_v58, %v8854_v61 }
 0x335   : > { %v20082_v39 = vmax.f32 %v20080_v5, %v20081_v52  ;;  %v17817_v55 = vmax.f32 %v20085_v49, %v9019_v23  ;;  %13235 = vmatprep.mubr.msk.bf16.mxu1 %vm3131_vm2, %v13678_v35  ;;  %v11836_v53 = vpack.c.bf16 %v9472_v43, %v9472_v43  ;;  %v9473_v4 = vmax.f32 %v9265_v60, 0.0  ;;  %v13679_v0 = vld [vmem:[%s13759_s28 + $0x638] sm:$0xff]  }
 0x336   : > { %v11940_v29 = vpack.c.bf16 %v9576_v44, %v9576_v44  ;;  %v9577_v3 = vmax.f32 %v9369_v31, 0.0  ;;  %v13129_v5 = vpop.f32.mrb[32].mxu1  ;;  %v20086_v44 = vld [vmem:[#allocation22_spill] sm:$0xff] }
 0x337   : > { %v17812_v46 = vmax.f32 %v20082_v39, %v8291_v28  ;;  %v12713_v28 = vpop.f32.mrb[32].mxu0  ;;  %10513 = vst.msk [vmem:[%s15038_s7 + $0xd0] sm:$0xf] %vm10460_vm4, %v11836_v53  ;;  %v11837_v14 = vpack.c.bf16 %v9473_v4, %v9473_v4  ;;  %v8874_v34 = vsel %vm7748_vm3, %v13129_v5, -inf  ;;  %v7237_v43 = vpop.f32.mrb[33].mxu1  ;;  %v13680_v39 = vld [vmem:[%s13759_s28 + $0xcb8] sm:$0xff]  }
 0x338   : > { %v8146_v23 = vsel %vm7748_vm3, %v12713_v28, -inf  ;;  %v5573_v52 = vpop.f32.mrb[33].mxu0  ;;  %10617 = vst.msk [vmem:[%s15038_s7 + $0x270] sm:$0xf] %vm10460_vm4, %v11940_v29  ;;  %v11941_v56 = vpack.c.bf16 %v9577_v3, %v9577_v3  ;;  %v8875_v49 = vmax.f32 %v17521_v59, %v8874_v34  ;;  %v8860_v53 = vsel %vm7748_vm3, %v7237_v43, -inf  ;;  %v13130_v4 = vpop.f32.mrb[34].mxu1 }
 0x339   : > { %v8147_v35 = vmax.f32 %v17513_v15, %v8146_v23  ;;  %v8132_v61 = vsel %vm7748_vm3, %v5573_v52, -inf  ;;  %v12714_v60 = vpop.f32.mrb[34].mxu0  ;;  %v13682_v28 = vld [vmem:[%s13759_s28 + $0xcc0] sm:$0xff]   ;;  %10514 = vst.msk [vmem:[%s15038_s7 + $0xd4] sm:$0xf] %vm10460_vm4, %v11837_v14  ;;  %v8861_v5 = vmax.f32 %v17452_v42, %v8860_v53  ;;  %v8881_v29 = vsel %vm7748_vm3, %v13130_v4, -inf }
 0x33a   : > { %v8133_v31 = vmax.f32 %v20086_v44, %v8132_v61  ;;  %v5576_v15 = vpop.f32.mrb[35].mxu0  ;;  %v8153_v52 = vsel %vm7748_vm3, %v12714_v60, -inf  ;;  %v7240_v3 = vpop.f32.mrb[35].mxu1  ;;  %10618 = vst.msk [vmem:[%s15038_s7 + $0x274] sm:$0xf] %vm10460_vm4, %v11941_v56  ;;  %v9372_v59 = vadd.f32 %v17793_v58, %v8875_v49  ;;  %v8882_v43 = vmax.f32 %v17545_v16, %v8881_v29  ;;  %12820 = vmatmul.mubr.msk.bf16.gmra.mrb[140].mxu0 %vm3131_vm2, %v13679_v0  ;;  %v13683_v29 = vld [vmem:[%s13759_s28 + $0x648] sm:$0xff]  }
 0x33b   : > { %v9268_v23 = vadd.f32 %v17793_v58, %v8147_v35  ;;  %v8154_v61 = vmax.f32 %v17538_v19, %v8153_v52  ;;  %v9370_v42 = vadd.f32 %v17793_v58, %v8861_v5  ;;  %v8139_v35 = vsel %vm7748_vm3, %v5576_v15, -inf  ;;  %12823 = vmatprep.mubr.msk.bf16.mxu0 %vm3131_vm2, %v13681_v21 }
 0x33c   : > { %v9266_v34 = vadd.f32 %v17793_v58, %v8133_v31  ;;  %v8867_v60 = vsel %vm7748_vm3, %v7240_v3, -inf  ;;  %13236 = vmatmul.mubr.msk.bf16.gmra.mrb[140].mxu1 %vm3131_vm2, %v13680_v39  ;;  %v9580_v56 = vmax.f32 %v9372_v59, 0.0  ;;  %v9373_v16 = vadd.f32 %v17793_v58, %v8882_v43 }
 0x33d   : > { %v9476_v14 = vmax.f32 %v9268_v23, 0.0  ;;  %v9269_v19 = vadd.f32 %v17793_v58, %v8154_v61  ;;  %13239 = vmatprep.mubr.msk.bf16.mxu1 %vm3131_vm2, %v13682_v28  ;;  %v9578_v44 = vmax.f32 %v9370_v42, 0.0  ;;  %v8140_v31 = vmax.f32 %v17470_v24, %v8139_v35  ;;  %v12717_v39 = vpop.f32.mrb[36].mxu0  ;;  %v13684_v61 = vld [vmem:[%s13759_s28 + $0xcc8] sm:$0xff]  }
 0x33e   : > { %v9474_v49 = vmax.f32 %v9266_v34, 0.0  ;;  %v8868_v53 = vmax.f32 %v17477_v54, %v8867_v60  ;;  %v11944_v21 = vpack.c.bf16 %v9580_v56, %v9580_v56  ;;  %v9581_v23 = vmax.f32 %v9373_v16, 0.0  ;;  %v13133_v5 = vpop.f32.mrb[36].mxu1  ;;  %v5589_v52 = vpop.f32.mrb[37].mxu0 }
 0x33f   : > { %v11840_v0 = vpack.c.bf16 %v9476_v14, %v9476_v14  ;;  %v9477_v15 = vmax.f32 %v9269_v19, 0.0  ;;  %v11942_v28 = vpack.c.bf16 %v9578_v44, %v9578_v44  ;;  %v9267_v24 = vadd.f32 %v17793_v58, %v8140_v31  ;;  %v7253_v59 = vpop.f32.mrb[37].mxu1  ;;  %v12718_v34 = vpop.f32.mrb[38].mxu0  ;;  %v13686_v19 = vld [vmem:[%s13759_s28 + $0xcd0] sm:$0xff]  }
 0x340   : > { %v11838_v4 = vpack.c.bf16 %v9474_v49, %v9474_v49  ;;  %v9371_v54 = vadd.f32 %v17793_v58, %v8868_v53  ;;  %v8174_v3 = vsel %vm7748_vm3, %v12717_v39, -inf  ;;  %10621 = vst.msk [vmem:[%s15038_s7 + $0x280] sm:$0xf] %vm10460_vm4, %v11944_v21  ;;  %v11945_v14 = vpack.c.bf16 %v9581_v23, %v9581_v23  ;;  %v13134_v60 = vpop.f32.mrb[38].mxu1  ;;  %v5592_v56 = vpop.f32.mrb[39].mxu0  ;;  %v13685_v49 = vld [vmem:[%s13759_s28 + $0x650] sm:$0xff]  }
 0x341   : > { %10517 = vst.msk [vmem:[%s15038_s7 + $0xe0] sm:$0xf] %vm10460_vm4, %v11840_v0  ;;  %v11841_v43 = vpack.c.bf16 %v9477_v15, %v9477_v15  ;;  %v8175_v42 = vmax.f32 %v17569_v27, %v8174_v3  ;;  %v8902_v35 = vsel %vm7748_vm3, %v13133_v5, -inf  ;;  %10619 = vst.msk [vmem:[%s15038_s7 + $0x278] sm:$0xf] %vm10460_vm4, %v11942_v28  ;;  %v9475_v16 = vmax.f32 %v9267_v24, 0.0 }
 0x342   : > { %10515 = vst.msk [vmem:[%s15038_s7 + $0xd8] sm:$0xf] %vm10460_vm4, %v11838_v4  ;;  %v9579_v0 = vmax.f32 %v9371_v54, 0.0  ;;  %v8903_v44 = vmax.f32 %v17577_v47, %v8902_v35  ;;  %v8160_v31 = vsel %vm7748_vm3, %v5589_v52, -inf  ;;  %v7256_v53 = vpop.f32.mrb[39].mxu1  ;;  %v8888_v21 = vsel %vm7748_vm3, %v7253_v59, -inf  ;;  %12824 = vmatmul.mubr.msk.bf16.gmra.mrb[144].mxu0 %vm3131_vm2, %v13683_v29 }
 0x343   : > { %10518 = vst.msk [vmem:[%s15038_s7 + $0xe4] sm:$0xf] %vm10460_vm4, %v11841_v43  ;;  %10622 = vst.msk [vmem:[%s15038_s7 + $0x284] sm:$0xf] %vm10460_vm4, %v11945_v14  ;;  %v9272_v27 = vadd.f32 %v17793_v58, %v8175_v42  ;;  %v8161_v39 = vmax.f32 %v17499_v6, %v8160_v31  ;;  %v8181_v4 = vsel %vm7748_vm3, %v12718_v34, -inf  ;;  %v11839_v47 = vpack.c.bf16 %v9475_v16, %v9475_v16  ;;  %v13687_v35 = vld [vmem:[%s13759_s28 + $0x658] sm:$0xff]  }
 0x344   : > { %v11943_v15 = vpack.c.bf16 %v9579_v0, %v9579_v0  ;;  %v9376_v23 = vadd.f32 %v17793_v58, %v8903_v44  ;;  %v8889_v5 = vmax.f32 %v17508_v18, %v8888_v21  ;;  %13240 = vmatmul.mubr.msk.bf16.gmra.mrb[144].mxu1 %vm3131_vm2, %v13684_v61  ;;  %v8182_v6 = vmax.f32 %v17594_v11, %v8181_v4  ;;  %v13688_v0 = vld [vmem:[%s13759_s28 + $0xcd8] sm:$0xff]   ;;  %v13689_v44 = vld [vmem:[%s13759_s28 + $0x660] sm:$0xff]  }
 0x345   : > { %v9480_v52 = vmax.f32 %v9272_v27, 0.0  ;;  %v9270_v28 = vadd.f32 %v17793_v58, %v8161_v39  ;;  %v8909_v24 = vsel %vm7748_vm3, %v13134_v60, -inf  ;;  %12827 = vmatprep.mubr.msk.bf16.mxu0 %vm3131_vm2, %v13685_v49  ;;  %13243 = vmatprep.mubr.msk.bf16.mxu1 %vm3131_vm2, %v13686_v19  ;;  %10516 = vst.msk [vmem:[%s15038_s7 + $0xdc] sm:$0xf] %vm10460_vm4, %v11839_v47  ;;  %v8167_v3 = vsel %vm7748_vm3, %v5592_v56, -inf  ;;  %v12721_v11 = vpop.f32.mrb[40].mxu0 }
 0x346   : > { %10620 = vst.msk [vmem:[%s15038_s7 + $0x27c] sm:$0xf] %vm10460_vm4, %v11943_v15  ;;  %v9584_v29 = vmax.f32 %v9376_v23, 0.0  ;;  %v9374_v18 = vadd.f32 %v17793_v58, %v8889_v5  ;;  %v8910_v54 = vmax.f32 %v17601_v2, %v8909_v24  ;;  %v9273_v61 = vadd.f32 %v17793_v58, %v8182_v6  ;;  %v5605_v42 = vpop.f32.mrb[41].mxu0  ;;  %v13690_v47 = vld [vmem:[%s13759_s28 + $0xce0] sm:$0xff]  }
 0x347   : > { %v11844_v59 = vpack.c.bf16 %v9480_v52, %v9480_v52  ;;  %v9478_v34 = vmax.f32 %v9270_v28, 0.0  ;;  %v8168_v43 = vmax.f32 %v17526_v37, %v8167_v3  ;;  %v13137_v14 = vpop.f32.mrb[40].mxu1  ;;  %v8895_v56 = vsel %vm7748_vm3, %v7256_v53, -inf  ;;  %v12722_v16 = vpop.f32.mrb[42].mxu0 }
 0x348   : > { %v11948_v60 = vpack.c.bf16 %v9584_v29, %v9584_v29  ;;  %v9582_v49 = vmax.f32 %v9374_v18, 0.0  ;;  %v9377_v2 = vadd.f32 %v17793_v58, %v8910_v54  ;;  %v7269_v19 = vpop.f32.mrb[41].mxu1  ;;  %v9481_v37 = vmax.f32 %v9273_v61, 0.0  ;;  %v5608_v4 = vpop.f32.mrb[43].mxu0 }
 0x349   : > { %10521 = vst.msk [vmem:[%s15038_s7 + $0xf0] sm:$0xf] %vm10460_vm4, %v11844_v59  ;;  %v11842_v31 = vpack.c.bf16 %v9478_v34, %v9478_v34  ;;  %v9271_v27 = vadd.f32 %v17793_v58, %v8168_v43  ;;  %v8896_v39 = vmax.f32 %v17533_v40, %v8895_v56  ;;  %v13138_v21 = vpop.f32.mrb[42].mxu1  ;;  %v8202_v23 = vsel %vm7748_vm3, %v12721_v11, -inf }
 0x34a   : > { %10625 = vst.msk [vmem:[%s15038_s7 + $0x290] sm:$0xf] %vm10460_vm4, %v11948_v60  ;;  %v11946_v53 = vpack.c.bf16 %v9582_v49, %v9582_v49  ;;  %v9585_v15 = vmax.f32 %v9377_v2, 0.0  ;;  %v8930_v5 = vsel %vm7748_vm3, %v13137_v14, -inf  ;;  %v7272_v52 = vpop.f32.mrb[43].mxu1  ;;  %v11845_v28 = vpack.c.bf16 %v9481_v37, %v9481_v37  ;;  %12828 = vmatmul.mubr.msk.bf16.gmra.mrb[148].mxu0 %vm3131_vm2, %v13687_v35 }
 0x34b   : > { %10519 = vst.msk [vmem:[%s15038_s7 + $0xe8] sm:$0xf] %vm10460_vm4, %v11842_v31  ;;  %v9479_v6 = vmax.f32 %v9271_v27, 0.0  ;;  %v9375_v40 = vadd.f32 %v17793_v58, %v8896_v39  ;;  %v8203_v24 = vmax.f32 %v17625_v32, %v8202_v23  ;;  %v8931_v18 = vmax.f32 %v17633_v30, %v8930_v5  ;;  %12831 = vmatprep.mubr.msk.bf16.mxu0 %vm3131_vm2, %v13689_v44  ;;  %v13692_v27 = vld [vmem:[%s13759_s28 + $0xce8] sm:$0xff]   ;;  %v13693_v39 = vld [vmem:[%s13759_s28 + $0x670] sm:$0xff]  }
 0x34c   : > { %10623 = vst.msk [vmem:[%s15038_s7 + $0x288] sm:$0xf] %vm10460_vm4, %v11946_v53  ;;  %v11949_v29 = vpack.c.bf16 %v9585_v15, %v9585_v15  ;;  %v8188_v54 = vsel %vm7748_vm3, %v5605_v42, -inf  ;;  %v8916_v3 = vsel %vm7748_vm3, %v7269_v19, -inf  ;;  %13244 = vmatmul.mubr.msk.bf16.gmra.mrb[148].mxu1 %vm3131_vm2, %v13688_v0  ;;  %10522 = vst.msk [vmem:[%s15038_s7 + $0xf4] sm:$0xf] %vm10460_vm4, %v11845_v28 }
 0x34d   : > { %v11843_v11 = vpack.c.bf16 %v9479_v6, %v9479_v6  ;;  %v9583_v32 = vmax.f32 %v9375_v40, 0.0  ;;  %v9276_v59 = vadd.f32 %v17793_v58, %v8203_v24  ;;  %v8189_v34 = vmax.f32 %v17555_v51, %v8188_v54  ;;  %13247 = vmatprep.mubr.msk.bf16.mxu1 %vm3131_vm2, %v13690_v47  ;;  %v12725_v42 = vpop.f32.mrb[44].mxu0  ;;  %v13691_v19 = vld [vmem:[%s13759_s28 + $0x668] sm:$0xff]   ;;  %v13694_v5 = vld [vmem:[%s13759_s28 + $0xcf0] sm:$0xff]  }
 0x34e   : > { %10626 = vst.msk [vmem:[%s15038_s7 + $0x294] sm:$0xf] %vm10460_vm4, %v11949_v29  ;;  %v9380_v30 = vadd.f32 %v17793_v58, %v8931_v18  ;;  %v8917_v61 = vmax.f32 %v17564_v48, %v8916_v3  ;;  %v8209_v43 = vsel %vm7748_vm3, %v12722_v16, -inf  ;;  %v8937_v14 = vsel %vm7748_vm3, %v13138_v21, -inf  ;;  %v5621_v56 = vpop.f32.mrb[45].mxu0 }
 0x34f   : > { %10520 = vst.msk [vmem:[%s15038_s7 + $0xec] sm:$0xf] %vm10460_vm4, %v11843_v11  ;;  %v11947_v35 = vpack.c.bf16 %v9583_v32, %v9583_v32  ;;  %v9484_v51 = vmax.f32 %v9276_v59, 0.0  ;;  %v9274_v60 = vadd.f32 %v17793_v58, %v8189_v34  ;;  %v8210_v49 = vmax.f32 %v17650_v41, %v8209_v43  ;;  %v13141_v2 = vpop.f32.mrb[44].mxu1  ;;  %v12726_v37 = vpop.f32.mrb[46].mxu0 }
 0x350   : > { %v9588_v48 = vmax.f32 %v9380_v30, 0.0  ;;  %v9378_v16 = vadd.f32 %v17793_v58, %v8917_v61  ;;  %v8938_v0 = vmax.f32 %v17657_v45, %v8937_v14  ;;  %v8195_v44 = vsel %vm7748_vm3, %v5608_v4, -inf  ;;  %v7285_v31 = vpop.f32.mrb[45].mxu1  ;;  %v5624_v23 = vpop.f32.mrb[47].mxu0 }
 0x351   : > { %10624 = vst.msk [vmem:[%s15038_s7 + $0x28c] sm:$0xf] %vm10460_vm4, %v11947_v35  ;;  %v11848_v21 = vpack.c.bf16 %v9484_v51, %v9484_v51  ;;  %v9482_v41 = vmax.f32 %v9274_v60, 0.0  ;;  %v9277_v47 = vadd.f32 %v17793_v58, %v8210_v49  ;;  %v8196_v53 = vmax.f32 %v17582_v7, %v8195_v44  ;;  %v13142_v15 = vpop.f32.mrb[46].mxu1 }
 0x352   : > { %v11952_v45 = vpack.c.bf16 %v9588_v48, %v9588_v48  ;;  %v9586_v28 = vmax.f32 %v9378_v16, 0.0  ;;  %v9381_v4 = vadd.f32 %v17793_v58, %v8938_v0  ;;  %v8923_v6 = vsel %vm7748_vm3, %v7272_v52, -inf  ;;  %v17960_v40 = vpop.f32.mrb[47].mxu1  ;;  %12832 = vmatmul.mubr.msk.bf16.gmra.mrb[152].mxu0 %vm3131_vm2, %v13691_v19  ;;  %v13695_v19 = vld [vmem:[%s13759_s28 + $0x678] sm:$0xff]  }
 0x353   : > { %10525 = vst.msk [vmem:[%s15038_s7 + $0x100] sm:$0xf] %vm10460_vm4, %v11848_v21  ;;  %v11846_v24 = vpack.c.bf16 %v9482_v41, %v9482_v41  ;;  %v9485_v29 = vmax.f32 %v9277_v47, 0.0  ;;  %v9275_v18 = vadd.f32 %v17793_v58, %v8196_v53  ;;  %v8924_v7 = vmax.f32 %v17589_v10, %v8923_v6  ;;  %12835 = vmatprep.mubr.msk.bf16.mxu0 %vm3131_vm2, %v13693_v39 }
 0x354   : > { %10629 = vst.msk [vmem:[%s15038_s7 + $0x2a0] sm:$0xf] %vm10460_vm4, %v11952_v45  ;;  %v11950_v54 = vpack.c.bf16 %v9586_v28, %v9586_v28  ;;  %v9589_v3 = vmax.f32 %v9381_v4, 0.0  ;;  %v8230_v11 = vsel %vm7748_vm3, %v12725_v42, -inf  ;;  %v8958_v52 = vsel %vm7748_vm3, %v13141_v2, -inf  ;;  %13248 = vmatmul.mubr.msk.bf16.gmra.mrb[152].mxu1 %vm3131_vm2, %v13692_v27 }
 0x355   : > { %10523 = vst.msk [vmem:[%s15038_s7 + $0xf8] sm:$0xf] %vm10460_vm4, %v11846_v24  ;;  %v11849_v32 = vpack.c.bf16 %v9485_v29, %v9485_v29  ;;  %v9483_v59 = vmax.f32 %v9275_v18, 0.0  ;;  %v9379_v10 = vadd.f32 %v17793_v58, %v8924_v7  ;;  %v8231_v34 = vmax.f32 %v17681_v8, %v8230_v11  ;;  %13251 = vmatprep.mubr.msk.bf16.mxu1 %vm3131_vm2, %v13694_v5  ;;  %v12729_v42 = vpop.f32.mrb[48].mxu0 }
 0x356   : > { %10627 = vst.msk [vmem:[%s15038_s7 + $0x298] sm:$0xf] %vm10460_vm4, %v11950_v54  ;;  %v11953_v30 = vpack.c.bf16 %v9589_v3, %v9589_v3  ;;  %v8959_v61 = vmax.f32 %v17689_v57, %v8958_v52  ;;  %v8216_v43 = vsel %vm7748_vm3, %v5621_v56, -inf  ;;  %v8944_v14 = vsel %vm7748_vm3, %v7285_v31, -inf  ;;  %v5637_v2 = vpop.f32.mrb[49].mxu0  ;;  %v13696_v31 = vld [vmem:[%s13759_s28 + $0xcf8] sm:$0xff]  }
 0x357   : > { %10526 = vst.msk [vmem:[%s15038_s7 + $0x104] sm:$0xf] %vm10460_vm4, %v11849_v32  ;;  %v11847_v35 = vpack.c.bf16 %v9483_v59, %v9483_v59  ;;  %v9587_v51 = vmax.f32 %v9379_v10, 0.0  ;;  %v9280_v8 = vadd.f32 %v17793_v58, %v8231_v34  ;;  %v8217_v60 = vmax.f32 %v17611_v36, %v8216_v43  ;;  %v13145_v49 = vpop.f32.mrb[48].mxu1  ;;  %v12730_v44 = vpop.f32.mrb[50].mxu0 }
 0x358   : > { %10630 = vst.msk [vmem:[%s15038_s7 + $0x2a4] sm:$0xf] %vm10460_vm4, %v11953_v30  ;;  %v9384_v57 = vadd.f32 %v17793_v58, %v8959_v61  ;;  %v8945_v56 = vmax.f32 %v17620_v38, %v8944_v14  ;;  %v8237_v48 = vsel %vm7748_vm3, %v12726_v37, -inf  ;;  %v8965_v16 = vsel %vm7748_vm3, %v13142_v15, -inf  ;;  %v7301_v0 = vpop.f32.mrb[49].mxu1  ;;  %v17999_v47 = vpop.f32.mrb[51].mxu0 }
 0x359   : > { %10524 = vst.msk [vmem:[%s15038_s7 + $0xfc] sm:$0xf] %vm10460_vm4, %v11847_v35  ;;  %v11951_v36 = vpack.c.bf16 %v9587_v51, %v9587_v51  ;;  %v9488_v27 = vmax.f32 %v9280_v8, 0.0  ;;  %v9278_v39 = vadd.f32 %v17793_v58, %v8217_v60  ;;  %v8238_v21 = vmax.f32 %v17706_v13, %v8237_v48  ;;  %v13146_v41 = vpop.f32.mrb[50].mxu1 }
 0x35a   : > { %v9592_v38 = vmax.f32 %v9384_v57, 0.0  ;;  %v9382_v37 = vadd.f32 %v17793_v58, %v8945_v56  ;;  %v8966_v53 = vmax.f32 %v17713_v17, %v8965_v16  ;;  %v8223_v15 = vsel %vm7748_vm3, %v5624_v23, -inf  ;;  %v18004_v5 = vpop.f32.mrb[51].mxu1  ;;  %12836 = vmatmul.mubr.msk.bf16.gmra.mrb[156].mxu0 %vm3131_vm2, %v13695_v19 }
 0x35b   : > { %10628 = vst.msk [vmem:[%s15038_s7 + $0x29c] sm:$0xf] %vm10460_vm4, %v11951_v36  ;;  %v11852_v45 = vpack.c.bf16 %v9488_v27, %v9488_v27  ;;  %v9486_v28 = vmax.f32 %v9278_v39, 0.0  ;;  %v9281_v13 = vadd.f32 %v17793_v58, %v8238_v21  ;;  %v8224_v4 = vmax.f32 %v17638_v12, %v8223_v15 }
 0x35c   : > { %v11956_v6 = vpack.c.bf16 %v9592_v38, %v9592_v38  ;;  %v9590_v24 = vmax.f32 %v9382_v37, 0.0  ;;  %v9385_v17 = vadd.f32 %v17793_v58, %v8966_v53  ;;  %v8951_v23 = vsel %vm7748_vm3, %v17960_v40, -inf  ;;  %13252 = vmatmul.mubr.msk.bf16.gmra.mrb[156].mxu1 %vm3131_vm2, %v13696_v31 }
 0x35d   : > { %10529 = vst.msk [vmem:[%s15038_s7 + $0x110] sm:$0xf] %vm10460_vm4, %v11852_v45  ;;  %v11850_v29 = vpack.c.bf16 %v9486_v28, %v9486_v28  ;;  %v9489_v18 = vmax.f32 %v9281_v13, 0.0  ;;  %v9279_v7 = vadd.f32 %v17793_v58, %v8224_v4  ;;  %v8952_v12 = vmax.f32 %v17645_v9, %v8951_v23  ;;  %v12733_v40 = vpop.f32.mrb[52].mxu0 }
 0x35e   : > { %10633 = vst.msk [vmem:[%s15038_s7 + $0x2b0] sm:$0xf] %vm10460_vm4, %v11956_v6  ;;  %v11954_v54 = vpack.c.bf16 %v9590_v24, %v9590_v24  ;;  %v9593_v3 = vmax.f32 %v9385_v17, 0.0  ;;  %v8258_v11 = vsel %vm7748_vm3, %v12729_v42, -inf  ;;  %v8986_v52 = vsel %vm7748_vm3, %v13145_v49, -inf  ;;  %v18027_v9 = vpop.f32.mrb[53].mxu0 }
 0x35f   : > { %10527 = vst.msk [vmem:[%s15038_s7 + $0x108] sm:$0xf] %vm10460_vm4, %v11850_v29  ;;  %v11853_v32 = vpack.c.bf16 %v9489_v18, %v9489_v18  ;;  %v9487_v59 = vmax.f32 %v9279_v7, 0.0  ;;  %v9383_v10 = vadd.f32 %v17793_v58, %v8952_v12  ;;  %v8259_v34 = vmax.f32 %v17737_v26, %v8258_v11  ;;  %v13149_v30 = vpop.f32.mrb[52].mxu1  ;;  %v18034_v51 = vpop.f32.mrb[54].mxu0 }
 0x360   : > { %10631 = vst.msk [vmem:[%s15038_s7 + $0x2a8] sm:$0xf] %vm10460_vm4, %v11954_v54  ;;  %v11957_v61 = vpack.c.bf16 %v9593_v3, %v9593_v3  ;;  %v8987_v43 = vmax.f32 %v17745_v50, %v8986_v52  ;;  %v8244_v14 = vsel %vm7748_vm3, %v5637_v2, -inf  ;;  %v8972_v42 = vsel %vm7748_vm3, %v7301_v0, -inf  ;;  %v7317_v35 = vpop.f32.mrb[53].mxu1  ;;  %v18042_v57 = vpop.f32.mrb[55].mxu0 }
 0x361   : > { %10530 = vst.msk [vmem:[%s15038_s7 + $0x114] sm:$0xf] %vm10460_vm4, %v11853_v32  ;;  %v11851_v26 = vpack.c.bf16 %v9487_v59, %v9487_v59  ;;  %v9591_v8 = vmax.f32 %v9383_v10, 0.0  ;;  %v9284_v60 = vadd.f32 %v17793_v58, %v8259_v34  ;;  %v8245_v49 = vmax.f32 %v17667_v1, %v8244_v14  ;;  %v18040_v19 = vpop.f32.mrb[54].mxu1  ;;  %v20087_v54 = vld [vmem:[#allocation26_spill] sm:$0xff] }
 0x362   : > { %10634 = vst.msk [vmem:[%s15038_s7 + $0x2b4] sm:$0xf] %vm10460_vm4, %v11957_v61  ;;  %v9388_v50 = vadd.f32 %v17793_v58, %v8987_v43  ;;  %v8973_v2 = vmax.f32 %v17676_v33, %v8972_v42  ;;  %v8265_v56 = vsel %vm7748_vm3, %v12730_v44, -inf  ;;  %v8993_v48 = vsel %vm7748_vm3, %v13146_v41, -inf  ;;  %v18050_v16 = vpop.f32.mrb[55].mxu1  ;;  %v20088_v14 = vld [vmem:[#allocation30_spill] sm:$0xff] }
 0x363   : > { %10528 = vst.msk [vmem:[%s15038_s7 + $0x10c] sm:$0xf] %vm10460_vm4, %v11851_v26  ;;  %v11955_v1 = vpack.c.bf16 %v9591_v8, %v9591_v8  ;;  %v9492_v0 = vmax.f32 %v9284_v60, 0.0  ;;  %v9282_v31 = vadd.f32 %v17793_v58, %v8245_v49  ;;  %v8266_v36 = vmax.f32 %v17762_v25, %v8265_v56  ;;  %v20089_v26 = vld [vmem:[#allocation23_spill] sm:$0xff] }
 0x364   : > { %v9596_v27 = vmax.f32 %v9388_v50, 0.0  ;;  %v9386_v39 = vadd.f32 %v17793_v58, %v8973_v2  ;;  %v8994_v33 = vmax.f32 %v17769_v62, %v8993_v48  ;;  %v8251_v44 = vsel %vm7748_vm3, %v17999_v47, -inf }
 0x365   : > { %10632 = vst.msk [vmem:[%s15038_s7 + $0x2ac] sm:$0xf] %vm10460_vm4, %v11955_v1  ;;  %v11856_v21 = vpack.c.bf16 %v9492_v0, %v9492_v0  ;;  %v9490_v41 = vmax.f32 %v9282_v31, 0.0  ;;  %v9285_v38 = vadd.f32 %v17793_v58, %v8266_v36  ;;  %v8252_v37 = vmax.f32 %v17694_v63, %v8251_v44  ;;  %v18067_v62 = vpop.f32.mrb[56].mxu0 }
 0x366   : > { %v11960_v53 = vpack.c.bf16 %v9596_v27, %v9596_v27  ;;  %v9594_v15 = vmax.f32 %v9386_v39, 0.0  ;;  %v9389_v25 = vadd.f32 %v17793_v58, %v8994_v33  ;;  %v8979_v45 = vsel %vm7748_vm3, %v18004_v5, -inf  ;;  %v18075_v63 = vpop.f32.mrb[57].mxu0  ;;  %v20090_v27 = vld [vmem:[#allocation7_spill] sm:$0xff] }
 0x367   : > { %10533 = vst.msk [vmem:[%s15038_s7 + $0x120] sm:$0xf] %vm10460_vm4, %v11856_v21  ;;  %v11854_v47 = vpack.c.bf16 %v9490_v41, %v9490_v41  ;;  %v9493_v28 = vmax.f32 %v9285_v38, 0.0  ;;  %v9283_v13 = vadd.f32 %v17793_v58, %v8252_v37  ;;  %v8980_v4 = vmax.f32 %v17701_v22, %v8979_v45  ;;  %v18073_v6 = vpop.f32.mrb[56].mxu1  ;;  %v18083_v18 = vpop.f32.mrb[58].mxu0 }
 0x368   : > { %10637 = vst.msk [vmem:[%s15038_s7 + $0x2c0] sm:$0xf] %vm10460_vm4, %v11960_v53  ;;  %v11958_v24 = vpack.c.bf16 %v9594_v15, %v9594_v15  ;;  %v9597_v5 = vmax.f32 %v9389_v25, 0.0  ;;  %v8286_v17 = vsel %vm7748_vm3, %v12733_v40, -inf  ;;  %v9014_v23 = vsel %vm7748_vm3, %v13149_v30, -inf  ;;  %v18081_v29 = vpop.f32.mrb[57].mxu1 }
 0x369   : > { %10531 = vst.msk [vmem:[%s15038_s7 + $0x118] sm:$0xf] %vm10460_vm4, %v11854_v47  ;;  %v11857_v22 = vpack.c.bf16 %v9493_v28, %v9493_v28  ;;  %v9491_v7 = vmax.f32 %v9283_v13, 0.0  ;;  %v9387_v12 = vadd.f32 %v17793_v58, %v8980_v4  ;;  %v8287_v3 = vmax.f32 %v20087_v54, %v8286_v17  ;;  %v18089_v11 = vpop.f32.mrb[58].mxu1  ;;  %v18091_v52 = vpop.f32.mrb[59].mxu0  ;;  %v20091_v25 = vld [vmem:[#allocation8_spill] sm:$0xff] }
 0x36a   : > { %10635 = vst.msk [vmem:[%s15038_s7 + $0x2b8] sm:$0xf] %vm10460_vm4, %v11958_v24  ;;  %v11961_v40 = vpack.c.bf16 %v9597_v5, %v9597_v5  ;;  %v9015_v32 = vmax.f32 %v17799_v20, %v9014_v23  ;;  %v8272_v59 = vsel %vm7748_vm3, %v18027_v9, -inf  ;;  %v9000_v10 = vsel %vm7748_vm3, %v7317_v35, -inf  ;;  %v18099_v34 = vpop.f32.mrb[59].mxu1 }
 0x36b   : > { %10534 = vst.msk [vmem:[%s15038_s7 + $0x124] sm:$0xf] %vm10460_vm4, %v11857_v22  ;;  %v11855_v30 = vpack.c.bf16 %v9491_v7, %v9491_v7  ;;  %v9595_v61 = vmax.f32 %v9387_v12, 0.0  ;;  %v9288_v43 = vadd.f32 %v17793_v58, %v8287_v3  ;;  %v8273_v42 = vmax.f32 %v20088_v14, %v8272_v59 }
 0x36c   : > { %10638 = vst.msk [vmem:[%s15038_s7 + $0x2c4] sm:$0xf] %vm10460_vm4, %v11961_v40  ;;  %v9392_v20 = vadd.f32 %v17793_v58, %v9015_v32  ;;  %v9001_v8 = vmax.f32 %v20089_v26, %v9000_v10  ;;  %v8293_v9 = vsel %vm7748_vm3, %v18034_v51, -inf  ;;  %v9021_v35 = vsel %vm7748_vm3, %v18040_v19, -inf }
 0x36d   : > { %10532 = vst.msk [vmem:[%s15038_s7 + $0x11c] sm:$0xf] %vm10460_vm4, %v11855_v30  ;;  %v11959_v60 = vpack.c.bf16 %v9595_v61, %v9595_v61  ;;  %v9496_v49 = vmax.f32 %v9288_v43, 0.0  ;;  %v9286_v50 = vadd.f32 %v17793_v58, %v8273_v42  ;;  %v8294_v2 = vmax.f32 %v17812_v46, %v8293_v9  ;;  %v18121_v0 = vpop.f32.mrb[60].mxu0 }
 0x36e   : > { %v9600_v56 = vmax.f32 %v9392_v20, 0.0  ;;  %v9390_v48 = vadd.f32 %v17793_v58, %v9001_v8  ;;  %v9022_v1 = vmax.f32 %v17817_v55, %v9021_v35  ;;  %v8279_v51 = vsel %vm7748_vm3, %v18042_v57, -inf  ;;  %v18129_v33 = vpop.f32.mrb[61].mxu0 }
 0x36f   : > { %10636 = vst.msk [vmem:[%s15038_s7 + $0x2bc] sm:$0xf] %vm10460_vm4, %v11959_v60  ;;  %v11860_v19 = vpack.c.bf16 %v9496_v49, %v9496_v49  ;;  %v9494_v31 = vmax.f32 %v9286_v50, 0.0  ;;  %v9289_v36 = vadd.f32 %v17793_v58, %v8294_v2  ;;  %v8280_v39 = vmax.f32 %v20090_v27, %v8279_v51  ;;  %v18127_v46 = vpop.f32.mrb[60].mxu1  ;;  %v18136_v38 = vpop.f32.mrb[62].mxu0 }
 0x370   : > { %v11964_v55 = vpack.c.bf16 %v9600_v56, %v9600_v56  ;;  %v9598_v44 = vmax.f32 %v9390_v48, 0.0  ;;  %v9393_v57 = vadd.f32 %v17793_v58, %v9022_v1  ;;  %v9007_v21 = vsel %vm7748_vm3, %v18050_v16, -inf  ;;  %v18134_v41 = vpop.f32.mrb[61].mxu1  ;;  %v18144_v28 = vpop.f32.mrb[63].mxu0 }
 0x371   : > { %10537 = vst.msk [vmem:[%s15038_s7 + $0x130] sm:$0xf] %vm10460_vm4, %v11860_v19  ;;  %v11858_v37 = vpack.c.bf16 %v9494_v31, %v9494_v31  ;;  %v9497_v53 = vmax.f32 %v9289_v36, 0.0  ;;  %v9287_v15 = vadd.f32 %v17793_v58, %v8280_v39  ;;  %v9008_v45 = vmax.f32 %v20091_v25, %v9007_v21  ;;  %v18142_v47 = vpop.f32.mrb[62].mxu1 }
 0x372   : > { %10641 = vst.msk [vmem:[%s15038_s7 + $0x2d0] sm:$0xf] %vm10460_vm4, %v11964_v55  ;;  %v11962_v16 = vpack.c.bf16 %v9598_v44, %v9598_v44  ;;  %v9601_v13 = vmax.f32 %v9393_v57, 0.0  ;;  %v18148_v4 = vpop.f32.mrb[63].mxu1  ;;  %v18229_v21 = vsel %vm7748_vm3, %v18075_v63, -inf  ;;  %v18238_v25 = vsel %vm7748_vm3, %v18081_v29, -inf }
 0x373   : > { %10535 = vst.msk [vmem:[%s15038_s7 + $0x128] sm:$0xf] %vm10460_vm4, %v11858_v37  ;;  %v11861_v24 = vpack.c.bf16 %v9497_v53, %v9497_v53  ;;  %v9495_v5 = vmax.f32 %v9287_v15, 0.0  ;;  %v9391_v17 = vadd.f32 %v17793_v58, %v9008_v45 }
 0x374   : > { %10639 = vst.msk [vmem:[%s15038_s7 + $0x2c8] sm:$0xf] %vm10460_vm4, %v11962_v16  ;;  %v11965_v23 = vpack.c.bf16 %v9601_v13, %v9601_v13 }
 0x375   : > { %10538 = vst.msk [vmem:[%s15038_s7 + $0x134] sm:$0xf] %vm10460_vm4, %v11861_v24  ;;  %v11859_v22 = vpack.c.bf16 %v9495_v5, %v9495_v5  ;;  %v9599_v7 = vmax.f32 %v9391_v17, 0.0  ;;  %v18159_v12 = vpop.f32.mrb[64].mxu0  ;;  %v18249_v24 = vsel %vm7748_vm3, %v18091_v52, -inf }
 0x376   : > { %10642 = vst.msk [vmem:[%s15038_s7 + $0x2d4] sm:$0xf] %vm10460_vm4, %v11965_v23  ;;  %v18165_v40 = vpop.f32.mrb[65].mxu0  ;;  %20092 = vst [vmem:[#allocation28_spill] sm:$0xff] %v18249_v24 }
 0x377   : > { %10536 = vst.msk [vmem:[%s15038_s7 + $0x12c] sm:$0xf] %vm10460_vm4, %v11859_v22  ;;  %v11963_v54 = vpack.c.bf16 %v9599_v7, %v9599_v7  ;;  %v18163_v3 = vpop.f32.mrb[64].mxu1  ;;  %v18169_v58 = vpop.f32.mrb[66].mxu0  ;;  %v18260_v22 = vsel %vm7748_vm3, %v18099_v34, -inf  ;;  %v18281_v34 = vsel %vm7748_vm3, %v18083_v18, -inf }
 0x378   : > { %v18167_v32 = vpop.f32.mrb[65].mxu1  ;;  %v18175_v10 = vpop.f32.mrb[67].mxu0  ;;  %20094 = vst [vmem:[#allocation12_spill] sm:$0xff] %v18260_v22  ;;  %v18300_v18 = vsel %vm7748_vm3, %v18148_v4, -inf }
 0x379   : > { %10640 = vst.msk [vmem:[%s15038_s7 + $0x2cc] sm:$0xf] %vm10460_vm4, %v11963_v54  ;;  %v18173_v59 = vpop.f32.mrb[66].mxu1  ;;  %20100 = vst [vmem:[#allocation13_spill] sm:$0xff] %v18300_v18 }
 0x37a   : > { %v18177_v30 = vpop.f32.mrb[67].mxu1 }
 0x37d   : > { %v18179_v61 = vpop.f32.mrb[68].mxu0 }
 0x37e   : > { %v18183_v14 = vpop.f32.mrb[69].mxu0 }
 0x37f   : > { %v18181_v43 = vpop.f32.mrb[68].mxu1  ;;  %v18187_v20 = vpop.f32.mrb[70].mxu0 }
 0x380   : > { %v18185_v42 = vpop.f32.mrb[69].mxu1  ;;  %v18191_v8 = vpop.f32.mrb[71].mxu0 }
 0x381   : > { %v18189_v26 = vpop.f32.mrb[70].mxu1 }
 0x382   : > { %v18193_v9 = vpop.f32.mrb[71].mxu1 }
 0x385   : > { %v18195_v35 = vpop.f32.mrb[72].mxu0 }
 0x386   : > { %v18199_v49 = vpop.f32.mrb[73].mxu0 }
 0x387   : > { %v18197_v60 = vpop.f32.mrb[72].mxu1  ;;  %v18203_v2 = vpop.f32.mrb[74].mxu0 }
 0x388   : > { %v18201_v50 = vpop.f32.mrb[73].mxu1  ;;  %v18207_v48 = vpop.f32.mrb[75].mxu0 }
 0x389   : > { %v18205_v56 = vpop.f32.mrb[74].mxu1 }
 0x38a   : > { %v18209_v1 = vpop.f32.mrb[75].mxu1 }
 0x38d   : > { %v18211_v51 = vpop.f32.mrb[76].mxu0 }
 0x38e   : > { %v18215_v31 = vpop.f32.mrb[77].mxu0 }
 0x38f   : > { %v18213_v19 = vpop.f32.mrb[76].mxu1  ;;  %v18219_v27 = vpop.f32.mrb[78].mxu0 }
 0x390   : > { %v18217_v36 = vpop.f32.mrb[77].mxu1  ;;  %v18223_v55 = vpop.f32.mrb[79].mxu0 }
 0x391   : > { %v18221_v39 = vpop.f32.mrb[78].mxu1 }
 0x392   : > { %v18225_v44 = vpop.f32.mrb[79].mxu1 }
 0x395   : > { %v12761_v57 = vpop.f32.mrb[80].mxu0 }
 0x396   : > { %v18232_v37 = vsel %vm7748_vm3, %v12761_v57, -inf  ;;  %v18234_v15 = vpop.f32.mrb[81].mxu0  ;;  %v18289_v57 = vsel %vm7748_vm3, %v18134_v41, -inf }
 0x397   : > { %v13177_v53 = vpop.f32.mrb[80].mxu1  ;;  %v12762_v63 = vpop.f32.mrb[82].mxu0  ;;  %20097 = vst [vmem:[#allocation31_spill] sm:$0xff] %v18289_v57 }
 0x398   : > { %v18243_v16 = vsel %vm7748_vm3, %v13177_v53, -inf  ;;  %v18245_v13 = vpop.f32.mrb[81].mxu1  ;;  %v18254_v17 = vsel %vm7748_vm3, %v12762_v63, -inf  ;;  %v18256_v23 = vpop.f32.mrb[83].mxu0  ;;  %v18273_v53 = vsel %vm7748_vm3, %v18067_v62, -inf  ;;  %v18277_v63 = vsel %vm7748_vm3, %v18073_v6, -inf }
 0x399   : > { %20093 = vst [vmem:[#allocation10_spill] sm:$0xff] %v18254_v17  ;;  %v13178_v29 = vpop.f32.mrb[82].mxu1  ;;  %v18293_v62 = vsel %vm7748_vm3, %v18144_v28, -inf }
 0x39a   : > { %v18265_v54 = vsel %vm7748_vm3, %v13178_v29, -inf  ;;  %v18267_v52 = vpop.f32.mrb[83].mxu1  ;;  %v18285_v29 = vsel %vm7748_vm3, %v18129_v33, -inf  ;;  %20098 = vst [vmem:[#allocation11_spill] sm:$0xff] %v18293_v62 }
 0x39b   : > { %20095 = vst [vmem:[#allocation27_spill] sm:$0xff] %v18265_v54  ;;  %20096 = vst [vmem:[#allocation29_spill] sm:$0xff] %v18285_v29 }
 0x39d   : > { %v12765_v7 = vpop.f32.mrb[84].mxu0 }
 0x39e   : > { %v18296_v6 = vsel %vm7748_vm3, %v12765_v7, -inf  ;;  %v5781_v45 = vpop.f32.mrb[85].mxu0 }
 0x39f   : > { %20099 = vst [vmem:[#allocation14_spill] sm:$0xff] %v18296_v6  ;;  %v13181_v5 = vpop.f32.mrb[84].mxu1  ;;  %v18308_v41 = vsel %vm7748_vm3, %v5781_v45, -inf  ;;  %v12766_v22 = vpop.f32.mrb[86].mxu0 }
 0x3a0   : > { %v18305_v54 = vsel %vm7748_vm3, %v13181_v5, -inf  ;;  %v7445_v28 = vpop.f32.mrb[85].mxu1  ;;  %v18318_v24 = vsel %vm7748_vm3, %v12766_v22, -inf  ;;  %v5784_v5 = vpop.f32.mrb[87].mxu0  ;;  %v18353_v22 = vsel %vm7748_vm3, %v18136_v38, -inf  ;;  %v18372_v38 = vsel %vm7748_vm3, %v18177_v30, -inf }
 0x3a1   : > { %20101 = vst [vmem:[#allocation20_spill] sm:$0xff] %v18305_v54  ;;  %v18315_v4 = vsel %vm7748_vm3, %v7445_v28, -inf  ;;  %20102 = vst [vmem:[#allocation33_spill] sm:$0xff] %v18318_v24  ;;  %v13182_v33 = vpop.f32.mrb[86].mxu1  ;;  %v18328_v7 = vsel %vm7748_vm3, %v5784_v5, -inf  ;;  %v18332_v28 = vsel %vm7748_vm3, %v18089_v11, -inf }
 0x3a2   : > { %v18325_v29 = vsel %vm7748_vm3, %v13182_v33, -inf  ;;  %v7448_v17 = vpop.f32.mrb[87].mxu1  ;;  %v18345_v5 = vsel %vm7748_vm3, %v18121_v0, -inf  ;;  %v18349_v11 = vsel %vm7748_vm3, %v18127_v46, -inf  ;;  %v18361_v33 = vsel %vm7748_vm3, %v18167_v32, -inf  ;;  %20108 = vst [vmem:[#allocation35_spill] sm:$0xff] %v18372_v38 }
 0x3a3   : > { %20103 = vst [vmem:[#allocation32_spill] sm:$0xff] %v18325_v29  ;;  %v18339_v54 = vsel %vm7748_vm3, %v7448_v17, -inf  ;;  %v18357_v17 = vsel %vm7748_vm3, %v18165_v40, -inf  ;;  %20105 = vst [vmem:[#allocation39_spill] sm:$0xff] %v18361_v33  ;;  %v18365_v0 = vsel %vm7748_vm3, %v18175_v10, -inf }
 0x3a4   : > { %20104 = vst [vmem:[#allocation34_spill] sm:$0xff] %v18357_v17  ;;  %20106 = vst [vmem:[#allocation19_spill] sm:$0xff] %v18365_v0 }
 0x3a5   : > { %v12769_v6 = vpop.f32.mrb[88].mxu0 }
 0x3a6   : > { %v18368_v46 = vsel %vm7748_vm3, %v12769_v6, -inf  ;;  %v5797_v29 = vpop.f32.mrb[89].mxu0 }
 0x3a7   : > { %20107 = vst [vmem:[#allocation36_spill] sm:$0xff] %v18368_v46  ;;  %v13185_v45 = vpop.f32.mrb[88].mxu1  ;;  %v18380_v32 = vsel %vm7748_vm3, %v5797_v29, -inf  ;;  %v12770_v24 = vpop.f32.mrb[90].mxu0 }
 0x3a8   : > { %v18377_v18 = vsel %vm7748_vm3, %v13185_v45, -inf  ;;  %v7461_v10 = vpop.f32.mrb[89].mxu1  ;;  %v18390_v57 = vsel %vm7748_vm3, %v12770_v24, -inf  ;;  %v5800_v45 = vpop.f32.mrb[91].mxu0  ;;  %v18425_v24 = vsel %vm7748_vm3, %v18169_v58, -inf  ;;  %v18444_v58 = vsel %vm7748_vm3, %v18193_v9, -inf }
 0x3a9   : > { %20109 = vst [vmem:[#allocation38_spill] sm:$0xff] %v18377_v18  ;;  %v18387_v30 = vsel %vm7748_vm3, %v7461_v10, -inf  ;;  %20110 = vst [vmem:[#allocation41_spill] sm:$0xff] %v18390_v57  ;;  %v13186_v40 = vpop.f32.mrb[90].mxu1  ;;  %v18400_v6 = vsel %vm7748_vm3, %v5800_v45, -inf  ;;  %v18404_v10 = vsel %vm7748_vm3, %v18142_v47, -inf }
 0x3aa   : > { %v18397_v17 = vsel %vm7748_vm3, %v13186_v40, -inf  ;;  %v7464_v62 = vpop.f32.mrb[91].mxu1  ;;  %v18417_v45 = vsel %vm7748_vm3, %v18159_v12, -inf  ;;  %v18421_v47 = vsel %vm7748_vm3, %v18163_v3, -inf  ;;  %v18433_v40 = vsel %vm7748_vm3, %v18185_v42, -inf  ;;  %20116 = vst [vmem:[#allocation46_spill] sm:$0xff] %v18444_v58 }
 0x3ab   : > { %20111 = vst [vmem:[#allocation40_spill] sm:$0xff] %v18397_v17  ;;  %v18411_v18 = vsel %vm7748_vm3, %v7464_v62, -inf  ;;  %v18429_v62 = vsel %vm7748_vm3, %v18183_v14, -inf  ;;  %20113 = vst [vmem:[#allocation43_spill] sm:$0xff] %v18433_v40  ;;  %v18437_v12 = vsel %vm7748_vm3, %v18191_v8, -inf }
 0x3ac   : > { %20112 = vst [vmem:[#allocation42_spill] sm:$0xff] %v18429_v62  ;;  %20114 = vst [vmem:[#allocation37_spill] sm:$0xff] %v18437_v12 }
 0x3ad   : > { %v12773_v46 = vpop.f32.mrb[92].mxu0 }
 0x3ae   : > { %v18440_v3 = vsel %vm7748_vm3, %v12773_v46, -inf  ;;  %v5813_v17 = vpop.f32.mrb[93].mxu0 }
 0x3af   : > { %20115 = vst [vmem:[#allocation47_spill] sm:$0xff] %v18440_v3  ;;  %v13189_v29 = vpop.f32.mrb[92].mxu1  ;;  %v18452_v42 = vsel %vm7748_vm3, %v5813_v17, -inf  ;;  %v12774_v57 = vpop.f32.mrb[94].mxu0 }
 0x3b0   : > { %v18449_v38 = vsel %vm7748_vm3, %v13189_v29, -inf  ;;  %v7477_v8 = vpop.f32.mrb[93].mxu1  ;;  %v18462_v33 = vsel %vm7748_vm3, %v12774_v57, -inf  ;;  %v5816_v29 = vpop.f32.mrb[95].mxu0  ;;  %v18497_v57 = vsel %vm7748_vm3, %v18187_v20, -inf  ;;  %v18516_v20 = vsel %vm7748_vm3, %v18209_v1, -inf }
 0x3b1   : > { %20117 = vst [vmem:[#allocation61_spill] sm:$0xff] %v18449_v38  ;;  %v18459_v9 = vsel %vm7748_vm3, %v7477_v8, -inf  ;;  %20118 = vst [vmem:[#allocation51_spill] sm:$0xff] %v18462_v33  ;;  %v13190_v14 = vpop.f32.mrb[94].mxu1  ;;  %v18472_v46 = vsel %vm7748_vm3, %v5816_v29, -inf  ;;  %v18476_v8 = vsel %vm7748_vm3, %v18173_v59, -inf }
 0x3b2   : > { %v18469_v62 = vsel %vm7748_vm3, %v13190_v14, -inf  ;;  %v7480_v0 = vpop.f32.mrb[95].mxu1  ;;  %v18489_v29 = vsel %vm7748_vm3, %v18179_v61, -inf  ;;  %v18493_v59 = vsel %vm7748_vm3, %v18181_v43, -inf  ;;  %v18505_v14 = vsel %vm7748_vm3, %v18201_v50, -inf  ;;  %20124 = vst [vmem:[#allocation44_spill] sm:$0xff] %v18516_v20 }
 0x3b3   : > { %20119 = vst [vmem:[#allocation45_spill] sm:$0xff] %v18469_v62  ;;  %v18483_v38 = vsel %vm7748_vm3, %v7480_v0, -inf  ;;  %v18501_v0 = vsel %vm7748_vm3, %v18199_v49, -inf  ;;  %20121 = vst [vmem:[#allocation60_spill] sm:$0xff] %v18505_v14  ;;  %v18509_v61 = vsel %vm7748_vm3, %v18207_v48, -inf }
 0x3b4   : > { %20120 = vst [vmem:[#allocation59_spill] sm:$0xff] %v18501_v0  ;;  %20122 = vst [vmem:[#allocation50_spill] sm:$0xff] %v18509_v61 }
 0x3b5   : > { %v12777_v3 = vpop.f32.mrb[96].mxu0 }
 0x3b6   : > { %v18512_v43 = vsel %vm7748_vm3, %v12777_v3, -inf  ;;  %v5829_v62 = vpop.f32.mrb[97].mxu0 }
 0x3b7   : > { %20123 = vst [vmem:[#allocation49_spill] sm:$0xff] %v18512_v43  ;;  %v13193_v17 = vpop.f32.mrb[96].mxu1  ;;  %v18524_v50 = vsel %vm7748_vm3, %v5829_v62, -inf  ;;  %v12778_v33 = vpop.f32.mrb[98].mxu0 }
 0x3b8   : > { %v18521_v58 = vsel %vm7748_vm3, %v13193_v17, -inf  ;;  %v7493_v48 = vpop.f32.mrb[97].mxu1  ;;  %v18534_v40 = vsel %vm7748_vm3, %v12778_v33, -inf  ;;  %v5832_v17 = vpop.f32.mrb[99].mxu0  ;;  %v18569_v33 = vsel %vm7748_vm3, %v18203_v2, -inf  ;;  %v18588_v2 = vsel %vm7748_vm3, %v18225_v44, -inf }
 0x3b9   : > { %20125 = vst [vmem:[#allocation57_spill] sm:$0xff] %v18521_v58  ;;  %v18531_v1 = vsel %vm7748_vm3, %v7493_v48, -inf  ;;  %20126 = vst [vmem:[#allocation48_spill] sm:$0xff] %v18534_v40  ;;  %v13194_v49 = vpop.f32.mrb[98].mxu1  ;;  %v18544_v3 = vsel %vm7748_vm3, %v5832_v17, -inf  ;;  %v18548_v48 = vsel %vm7748_vm3, %v18189_v26, -inf }
 0x3ba   : > { %v18541_v0 = vsel %vm7748_vm3, %v13194_v49, -inf  ;;  %v7496_v12 = vpop.f32.mrb[99].mxu1  ;;  %v18561_v17 = vsel %vm7748_vm3, %v18195_v35, -inf  ;;  %v18565_v26 = vsel %vm7748_vm3, %v18197_v60, -inf  ;;  %v18577_v49 = vsel %vm7748_vm3, %v18217_v36, -inf  ;;  %20132 = vst [vmem:[#allocation55_spill] sm:$0xff] %v18588_v2 }
 0x3bb   : > { %20127 = vst [vmem:[#allocation52_spill] sm:$0xff] %v18541_v0  ;;  %v18555_v58 = vsel %vm7748_vm3, %v7496_v12, -inf  ;;  %v18573_v12 = vsel %vm7748_vm3, %v18215_v31, -inf  ;;  %20129 = vst [vmem:[#allocation2_spill] sm:$0xff] %v18577_v49  ;;  %v18581_v35 = vsel %vm7748_vm3, %v18223_v55, -inf }
 0x3bc   : > { %20128 = vst [vmem:[#allocation54_spill] sm:$0xff] %v18573_v12  ;;  %20130 = vst [vmem:[#allocation15_spill] sm:$0xff] %v18581_v35 }
 0x3bd   : > { %v12781_v43 = vpop.f32.mrb[100].mxu0 }
 0x3be   : > { %v18584_v60 = vsel %vm7748_vm3, %v12781_v43, -inf  ;;  %v5845_v0 = vpop.f32.mrb[101].mxu0 }
 0x3bf   : > { %20131 = vst [vmem:[#allocation56_spill] sm:$0xff] %v18584_v60  ;;  %v13197_v62 = vpop.f32.mrb[100].mxu1  ;;  %v18596_v36 = vsel %vm7748_vm3, %v5845_v0, -inf  ;;  %v12782_v40 = vpop.f32.mrb[102].mxu0 }
 0x3c0   : > { %v18593_v20 = vsel %vm7748_vm3, %v13197_v62, -inf  ;;  %v7509_v55 = vpop.f32.mrb[101].mxu1  ;;  %v18606_v14 = vsel %vm7748_vm3, %v12782_v40, -inf  ;;  %v5848_v62 = vpop.f32.mrb[103].mxu0  ;;  %v18641_v40 = vsel %vm7748_vm3, %v18219_v27, -inf  ;;  %v18660_v27 = vsel %vm7748_vm3, %v18267_v52, -inf }
 0x3c1   : > { %20133 = vst [vmem:[#allocation5_spill] sm:$0xff] %v18593_v20  ;;  %v18603_v44 = vsel %vm7748_vm3, %v7509_v55, -inf  ;;  %20134 = vst [vmem:[#allocation6_spill] sm:$0xff] %v18606_v14  ;;  %v13198_v31 = vpop.f32.mrb[102].mxu1  ;;  %v18616_v43 = vsel %vm7748_vm3, %v5848_v62, -inf  ;;  %v18620_v55 = vsel %vm7748_vm3, %v18205_v56, -inf }
 0x3c2   : > { %v18613_v12 = vsel %vm7748_vm3, %v13198_v31, -inf  ;;  %v7512_v61 = vpop.f32.mrb[103].mxu1  ;;  %v18633_v62 = vsel %vm7748_vm3, %v18211_v51, -inf  ;;  %v18637_v56 = vsel %vm7748_vm3, %v18213_v19, -inf  ;;  %v18649_v31 = vsel %vm7748_vm3, %v18245_v13, -inf  ;;  %20140 = vst [vmem:[#allocation16_spill] sm:$0xff] %v18660_v27 }
 0x3c3   : > { %20135 = vst [vmem:[#allocation21_spill] sm:$0xff] %v18613_v12  ;;  %v18627_v20 = vsel %vm7748_vm3, %v7512_v61, -inf  ;;  %v18645_v61 = vsel %vm7748_vm3, %v18234_v15, -inf  ;;  %20137 = vst [vmem:[#allocation58_spill] sm:$0xff] %v18649_v31  ;;  %v18653_v51 = vsel %vm7748_vm3, %v18256_v23, -inf  ;;  %v20146_v27 = vmax.f32 %v18277_v63, %v18315_v4 }
 0x3c4   : > { %20136 = vst [vmem:[#allocation62_spill] sm:$0xff] %v18645_v61  ;;  %20138 = vst [vmem:[#allocation63_spill] sm:$0xff] %v18653_v51  ;;  %v20149_v63 = vmax.f32 %v18281_v34, %v18328_v7  ;;  %v20154_v34 = vld [vmem:[#allocation12_spill] sm:$0xff]  ;;  %v20155_v7 = vld [vmem:[#allocation27_spill] sm:$0xff] }
 0x3c5   : > { %v12785_v60 = vpop.f32.mrb[104].mxu0 }
 0x3c6   : > { %v18656_v19 = vsel %vm7748_vm3, %v12785_v60, -inf  ;;  %v5861_v12 = vpop.f32.mrb[105].mxu0 }
 0x3c7   : > { %20139 = vst [vmem:[#allocation53_spill] sm:$0xff] %v18656_v19  ;;  %v13201_v0 = vpop.f32.mrb[104].mxu1  ;;  %v18668_v13 = vsel %vm7748_vm3, %v5861_v12, -inf  ;;  %v12786_v14 = vpop.f32.mrb[106].mxu0 }
 0x3c8   : > { %v18665_v2 = vsel %vm7748_vm3, %v13201_v0, -inf  ;;  %v7525_v23 = vpop.f32.mrb[105].mxu1  ;;  %v18678_v49 = vsel %vm7748_vm3, %v12786_v14, -inf  ;;  %v5864_v0 = vpop.f32.mrb[107].mxu0 }
 0x3c9   : > { %20141 = vst [vmem:[#allocation4_spill] sm:$0xff] %v18665_v2  ;;  %v18675_v52 = vsel %vm7748_vm3, %v7525_v23, -inf  ;;  %20142 = vst [vmem:[#allocation17_spill] sm:$0xff] %v18678_v49  ;;  %v13202_v15 = vpop.f32.mrb[106].mxu1  ;;  %v18688_v60 = vsel %vm7748_vm3, %v5864_v0, -inf  ;;  %v18692_v23 = vsel %vm7748_vm3, %v18221_v39, -inf  ;;  %v20145_v39 = vmax.f32 %v18273_v53, %v18308_v41 }
 0x3ca   : > { %v18685_v61 = vsel %vm7748_vm3, %v13202_v15, -inf  ;;  %v7528_v35 = vpop.f32.mrb[107].mxu1 }
 0x3cb   : > { %20143 = vst [vmem:[#allocation24_spill] sm:$0xff] %v18685_v61  ;;  %v18699_v2 = vsel %vm7748_vm3, %v7528_v35, -inf }
 0x3cc   : > { %20144 = vst [vmem:[#allocation25_spill] sm:$0xff] %v18699_v2 }
 0x3cd   : > { %v12789_v19 = vpop.f32.mrb[108].mxu0 }
 0x3ce   : > { %v8312_v0 = vsel %vm7748_vm3, %v12789_v19, -inf  ;;  %v5877_v51 = vpop.f32.mrb[109].mxu0  ;;  %v20147_v19 = vmax.f32 %v18229_v21, %v18232_v37 }
 0x3cf   : > { %v13205_v49 = vpop.f32.mrb[108].mxu1  ;;  %v18707_v31 = vmax.f32 %v20145_v39, %v8312_v0  ;;  %v8298_v12 = vsel %vm7748_vm3, %v5877_v51, -inf  ;;  %v12790_v35 = vpop.f32.mrb[110].mxu0  ;;  %v20148_v51 = vmax.f32 %v18238_v25, %v18243_v16 }
 0x3d0   : > { %v9040_v14 = vsel %vm7748_vm3, %v13205_v49, -inf  ;;  %v7541_v61 = vpop.f32.mrb[109].mxu1  ;;  %v18719_v2 = vmax.f32 %v20147_v19, %v8298_v12  ;;  %v8319_v41 = vsel %vm7748_vm3, %v12790_v35, -inf  ;;  %v5880_v49 = vpop.f32.mrb[111].mxu0  ;;  %v20152_v35 = vld [vmem:[#allocation10_spill] sm:$0xff] }
 0x3d1   : > { %v18714_v15 = vmax.f32 %v20146_v27, %v9040_v14  ;;  %v9026_v53 = vsel %vm7748_vm3, %v7541_v61, -inf  ;;  %v13206_v0 = vpop.f32.mrb[110].mxu1  ;;  %v18731_v4 = vmax.f32 %v20149_v63, %v8319_v41  ;;  %v8305_v37 = vsel %vm7748_vm3, %v5880_v49, -inf  ;;  %v20151_v14 = vld [vmem:[#allocation28_spill] sm:$0xff] }
 0x3d2   : > { %v18726_v39 = vmax.f32 %v20148_v51, %v9026_v53  ;;  %v9047_v21 = vsel %vm7748_vm3, %v13206_v0, -inf  ;;  %v7544_v27 = vpop.f32.mrb[111].mxu1  ;;  %v20150_v61 = vmax.f32 %v18332_v28, %v18339_v54  ;;  %v20153_v25 = vmax.f32 %v20151_v14, %v20152_v35 }
 0x3d3   : > { %v9033_v19 = vsel %vm7748_vm3, %v7544_v27, -inf  ;;  %v20156_v53 = vmax.f32 %v20154_v34, %v20155_v7  ;;  %v20157_v54 = vmax.f32 %v18345_v5, %v18380_v32  ;;  %v20158_v14 = vmax.f32 %v18349_v11, %v18387_v30 }
 0x3d4   : > { %v18738_v12 = vmax.f32 %v20150_v61, %v9047_v21  ;;  %v18743_v16 = vmax.f32 %v20153_v25, %v8305_v37  ;;  %v20159_v25 = vld [vmem:[#allocation29_spill] sm:$0xff]  ;;  %v20165_v11 = vmax.f32 %v18353_v22, %v18400_v6  ;;  %v20171_v6 = vld [vmem:[#allocation32_spill] sm:$0xff] }
 0x3d5   : > { %v18749_v41 = vmax.f32 %v20156_v53, %v9033_v19  ;;  %v12793_v0 = vpop.f32.mrb[112].mxu0  ;;  %v20160_v19 = vld [vmem:[#allocation14_spill] sm:$0xff]  ;;  %v20170_v22 = vld [vmem:[#allocation13_spill] sm:$0xff] }
 0x3d6   : > { %v8340_v49 = vsel %vm7748_vm3, %v12793_v0, -inf  ;;  %v5893_v63 = vpop.f32.mrb[113].mxu0  ;;  %v20161_v34 = vmax.f32 %v20159_v25, %v20160_v19  ;;  %v20167_v25 = vld [vmem:[#allocation11_spill] sm:$0xff]  ;;  %v20168_v19 = vld [vmem:[#allocation33_spill] sm:$0xff] }
 0x3d7   : > { %v13209_v51 = vpop.f32.mrb[112].mxu1  ;;  %v18755_v28 = vmax.f32 %v20157_v54, %v8340_v49  ;;  %v8326_v37 = vsel %vm7748_vm3, %v5893_v63, -inf  ;;  %v12794_v61 = vpop.f32.mrb[114].mxu0  ;;  %v20162_v49 = vld [vmem:[#allocation31_spill] sm:$0xff] }
 0x3d8   : > { %v9068_v21 = vsel %vm7748_vm3, %v13209_v51, -inf  ;;  %v7557_v27 = vpop.f32.mrb[113].mxu1  ;;  %v18767_v7 = vmax.f32 %v20161_v34, %v8326_v37  ;;  %v8347_v32 = vsel %vm7748_vm3, %v12794_v61, -inf  ;;  %v5896_v0 = vpop.f32.mrb[115].mxu0  ;;  %v20163_v51 = vld [vmem:[#allocation20_spill] sm:$0xff]  ;;  %v20169_v34 = vmax.f32 %v20167_v25, %v20168_v19 }
 0x3d9   : > { %v18762_v35 = vmax.f32 %v20158_v14, %v9068_v21  ;;  %v9054_v5 = vsel %vm7748_vm3, %v7557_v27, -inf  ;;  %v13210_v53 = vpop.f32.mrb[114].mxu1  ;;  %v20164_v63 = vmax.f32 %v20162_v49, %v20163_v51  ;;  %v18779_v30 = vmax.f32 %v20165_v11, %v8347_v32 }
 0x3da   : > { %v9075_v21 = vsel %vm7748_vm3, %v13210_v53, -inf  ;;  %v8333_v37 = vsel %vm7748_vm3, %v5896_v0, -inf  ;;  %v7560_v14 = vpop.f32.mrb[115].mxu1  ;;  %v20166_v27 = vmax.f32 %v18404_v10, %v18411_v18  ;;  %v20172_v32 = vmax.f32 %v20170_v22, %v20171_v6 }
 0x3db   : > { %v18774_v54 = vmax.f32 %v20164_v63, %v9054_v5  ;;  %v18791_v5 = vmax.f32 %v20169_v34, %v8333_v37  ;;  %v9061_v49 = vsel %vm7748_vm3, %v7560_v14, -inf  ;;  %v20173_v18 = vmax.f32 %v18417_v45, %v18452_v42  ;;  %v20175_v34 = vld [vmem:[#allocation34_spill] sm:$0xff] }
 0x3dc   : > { %v18786_v61 = vmax.f32 %v20166_v27, %v9075_v21  ;;  %v18797_v51 = vmax.f32 %v20172_v32, %v9061_v49  ;;  %v20174_v25 = vmax.f32 %v18421_v47, %v18459_v9  ;;  %v20176_v49 = vld [vmem:[#allocation36_spill] sm:$0xff]  ;;  %v20181_v47 = vmax.f32 %v18425_v24, %v18472_v46  ;;  %v20186_v24 = vld [vmem:[#allocation35_spill] sm:$0xff] }
 0x3dd   : > { %v12797_v53 = vpop.f32.mrb[116].mxu0  ;;  %v20177_v22 = vmax.f32 %v20175_v34, %v20176_v49  ;;  %v20183_v34 = vld [vmem:[#allocation19_spill] sm:$0xff]  ;;  %v20184_v49 = vld [vmem:[#allocation41_spill] sm:$0xff]  ;;  %v20187_v46 = vld [vmem:[#allocation40_spill] sm:$0xff] }
 0x3de   : > { %v8368_v0 = vsel %vm7748_vm3, %v12797_v53, -inf  ;;  %v5909_v11 = vpop.f32.mrb[117].mxu0 }
 0x3df   : > { %v13213_v63 = vpop.f32.mrb[116].mxu1  ;;  %v18803_v10 = vmax.f32 %v20173_v18, %v8368_v0  ;;  %v8354_v37 = vsel %vm7748_vm3, %v5909_v11, -inf  ;;  %v12798_v27 = vpop.f32.mrb[118].mxu0  ;;  %v20178_v0 = vld [vmem:[#allocation39_spill] sm:$0xff] }
 0x3e0   : > { %v9096_v21 = vsel %vm7748_vm3, %v13213_v63, -inf  ;;  %v7573_v14 = vpop.f32.mrb[117].mxu1  ;;  %v18815_v6 = vmax.f32 %v20177_v22, %v8354_v37  ;;  %v8375_v42 = vsel %vm7748_vm3, %v12798_v27, -inf  ;;  %v5912_v53 = vpop.f32.mrb[119].mxu0  ;;  %v20179_v63 = vld [vmem:[#allocation38_spill] sm:$0xff]  ;;  %v20185_v22 = vmax.f32 %v20183_v34, %v20184_v49 }
 0x3e1   : > { %v18810_v19 = vmax.f32 %v20174_v25, %v9096_v21  ;;  %v9082_v45 = vsel %vm7748_vm3, %v7573_v14, -inf  ;;  %v13214_v32 = vpop.f32.mrb[118].mxu1  ;;  %v20180_v11 = vmax.f32 %v20178_v0, %v20179_v63  ;;  %v18827_v9 = vmax.f32 %v20181_v47, %v8375_v42 }
 0x3e2   : > { %v9103_v21 = vsel %vm7748_vm3, %v13214_v32, -inf  ;;  %v8361_v37 = vsel %vm7748_vm3, %v5912_v53, -inf  ;;  %v7576_v25 = vpop.f32.mrb[119].mxu1  ;;  %v20182_v14 = vmax.f32 %v18476_v8, %v18483_v38  ;;  %v20188_v42 = vmax.f32 %v20186_v24, %v20187_v46 }
 0x3e3   : > { %v18822_v18 = vmax.f32 %v20180_v11, %v9082_v45  ;;  %v18839_v45 = vmax.f32 %v20185_v22, %v8361_v37  ;;  %v9089_v0 = vsel %vm7748_vm3, %v7576_v25, -inf  ;;  %v20189_v38 = vmax.f32 %v18489_v29, %v18524_v50  ;;  %v20191_v22 = vld [vmem:[#allocation42_spill] sm:$0xff] }
 0x3e4   : > { %v18834_v27 = vmax.f32 %v20182_v14, %v9103_v21  ;;  %v18845_v63 = vmax.f32 %v20188_v42, %v9089_v0  ;;  %v20190_v34 = vmax.f32 %v18493_v59, %v18531_v1  ;;  %v20192_v0 = vld [vmem:[#allocation47_spill] sm:$0xff]  ;;  %v20197_v59 = vmax.f32 %v18497_v57, %v18544_v3  ;;  %v20202_v57 = vld [vmem:[#allocation46_spill] sm:$0xff]  ;;  %v20203_v3 = vld [vmem:[#allocation45_spill] sm:$0xff] }
 0x3e5   : > { %v12801_v32 = vpop.f32.mrb[120].mxu0  ;;  %v20193_v24 = vmax.f32 %v20191_v22, %v20192_v0  ;;  %v20199_v22 = vld [vmem:[#allocation37_spill] sm:$0xff]  ;;  %v20200_v0 = vld [vmem:[#allocation51_spill] sm:$0xff] }
 0x3e6   : > { %v8396_v53 = vsel %vm7748_vm3, %v12801_v32, -inf  ;;  %v5925_v47 = vpop.f32.mrb[121].mxu0 }
 0x3e7   : > { %v13217_v11 = vpop.f32.mrb[120].mxu1  ;;  %v18851_v8 = vmax.f32 %v20189_v38, %v8396_v53  ;;  %v8382_v37 = vsel %vm7748_vm3, %v5925_v47, -inf  ;;  %v12802_v14 = vpop.f32.mrb[122].mxu0  ;;  %v20194_v53 = vld [vmem:[#allocation43_spill] sm:$0xff] }
 0x3e8   : > { %v9124_v21 = vsel %vm7748_vm3, %v13217_v11, -inf  ;;  %v7589_v25 = vpop.f32.mrb[121].mxu1  ;;  %v18863_v46 = vmax.f32 %v20193_v24, %v8382_v37  ;;  %v8403_v50 = vsel %vm7748_vm3, %v12802_v14, -inf  ;;  %v5928_v32 = vpop.f32.mrb[123].mxu0  ;;  %v20195_v11 = vld [vmem:[#allocation61_spill] sm:$0xff]  ;;  %v20201_v24 = vmax.f32 %v20199_v22, %v20200_v0 }
 0x3e9   : > { %v18858_v49 = vmax.f32 %v20190_v34, %v9124_v21  ;;  %v9110_v29 = vsel %vm7748_vm3, %v7589_v25, -inf  ;;  %v13218_v42 = vpop.f32.mrb[122].mxu1  ;;  %v20196_v47 = vmax.f32 %v20194_v53, %v20195_v11  ;;  %v18875_v1 = vmax.f32 %v20197_v59, %v8403_v50 }
 0x3ea   : > { %v9131_v21 = vsel %vm7748_vm3, %v13218_v42, -inf  ;;  %v8389_v37 = vsel %vm7748_vm3, %v5928_v32, -inf  ;;  %v7592_v34 = vpop.f32.mrb[123].mxu1  ;;  %v20198_v25 = vmax.f32 %v18548_v48, %v18555_v58  ;;  %v20204_v50 = vmax.f32 %v20202_v57, %v20203_v3 }
 0x3eb   : > { %v18870_v38 = vmax.f32 %v20196_v47, %v9110_v29  ;;  %v18887_v29 = vmax.f32 %v20201_v24, %v8389_v37  ;;  %v9117_v53 = vsel %vm7748_vm3, %v7592_v34, -inf  ;;  %v20205_v58 = vmax.f32 %v18561_v17, %v18596_v36  ;;  %v20207_v24 = vld [vmem:[#allocation59_spill] sm:$0xff] }
 0x3ec   : > { %v18882_v14 = vmax.f32 %v20198_v25, %v9131_v21  ;;  %v18893_v11 = vmax.f32 %v20204_v50, %v9117_v53  ;;  %v20206_v22 = vmax.f32 %v18565_v26, %v18603_v44  ;;  %v20208_v53 = vld [vmem:[#allocation49_spill] sm:$0xff]  ;;  %v20213_v26 = vmax.f32 %v18569_v33, %v18616_v43  ;;  %v20218_v33 = vld [vmem:[#allocation44_spill] sm:$0xff] }
 0x3ed   : > { %v12805_v42 = vpop.f32.mrb[124].mxu0  ;;  %v20209_v57 = vmax.f32 %v20207_v24, %v20208_v53  ;;  %v20215_v24 = vld [vmem:[#allocation50_spill] sm:$0xff]  ;;  %v20216_v53 = vld [vmem:[#allocation48_spill] sm:$0xff] }
 0x3ee   : > { %v8424_v32 = vsel %vm7748_vm3, %v12805_v42, -inf  ;;  %v5941_v59 = vpop.f32.mrb[125].mxu0  ;;  %v20219_v43 = vld [vmem:[#allocation52_spill] sm:$0xff] }
 0x3ef   : > { %v13221_v47 = vpop.f32.mrb[124].mxu1  ;;  %v18899_v48 = vmax.f32 %v20205_v58, %v8424_v32  ;;  %v8410_v37 = vsel %vm7748_vm3, %v5941_v59, -inf  ;;  %v12806_v25 = vpop.f32.mrb[126].mxu0  ;;  %v20210_v32 = vld [vmem:[#allocation60_spill] sm:$0xff] }
 0x3f0   : > { %v9152_v21 = vsel %vm7748_vm3, %v13221_v47, -inf  ;;  %v7605_v34 = vpop.f32.mrb[125].mxu1  ;;  %v18911_v3 = vmax.f32 %v20209_v57, %v8410_v37  ;;  %v8431_v36 = vsel %vm7748_vm3, %v12806_v25, -inf  ;;  %v5944_v42 = vpop.f32.mrb[127].mxu0  ;;  %v20211_v47 = vld [vmem:[#allocation57_spill] sm:$0xff]  ;;  %v20217_v57 = vmax.f32 %v20215_v24, %v20216_v53 }
 0x3f1   : > { %v18906_v0 = vmax.f32 %v20206_v22, %v9152_v21  ;;  %v9138_v17 = vsel %vm7748_vm3, %v7605_v34, -inf  ;;  %v13222_v50 = vpop.f32.mrb[126].mxu1  ;;  %v20212_v59 = vmax.f32 %v20210_v32, %v20211_v47  ;;  %v18923_v44 = vmax.f32 %v20213_v26, %v8431_v36 }
 0x3f2   : > { %v9159_v21 = vsel %vm7748_vm3, %v13222_v50, -inf  ;;  %v8417_v37 = vsel %vm7748_vm3, %v5944_v42, -inf  ;;  %v7608_v22 = vpop.f32.mrb[127].mxu1  ;;  %v20214_v34 = vmax.f32 %v18620_v55, %v18627_v20  ;;  %v20220_v36 = vmax.f32 %v20218_v33, %v20219_v43 }
 0x3f3   : > { %v18918_v58 = vmax.f32 %v20212_v59, %v9138_v17  ;;  %v18935_v17 = vmax.f32 %v20217_v57, %v8417_v37  ;;  %v9145_v32 = vsel %vm7748_vm3, %v7608_v22, -inf  ;;  %v20221_v20 = vmax.f32 %v18633_v62, %v18668_v13  ;;  %v20225_v57 = vld [vmem:[#allocation54_spill] sm:$0xff] }
 0x3f4   : > { %v18930_v25 = vmax.f32 %v20214_v34, %v9159_v21  ;;  %v18941_v47 = vmax.f32 %v20220_v36, %v9145_v32  ;;  %v20223_v24 = vmax.f32 %v18637_v56, %v18675_v52  ;;  %v20226_v32 = vld [vmem:[#allocation56_spill] sm:$0xff]  ;;  %v20231_v56 = vmax.f32 %v18641_v40, %v18688_v60  ;;  %v20239_v40 = vld [vmem:[#allocation55_spill] sm:$0xff]  ;;  %v20240_v60 = vld [vmem:[#allocation21_spill] sm:$0xff] }
 0x3f5   : > { %v12809_v50 = vpop.f32.mrb[128].mxu0  ;;  %v20227_v33 = vmax.f32 %v20225_v57, %v20226_v32  ;;  %v20236_v32 = vld [vmem:[#allocation15_spill] sm:$0xff] }
 0x3f6   : > { %v8452_v42 = vsel %vm7748_vm3, %v12809_v50, -inf  ;;  %v5957_v26 = vpop.f32.mrb[129].mxu0 }
 0x3f7   : > { %v13225_v59 = vpop.f32.mrb[128].mxu1  ;;  %v18947_v55 = vmax.f32 %v20221_v20, %v8452_v42  ;;  %v8438_v37 = vsel %vm7748_vm3, %v5957_v26, -inf  ;;  %v12810_v34 = vpop.f32.mrb[130].mxu0  ;;  %v20228_v42 = vld [vmem:[#allocation2_spill] sm:$0xff] }
 0x3f8   : > { %v9180_v21 = vsel %vm7748_vm3, %v13225_v59, -inf  ;;  %v7621_v22 = vpop.f32.mrb[129].mxu1  ;;  %v18959_v43 = vmax.f32 %v20227_v33, %v8438_v37  ;;  %v8459_v13 = vsel %vm7748_vm3, %v12810_v34, -inf  ;;  %v5960_v50 = vpop.f32.mrb[131].mxu0  ;;  %v20229_v59 = vld [vmem:[#allocation5_spill] sm:$0xff]  ;;  %v20237_v33 = vld [vmem:[#allocation6_spill] sm:$0xff] }
 0x3f9   : > { %20222 = vst [vmem:[#allocation18_spill] sm:$0xff] %v18947_v55  ;;  %v18954_v53 = vmax.f32 %v20223_v24, %v9180_v21  ;;  %v9166_v62 = vsel %vm7748_vm3, %v7621_v22, -inf  ;;  %v13226_v36 = vpop.f32.mrb[130].mxu1  ;;  %v20230_v26 = vmax.f32 %v20228_v42, %v20229_v59  ;;  %v18971_v52 = vmax.f32 %v20231_v56, %v8459_v13  ;;  %v20233_v22 = vld [vmem:[#allocation25_spill] sm:$0xff] }
 0x3fa   : > { %v9187_v21 = vsel %vm7748_vm3, %v13226_v36, -inf  ;;  %v8445_v37 = vsel %vm7748_vm3, %v5960_v50, -inf  ;;  %v7624_v24 = vpop.f32.mrb[131].mxu1  ;;  %v20234_v34 = vmax.f32 %v18692_v23, %v20233_v22  ;;  %v20238_v42 = vmax.f32 %v20236_v32, %v20237_v33  ;;  %v20242_v32 = vld [vmem:[#allocation62_spill] sm:$0xff]  ;;  %v20243_v33 = vld [vmem:[#allocation53_spill] sm:$0xff] }
 0x3fb   : > { %20224 = vst [vmem:[#allocation3_spill] sm:$0xff] %v18954_v53  ;;  %v18966_v20 = vmax.f32 %v20230_v26, %v9166_v62  ;;  %20232 = vst [vmem:[#allocation9_spill] sm:$0xff] %v18971_v52  ;;  %v9173_v59 = vsel %vm7748_vm3, %v7624_v24, -inf  ;;  %v20241_v13 = vmax.f32 %v20239_v40, %v20240_v60 }
 0x3fc   : > { %v18978_v57 = vmax.f32 %v20234_v34, %v9187_v21  ;;  %v18983_v62 = vmax.f32 %v20238_v42, %v8445_v37  ;;  %v20244_v42 = vmax.f32 %v20242_v32, %v20243_v33 }
 0x3fd   : > { %v18989_v26 = vmax.f32 %v20241_v13, %v9173_v59  ;;  %v12813_v36 = vpop.f32.mrb[132].mxu0 }
 0x3fe   : > { %20235 = vst [vmem:[#allocation22_spill] sm:$0xff] %v18978_v57  ;;  %v8300_v50 = vsel %vm7748_vm3, %v12813_v36, -inf  ;;  %v5973_v52 = vpop.f32.mrb[133].mxu0 }
 0x3ff   : > { %v13229_v56 = vpop.f32.mrb[132].mxu1  ;;  %v8301_v23 = vmax.f32 %v18719_v2, %v8300_v50  ;;  %v8466_v22 = vsel %vm7748_vm3, %v5973_v52, -inf  ;;  %v12814_v34 = vpop.f32.mrb[134].mxu0  ;;  %v19006_v2 = vld [vmem:[%s19294_s2] ss:$0 sm:$0xff] }
 0x400   : > { %v9028_v21 = vsel %vm7748_vm3, %v13229_v56, -inf  ;;  %v7637_v37 = vpop.f32.mrb[133].mxu1  ;;  %v18999_v59 = vmax.f32 %v20244_v42, %v8466_v22  ;;  %v8307_v60 = vsel %vm7748_vm3, %v12814_v34, -inf  ;;  %v5976_v36 = vpop.f32.mrb[135].mxu0  ;;  %v20246_v50 = vld [vmem:[#allocation58_spill] sm:$0xff] }
 0x401   : > { %v9029_v24 = vmax.f32 %v18726_v39, %v9028_v21  ;;  %v9194_v40 = vsel %vm7748_vm3, %v7637_v37, -inf  ;;  %v13230_v13 = vpop.f32.mrb[134].mxu1  ;;  %v9290_v52 = vadd.f32 %v19006_v2, %v8301_v23  ;;  %v20247_v39 = vld [vmem:[#allocation4_spill] sm:$0xff]  ;;  %v8308_v22 = vmax.f32 %v18743_v16, %v8307_v60 }
 0x402   : > { %20245 = vst [vmem:[#allocation26_spill] sm:$0xff] %v18999_v59  ;;  %v20248_v56 = vmax.f32 %v20246_v50, %v20247_v39  ;;  %v9035_v37 = vsel %vm7748_vm3, %v13230_v13, -inf  ;;  %v7640_v32 = vpop.f32.mrb[135].mxu1  ;;  %v8473_v42 = vsel %vm7748_vm3, %v5976_v36, -inf  ;;  %v20250_v50 = vld [vmem:[#allocation63_spill] sm:$0xff]  ;;  %v20253_v16 = vld [vmem:[#allocation16_spill] sm:$0xff] }
 0x403   : > { %v9394_v34 = vadd.f32 %v19006_v2, %v9029_v24  ;;  %v9036_v33 = vmax.f32 %v18749_v41, %v9035_v37  ;;  %v9201_v57 = vsel %vm7748_vm3, %v7640_v32, -inf  ;;  %v9498_v23 = vmax.f32 %v9290_v52, 0.0  ;;  %v20254_v60 = vld [vmem:[#allocation24_spill] sm:$0xff] }
 0x404   : > { %v19012_v21 = vmax.f32 %v20248_v56, %v9194_v40  ;;  %v9291_v53 = vadd.f32 %v19006_v2, %v8308_v22  ;;  %v20251_v40 = vld [vmem:[#allocation17_spill] sm:$0xff]  ;;  %v20255_v13 = vmax.f32 %v20253_v16, %v20254_v60 }
 0x405   : > { %v20252_v39 = vmax.f32 %v20250_v50, %v20251_v40  ;;  %v9602_v24 = vmax.f32 %v9394_v34, 0.0  ;;  %v9395_v41 = vadd.f32 %v19006_v2, %v9036_v33  ;;  %v11862_v36 = vpack.c.bf16 %v9498_v23, %v9498_v23  ;;  %v12817_v32 = vpop.f32.mrb[136].mxu0 }
 0x406   : > { %20249 = vst [vmem:[#allocation30_spill] sm:$0xff] %v19012_v21  ;;  %v19029_v55 = vmax.f32 %v20255_v13, %v9201_v57  ;;  %v9499_v37 = vmax.f32 %v9291_v53, 0.0  ;;  %v8328_v22 = vsel %vm7748_vm3, %v12817_v32, -inf }
 0x407   : > { %v19024_v56 = vmax.f32 %v20252_v39, %v8473_v42  ;;  %v11966_v52 = vpack.c.bf16 %v9602_v24, %v9602_v24  ;;  %v9603_v21 = vmax.f32 %v9395_v41, 0.0  ;;  %v13233_v59 = vpop.f32.mrb[136].mxu1  ;;  %v5989_v42 = vpop.f32.mrb[137].mxu0  ;;  %10539 = vst.msk [vmem:[%s15038_s7 + $0x138] sm:$0xf] %vm10460_vm4, %v11862_v36  ;;  %v8329_v57 = vmax.f32 %v18767_v7, %v8328_v22 }
 0x408   : > { %v11863_v50 = vpack.c.bf16 %v9499_v37, %v9499_v37  ;;  %v9056_v34 = vsel %vm7748_vm3, %v13233_v59, -inf  ;;  %v8314_v33 = vsel %vm7748_vm3, %v5989_v42, -inf  ;;  %v7653_v23 = vpop.f32.mrb[137].mxu1  ;;  %v12818_v53 = vpop.f32.mrb[138].mxu0 }
 0x409   : > { %10643 = vst.msk [vmem:[%s15038_s7 + $0x2d8] sm:$0xf] %vm10460_vm4, %v11966_v52  ;;  %v11967_v40 = vpack.c.bf16 %v9603_v21, %v9603_v21  ;;  %v9057_v39 = vmax.f32 %v18774_v54, %v9056_v34  ;;  %v8315_v16 = vmax.f32 %v18707_v31, %v8314_v33  ;;  %v9042_v60 = vsel %vm7748_vm3, %v7653_v23, -inf  ;;  %v13234_v13 = vpop.f32.mrb[138].mxu1  ;;  %v5992_v24 = vpop.f32.mrb[139].mxu0 }
 0x40a   : > { %10540 = vst.msk [vmem:[%s15038_s7 + $0x13c] sm:$0xf] %vm10460_vm4, %v11863_v50  ;;  %v9294_v7 = vadd.f32 %v19006_v2, %v8329_v57  ;;  %v9043_v59 = vmax.f32 %v18714_v15, %v9042_v60  ;;  %v8335_v41 = vsel %vm7748_vm3, %v12818_v53, -inf  ;;  %v9063_v36 = vsel %vm7748_vm3, %v13234_v13, -inf  ;;  %v7656_v37 = vpop.f32.mrb[139].mxu1 }
 0x40b   : > { %10644 = vst.msk [vmem:[%s15038_s7 + $0x2dc] sm:$0xf] %vm10460_vm4, %v11967_v40  ;;  %v9398_v54 = vadd.f32 %v19006_v2, %v9057_v39  ;;  %v9292_v31 = vadd.f32 %v19006_v2, %v8315_v16  ;;  %v8336_v21 = vmax.f32 %v18791_v5, %v8335_v41  ;;  %v9064_v32 = vmax.f32 %v18797_v51, %v9063_v36 }
 0x40c   : > { %v9502_v52 = vmax.f32 %v9294_v7, 0.0  ;;  %v9396_v22 = vadd.f32 %v19006_v2, %v9043_v59  ;;  %v8321_v15 = vsel %vm7748_vm3, %v5992_v24, -inf  ;;  %v9049_v42 = vsel %vm7748_vm3, %v7656_v37, -inf }
 0x40d   : > { %v9606_v50 = vmax.f32 %v9398_v54, 0.0  ;;  %v9500_v57 = vmax.f32 %v9292_v31, 0.0  ;;  %v9295_v34 = vadd.f32 %v19006_v2, %v8336_v21  ;;  %v9399_v33 = vadd.f32 %v19006_v2, %v9064_v32  ;;  %v12821_v40 = vpop.f32.mrb[140].mxu0 }
 0x40e   : > { %v11866_v23 = vpack.c.bf16 %v9502_v52, %v9502_v52  ;;  %v9604_v53 = vmax.f32 %v9396_v22, 0.0  ;;  %v8322_v5 = vmax.f32 %v18731_v4, %v8321_v15  ;;  %v9050_v51 = vmax.f32 %v18738_v12, %v9049_v42  ;;  %v6005_v7 = vpop.f32.mrb[141].mxu0 }
 0x40f   : > { %v11970_v39 = vpack.c.bf16 %v9606_v50, %v9606_v50  ;;  %v11864_v16 = vpack.c.bf16 %v9500_v57, %v9500_v57  ;;  %v9503_v60 = vmax.f32 %v9295_v34, 0.0  ;;  %v9607_v13 = vmax.f32 %v9399_v33, 0.0  ;;  %v13237_v24 = vpop.f32.mrb[140].mxu1  ;;  %v12822_v12 = vpop.f32.mrb[142].mxu0 }
 0x410   : > { %10543 = vst.msk [vmem:[%s15038_s7 + $0x148] sm:$0xf] %vm10460_vm4, %v11866_v23  ;;  %v11968_v59 = vpack.c.bf16 %v9604_v53, %v9604_v53  ;;  %v9293_v41 = vadd.f32 %v19006_v2, %v8322_v5  ;;  %v9397_v36 = vadd.f32 %v19006_v2, %v9050_v51  ;;  %v8356_v4 = vsel %vm7748_vm3, %v12821_v40, -inf  ;;  %v7669_v37 = vpop.f32.mrb[141].mxu1  ;;  %v6008_v22 = vpop.f32.mrb[143].mxu0 }
 0x411   : > { %10647 = vst.msk [vmem:[%s15038_s7 + $0x2e8] sm:$0xf] %vm10460_vm4, %v11970_v39  ;;  %10541 = vst.msk [vmem:[%s15038_s7 + $0x140] sm:$0xf] %vm10460_vm4, %v11864_v16  ;;  %v11867_v54 = vpack.c.bf16 %v9503_v60, %v9503_v60  ;;  %v11971_v31 = vpack.c.bf16 %v9607_v13, %v9607_v13  ;;  %v8357_v21 = vmax.f32 %v18815_v6, %v8356_v4  ;;  %v9084_v32 = vsel %vm7748_vm3, %v13237_v24, -inf  ;;  %v13238_v52 = vpop.f32.mrb[142].mxu1 }
 0x412   : > { %10645 = vst.msk [vmem:[%s15038_s7 + $0x2e0] sm:$0xf] %vm10460_vm4, %v11968_v59  ;;  %v9501_v15 = vmax.f32 %v9293_v41, 0.0  ;;  %v9605_v42 = vmax.f32 %v9397_v36, 0.0  ;;  %v9085_v50 = vmax.f32 %v18822_v18, %v9084_v32  ;;  %v8342_v57 = vsel %vm7748_vm3, %v6005_v7, -inf  ;;  %v7672_v34 = vpop.f32.mrb[143].mxu1 }
 0x413   : > { %10544 = vst.msk [vmem:[%s15038_s7 + $0x14c] sm:$0xf] %vm10460_vm4, %v11867_v54  ;;  %10648 = vst.msk [vmem:[%s15038_s7 + $0x2ec] sm:$0xf] %vm10460_vm4, %v11971_v31  ;;  %v9298_v6 = vadd.f32 %v19006_v2, %v8357_v21  ;;  %v8343_v33 = vmax.f32 %v18755_v28, %v8342_v57  ;;  %v9070_v23 = vsel %vm7748_vm3, %v7669_v37, -inf  ;;  %v8363_v53 = vsel %vm7748_vm3, %v12822_v12, -inf }
 0x414   : > { %v11865_v5 = vpack.c.bf16 %v9501_v15, %v9501_v15  ;;  %v11969_v51 = vpack.c.bf16 %v9605_v42, %v9605_v42  ;;  %v9402_v18 = vadd.f32 %v19006_v2, %v9085_v50  ;;  %v9071_v40 = vmax.f32 %v18762_v35, %v9070_v23 }
 0x415   : > { %v9506_v39 = vmax.f32 %v9298_v6, 0.0  ;;  %v9296_v16 = vadd.f32 %v19006_v2, %v8343_v33  ;;  %v8364_v60 = vmax.f32 %v18839_v45, %v8363_v53  ;;  %v9091_v13 = vsel %vm7748_vm3, %v13238_v52, -inf  ;;  %v12825_v35 = vpop.f32.mrb[144].mxu0 }
 0x416   : > { %10542 = vst.msk [vmem:[%s15038_s7 + $0x144] sm:$0xf] %vm10460_vm4, %v11865_v5  ;;  %10646 = vst.msk [vmem:[%s15038_s7 + $0x2e4] sm:$0xf] %vm10460_vm4, %v11969_v51  ;;  %v9610_v28 = vmax.f32 %v9402_v18, 0.0  ;;  %v9400_v24 = vadd.f32 %v19006_v2, %v9071_v40  ;;  %v9092_v7 = vmax.f32 %v18845_v63, %v9091_v13  ;;  %v8349_v59 = vsel %vm7748_vm3, %v6008_v22, -inf }
 0x417   : > { %v11870_v41 = vpack.c.bf16 %v9506_v39, %v9506_v39  ;;  %v9504_v36 = vmax.f32 %v9296_v16, 0.0  ;;  %v9299_v4 = vadd.f32 %v19006_v2, %v8364_v60  ;;  %v8350_v45 = vmax.f32 %v18779_v30, %v8349_v59  ;;  %v13241_v37 = vpop.f32.mrb[144].mxu1  ;;  %v6021_v12 = vpop.f32.mrb[145].mxu0 }
 0x418   : > { %v11974_v54 = vpack.c.bf16 %v9610_v28, %v9610_v28  ;;  %v9608_v31 = vmax.f32 %v9400_v24, 0.0  ;;  %v9403_v21 = vadd.f32 %v19006_v2, %v9092_v7  ;;  %v9077_v32 = vsel %vm7748_vm3, %v7672_v34, -inf  ;;  %v7685_v63 = vpop.f32.mrb[145].mxu1  ;;  %v12826_v52 = vpop.f32.mrb[146].mxu0 }
 0x419   : > { %10547 = vst.msk [vmem:[%s15038_s7 + $0x158] sm:$0xf] %vm10460_vm4, %v11870_v41  ;;  %v11868_v22 = vpack.c.bf16 %v9504_v36, %v9504_v36  ;;  %v9507_v15 = vmax.f32 %v9299_v4, 0.0  ;;  %v9297_v42 = vadd.f32 %v19006_v2, %v8350_v45  ;;  %v9078_v30 = vmax.f32 %v18786_v61, %v9077_v32  ;;  %v13242_v50 = vpop.f32.mrb[146].mxu1  ;;  %v6024_v57 = vpop.f32.mrb[147].mxu0 }
 0x41a   : > { %10651 = vst.msk [vmem:[%s15038_s7 + $0x2f8] sm:$0xf] %vm10460_vm4, %v11974_v54  ;;  %v11972_v6 = vpack.c.bf16 %v9608_v31, %v9608_v31  ;;  %v9611_v33 = vmax.f32 %v9403_v21, 0.0  ;;  %v8384_v34 = vsel %vm7748_vm3, %v12825_v35, -inf  ;;  %v9112_v23 = vsel %vm7748_vm3, %v13241_v37, -inf  ;;  %v7688_v53 = vpop.f32.mrb[147].mxu1 }
 0x41b   : > { %10545 = vst.msk [vmem:[%s15038_s7 + $0x150] sm:$0xf] %vm10460_vm4, %v11868_v22  ;;  %v11871_v5 = vpack.c.bf16 %v9507_v15, %v9507_v15  ;;  %v9505_v51 = vmax.f32 %v9297_v42, 0.0  ;;  %v9401_v18 = vadd.f32 %v19006_v2, %v9078_v30  ;;  %v8385_v61 = vmax.f32 %v18863_v46, %v8384_v34 }
 0x41c   : > { %10649 = vst.msk [vmem:[%s15038_s7 + $0x2f0] sm:$0xf] %vm10460_vm4, %v11972_v6  ;;  %v11975_v40 = vpack.c.bf16 %v9611_v33, %v9611_v33  ;;  %v9113_v39 = vmax.f32 %v18870_v38, %v9112_v23  ;;  %v8370_v16 = vsel %vm7748_vm3, %v6021_v12, -inf  ;;  %v9098_v60 = vsel %vm7748_vm3, %v7685_v63, -inf }
 0x41d   : > { %10548 = vst.msk [vmem:[%s15038_s7 + $0x15c] sm:$0xf] %vm10460_vm4, %v11871_v5  ;;  %v11869_v13 = vpack.c.bf16 %v9505_v51, %v9505_v51  ;;  %v9609_v28 = vmax.f32 %v9401_v18, 0.0  ;;  %v9302_v24 = vadd.f32 %v19006_v2, %v8385_v61  ;;  %v8371_v7 = vmax.f32 %v18803_v10, %v8370_v16  ;;  %v12829_v41 = vpop.f32.mrb[148].mxu0 }
 0x41e   : > { %10652 = vst.msk [vmem:[%s15038_s7 + $0x2fc] sm:$0xf] %vm10460_vm4, %v11975_v40  ;;  %v9406_v46 = vadd.f32 %v19006_v2, %v9113_v39  ;;  %v9099_v59 = vmax.f32 %v18810_v19, %v9098_v60  ;;  %v8391_v38 = vsel %vm7748_vm3, %v12826_v52, -inf  ;;  %v9119_v35 = vsel %vm7748_vm3, %v13242_v50, -inf  ;;  %v6037_v12 = vpop.f32.mrb[149].mxu0 }
 0x41f   : > { %10546 = vst.msk [vmem:[%s15038_s7 + $0x154] sm:$0xf] %vm10460_vm4, %v11869_v13  ;;  %v11973_v36 = vpack.c.bf16 %v9609_v28, %v9609_v28  ;;  %v9510_v4 = vmax.f32 %v9302_v24, 0.0  ;;  %v9300_v45 = vadd.f32 %v19006_v2, %v8371_v7  ;;  %v8392_v10 = vmax.f32 %v18887_v29, %v8391_v38  ;;  %v13245_v37 = vpop.f32.mrb[148].mxu1  ;;  %v12830_v63 = vpop.f32.mrb[150].mxu0 }
 0x420   : > { %v9614_v54 = vmax.f32 %v9406_v46, 0.0  ;;  %v9404_v31 = vadd.f32 %v19006_v2, %v9099_v59  ;;  %v9120_v19 = vmax.f32 %v18893_v11, %v9119_v35  ;;  %v8377_v21 = vsel %vm7748_vm3, %v6024_v57, -inf  ;;  %v7701_v32 = vpop.f32.mrb[149].mxu1  ;;  %v6040_v30 = vpop.f32.mrb[151].mxu0 }
 0x421   : > { %10650 = vst.msk [vmem:[%s15038_s7 + $0x2f4] sm:$0xf] %vm10460_vm4, %v11973_v36  ;;  %v11874_v52 = vpack.c.bf16 %v9510_v4, %v9510_v4  ;;  %v9508_v22 = vmax.f32 %v9300_v45, 0.0  ;;  %v9303_v15 = vadd.f32 %v19006_v2, %v8392_v10  ;;  %v8378_v29 = vmax.f32 %v18827_v9, %v8377_v21  ;;  %v13246_v42 = vpop.f32.mrb[150].mxu1 }
 0x422   : > { %v11978_v50 = vpack.c.bf16 %v9614_v54, %v9614_v54  ;;  %v9612_v6 = vmax.f32 %v9404_v31, 0.0  ;;  %v9407_v11 = vadd.f32 %v19006_v2, %v9120_v19  ;;  %v9105_v57 = vsel %vm7748_vm3, %v7688_v53, -inf  ;;  %v7704_v33 = vpop.f32.mrb[151].mxu1 }
 0x423   : > { %10551 = vst.msk [vmem:[%s15038_s7 + $0x168] sm:$0xf] %vm10460_vm4, %v11874_v52  ;;  %v11872_v34 = vpack.c.bf16 %v9508_v22, %v9508_v22  ;;  %v9511_v23 = vmax.f32 %v9303_v15, 0.0  ;;  %v9301_v5 = vadd.f32 %v19006_v2, %v8378_v29  ;;  %v9106_v51 = vmax.f32 %v18834_v27, %v9105_v57 }
 0x424   : > { %10655 = vst.msk [vmem:[%s15038_s7 + $0x308] sm:$0xf] %vm10460_vm4, %v11978_v50  ;;  %v11976_v9 = vpack.c.bf16 %v9612_v6, %v9612_v6  ;;  %v9615_v18 = vmax.f32 %v9407_v11, 0.0  ;;  %v8412_v61 = vsel %vm7748_vm3, %v12829_v41, -inf  ;;  %v9140_v40 = vsel %vm7748_vm3, %v13245_v37, -inf }
 0x425   : > { %10549 = vst.msk [vmem:[%s15038_s7 + $0x160] sm:$0xf] %vm10460_vm4, %v11872_v34  ;;  %v11875_v53 = vpack.c.bf16 %v9511_v23, %v9511_v23  ;;  %v9509_v39 = vmax.f32 %v9301_v5, 0.0  ;;  %v9405_v16 = vadd.f32 %v19006_v2, %v9106_v51  ;;  %v8413_v60 = vmax.f32 %v18911_v3, %v8412_v61  ;;  %v12833_v7 = vpop.f32.mrb[152].mxu0 }
 0x426   : > { %10653 = vst.msk [vmem:[%s15038_s7 + $0x300] sm:$0xf] %vm10460_vm4, %v11976_v9  ;;  %v11979_v27 = vpack.c.bf16 %v9615_v18, %v9615_v18  ;;  %v9141_v13 = vmax.f32 %v18918_v58, %v9140_v40  ;;  %v8398_v28 = vsel %vm7748_vm3, %v6037_v12, -inf  ;;  %v9126_v24 = vsel %vm7748_vm3, %v7701_v32, -inf  ;;  %v6053_v41 = vpop.f32.mrb[153].mxu0 }
 0x427   : > { %10552 = vst.msk [vmem:[%s15038_s7 + $0x16c] sm:$0xf] %vm10460_vm4, %v11875_v53  ;;  %v11873_v46 = vpack.c.bf16 %v9509_v39, %v9509_v39  ;;  %v9613_v59 = vmax.f32 %v9405_v16, 0.0  ;;  %v9306_v38 = vadd.f32 %v19006_v2, %v8413_v60  ;;  %v8399_v35 = vmax.f32 %v18851_v8, %v8398_v28  ;;  %v13249_v3 = vpop.f32.mrb[152].mxu1  ;;  %v12834_v37 = vpop.f32.mrb[154].mxu0 }
 0x428   : > { %10656 = vst.msk [vmem:[%s15038_s7 + $0x30c] sm:$0xf] %vm10460_vm4, %v11979_v27  ;;  %v9410_v58 = vadd.f32 %v19006_v2, %v9141_v13  ;;  %v9127_v36 = vmax.f32 %v18858_v49, %v9126_v24  ;;  %v8419_v4 = vsel %vm7748_vm3, %v12830_v63, -inf  ;;  %v9147_v45 = vsel %vm7748_vm3, %v13246_v42, -inf  ;;  %v7717_v10 = vpop.f32.mrb[153].mxu1  ;;  %v6056_v21 = vpop.f32.mrb[155].mxu0 }
 0x429   : > { %10550 = vst.msk [vmem:[%s15038_s7 + $0x164] sm:$0xf] %vm10460_vm4, %v11873_v46  ;;  %v11977_v12 = vpack.c.bf16 %v9613_v59, %v9613_v59  ;;  %v9514_v54 = vmax.f32 %v9306_v38, 0.0  ;;  %v9304_v8 = vadd.f32 %v19006_v2, %v8399_v35  ;;  %v8420_v31 = vmax.f32 %v18935_v17, %v8419_v4  ;;  %v13250_v19 = vpop.f32.mrb[154].mxu1 }
 0x42a   : > { %v9618_v32 = vmax.f32 %v9410_v58, 0.0  ;;  %v9408_v49 = vadd.f32 %v19006_v2, %v9127_v36  ;;  %v9148_v63 = vmax.f32 %v18941_v47, %v9147_v45  ;;  %v8405_v52 = vsel %vm7748_vm3, %v6040_v30, -inf  ;;  %v19175_v22 = vpop.f32.mrb[155].mxu1 }
 0x42b   : > { %10654 = vst.msk [vmem:[%s15038_s7 + $0x304] sm:$0xf] %vm10460_vm4, %v11977_v12  ;;  %v11878_v15 = vpack.c.bf16 %v9514_v54, %v9514_v54  ;;  %v9512_v29 = vmax.f32 %v9304_v8, 0.0  ;;  %v9307_v42 = vadd.f32 %v19006_v2, %v8420_v31  ;;  %v8406_v17 = vmax.f32 %v18875_v1, %v8405_v52 }
 0x42c   : > { %v11982_v50 = vpack.c.bf16 %v9618_v32, %v9618_v32  ;;  %v9616_v6 = vmax.f32 %v9408_v49, 0.0  ;;  %v9411_v11 = vadd.f32 %v19006_v2, %v9148_v63  ;;  %v9133_v47 = vsel %vm7748_vm3, %v7704_v33, -inf }
 0x42d   : > { %10555 = vst.msk [vmem:[%s15038_s7 + $0x178] sm:$0xf] %vm10460_vm4, %v11878_v15  ;;  %v11876_v30 = vpack.c.bf16 %v9512_v29, %v9512_v29  ;;  %v9515_v57 = vmax.f32 %v9307_v42, 0.0  ;;  %v9305_v34 = vadd.f32 %v19006_v2, %v8406_v17  ;;  %v9134_v23 = vmax.f32 %v18882_v14, %v9133_v47  ;;  %v12837_v18 = vpop.f32.mrb[156].mxu0  ;;  %v20256_v47 = vld [vmem:[#allocation26_spill] sm:$0xff] }
 0x42e   : > { %10659 = vst.msk [vmem:[%s15038_s7 + $0x318] sm:$0xf] %vm10460_vm4, %v11982_v50  ;;  %v11980_v5 = vpack.c.bf16 %v9616_v6, %v9616_v6  ;;  %v9619_v1 = vmax.f32 %v9411_v11, 0.0  ;;  %v8440_v51 = vsel %vm7748_vm3, %v12833_v7, -inf  ;;  %v9168_v9 = vsel %vm7748_vm3, %v13249_v3, -inf  ;;  %v6069_v14 = vpop.f32.mrb[157].mxu0 }
 0x42f   : > { %10553 = vst.msk [vmem:[%s15038_s7 + $0x170] sm:$0xf] %vm10460_vm4, %v11876_v30  ;;  %v11879_v33 = vpack.c.bf16 %v9515_v57, %v9515_v57  ;;  %v9513_v61 = vmax.f32 %v9305_v34, 0.0  ;;  %v9409_v40 = vadd.f32 %v19006_v2, %v9134_v23  ;;  %v8441_v53 = vmax.f32 %v18959_v43, %v8440_v51  ;;  %v13253_v39 = vpop.f32.mrb[156].mxu1  ;;  %v12838_v24 = vpop.f32.mrb[158].mxu0  ;;  %v20257_v57 = vld [vmem:[#allocation30_spill] sm:$0xff] }
 0x430   : > { %10657 = vst.msk [vmem:[%s15038_s7 + $0x310] sm:$0xf] %vm10460_vm4, %v11980_v5  ;;  %v11983_v16 = vpack.c.bf16 %v9619_v1, %v9619_v1  ;;  %v9169_v60 = vmax.f32 %v18966_v20, %v9168_v9  ;;  %v8426_v27 = vsel %vm7748_vm3, %v6053_v41, -inf  ;;  %v9154_v13 = vsel %vm7748_vm3, %v7717_v10, -inf  ;;  %v7733_v28 = vpop.f32.mrb[157].mxu1  ;;  %v19204_v35 = vpop.f32.mrb[159].mxu0 }
 0x431   : > { %10556 = vst.msk [vmem:[%s15038_s7 + $0x17c] sm:$0xf] %vm10460_vm4, %v11879_v33  ;;  %v11877_v7 = vpack.c.bf16 %v9513_v61, %v9513_v61  ;;  %v9617_v46 = vmax.f32 %v9409_v40, 0.0  ;;  %v9310_v43 = vadd.f32 %v19006_v2, %v8441_v53  ;;  %v8427_v59 = vmax.f32 %v18899_v48, %v8426_v27  ;;  %v13254_v38 = vpop.f32.mrb[158].mxu1  ;;  %v20259_v40 = vld [vmem:[#allocation3_spill] sm:$0xff] }
 0x432   : > { %10660 = vst.msk [vmem:[%s15038_s7 + $0x31c] sm:$0xf] %vm10460_vm4, %v11983_v16  ;;  %v9414_v20 = vadd.f32 %v19006_v2, %v9169_v60  ;;  %v9155_v3 = vmax.f32 %v18906_v0, %v9154_v13  ;;  %v8447_v41 = vsel %vm7748_vm3, %v12834_v37, -inf  ;;  %v9175_v58 = vsel %vm7748_vm3, %v13250_v19, -inf  ;;  %v19212_v36 = vpop.f32.mrb[159].mxu1 }
 0x433   : > { %10554 = vst.msk [vmem:[%s15038_s7 + $0x174] sm:$0xf] %vm10460_vm4, %v11877_v7  ;;  %v11981_v4 = vpack.c.bf16 %v9617_v46, %v9617_v46  ;;  %v9518_v48 = vmax.f32 %v9310_v43, 0.0  ;;  %v9308_v45 = vadd.f32 %v19006_v2, %v8427_v59  ;;  %v8448_v10 = vmax.f32 %v18983_v62, %v8447_v41 }
 0x434   : > { %v9622_v12 = vmax.f32 %v9414_v20, 0.0  ;;  %v9412_v54 = vadd.f32 %v19006_v2, %v9155_v3  ;;  %v9176_v0 = vmax.f32 %v18989_v26, %v9175_v58  ;;  %v8433_v37 = vsel %vm7748_vm3, %v6056_v21, -inf  ;;  %v20260_v20 = vld [vmem:[#allocation9_spill] sm:$0xff] }
 0x435   : > { %10658 = vst.msk [vmem:[%s15038_s7 + $0x314] sm:$0xf] %vm10460_vm4, %v11981_v4  ;;  %v11882_v8 = vpack.c.bf16 %v9518_v48, %v9518_v48  ;;  %v9516_v31 = vmax.f32 %v9308_v45, 0.0  ;;  %v9311_v19 = vadd.f32 %v19006_v2, %v8448_v10  ;;  %v8434_v32 = vmax.f32 %v18923_v44, %v8433_v37  ;;  %v20261_v45 = vld [vmem:[#allocation22_spill] sm:$0xff] }
 0x436   : > { %v11986_v49 = vpack.c.bf16 %v9622_v12, %v9622_v12  ;;  %v9620_v63 = vmax.f32 %v9412_v54, 0.0  ;;  %v9415_v62 = vadd.f32 %v19006_v2, %v9176_v0  ;;  %v9161_v52 = vsel %vm7748_vm3, %v19175_v22, -inf }
 0x437   : > { %10559 = vst.msk [vmem:[%s15038_s7 + $0x188] sm:$0xf] %vm10460_vm4, %v11882_v8  ;;  %v11880_v26 = vpack.c.bf16 %v9516_v31, %v9516_v31  ;;  %v9519_v21 = vmax.f32 %v9311_v19, 0.0  ;;  %v9309_v15 = vadd.f32 %v19006_v2, %v8434_v32  ;;  %v9162_v29 = vmax.f32 %v18930_v25, %v9161_v52 }
 0x438   : > { %10663 = vst.msk [vmem:[%s15038_s7 + $0x328] sm:$0xf] %vm10460_vm4, %v11986_v49  ;;  %v11984_v44 = vpack.c.bf16 %v9620_v63, %v9620_v63  ;;  %v9623_v42 = vmax.f32 %v9415_v62, 0.0  ;;  %v8468_v17 = vsel %vm7748_vm3, %v12837_v18, -inf  ;;  %v9196_v50 = vsel %vm7748_vm3, %v13253_v39, -inf  ;;  %v20258_v18 = vld [vmem:[#allocation18_spill] sm:$0xff] }
 0x439   : > { %10557 = vst.msk [vmem:[%s15038_s7 + $0x180] sm:$0xf] %vm10460_vm4, %v11880_v26  ;;  %v11883_v22 = vpack.c.bf16 %v9519_v21, %v9519_v21  ;;  %v9517_v6 = vmax.f32 %v9309_v15, 0.0  ;;  %v9413_v11 = vadd.f32 %v19006_v2, %v9162_v29  ;;  %v8469_v30 = vmax.f32 %v20256_v47, %v8468_v17 }
 0x43a   : > { %10661 = vst.msk [vmem:[%s15038_s7 + $0x320] sm:$0xf] %vm10460_vm4, %v11984_v44  ;;  %v11987_v25 = vpack.c.bf16 %v9623_v42, %v9623_v42  ;;  %v9197_v34 = vmax.f32 %v20257_v57, %v9196_v50  ;;  %v8454_v23 = vsel %vm7748_vm3, %v6069_v14, -inf  ;;  %v9182_v5 = vsel %vm7748_vm3, %v7733_v28, -inf }
 0x43b   : > { %10560 = vst.msk [vmem:[%s15038_s7 + $0x18c] sm:$0xf] %vm10460_vm4, %v11883_v22  ;;  %v11881_v1 = vpack.c.bf16 %v9517_v6, %v9517_v6  ;;  %v9621_v51 = vmax.f32 %v9413_v11, 0.0  ;;  %v9314_v9 = vadd.f32 %v19006_v2, %v8469_v30  ;;  %v8455_v33 = vmax.f32 %v20258_v18, %v8454_v23 }
 0x43c   : > { %10664 = vst.msk [vmem:[%s15038_s7 + $0x32c] sm:$0xf] %vm10460_vm4, %v11987_v25  ;;  %v9418_v61 = vadd.f32 %v19006_v2, %v9197_v34  ;;  %v9183_v53 = vmax.f32 %v20259_v40, %v9182_v5  ;;  %v8475_v39 = vsel %vm7748_vm3, %v12838_v24, -inf  ;;  %v9203_v14 = vsel %vm7748_vm3, %v13254_v38, -inf }
 0x43d   : > { %10558 = vst.msk [vmem:[%s15038_s7 + $0x184] sm:$0xf] %vm10460_vm4, %v11881_v1  ;;  %v11985_v16 = vpack.c.bf16 %v9621_v51, %v9621_v51  ;;  %v9522_v60 = vmax.f32 %v9314_v9, 0.0  ;;  %v9312_v27 = vadd.f32 %v19006_v2, %v8455_v33  ;;  %v8476_v13 = vmax.f32 %v19024_v56, %v8475_v39 }
 0x43e   : > { %v9626_v28 = vmax.f32 %v9418_v61, 0.0  ;;  %v9416_v7 = vadd.f32 %v19006_v2, %v9183_v53  ;;  %v9204_v46 = vmax.f32 %v19029_v55, %v9203_v14  ;;  %v8461_v24 = vsel %vm7748_vm3, %v19204_v35, -inf }
 0x43f   : > { %10662 = vst.msk [vmem:[%s15038_s7 + $0x324] sm:$0xf] %vm10460_vm4, %v11985_v16  ;;  %v11886_v43 = vpack.c.bf16 %v9522_v60, %v9522_v60  ;;  %v9520_v59 = vmax.f32 %v9312_v27, 0.0  ;;  %v9315_v38 = vadd.f32 %v19006_v2, %v8476_v13  ;;  %v8462_v3 = vmax.f32 %v20260_v20, %v8461_v24 }
 0x440   : > { %v11990_v41 = vpack.c.bf16 %v9626_v28, %v9626_v28  ;;  %v9624_v56 = vmax.f32 %v9416_v7, 0.0  ;;  %v9419_v58 = vadd.f32 %v19006_v2, %v9204_v46  ;;  %v9189_v55 = vsel %vm7748_vm3, %v19212_v36, -inf }
 0x441   : > { %10563 = vst.msk [vmem:[%s15038_s7 + $0x198] sm:$0xf] %vm10460_vm4, %v11886_v43  ;;  %v11884_v35 = vpack.c.bf16 %v9520_v59, %v9520_v59  ;;  %v9523_v4 = vmax.f32 %v9315_v38, 0.0  ;;  %v9313_v48 = vadd.f32 %v19006_v2, %v8462_v3  ;;  %v9190_v10 = vmax.f32 %v20261_v45, %v9189_v55 }
 0x442   : > { %10667 = vst.msk [vmem:[%s15038_s7 + $0x338] sm:$0xf] %vm10460_vm4, %v11990_v41  ;;  %v11988_v12 = vpack.c.bf16 %v9624_v56, %v9624_v56  ;;  %v9627_v54 = vmax.f32 %v9419_v58, 0.0 }
 0x443   : > { %10561 = vst.msk [vmem:[%s15038_s7 + $0x190] sm:$0xf] %vm10460_vm4, %v11884_v35  ;;  %v11887_v0 = vpack.c.bf16 %v9523_v4, %v9523_v4  ;;  %v9521_v37 = vmax.f32 %v9313_v48, 0.0  ;;  %v9417_v36 = vadd.f32 %v19006_v2, %v9190_v10 }
 0x444   : > { %10665 = vst.msk [vmem:[%s15038_s7 + $0x330] sm:$0xf] %vm10460_vm4, %v11988_v12  ;;  %v11991_v8 = vpack.c.bf16 %v9627_v54, %v9627_v54 }
 0x445   : > { %10564 = vst.msk [vmem:[%s15038_s7 + $0x19c] sm:$0xf] %vm10460_vm4, %v11887_v0  ;;  %v11885_v31 = vpack.c.bf16 %v9521_v37, %v9521_v37  ;;  %v9625_v19 = vmax.f32 %v9417_v36, 0.0 }
 0x446   : > { %10668 = vst.msk [vmem:[%s15038_s7 + $0x33c] sm:$0xf] %vm10460_vm4, %v11991_v8 }
 0x447   : > { %10562 = vst.msk [vmem:[%s15038_s7 + $0x194] sm:$0xf] %vm10460_vm4, %v11885_v31  ;;  %v11989_v32 = vpack.c.bf16 %v9625_v19, %v9625_v19 }
 0x449   : > { %10666 = vst.msk [vmem:[%s15038_s7 + $0x334] sm:$0xf] %vm10460_vm4, %v11989_v32 }
 0x44a PF: > { %s13_s12 = sadd.s32 1, %s13707_s12  }
 0x44b   : > { %p10_p4 = scmp.ge.s32.totalorder %s13_s12, 4  }
 0x44d   :  { %12 = sbr.rel (!%p10_p4) target bundleno = 1 (0x1), region = 62 }

// kernel: net_forward.3
= control target key start
LH: loop header
LB: loop body
LE: loop exit
PB: predicated region body
PF: predicated region fallthrough
CT: control target
= control target key end

     0   :  { %v6857_v0 = vmov 0   ;;  %vm1517_vm0 = vcmask 179200   ;;  %vm1902_vm1 = vcmask 1042432   ;;  %vm2963_vm2 = vcmask 130048   ;;  %s9382_s1 = inlined_call_operand.vmem [shape: bf16[150,16], index: 1, kind: input, shape index: {}]   ;;  %s9383_s0 = inlined_call_operand.vmem [shape: bf16[4,32,16,150], index: 0, kind: input, shape index: {}]   ;;  %s9384_s3 = inlined_call_operand.vmem [shape: bf16[32,16,120], index: 3, kind: input, shape index: {}]   ;;  %s9385_s2 = inlined_call_operand.vmem [shape: f32[1,16], index: 2, kind: input, shape index: {}]   ;;  %s9386_s5 = inlined_call_operand.vmem [shape: bf16[120,84], index: 5, kind: input, shape index: {}]   ;;  %s9387_s7 = inlined_call_operand.vmem [shape: bf16[84,10], index: 7, kind: input, shape index: {}]   ;;  %s9388_s4 = inlined_call_operand.vmem [shape: f32[1,120], index: 4, kind: input, shape index: {}]   ;;  %s9389_s6 = inlined_call_operand.vmem [shape: f32[1,84], index: 6, kind: input, shape index: {}]   ;;  %s9390_s8 = inlined_call_operand.vmem [shape: f32[1,10], index: 8, kind: input, shape index: {}]   ;;  %s9391_s9 = inlined_call_operand.vmem [shape: f32[16,10], index: 9, kind: output, shape index: {}]  }
   0x1   :  { %1906 = vmatprep.subr.bf16.mxu0 %v6857_v0  ;;  %v6416_v1 = vld [vmem:[%s9382_s1] sm:$0xff]   ;;  %6393 = vmatprep.subr.bf16.mxu1 %v6857_v0  ;;  %v6417_v2 = vld [vmem:[%s9382_s1 + $0x8] sm:$0xff]   ;;  %v6418_v3 = vld [vmem:[%s9382_s1 + $0x10] sm:$0xff]   ;;  %vm6859_vm3 = vmmov 0   ;;  %vm5243_vm4 = vcmask 982016   ;;  %vm5452_vm5 = vcmask 1043456  }
   0x2   :  { %1907 = vmatpush1.bf16.msra.mxu0 %v6416_v1  ;;  %6403 = vmatpush1.bf16.msra.mxu1 %v6416_v1  ;;  %v6419_v4 = vld [vmem:[%s9382_s1 + $0x18] sm:$0xff]   ;;  %v6428_v5 = vld [vmem:[%s9383_s0 + $0x4] ss:$8 sps:$4 sm:$0xff]   ;;  %v6422_v8 = vld [vmem:[%s9382_s1 + $0x30] sm:$0xff]   ;;  %vm5555_vm6 = vcmask 1041408   ;;  %vm5551_vm7 = vcmask 687104  }
   0x3   :  { %1908 = vmatprep.subr.bf16.mxu0 %v6857_v0  ;;  %6394 = vmatprep.subr.bf16.mxu1 %v6857_v0  ;;  %v6420_v6 = vld [vmem:[%s9382_s1 + $0x20] sm:$0xff]   ;;  %v6421_v7 = vld [vmem:[%s9382_s1 + $0x28] sm:$0xff]   ;;  %v6423_v9 = vld [vmem:[%s9382_s1 + $0x38] sm:$0xff]   ;;  %vm5600_vm8 = vcmask 80896  }
   0x4   :  { %5873 = vmatprep.mubr.msk.bf16.mxu0 %vm1517_vm0, %v6428_v5  ;;  %v6424_v10 = vld [vmem:[%s9382_s1 + $0x40] sm:$0xff]   ;;  %v6425_v11 = vld [vmem:[%s9382_s1 + $0x48] ss:$0 sps:$4 sm:$0x77]   ;;  %v6429_v14 = vld [vmem:[%s9383_s0 + $0x14] ss:$8 sps:$4 sm:$0xff]  }
   0x5   :  { %v1904_v12 = vsel %vm1902_vm1, %v6425_v11, 0  ;;  %v6426_v13 = vld [vmem:[%s9383_s0] ss:$8 sps:$4 sm:$0xff]   ;;  %v6431_v15 = vld [vmem:[%s9383_s0 + $0x10] ss:$8 sps:$4 sm:$0xff]  }
   0x6   :  { %1909 = vmatpush1.bf16.msra.mxu0 %v6417_v2  ;;  %6404 = vmatpush1.bf16.msra.mxu1 %v6417_v2  ;;  %v6432_v16 = vld [vmem:[%s9383_s0 + $0x24] ss:$8 sps:$4 sm:$0xff]   ;;  %v6434_v17 = vld [vmem:[%s9383_s0 + $0x20] ss:$8 sps:$4 sm:$0xff]   ;;  %v6435_v18 = vld [vmem:[%s9383_s0 + $0x34] ss:$8 sps:$4 sm:$0xff]  }
   0x7   :  { %1910 = vmatprep.subr.bf16.mxu0 %v6857_v0  ;;  %6395 = vmatprep.subr.bf16.mxu1 %v6857_v0  ;;  %v6437_v19 = vld [vmem:[%s9383_s0 + $0x30] ss:$8 sps:$4 sm:$0xff]   ;;  %v6438_v20 = vld [vmem:[%s9383_s0 + $0x44] ss:$8 sps:$4 sm:$0xff]   ;;  %v6440_v21 = vld [vmem:[%s9383_s0 + $0x40] ss:$8 sps:$4 sm:$0xff]  }
   0x8   :  { %v6441_v22 = vld [vmem:[%s9383_s0 + $0x54] ss:$8 sps:$4 sm:$0xff]   ;;  %v6489_v23 = vld [vmem:[%s9383_s0 + $0x540] ss:$8 sps:$4 sm:$0xff]   ;;  %v6491_v24 = vld [vmem:[%s9383_s0 + $0x544] ss:$8 sps:$4 sm:$0xff]  }
   0x9   :  { %v6443_v25 = vld [vmem:[%s9383_s0 + $0x50] ss:$8 sps:$4 sm:$0xff]   ;;  %5957 = vmatprep.mubr.msk.bf16.mxu1 %vm1517_vm0, %v6491_v24  ;;  %v6444_v26 = vld [vmem:[%s9383_s0 + $0x64] ss:$8 sps:$4 sm:$0xff]   ;;  %v6495_v27 = vld [vmem:[%s9383_s0 + $0x554] ss:$8 sps:$4 sm:$0xff]  }
   0xa   :  { %1911 = vmatpush1.bf16.msra.mxu0 %v6418_v3  ;;  %6405 = vmatpush1.bf16.msra.mxu1 %v6418_v3  ;;  %v6497_v28 = vld [vmem:[%s9383_s0 + $0x550] ss:$8 sps:$4 sm:$0xff]   ;;  %v6446_v29 = vld [vmem:[%s9383_s0 + $0x60] ss:$8 sps:$4 sm:$0xff]   ;;  %v6447_v30 = vld [vmem:[%s9383_s0 + $0x74] ss:$8 sps:$4 sm:$0xff]  }
   0xb   :  { %1912 = vmatprep.subr.bf16.mxu0 %v6857_v0  ;;  %6396 = vmatprep.subr.bf16.mxu1 %v6857_v0  ;;  %v6501_v31 = vld [vmem:[%s9383_s0 + $0x564] ss:$8 sps:$4 sm:$0xff]   ;;  %v6503_v32 = vld [vmem:[%s9383_s0 + $0x560] ss:$8 sps:$4 sm:$0xff]   ;;  %v6449_v33 = vld [vmem:[%s9383_s0 + $0x70] ss:$8 sps:$4 sm:$0xff]  }
   0xc   :  { %v6450_v34 = vld [vmem:[%s9383_s0 + $0x84] ss:$8 sps:$4 sm:$0xff]   ;;  %v6507_v35 = vld [vmem:[%s9383_s0 + $0x574] ss:$8 sps:$4 sm:$0xff]   ;;  %v6509_v36 = vld [vmem:[%s9383_s0 + $0x570] ss:$8 sps:$4 sm:$0xff]  }
   0xd   :  { %v6452_v37 = vld [vmem:[%s9383_s0 + $0x80] ss:$8 sps:$4 sm:$0xff]   ;;  %v6453_v38 = vld [vmem:[%s9383_s0 + $0x94] ss:$8 sps:$4 sm:$0xff]   ;;  %v6513_v39 = vld [vmem:[%s9383_s0 + $0x584] ss:$8 sps:$4 sm:$0xff]  }
   0xe   :  { %1913 = vmatpush1.bf16.msra.mxu0 %v6419_v4  ;;  %6406 = vmatpush1.bf16.msra.mxu1 %v6419_v4  ;;  %v6515_v40 = vld [vmem:[%s9383_s0 + $0x580] ss:$8 sps:$4 sm:$0xff]   ;;  %v6455_v41 = vld [vmem:[%s9383_s0 + $0x90] ss:$8 sps:$4 sm:$0xff]   ;;  %v6456_v42 = vld [vmem:[%s9383_s0 + $0xa4] ss:$8 sps:$4 sm:$0xff]  }
   0xf   :  { %1914 = vmatprep.subr.bf16.mxu0 %v6857_v0  ;;  %6397 = vmatprep.subr.bf16.mxu1 %v6857_v0  ;;  %v6519_v43 = vld [vmem:[%s9383_s0 + $0x594] ss:$8 sps:$4 sm:$0xff]   ;;  %v6521_v44 = vld [vmem:[%s9383_s0 + $0x590] ss:$8 sps:$4 sm:$0xff]   ;;  %v6458_v45 = vld [vmem:[%s9383_s0 + $0xa0] ss:$8 sps:$4 sm:$0xff]  }
  0x10   :  { %v6459_v46 = vld [vmem:[%s9383_s0 + $0xb4] ss:$8 sps:$4 sm:$0xff]   ;;  %v6525_v47 = vld [vmem:[%s9383_s0 + $0x5a4] ss:$8 sps:$4 sm:$0xff]   ;;  %v6527_v48 = vld [vmem:[%s9383_s0 + $0x5a0] ss:$8 sps:$4 sm:$0xff]  }
  0x11   :  { %v6461_v49 = vld [vmem:[%s9383_s0 + $0xb0] ss:$8 sps:$4 sm:$0xff]   ;;  %v6462_v50 = vld [vmem:[%s9383_s0 + $0xc4] ss:$8 sps:$4 sm:$0xff]   ;;  %v6531_v51 = vld [vmem:[%s9383_s0 + $0x5b4] ss:$8 sps:$4 sm:$0xff]  }
  0x12   :  { %1915 = vmatpush1.bf16.msra.mxu0 %v6420_v6  ;;  %6407 = vmatpush1.bf16.msra.mxu1 %v6420_v6  ;;  %v6533_v52 = vld [vmem:[%s9383_s0 + $0x5b0] ss:$8 sps:$4 sm:$0xff]   ;;  %v6464_v53 = vld [vmem:[%s9383_s0 + $0xc0] ss:$8 sps:$4 sm:$0xff]   ;;  %v6465_v54 = vld [vmem:[%s9383_s0 + $0xd4] ss:$8 sps:$4 sm:$0xff]  }
  0x13   :  { %1916 = vmatprep.subr.bf16.mxu0 %v6857_v0  ;;  %6398 = vmatprep.subr.bf16.mxu1 %v6857_v0  ;;  %v6537_v55 = vld [vmem:[%s9383_s0 + $0x5c4] ss:$8 sps:$4 sm:$0xff]   ;;  %v6539_v56 = vld [vmem:[%s9383_s0 + $0x5c0] ss:$8 sps:$4 sm:$0xff]   ;;  %v6467_v57 = vld [vmem:[%s9383_s0 + $0xd0] ss:$8 sps:$4 sm:$0xff]  }
  0x14   :  { %v6468_v58 = vld [vmem:[%s9383_s0 + $0xe4] ss:$8 sps:$4 sm:$0xff]   ;;  %v6543_v59 = vld [vmem:[%s9383_s0 + $0x5d4] ss:$8 sps:$4 sm:$0xff]   ;;  %v6545_v60 = vld [vmem:[%s9383_s0 + $0x5d0] ss:$8 sps:$4 sm:$0xff]  }
  0x15   :  { %v6470_v61 = vld [vmem:[%s9383_s0 + $0xe0] ss:$8 sps:$4 sm:$0xff]   ;;  %v6471_v62 = vld [vmem:[%s9383_s0 + $0xf4] ss:$8 sps:$4 sm:$0xff]   ;;  %v6549_v63 = vld [vmem:[%s9383_s0 + $0x5e4] ss:$8 sps:$4 sm:$0xff]  }
  0x16   :  { %1917 = vmatpush1.bf16.msra.mxu0 %v6421_v7  ;;  %6408 = vmatpush1.bf16.msra.mxu1 %v6421_v7  ;;  %v6473_v1 = vld [vmem:[%s9383_s0 + $0xf0] ss:$8 sps:$4 sm:$0xff]   ;;  %v6474_v2 = vld [vmem:[%s9383_s0 + $0x104] ss:$8 sps:$4 sm:$0xff]   ;;  %v6555_v3 = vld [vmem:[%s9383_s0 + $0x5f4] ss:$8 sps:$4 sm:$0xff]  }
  0x17   :  { %1918 = vmatprep.subr.bf16.mxu0 %v6857_v0  ;;  %6399 = vmatprep.subr.bf16.mxu1 %v6857_v0  ;;  %v6557_v4 = vld [vmem:[%s9383_s0 + $0x5f0] ss:$8 sps:$4 sm:$0xff]   ;;  %v6476_v5 = vld [vmem:[%s9383_s0 + $0x100] ss:$8 sps:$4 sm:$0xff]   ;;  %v6477_v6 = vld [vmem:[%s9383_s0 + $0x114] ss:$8 sps:$4 sm:$0xff]  }
  0x18   :  { %v6561_v7 = vld [vmem:[%s9383_s0 + $0x604] ss:$8 sps:$4 sm:$0xff]   ;;  %v6567_v11 = vld [vmem:[%s9383_s0 + $0x614] ss:$8 sps:$4 sm:$0xff]   ;;  %v6587_v24 = vld [vmem:[%s9383_s0 + $0x640] ss:$8 sps:$4 sm:$0xff]  }
  0x1a   :  { %1919 = vmatpush1.bf16.msra.mxu0 %v6422_v8  ;;  %6409 = vmatpush1.bf16.msra.mxu1 %v6422_v8  ;;  %v6563_v8 = vld [vmem:[%s9383_s0 + $0x600] ss:$8 sps:$4 sm:$0xff]  }
  0x1b   :  { %1920 = vmatprep.subr.bf16.mxu0 %v6857_v0  ;;  %6400 = vmatprep.subr.bf16.mxu1 %v6857_v0 }
  0x1e   :  { %1921 = vmatpush1.bf16.msra.mxu0 %v6423_v9  ;;  %6410 = vmatpush1.bf16.msra.mxu1 %v6423_v9  ;;  %v6479_v9 = vld [vmem:[%s9383_s0 + $0x110] ss:$8 sps:$4 sm:$0xff]  }
  0x1f   :  { %1922 = vmatprep.subr.bf16.mxu0 %v6857_v0  ;;  %6401 = vmatprep.subr.bf16.mxu1 %v6857_v0 }
  0x22   :  { %1923 = vmatpush1.bf16.msra.mxu0 %v6424_v10  ;;  %6411 = vmatpush1.bf16.msra.mxu1 %v6424_v10  ;;  %v6480_v10 = vld [vmem:[%s9383_s0 + $0x124] ss:$8 sps:$4 sm:$0xff]  }
  0x23   :  { %1924 = vmatprep.subr.bf16.mxu0 %v6857_v0  ;;  %6402 = vmatprep.subr.bf16.mxu1 %v6857_v0  ;;  %v6551_v0 = vld [vmem:[%s9383_s0 + $0x5e0] ss:$8 sps:$4 sm:$0xff]  }
  0x26   :  { %1925 = vmatpush1.bf16.msra.mxu0 %v1904_v12  ;;  %6412 = vmatpush1.bf16.msra.mxu1 %v1904_v12  ;;  %v6569_v12 = vld [vmem:[%s9383_s0 + $0x610] ss:$8 sps:$4 sm:$0xff]  }
  0x29   :  { %1939 = vmatmul.mubr.bf16.vlgmr.msra.gmra.mrb[0].mxu0 %v6426_v13  ;;  %2611 = vmatmul.mubr.bf16.vlgmr.msra.gmra.mrb[0].mxu1 %v6489_v23  ;;  %v6482_v13 = vld [vmem:[%s9383_s0 + $0x120] ss:$8 sps:$4 sm:$0xff]   ;;  %v6585_v23 = vld [vmem:[%s9383_s0 + $0x644] ss:$8 sps:$4 sm:$0xff]  }
  0x2a   :  { %5874 = vmatprep.mubr.msk.bf16.mxu0 %vm1517_vm0, %v6429_v14  ;;  %5958 = vmatprep.mubr.msk.bf16.mxu1 %vm1517_vm0, %v6495_v27  ;;  %v6483_v14 = vld [vmem:[%s9383_s0 + $0x134] ss:$8 sps:$4 sm:$0xff]  }
  0x2b   :  { %v6591_v27 = vld [vmem:[%s9383_s0 + $0x654] ss:$8 sps:$4 sm:$0xff]  }
  0x31   :  { %1947 = vmatmul.mubr.bf16.gmra.mrb[4].mxu0 %v6431_v15  ;;  %2619 = vmatmul.mubr.bf16.gmra.mrb[4].mxu1 %v6497_v28  ;;  %v6573_v15 = vld [vmem:[%s9383_s0 + $0x624] ss:$8 sps:$4 sm:$0xff]   ;;  %v6593_v28 = vld [vmem:[%s9383_s0 + $0x650] ss:$8 sps:$4 sm:$0xff]  }
  0x32   :  { %5875 = vmatprep.mubr.msk.bf16.mxu0 %vm1517_vm0, %v6432_v16  ;;  %5959 = vmatprep.mubr.msk.bf16.mxu1 %vm1517_vm0, %v6501_v31  ;;  %v6575_v16 = vld [vmem:[%s9383_s0 + $0x620] ss:$8 sps:$4 sm:$0xff]   ;;  %v6597_v31 = vld [vmem:[%s9383_s0 + $0x664] ss:$8 sps:$4 sm:$0xff]  }
  0x39   :  { %1955 = vmatmul.mubr.bf16.gmra.mrb[8].mxu0 %v6434_v17  ;;  %2627 = vmatmul.mubr.bf16.gmra.mrb[8].mxu1 %v6503_v32  ;;  %v6485_v17 = vld [vmem:[%s9383_s0 + $0x130] ss:$8 sps:$4 sm:$0xff]   ;;  %v6599_v32 = vld [vmem:[%s9383_s0 + $0x660] ss:$8 sps:$4 sm:$0xff]  }
  0x3a   :  { %5876 = vmatprep.mubr.msk.bf16.mxu0 %vm1517_vm0, %v6435_v18  ;;  %5960 = vmatprep.mubr.msk.bf16.mxu1 %vm1517_vm0, %v6507_v35  ;;  %v6486_v18 = vld [vmem:[%s9383_s0 + $0x144] ss:$8 sps:$4 sm:$0xff]   ;;  %v6603_v35 = vld [vmem:[%s9383_s0 + $0x674] ss:$8 sps:$4 sm:$0xff]  }
  0x41   :  { %1963 = vmatmul.mubr.bf16.gmra.mrb[12].mxu0 %v6437_v19  ;;  %2635 = vmatmul.mubr.bf16.gmra.mrb[12].mxu1 %v6509_v36  ;;  %v6579_v19 = vld [vmem:[%s9383_s0 + $0x634] ss:$8 sps:$4 sm:$0xff]   ;;  %v6605_v36 = vld [vmem:[%s9383_s0 + $0x670] ss:$8 sps:$4 sm:$0xff]  }
  0x42   :  { %5877 = vmatprep.mubr.msk.bf16.mxu0 %vm1517_vm0, %v6438_v20  ;;  %5961 = vmatprep.mubr.msk.bf16.mxu1 %vm1517_vm0, %v6513_v39  ;;  %v6581_v20 = vld [vmem:[%s9383_s0 + $0x630] ss:$8 sps:$4 sm:$0xff]   ;;  %v6609_v39 = vld [vmem:[%s9383_s0 + $0x684] ss:$8 sps:$4 sm:$0xff]  }
  0x49   :  { %1971 = vmatmul.mubr.bf16.gmra.mrb[16].mxu0 %v6440_v21  ;;  %2643 = vmatmul.mubr.bf16.gmra.mrb[16].mxu1 %v6515_v40  ;;  %v6488_v21 = vld [vmem:[%s9383_s0 + $0x140] ss:$8 sps:$4 sm:$0xff]  }
  0x4a   :  { %5878 = vmatprep.mubr.msk.bf16.mxu0 %vm1517_vm0, %v6441_v22  ;;  %5962 = vmatprep.mubr.msk.bf16.mxu1 %vm1517_vm0, %v6519_v43  ;;  %v6492_v22 = vld [vmem:[%s9383_s0 + $0x154] ss:$8 sps:$4 sm:$0xff]   ;;  %v6611_v40 = vld [vmem:[%s9383_s0 + $0x680] ss:$8 sps:$4 sm:$0xff]  }
  0x4b   :  { %v6615_v43 = vld [vmem:[%s9383_s0 + $0x694] ss:$8 sps:$4 sm:$0xff]  }
  0x51   :  { %1979 = vmatmul.mubr.bf16.gmra.mrb[20].mxu0 %v6443_v25  ;;  %2651 = vmatmul.mubr.bf16.gmra.mrb[20].mxu1 %v6521_v44  ;;  %v6494_v25 = vld [vmem:[%s9383_s0 + $0x150] ss:$8 sps:$4 sm:$0xff]  }
  0x52   :  { %5879 = vmatprep.mubr.msk.bf16.mxu0 %vm1517_vm0, %v6444_v26  ;;  %5963 = vmatprep.mubr.msk.bf16.mxu1 %vm1517_vm0, %v6525_v47  ;;  %v6498_v26 = vld [vmem:[%s9383_s0 + $0x164] ss:$8 sps:$4 sm:$0xff]   ;;  %v6617_v44 = vld [vmem:[%s9383_s0 + $0x690] ss:$8 sps:$4 sm:$0xff]  }
  0x53   :  { %v6621_v47 = vld [vmem:[%s9383_s0 + $0x6a4] ss:$8 sps:$4 sm:$0xff]  }
  0x59   :  { %1987 = vmatmul.mubr.bf16.gmra.mrb[24].mxu0 %v6446_v29  ;;  %2659 = vmatmul.mubr.bf16.gmra.mrb[24].mxu1 %v6527_v48  ;;  %v6500_v29 = vld [vmem:[%s9383_s0 + $0x160] ss:$8 sps:$4 sm:$0xff]  }
  0x5a   :  { %5880 = vmatprep.mubr.msk.bf16.mxu0 %vm1517_vm0, %v6447_v30  ;;  %5964 = vmatprep.mubr.msk.bf16.mxu1 %vm1517_vm0, %v6531_v51  ;;  %v6504_v30 = vld [vmem:[%s9383_s0 + $0x174] ss:$8 sps:$4 sm:$0xff]   ;;  %v6623_v48 = vld [vmem:[%s9383_s0 + $0x6a0] ss:$8 sps:$4 sm:$0xff]   ;;  %v6530_v51 = vld [vmem:[%s9383_s0 + $0x1b0] ss:$8 sps:$4 sm:$0xff]  }
  0x61   :  { %1995 = vmatmul.mubr.bf16.gmra.mrb[28].mxu0 %v6449_v33  ;;  %2667 = vmatmul.mubr.bf16.gmra.mrb[28].mxu1 %v6533_v52  ;;  %v6506_v33 = vld [vmem:[%s9383_s0 + $0x170] ss:$8 sps:$4 sm:$0xff]  }
  0x62   :  { %5881 = vmatprep.mubr.msk.bf16.mxu0 %vm1517_vm0, %v6450_v34  ;;  %5965 = vmatprep.mubr.msk.bf16.mxu1 %vm1517_vm0, %v6537_v55  ;;  %v6510_v34 = vld [vmem:[%s9383_s0 + $0x184] ss:$8 sps:$4 sm:$0xff]   ;;  %v6627_v55 = vld [vmem:[%s9383_s0 + $0x6b4] ss:$8 sps:$4 sm:$0xff]  }
  0x69   :  { %2003 = vmatmul.mubr.bf16.gmra.mrb[32].mxu0 %v6452_v37  ;;  %2675 = vmatmul.mubr.bf16.gmra.mrb[32].mxu1 %v6539_v56  ;;  %v6512_v37 = vld [vmem:[%s9383_s0 + $0x180] ss:$8 sps:$4 sm:$0xff]   ;;  %v6629_v56 = vld [vmem:[%s9383_s0 + $0x6b0] ss:$8 sps:$4 sm:$0xff]  }
  0x6a   :  { %5882 = vmatprep.mubr.msk.bf16.mxu0 %vm1517_vm0, %v6453_v38  ;;  %5966 = vmatprep.mubr.msk.bf16.mxu1 %vm1517_vm0, %v6543_v59  ;;  %v6516_v38 = vld [vmem:[%s9383_s0 + $0x194] ss:$8 sps:$4 sm:$0xff]   ;;  %v6536_v59 = vld [vmem:[%s9383_s0 + $0x1c0] ss:$8 sps:$4 sm:$0xff]  }
  0x71   :  { %2011 = vmatmul.mubr.bf16.gmra.mrb[36].mxu0 %v6455_v41  ;;  %2683 = vmatmul.mubr.bf16.gmra.mrb[36].mxu1 %v6545_v60  ;;  %v6518_v41 = vld [vmem:[%s9383_s0 + $0x190] ss:$8 sps:$4 sm:$0xff]  }
  0x72   :  { %5883 = vmatprep.mubr.msk.bf16.mxu0 %vm1517_vm0, %v6456_v42  ;;  %5967 = vmatprep.mubr.msk.bf16.mxu1 %vm1517_vm0, %v6549_v63  ;;  %v6522_v42 = vld [vmem:[%s9383_s0 + $0x1a4] ss:$8 sps:$4 sm:$0xff]  }
  0x73   :  { %v6633_v63 = vld [vmem:[%s9383_s0 + $0x6c4] ss:$8 sps:$4 sm:$0xff]  }
  0x79   :  { %2019 = vmatmul.mubr.bf16.gmra.mrb[40].mxu0 %v6458_v45  ;;  %2691 = vmatmul.mubr.bf16.gmra.mrb[40].mxu1 %v6551_v0  ;;  %v6524_v45 = vld [vmem:[%s9383_s0 + $0x1a0] ss:$8 sps:$4 sm:$0xff]  }
  0x7a   :  { %5884 = vmatprep.mubr.msk.bf16.mxu0 %vm1517_vm0, %v6459_v46  ;;  %5968 = vmatprep.mubr.msk.bf16.mxu1 %vm1517_vm0, %v6555_v3  ;;  %v6528_v46 = vld [vmem:[%s9383_s0 + $0x1b4] ss:$8 sps:$4 sm:$0xff]   ;;  %v6635_v0 = vld [vmem:[%s9383_s0 + $0x6c0] ss:$8 sps:$4 sm:$0xff]   ;;  %v6542_v3 = vld [vmem:[%s9383_s0 + $0x1d0] ss:$8 sps:$4 sm:$0xff]  }
  0x81   :  { %2027 = vmatmul.mubr.bf16.gmra.mrb[44].mxu0 %v6461_v49  ;;  %2699 = vmatmul.mubr.bf16.gmra.mrb[44].mxu1 %v6557_v4 }
  0x82   :  { %5885 = vmatprep.mubr.msk.bf16.mxu0 %vm1517_vm0, %v6462_v50  ;;  %5969 = vmatprep.mubr.msk.bf16.mxu1 %vm1517_vm0, %v6561_v7  ;;  %v6639_v7 = vld [vmem:[%s9383_s0 + $0x6d4] ss:$8 sps:$4 sm:$0xff]  }
  0x89   :  { %2035 = vmatmul.mubr.bf16.gmra.mrb[48].mxu0 %v6464_v53  ;;  %2707 = vmatmul.mubr.bf16.gmra.mrb[48].mxu1 %v6563_v8  ;;  %v6534_v53 = vld [vmem:[%s9383_s0 + $0x1c4] ss:$8 sps:$4 sm:$0xff]   ;;  %v6641_v8 = vld [vmem:[%s9383_s0 + $0x6d0] ss:$8 sps:$4 sm:$0xff]  }
  0x8a   :  { %5886 = vmatprep.mubr.msk.bf16.mxu0 %vm1517_vm0, %v6465_v54  ;;  %5970 = vmatprep.mubr.msk.bf16.mxu1 %vm1517_vm0, %v6567_v11  ;;  %v6548_v11 = vld [vmem:[%s9383_s0 + $0x1e0] ss:$8 sps:$4 sm:$0xff]  }
  0x91   :  { %2043 = vmatmul.mubr.bf16.gmra.mrb[52].mxu0 %v6467_v57  ;;  %2715 = vmatmul.mubr.bf16.gmra.mrb[52].mxu1 %v6569_v12 }
  0x92   :  { %5887 = vmatprep.mubr.msk.bf16.mxu0 %vm1517_vm0, %v6468_v58  ;;  %5971 = vmatprep.mubr.msk.bf16.mxu1 %vm1517_vm0, %v6573_v15  ;;  %v6645_v15 = vld [vmem:[%s9383_s0 + $0x6e4] ss:$8 sps:$4 sm:$0xff]  }
  0x99   :  { %2051 = vmatmul.mubr.bf16.gmra.mrb[56].mxu0 %v6470_v61  ;;  %2723 = vmatmul.mubr.bf16.gmra.mrb[56].mxu1 %v6575_v16  ;;  %v6540_v61 = vld [vmem:[%s9383_s0 + $0x1d4] ss:$8 sps:$4 sm:$0xff]   ;;  %v6647_v16 = vld [vmem:[%s9383_s0 + $0x6e0] ss:$8 sps:$4 sm:$0xff]  }
  0x9a   :  { %5888 = vmatprep.mubr.msk.bf16.mxu0 %vm1517_vm0, %v6471_v62  ;;  %5972 = vmatprep.mubr.msk.bf16.mxu1 %vm1517_vm0, %v6579_v19  ;;  %v6554_v19 = vld [vmem:[%s9383_s0 + $0x1f0] ss:$8 sps:$4 sm:$0xff]  }
  0xa1   :  { %2059 = vmatmul.mubr.bf16.gmra.mrb[60].mxu0 %v6473_v1  ;;  %2731 = vmatmul.mubr.bf16.gmra.mrb[60].mxu1 %v6581_v20 }
  0xa2   :  { %5889 = vmatprep.mubr.msk.bf16.mxu0 %vm1517_vm0, %v6474_v2  ;;  %5973 = vmatprep.mubr.msk.bf16.mxu1 %vm1517_vm0, %v6585_v23  ;;  %v6651_v23 = vld [vmem:[%s9383_s0 + $0x6f4] ss:$8 sps:$4 sm:$0xff]  }
  0xa9   :  { %2067 = vmatmul.mubr.bf16.gmra.mrb[64].mxu0 %v6476_v5  ;;  %2739 = vmatmul.mubr.bf16.gmra.mrb[64].mxu1 %v6587_v24  ;;  %v6546_v5 = vld [vmem:[%s9383_s0 + $0x1e4] ss:$8 sps:$4 sm:$0xff]   ;;  %v6653_v24 = vld [vmem:[%s9383_s0 + $0x6f0] ss:$8 sps:$4 sm:$0xff]  }
  0xaa   :  { %5890 = vmatprep.mubr.msk.bf16.mxu0 %vm1517_vm0, %v6477_v6  ;;  %5974 = vmatprep.mubr.msk.bf16.mxu1 %vm1517_vm0, %v6591_v27  ;;  %v6560_v27 = vld [vmem:[%s9383_s0 + $0x200] ss:$8 sps:$4 sm:$0xff]  }
  0xb1   :  { %2075 = vmatmul.mubr.bf16.gmra.mrb[68].mxu0 %v6479_v9  ;;  %2747 = vmatmul.mubr.bf16.gmra.mrb[68].mxu1 %v6593_v28 }
  0xb2   :  { %5891 = vmatprep.mubr.msk.bf16.mxu0 %vm1517_vm0, %v6480_v10  ;;  %5975 = vmatprep.mubr.msk.bf16.mxu1 %vm1517_vm0, %v6597_v31  ;;  %v9392_v31 = vmov 0.0  }
  0xb3   :  { %6165 = vmatprep.subr.bf16.mxu1 %v9392_v31 }
  0xb9   :  { %2083 = vmatmul.mubr.bf16.gmra.mrb[72].mxu0 %v6482_v13  ;;  %2755 = vmatmul.mubr.bf16.gmra.mrb[72].mxu1 %v6599_v32  ;;  %v6552_v13 = vld [vmem:[%s9383_s0 + $0x1f4] ss:$8 sps:$4 sm:$0xff]   ;;  %v6657_v32 = vld [vmem:[%s9384_s3] sm:$0xff]  }
  0xba   :  { %5892 = vmatprep.mubr.msk.bf16.mxu0 %vm1517_vm0, %v6483_v14  ;;  %5976 = vmatprep.mubr.msk.bf16.mxu1 %vm1517_vm0, %v6603_v35  ;;  %v6660_v35 = vld [vmem:[%s9383_s0 + $0x700] ss:$8 sps:$4 sm:$0xff]  }
  0xbb   :  { %6166 = vmatpush3.bf16.msra.mxu1 %v6657_v32 }
  0xbc   :  { %6171 = vmatprep.subr.bf16.mxu1 %v9392_v31 }
  0xc1   :  { %2091 = vmatmul.mubr.bf16.gmra.mrb[76].mxu0 %v6485_v17  ;;  %2763 = vmatmul.mubr.bf16.gmra.mrb[76].mxu1 %v6605_v36 }
  0xc2   :  { %5893 = vmatprep.mubr.msk.bf16.mxu0 %vm1517_vm0, %v6486_v18  ;;  %5977 = vmatprep.mubr.msk.bf16.mxu1 %vm1517_vm0, %v6609_v39  ;;  %v6570_v39 = vld [vmem:[%s9383_s0 + $0x224] ss:$8 sps:$4 sm:$0xff]  }
  0xc9   :  { %2099 = vmatmul.mubr.bf16.gmra.mrb[80].mxu0 %v6488_v21  ;;  %2771 = vmatmul.mubr.bf16.gmra.mrb[80].mxu1 %v6611_v40  ;;  %v6558_v21 = vld [vmem:[%s9383_s0 + $0x204] ss:$8 sps:$4 sm:$0xff]  }
  0xca   :  { %5894 = vmatprep.mubr.msk.bf16.mxu0 %vm1517_vm0, %v6492_v22  ;;  %5978 = vmatprep.mubr.msk.bf16.mxu1 %vm1517_vm0, %v6615_v43  ;;  %v6666_v43 = vld [vmem:[%s9383_s0 + $0x710] ss:$8 sps:$4 sm:$0xff]  }
  0xd1   :  { %2107 = vmatmul.mubr.bf16.gmra.mrb[84].mxu0 %v6494_v25  ;;  %2779 = vmatmul.mubr.bf16.gmra.mrb[84].mxu1 %v6617_v44 }
  0xd2   :  { %5895 = vmatprep.mubr.msk.bf16.mxu0 %vm1517_vm0, %v6498_v26  ;;  %5979 = vmatprep.mubr.msk.bf16.mxu1 %vm1517_vm0, %v6621_v47  ;;  %v6576_v47 = vld [vmem:[%s9383_s0 + $0x234] ss:$8 sps:$4 sm:$0xff]  }
  0xd9   :  { %2115 = vmatmul.mubr.bf16.gmra.mrb[88].mxu0 %v6500_v29  ;;  %2787 = vmatmul.mubr.bf16.gmra.mrb[88].mxu1 %v6623_v48  ;;  %v6564_v29 = vld [vmem:[%s9383_s0 + $0x214] ss:$8 sps:$4 sm:$0xff]  }
  0xda   :  { %5896 = vmatprep.mubr.msk.bf16.mxu0 %vm1517_vm0, %v6504_v30  ;;  %5980 = vmatprep.mubr.msk.bf16.mxu1 %vm1517_vm0, %v6627_v55 }
  0xe1   :  { %2123 = vmatmul.mubr.bf16.gmra.mrb[92].mxu0 %v6506_v33  ;;  %2795 = vmatmul.mubr.bf16.gmra.mrb[92].mxu1 %v6629_v56  ;;  %v6566_v33 = vld [vmem:[%s9383_s0 + $0x210] ss:$8 sps:$4 sm:$0xff]  }
  0xe2   :  { %5897 = vmatprep.mubr.msk.bf16.mxu0 %vm1517_vm0, %v6510_v34  ;;  %5981 = vmatprep.mubr.msk.bf16.mxu1 %vm1517_vm0, %v6633_v63  ;;  %v6658_v34 = vld [vmem:[%s9383_s0 + $0x704] ss:$8 sps:$4 sm:$0xff]   ;;  %v6678_v63 = vld [vmem:[%s9383_s0 + $0x730] ss:$8 sps:$4 sm:$0xff]  }
  0xe9   :  { %2131 = vmatmul.mubr.bf16.gmra.mrb[96].mxu0 %v6512_v37  ;;  %2803 = vmatmul.mubr.bf16.gmra.mrb[96].mxu1 %v6635_v0 }
  0xea   :  { %5898 = vmatprep.mubr.msk.bf16.mxu0 %vm1517_vm0, %v6516_v38  ;;  %5982 = vmatprep.mubr.msk.bf16.mxu1 %vm1517_vm0, %v6639_v7  ;;  %v6682_v7 = vld [vmem:[%s9383_s0 + $0x744] ss:$8 sps:$4 sm:$0xff]  }
  0xf1   :  { %2139 = vmatmul.mubr.bf16.gmra.mrb[100].mxu0 %v6518_v41  ;;  %2811 = vmatmul.mubr.bf16.gmra.mrb[100].mxu1 %v6641_v8  ;;  %v6664_v41 = vld [vmem:[%s9383_s0 + $0x714] ss:$8 sps:$4 sm:$0xff]   ;;  %v6684_v8 = vld [vmem:[%s9383_s0 + $0x740] ss:$8 sps:$4 sm:$0xff]  }
  0xf2   :  { %5899 = vmatprep.mubr.msk.bf16.mxu0 %vm1517_vm0, %v6522_v42  ;;  %5983 = vmatprep.mubr.msk.bf16.mxu1 %vm1517_vm0, %v6645_v15  ;;  %v6572_v42 = vld [vmem:[%s9383_s0 + $0x220] ss:$8 sps:$4 sm:$0xff]   ;;  %v6594_v15 = vld [vmem:[%s9383_s0 + $0x264] ss:$8 sps:$4 sm:$0xff]  }
  0xf9   :  { %2147 = vmatmul.mubr.bf16.gmra.mrb[104].mxu0 %v6524_v45  ;;  %2819 = vmatmul.mubr.bf16.gmra.mrb[104].mxu1 %v6647_v16 }
  0xfa   :  { %5900 = vmatprep.mubr.msk.bf16.mxu0 %vm1517_vm0, %v6528_v46  ;;  %5984 = vmatprep.mubr.msk.bf16.mxu1 %vm1517_vm0, %v6651_v23  ;;  %v6596_v23 = vld [vmem:[%s9383_s0 + $0x260] ss:$8 sps:$4 sm:$0xff]  }
  0xfc   :  { %v7293_v49 = vpop.f32.mrb[0].mxu0 }
  0xfd   :  { %v1942_v50 = vpop.f32.mrb[1].mxu0 }
  0xfe   :  { %v7299_v52 = vpop.f32.mrb[2].mxu0  ;;  %v6670_v50 = vld [vmem:[%s9383_s0 + $0x724] ss:$8 sps:$4 sm:$0xff]  }
  0xff   :  { %v1945_v54 = vpop.f32.mrb[3].mxu0 }
 0x101   :  { %2155 = vmatmul.mubr.bf16.gmra.mrb[108].mxu0 %v6530_v51  ;;  %2827 = vmatmul.mubr.bf16.gmra.mrb[108].mxu1 %v6653_v24  ;;  %v6578_v51 = vld [vmem:[%s9383_s0 + $0x230] ss:$8 sps:$4 sm:$0xff]  }
 0x102   :  { %5901 = vmatprep.mubr.msk.bf16.mxu0 %vm1517_vm0, %v6534_v53  ;;  %5985 = vmatprep.mubr.msk.bf16.mxu1 %vm1517_vm0, %v6658_v34  ;;  %v6672_v53 = vld [vmem:[%s9383_s0 + $0x720] ss:$8 sps:$4 sm:$0xff]   ;;  %v6602_v34 = vld [vmem:[%s9383_s0 + $0x270] ss:$8 sps:$4 sm:$0xff]  }
 0x104   :  { %v7311_v57 = vpop.f32.mrb[4].mxu0 }
 0x105   :  { %v1950_v58 = vpop.f32.mrb[5].mxu0 }
 0x106   :  { %v7317_v60 = vpop.f32.mrb[6].mxu0  ;;  %v6582_v58 = vld [vmem:[%s9383_s0 + $0x244] ss:$8 sps:$4 sm:$0xff]  }
 0x107   :  { %v1953_v62 = vpop.f32.mrb[7].mxu0 }
 0x108   :  { %v6584_v62 = vld [vmem:[%s9383_s0 + $0x240] ss:$8 sps:$4 sm:$0xff]  }
 0x109   :  { %2163 = vmatmul.mubr.bf16.gmra.mrb[112].mxu0 %v6536_v59  ;;  %2835 = vmatmul.mubr.bf16.gmra.mrb[112].mxu1 %v6660_v35 }
 0x10a   :  { %5902 = vmatprep.mubr.msk.bf16.mxu0 %vm1517_vm0, %v6540_v61  ;;  %5986 = vmatprep.mubr.msk.bf16.mxu1 %vm1517_vm0, %v6664_v41  ;;  %v6676_v61 = vld [vmem:[%s9383_s0 + $0x734] ss:$8 sps:$4 sm:$0xff]   ;;  %v6702_v41 = vld [vmem:[%s9383_s0 + $0x770] ss:$8 sps:$4 sm:$0xff]  }
 0x10c   :  { %v7329_v1 = vpop.f32.mrb[8].mxu0 }
 0x10d   :  { %v1958_v2 = vpop.f32.mrb[9].mxu0 }
 0x10e   :  { %v7335_v4 = vpop.f32.mrb[10].mxu0 }
 0x10f   :  { %v1961_v6 = vpop.f32.mrb[11].mxu0 }
 0x111   :  { %2171 = vmatmul.mubr.bf16.gmra.mrb[116].mxu0 %v6542_v3  ;;  %2843 = vmatmul.mubr.bf16.gmra.mrb[116].mxu1 %v6666_v43 }
 0x112   :  { %5903 = vmatprep.mubr.msk.bf16.mxu0 %vm1517_vm0, %v6546_v5  ;;  %5987 = vmatprep.mubr.msk.bf16.mxu1 %vm1517_vm0, %v6670_v50  ;;  %v6588_v5 = vld [vmem:[%s9383_s0 + $0x254] ss:$8 sps:$4 sm:$0xff]  }
 0x114   :  { %v7347_v9 = vpop.f32.mrb[12].mxu0 }
 0x115   :  { %v1966_v10 = vpop.f32.mrb[13].mxu0 }
 0x116   :  { %v7353_v12 = vpop.f32.mrb[14].mxu0 }
 0x117   :  { %v1969_v14 = vpop.f32.mrb[15].mxu0 }
 0x119   :  { %2179 = vmatmul.mubr.bf16.gmra.mrb[120].mxu0 %v6548_v11  ;;  %2851 = vmatmul.mubr.bf16.gmra.mrb[120].mxu1 %v6672_v53  ;;  %v6708_v53 = vld [vmem:[%s9383_s0 + $0x780] ss:$8 sps:$4 sm:$0xff]  }
 0x11a   :  { %5904 = vmatprep.mubr.msk.bf16.mxu0 %vm1517_vm0, %v6552_v13  ;;  %5988 = vmatprep.mubr.msk.bf16.mxu1 %vm1517_vm0, %v6676_v61  ;;  %v6590_v13 = vld [vmem:[%s9383_s0 + $0x250] ss:$8 sps:$4 sm:$0xff]  }
 0x11c   :  { %v7365_v17 = vpop.f32.mrb[16].mxu0 }
 0x11d   :  { %v1974_v18 = vpop.f32.mrb[17].mxu0 }
 0x11e   :  { %v7371_v20 = vpop.f32.mrb[18].mxu0  ;;  %v6688_v18 = vld [vmem:[%s9383_s0 + $0x754] ss:$8 sps:$4 sm:$0xff]  }
 0x11f   :  { %v1977_v22 = vpop.f32.mrb[19].mxu0 }
 0x121   :  { %2187 = vmatmul.mubr.bf16.gmra.mrb[124].mxu0 %v6554_v19  ;;  %2859 = vmatmul.mubr.bf16.gmra.mrb[124].mxu1 %v6678_v63  ;;  %v6690_v19 = vld [vmem:[%s9383_s0 + $0x750] ss:$8 sps:$4 sm:$0xff]  }
 0x122   :  { %5905 = vmatprep.mubr.msk.bf16.mxu0 %vm1517_vm0, %v6558_v21  ;;  %5989 = vmatprep.mubr.msk.bf16.mxu1 %vm1517_vm0, %v6682_v7 }
 0x124   :  { %v7383_v25 = vpop.f32.mrb[20].mxu0 }
 0x125   :  { %v1982_v26 = vpop.f32.mrb[21].mxu0 }
 0x126   :  { %v7389_v28 = vpop.f32.mrb[22].mxu0  ;;  %v6600_v26 = vld [vmem:[%s9383_s0 + $0x274] ss:$8 sps:$4 sm:$0xff]  }
 0x127   :  { %v1985_v30 = vpop.f32.mrb[23].mxu0 }
 0x128   :  { %v6696_v30 = vld [vmem:[%s9383_s0 + $0x760] ss:$8 sps:$4 sm:$0xff]  }
 0x129   :  { %2195 = vmatmul.mubr.bf16.gmra.mrb[128].mxu0 %v6560_v27  ;;  %2867 = vmatmul.mubr.bf16.gmra.mrb[128].mxu1 %v6684_v8  ;;  %v6620_v8 = vld [vmem:[%s9383_s0 + $0x2a0] ss:$8 sps:$4 sm:$0xff]  }
 0x12a   :  { %5906 = vmatprep.mubr.msk.bf16.mxu0 %vm1517_vm0, %v6564_v29  ;;  %5990 = vmatprep.mubr.msk.bf16.mxu1 %vm1517_vm0, %v6688_v18  ;;  %v6694_v29 = vld [vmem:[%s9383_s0 + $0x764] ss:$8 sps:$4 sm:$0xff]   ;;  %v6720_v18 = vld [vmem:[%s9383_s0 + $0x7a0] ss:$8 sps:$4 sm:$0xff]  }
 0x12c   :  { %v7408_v36 = vpop.f32.mrb[24].mxu0 }
 0x12d   :  { %v1990_v37 = vpop.f32.mrb[25].mxu0 }
 0x12e   :  { %v7412_v38 = vpop.f32.mrb[26].mxu0  ;;  %v6606_v37 = vld [vmem:[%s9383_s0 + $0x284] ss:$8 sps:$4 sm:$0xff]  }
 0x12f   :  { %v1993_v40 = vpop.f32.mrb[27].mxu0 }
 0x130   :  { %v6700_v40 = vld [vmem:[%s9383_s0 + $0x774] ss:$8 sps:$4 sm:$0xff]  }
 0x131   :  { %2203 = vmatmul.mubr.bf16.gmra.mrb[132].mxu0 %v6566_v33  ;;  %2875 = vmatmul.mubr.bf16.gmra.mrb[132].mxu1 %v6690_v19 }
 0x132   :  { %5907 = vmatprep.mubr.msk.bf16.mxu0 %vm1517_vm0, %v6570_v39  ;;  %5991 = vmatprep.mubr.msk.bf16.mxu1 %vm1517_vm0, %v6694_v29 }
 0x134   :  { %v7427_v44 = vpop.f32.mrb[28].mxu0 }
 0x135   :  { %v1998_v45 = vpop.f32.mrb[29].mxu0 }
 0x136   :  { %v7430_v46 = vpop.f32.mrb[30].mxu0  ;;  %v6608_v45 = vld [vmem:[%s9383_s0 + $0x280] ss:$8 sps:$4 sm:$0xff]  }
 0x137   :  { %v2001_v48 = vpop.f32.mrb[31].mxu0 }
 0x138   :  { %v6612_v48 = vld [vmem:[%s9383_s0 + $0x294] ss:$8 sps:$4 sm:$0xff]  }
 0x139   :  { %2211 = vmatmul.mubr.bf16.gmra.mrb[136].mxu0 %v6572_v42  ;;  %2883 = vmatmul.mubr.bf16.gmra.mrb[136].mxu1 %v6696_v30  ;;  %v6724_v30 = vld [vmem:[%s9383_s0 + $0x7b4] ss:$8 sps:$4 sm:$0xff]  }
 0x13a   :  { %5908 = vmatprep.mubr.msk.bf16.mxu0 %vm1517_vm0, %v6576_v47  ;;  %5992 = vmatprep.mubr.msk.bf16.mxu1 %vm1517_vm0, %v6700_v40 }
 0x13c   :  { %v7445_v54 = vpop.f32.mrb[32].mxu0 }
 0x13d   :  { %v2006_v55 = vpop.f32.mrb[33].mxu0 }
 0x13e   :  { %v7448_v56 = vpop.f32.mrb[34].mxu0 }
 0x13f   :  { %v2009_v59 = vpop.f32.mrb[35].mxu0 }
 0x140   :  { %v6614_v59 = vld [vmem:[%s9383_s0 + $0x290] ss:$8 sps:$4 sm:$0xff]  }
 0x141   :  { %2219 = vmatmul.mubr.bf16.gmra.mrb[140].mxu0 %v6578_v51  ;;  %2891 = vmatmul.mubr.bf16.gmra.mrb[140].mxu1 %v6702_v41  ;;  %v6706_v51 = vld [vmem:[%s9383_s0 + $0x784] ss:$8 sps:$4 sm:$0xff]   ;;  %v6636_v41 = vld [vmem:[%s9383_s0 + $0x2d4] ss:$8 sps:$4 sm:$0xff]  }
 0x142   :  { %5909 = vmatprep.mubr.msk.bf16.mxu0 %vm1517_vm0, %v6582_v58  ;;  %5993 = vmatprep.mubr.msk.bf16.mxu1 %vm1517_vm0, %v6706_v51 }
 0x144   :  { %v7463_v0 = vpop.f32.mrb[36].mxu0 }
 0x145   :  { %v2014_v2 = vpop.f32.mrb[37].mxu0 }
 0x146   :  { %v7466_v3 = vpop.f32.mrb[38].mxu0  ;;  %v6712_v2 = vld [vmem:[%s9383_s0 + $0x794] ss:$8 sps:$4 sm:$0xff]  }
 0x147   :  { %v2017_v6 = vpop.f32.mrb[39].mxu0 }
 0x149   :  { %2227 = vmatmul.mubr.bf16.gmra.mrb[144].mxu0 %v6584_v62  ;;  %v6618_v62 = vld [vmem:[%s9383_s0 + $0x2a4] ss:$8 sps:$4 sm:$0xff]   ;;  %2899 = vmatmul.mubr.bf16.gmra.mrb[144].mxu1 %v6708_v53  ;;  %v6638_v53 = vld [vmem:[%s9383_s0 + $0x2d0] ss:$8 sps:$4 sm:$0xff]  }
 0x14a   :  { %5910 = vmatprep.mubr.msk.bf16.mxu0 %vm1517_vm0, %v6588_v5  ;;  %v6714_v5 = vld [vmem:[%s9383_s0 + $0x790] ss:$8 sps:$4 sm:$0xff]   ;;  %5994 = vmatprep.mubr.msk.bf16.mxu1 %vm1517_vm0, %v6712_v2 }
 0x14b   :  { %v6738_v2 = vld [vmem:[%s9383_s0 + $0x7d0] ss:$8 sps:$4 sm:$0xff]  }
 0x14c   :  { %v7478_v10 = vpop.f32.mrb[40].mxu0 }
 0x14d   :  { %v2022_v11 = vpop.f32.mrb[41].mxu0 }
 0x14e   :  { %v7484_v14 = vpop.f32.mrb[42].mxu0 }
 0x14f   :  { %v2025_v16 = vpop.f32.mrb[43].mxu0 }
 0x150   :  { %v6718_v16 = vld [vmem:[%s9383_s0 + $0x7a4] ss:$8 sps:$4 sm:$0xff]  }
 0x151   :  { %2235 = vmatmul.mubr.bf16.gmra.mrb[148].mxu0 %v6590_v13  ;;  %v6624_v13 = vld [vmem:[%s9383_s0 + $0x2b4] ss:$8 sps:$4 sm:$0xff]   ;;  %2907 = vmatmul.mubr.bf16.gmra.mrb[148].mxu1 %v6714_v5 }
 0x152   :  { %5911 = vmatprep.mubr.msk.bf16.mxu0 %vm1517_vm0, %v6594_v15  ;;  %5995 = vmatprep.mubr.msk.bf16.mxu1 %vm1517_vm0, %v6718_v16 }
 0x154   :  { %v7496_v21 = vpop.f32.mrb[44].mxu0 }
 0x155   :  { %v2030_v22 = vpop.f32.mrb[45].mxu0 }
 0x156   :  { %v7502_v24 = vpop.f32.mrb[46].mxu0 }
 0x157   :  { %v2033_v27 = vpop.f32.mrb[47].mxu0 }
 0x158   :  { %v6630_v27 = vld [vmem:[%s9383_s0 + $0x2c4] ss:$8 sps:$4 sm:$0xff]  }
 0x159   :  { %2243 = vmatmul.mubr.bf16.gmra.mrb[152].mxu0 %v6596_v23  ;;  %v6626_v23 = vld [vmem:[%s9383_s0 + $0x2b0] ss:$8 sps:$4 sm:$0xff]   ;;  %2915 = vmatmul.mubr.bf16.gmra.mrb[152].mxu1 %v6720_v18  ;;  %v6742_v18 = vld [vmem:[%s9383_s0 + $0x7e4] ss:$8 sps:$4 sm:$0xff]  }
 0x15a   :  { %5912 = vmatprep.mubr.msk.bf16.mxu0 %vm1517_vm0, %v6600_v26  ;;  %5996 = vmatprep.mubr.msk.bf16.mxu1 %vm1517_vm0, %v6724_v30 }
 0x15c   :  { %v7514_v32 = vpop.f32.mrb[48].mxu0 }
 0x15d   :  { %v2038_v33 = vpop.f32.mrb[49].mxu0 }
 0x15e   :  { %v7520_v35 = vpop.f32.mrb[50].mxu0  ;;  %v6726_v33 = vld [vmem:[%s9383_s0 + $0x7b0] ss:$8 sps:$4 sm:$0xff]  }
 0x15f   :  { %v2041_v39 = vpop.f32.mrb[51].mxu0 }
 0x160   :  { %v6632_v39 = vld [vmem:[%s9383_s0 + $0x2c0] ss:$8 sps:$4 sm:$0xff]  }
 0x161   :  { %2251 = vmatmul.mubr.bf16.gmra.mrb[156].mxu0 %v6602_v34  ;;  %2923 = vmatmul.mubr.bf16.gmra.mrb[156].mxu1 %v6726_v33  ;;  %v6654_v33 = vld [vmem:[%s9383_s0 + $0x304] ss:$8 sps:$4 sm:$0xff]  }
 0x162   :  { %5913 = vmatprep.mubr.msk.bf16.mxu0 %vm1517_vm0, %v6606_v37 }
 0x164   :  { %v7532_v42 = vpop.f32.mrb[52].mxu0 }
 0x165   :  { %v2046_v43 = vpop.f32.mrb[53].mxu0 }
 0x166   :  { %v7538_v47 = vpop.f32.mrb[54].mxu0 }
 0x167   :  { %v2049_v50 = vpop.f32.mrb[55].mxu0 }
 0x169   :  { %2259 = vmatmul.mubr.bf16.gmra.mrb[160].mxu0 %v6608_v45  ;;  %v6730_v45 = vld [vmem:[%s9383_s0 + $0x7c4] ss:$8 sps:$4 sm:$0xff]  }
 0x16a   :  { %5914 = vmatprep.mubr.msk.bf16.mxu0 %vm1517_vm0, %v6612_v48  ;;  %v6732_v48 = vld [vmem:[%s9383_s0 + $0x7c0] ss:$8 sps:$4 sm:$0xff]   ;;  %5997 = vmatprep.mubr.msk.bf16.mxu1 %vm1517_vm0, %v6730_v45  ;;  %v6748_v45 = vld [vmem:[%s9383_s0 + $0x7f4] ss:$8 sps:$4 sm:$0xff]  }
 0x16b   :  { %2931 = vmatmul.mubr.bf16.gmra.mrb[160].mxu1 %v6732_v48 }
 0x16c   :  { %v7550_v55 = vpop.f32.mrb[56].mxu0 }
 0x16d   :  { %v2054_v58 = vpop.f32.mrb[57].mxu0 }
 0x16e   :  { %v7556_v61 = vpop.f32.mrb[58].mxu0 }
 0x16f   :  { %v2057_v63 = vpop.f32.mrb[59].mxu0 }
 0x170   :  { %v6736_v63 = vld [vmem:[%s9383_s0 + $0x7d4] ss:$8 sps:$4 sm:$0xff]  }
 0x171   :  { %2267 = vmatmul.mubr.bf16.gmra.mrb[164].mxu0 %v6614_v59  ;;  %v6642_v59 = vld [vmem:[%s9383_s0 + $0x2e4] ss:$8 sps:$4 sm:$0xff]   ;;  %5998 = vmatprep.mubr.msk.bf16.mxu1 %vm1517_vm0, %v6736_v63  ;;  %v6656_v63 = vld [vmem:[%s9383_s0 + $0x300] ss:$8 sps:$4 sm:$0xff]  }
 0x172   :  { %5915 = vmatprep.mubr.msk.bf16.mxu0 %vm1517_vm0, %v6618_v62 }
 0x173   :  { %2939 = vmatmul.mubr.bf16.gmra.mrb[164].mxu1 %v6738_v2 }
 0x174   :  { %v7568_v6 = vpop.f32.mrb[60].mxu0  ;;  %5999 = vmatprep.mubr.msk.bf16.mxu1 %vm1517_vm0, %v6742_v18 }
 0x175   :  { %v2062_v7 = vpop.f32.mrb[61].mxu0 }
 0x176   :  { %v7574_v11 = vpop.f32.mrb[62].mxu0 }
 0x177   :  { %v2065_v15 = vpop.f32.mrb[63].mxu0 }
 0x178   :  { %v6648_v15 = vld [vmem:[%s9383_s0 + $0x2f4] ss:$8 sps:$4 sm:$0xff]  }
 0x179   :  { %2275 = vmatmul.mubr.bf16.gmra.mrb[168].mxu0 %v6620_v8  ;;  %v6644_v8 = vld [vmem:[%s9383_s0 + $0x2e0] ss:$8 sps:$4 sm:$0xff]  }
 0x17a   :  { %5916 = vmatprep.mubr.msk.bf16.mxu0 %vm1517_vm0, %v6624_v13 }
 0x17c   :  { %v7586_v19 = vpop.f32.mrb[64].mxu0 }
 0x17d   :  { %v2070_v22 = vpop.f32.mrb[65].mxu0 }
 0x17e   :  { %v7592_v26 = vpop.f32.mrb[66].mxu0  ;;  %v6744_v22 = vld [vmem:[%s9383_s0 + $0x7e0] ss:$8 sps:$4 sm:$0xff]  }
 0x17f   :  { %v2073_v29 = vpop.f32.mrb[67].mxu0  ;;  %2947 = vmatmul.mubr.bf16.gmra.mrb[168].mxu1 %v6744_v22 }
 0x180   :  { %v6650_v29 = vld [vmem:[%s9383_s0 + $0x2f0] ss:$8 sps:$4 sm:$0xff]   ;;  %6000 = vmatprep.mubr.msk.bf16.mxu1 %vm1517_vm0, %v6748_v45 }
 0x181   :  { %2283 = vmatmul.mubr.bf16.gmra.mrb[172].mxu0 %v6626_v23 }
 0x182   :  { %5917 = vmatprep.mubr.msk.bf16.mxu0 %vm1517_vm0, %v6630_v27 }
 0x184   :  { %v7604_v34 = vpop.f32.mrb[68].mxu0 }
 0x185   :  { %v2078_v37 = vpop.f32.mrb[69].mxu0 }
 0x186   :  { %v7610_v40 = vpop.f32.mrb[70].mxu0 }
 0x187   :  { %v2081_v43 = vpop.f32.mrb[71].mxu0 }
 0x189   :  { %2291 = vmatmul.mubr.bf16.gmra.mrb[176].mxu0 %v6632_v39  ;;  %v7669_v39 = vpop.f32.mrb[0].mxu1 }
 0x18a   :  { %5918 = vmatprep.mubr.msk.bf16.mxu0 %vm1517_vm0, %v6636_v41  ;;  %v2614_v41 = vpop.f32.mrb[1].mxu1 }
 0x18b   :  { %v7672_v43 = vpop.f32.mrb[2].mxu1 }
 0x18c   :  { %v7622_v50 = vpop.f32.mrb[72].mxu0  ;;  %v2617_v48 = vpop.f32.mrb[3].mxu1 }
 0x18d   :  { %v2086_v51 = vpop.f32.mrb[73].mxu0  ;;  %v6663_v48 = vld [vmem:[%s9383_s0 + $0x310] ss:$8 sps:$4 sm:$0xff]  }
 0x18e   :  { %v7628_v58 = vpop.f32.mrb[74].mxu0  ;;  %v6750_v51 = vld [vmem:[%s9383_s0 + $0x7f0] ss:$8 sps:$4 sm:$0xff]  }
 0x18f   :  { %v2089_v62 = vpop.f32.mrb[75].mxu0  ;;  %2955 = vmatmul.mubr.bf16.gmra.mrb[172].mxu1 %v6750_v51 }
 0x191   :  { %2299 = vmatmul.mubr.bf16.gmra.mrb[180].mxu0 %v6638_v53 }
 0x192   :  { %5919 = vmatprep.mubr.msk.bf16.mxu0 %vm1517_vm0, %v6642_v59  ;;  %v7682_v59 = vpop.f32.mrb[4].mxu1 }
 0x193   :  { %v2622_v2 = vpop.f32.mrb[5].mxu1 }
 0x194   :  { %v7640_v5 = vpop.f32.mrb[76].mxu0 }
 0x195   :  { %v2094_v7 = vpop.f32.mrb[77].mxu0 }
 0x196   :  { %v7646_v13 = vpop.f32.mrb[78].mxu0 }
 0x197   :  { %v2097_v16 = vpop.f32.mrb[79].mxu0 }
 0x199   :  { %2307 = vmatmul.mubr.bf16.gmra.mrb[184].mxu0 %v6644_v8  ;;  %v6661_v8 = vld [vmem:[%s9383_s0 + $0x314] ss:$8 sps:$4 sm:$0xff]  }
 0x19a   :  { %5920 = vmatprep.mubr.msk.bf16.mxu0 %vm1517_vm0, %v6648_v15  ;;  %v7693_v15 = vpop.f32.mrb[6].mxu1 }
 0x19b   :  { %v2625_v18 = vpop.f32.mrb[7].mxu1 }
 0x19c   :  { %v7658_v23 = vpop.f32.mrb[80].mxu0  ;;  %v7695_v22 = vpop.f32.mrb[8].mxu1 }
 0x19d   :  { %v2102_v27 = vpop.f32.mrb[81].mxu0 }
 0x19e   :  { %v7664_v30 = vpop.f32.mrb[82].mxu0  ;;  %v2630_v27 = vpop.f32.mrb[9].mxu1 }
 0x19f   :  { %v2105_v37 = vpop.f32.mrb[83].mxu0 }
 0x1a1   :  { %2315 = vmatmul.mubr.bf16.gmra.mrb[188].mxu0 %v6650_v29  ;;  %v7698_v29 = vpop.f32.mrb[10].mxu1 }
 0x1a2   :  { %5921 = vmatprep.mubr.msk.bf16.mxu0 %vm1517_vm0, %v6654_v33  ;;  %v2633_v33 = vpop.f32.mrb[11].mxu1 }
 0x1a3   :  { %v7702_v41 = vpop.f32.mrb[12].mxu1 }
 0x1a4   :  { %v7680_v53 = vpop.f32.mrb[84].mxu0  ;;  %9459 = vst [vmem:[#allocation2_spill] sm:$0xff] %v7702_v41  ;;  %v2638_v51 = vpop.f32.mrb[13].mxu1 }
 0x1a5   :  { %v2110_v62 = vpop.f32.mrb[85].mxu0  ;;  %v7712_v2 = vpop.f32.mrb[14].mxu1 }
 0x1a6   :  { %v7688_v7 = vpop.f32.mrb[86].mxu0  ;;  %9460 = vst [vmem:[#allocation3_spill] sm:$0xff] %v7712_v2  ;;  %v6669_v2 = vld [vmem:[%s9383_s0 + $0x320] ss:$8 sps:$4 sm:$0xff]  }
 0x1a7   :  { %v2113_v16 = vpop.f32.mrb[87].mxu0 }
 0x1a8   :  { %v2641_v16 = vpop.f32.mrb[15].mxu1 }
 0x1a9   :  { %2323 = vmatmul.mubr.bf16.gmra.mrb[192].mxu0 %v6656_v63  ;;  %v6667_v63 = vld [vmem:[%s9383_s0 + $0x324] ss:$8 sps:$4 sm:$0xff]   ;;  %v7714_v18 = vpop.f32.mrb[16].mxu1 }
 0x1aa   :  { %5922 = vmatprep.mubr.msk.bf16.mxu0 %vm1517_vm0, %v6661_v8  ;;  %9461 = vst [vmem:[#allocation4_spill] sm:$0xff] %v7714_v18  ;;  %v2646_v27 = vpop.f32.mrb[17].mxu1 }
 0x1ab   :  { %v7717_v33 = vpop.f32.mrb[18].mxu1 }
 0x1ac   :  { %v7700_v37 = vpop.f32.mrb[88].mxu0  ;;  %9462 = vst [vmem:[#allocation5_spill] sm:$0xff] %v7717_v33 }
 0x1ad   :  { %v2118_v45 = vpop.f32.mrb[89].mxu0 }
 0x1ae   :  { %v7707_v62 = vpop.f32.mrb[90].mxu0  ;;  %v2649_v45 = vpop.f32.mrb[19].mxu1 }
 0x1af   :  { %v2121_v8 = vpop.f32.mrb[91].mxu0  ;;  %v7721_v31 = vpop.f32.mrb[20].mxu1 }
 0x1b0   :  { %9464 = vst [vmem:[#allocation7_spill] sm:$0xff] %v7721_v31  ;;  %v2654_v8 = vpop.f32.mrb[21].mxu1 }
 0x1b1   :  { %2331 = vmatmul.mubr.bf16.gmra.mrb[196].mxu0 %v6663_v48  ;;  %v6673_v48 = vld [vmem:[%s9383_s0 + $0x334] ss:$8 sps:$4 sm:$0xff]  }
 0x1b2   :  { %5923 = vmatprep.mubr.msk.bf16.mxu0 %vm1517_vm0, %v6667_v63  ;;  %v7731_v63 = vpop.f32.mrb[22].mxu1 }
 0x1b3   :  { %9466 = vst [vmem:[#allocation9_spill] sm:$0xff] %v7731_v63  ;;  %v2657_v45 = vpop.f32.mrb[23].mxu1  ;;  %v6675_v63 = vld [vmem:[%s9383_s0 + $0x330] ss:$8 sps:$4 sm:$0xff]  }
 0x1b4   :  { %v7719_v51 = vpop.f32.mrb[92].mxu0  ;;  %v7733_v33 = vpop.f32.mrb[24].mxu1 }
 0x1b5   :  { %9463 = vst [vmem:[#allocation6_spill] sm:$0xff] %v7719_v51  ;;  %v2126_v41 = vpop.f32.mrb[93].mxu0  ;;  %9467 = vst [vmem:[#allocation10_spill] sm:$0xff] %v7733_v33  ;;  %v2662_v31 = vpop.f32.mrb[25].mxu1 }
 0x1b6   :  { %v7726_v16 = vpop.f32.mrb[94].mxu0  ;;  %v7736_v41 = vpop.f32.mrb[26].mxu1  ;;  %v6679_v31 = vld [vmem:[%s9383_s0 + $0x344] ss:$8 sps:$4 sm:$0xff]  }
 0x1b7   :  { %9465 = vst [vmem:[#allocation8_spill] sm:$0xff] %v7726_v16  ;;  %v2129_v27 = vpop.f32.mrb[95].mxu0  ;;  %9468 = vst [vmem:[#allocation11_spill] sm:$0xff] %v7736_v41  ;;  %v2665_v18 = vpop.f32.mrb[27].mxu1 }
 0x1b8   :  { %v7740_v16 = vpop.f32.mrb[28].mxu1 }
 0x1b9   :  { %2339 = vmatmul.mubr.bf16.gmra.mrb[200].mxu0 %v6669_v2  ;;  %9470 = vst [vmem:[#allocation13_spill] sm:$0xff] %v7740_v16  ;;  %v2670_v27 = vpop.f32.mrb[29].mxu1 }
 0x1ba   :  { %5924 = vmatprep.mubr.msk.bf16.mxu0 %vm1517_vm0, %v6673_v48  ;;  %v7750_v2 = vpop.f32.mrb[30].mxu1 }
 0x1bb   :  { %9472 = vst [vmem:[#allocation15_spill] sm:$0xff] %v7750_v2  ;;  %v2673_v18 = vpop.f32.mrb[31].mxu1  ;;  %v6681_v2 = vld [vmem:[%s9383_s0 + $0x340] ss:$8 sps:$4 sm:$0xff]  }
 0x1bc   :  { %v7738_v8 = vpop.f32.mrb[96].mxu0  ;;  %v7752_v41 = vpop.f32.mrb[32].mxu1 }
 0x1bd   :  { %9469 = vst [vmem:[#allocation12_spill] sm:$0xff] %v7738_v8  ;;  %v2134_v51 = vpop.f32.mrb[97].mxu0  ;;  %9473 = vst [vmem:[#allocation16_spill] sm:$0xff] %v7752_v41  ;;  %v2678_v16 = vpop.f32.mrb[33].mxu1 }
 0x1be   :  { %v7745_v45 = vpop.f32.mrb[98].mxu0  ;;  %v7755_v51 = vpop.f32.mrb[34].mxu1  ;;  %v6685_v16 = vld [vmem:[%s9383_s0 + $0x354] ss:$8 sps:$4 sm:$0xff]  }
 0x1bf   :  { %9471 = vst [vmem:[#allocation14_spill] sm:$0xff] %v7745_v45  ;;  %v2137_v48 = vpop.f32.mrb[99].mxu0  ;;  %9474 = vst [vmem:[#allocation17_spill] sm:$0xff] %v7755_v51  ;;  %v2681_v33 = vpop.f32.mrb[35].mxu1 }
 0x1c0   :  { %v7759_v45 = vpop.f32.mrb[36].mxu1 }
 0x1c1   :  { %2347 = vmatmul.mubr.bf16.gmra.mrb[204].mxu0 %v6675_v63  ;;  %9476 = vst [vmem:[#allocation19_spill] sm:$0xff] %v7759_v45  ;;  %v2686_v48 = vpop.f32.mrb[37].mxu1 }
 0x1c2   :  { %5925 = vmatprep.mubr.msk.bf16.mxu0 %vm1517_vm0, %v6679_v31  ;;  %v7769_v63 = vpop.f32.mrb[38].mxu1 }
 0x1c3   :  { %9478 = vst [vmem:[#allocation21_spill] sm:$0xff] %v7769_v63  ;;  %v2689_v33 = vpop.f32.mrb[39].mxu1  ;;  %v6687_v63 = vld [vmem:[%s9383_s0 + $0x350] ss:$8 sps:$4 sm:$0xff]  }
 0x1c4   :  { %v7757_v27 = vpop.f32.mrb[100].mxu0  ;;  %v7771_v51 = vpop.f32.mrb[40].mxu1 }
 0x1c5   :  { %9475 = vst [vmem:[#allocation18_spill] sm:$0xff] %v7757_v27  ;;  %v2142_v8 = vpop.f32.mrb[101].mxu0  ;;  %9479 = vst [vmem:[#allocation22_spill] sm:$0xff] %v7771_v51  ;;  %v2694_v45 = vpop.f32.mrb[41].mxu1 }
 0x1c6   :  { %v7764_v18 = vpop.f32.mrb[102].mxu0  ;;  %v7774_v8 = vpop.f32.mrb[42].mxu1  ;;  %v6691_v45 = vld [vmem:[%s9383_s0 + $0x364] ss:$8 sps:$4 sm:$0xff]  }
 0x1c7   :  { %9477 = vst [vmem:[#allocation20_spill] sm:$0xff] %v7764_v18  ;;  %v2145_v31 = vpop.f32.mrb[103].mxu0  ;;  %9480 = vst [vmem:[#allocation23_spill] sm:$0xff] %v7774_v8  ;;  %v2697_v41 = vpop.f32.mrb[43].mxu1 }
 0x1c8   :  { %v7778_v18 = vpop.f32.mrb[44].mxu1 }
 0x1c9   :  { %2355 = vmatmul.mubr.bf16.gmra.mrb[208].mxu0 %v6681_v2  ;;  %9482 = vst [vmem:[#allocation25_spill] sm:$0xff] %v7778_v18  ;;  %v2702_v31 = vpop.f32.mrb[45].mxu1 }
 0x1ca   :  { %5926 = vmatprep.mubr.msk.bf16.mxu0 %vm1517_vm0, %v6685_v16  ;;  %v7788_v2 = vpop.f32.mrb[46].mxu1 }
 0x1cb   :  { %9484 = vst [vmem:[#allocation27_spill] sm:$0xff] %v7788_v2  ;;  %v2705_v41 = vpop.f32.mrb[47].mxu1  ;;  %v6693_v2 = vld [vmem:[%s9383_s0 + $0x360] ss:$8 sps:$4 sm:$0xff]  }
 0x1cc   :  { %v7776_v48 = vpop.f32.mrb[104].mxu0  ;;  %v7790_v8 = vpop.f32.mrb[48].mxu1 }
 0x1cd   :  { %9481 = vst [vmem:[#allocation24_spill] sm:$0xff] %v7776_v48  ;;  %v2150_v27 = vpop.f32.mrb[105].mxu0  ;;  %9485 = vst [vmem:[#allocation28_spill] sm:$0xff] %v7790_v8  ;;  %v2710_v18 = vpop.f32.mrb[49].mxu1 }
 0x1ce   :  { %v7783_v33 = vpop.f32.mrb[106].mxu0  ;;  %v7793_v27 = vpop.f32.mrb[50].mxu1  ;;  %v6697_v18 = vld [vmem:[%s9383_s0 + $0x374] ss:$8 sps:$4 sm:$0xff]  }
 0x1cf   :  { %9483 = vst [vmem:[#allocation26_spill] sm:$0xff] %v7783_v33  ;;  %v2153_v16 = vpop.f32.mrb[107].mxu0  ;;  %9486 = vst [vmem:[#allocation29_spill] sm:$0xff] %v7793_v27  ;;  %v2713_v51 = vpop.f32.mrb[51].mxu1 }
 0x1d0   :  { %v7797_v33 = vpop.f32.mrb[52].mxu1 }
 0x1d1   :  { %2363 = vmatmul.mubr.bf16.gmra.mrb[212].mxu0 %v6687_v63  ;;  %9488 = vst [vmem:[#allocation31_spill] sm:$0xff] %v7797_v33  ;;  %v2718_v16 = vpop.f32.mrb[53].mxu1 }
 0x1d2   :  { %5927 = vmatprep.mubr.msk.bf16.mxu0 %vm1517_vm0, %v6691_v45  ;;  %v7807_v63 = vpop.f32.mrb[54].mxu1 }
 0x1d3   :  { %9490 = vst [vmem:[#allocation33_spill] sm:$0xff] %v7807_v63  ;;  %v2721_v51 = vpop.f32.mrb[55].mxu1  ;;  %v6699_v63 = vld [vmem:[%s9383_s0 + $0x370] ss:$8 sps:$4 sm:$0xff]  }
 0x1d4   :  { %v7795_v31 = vpop.f32.mrb[108].mxu0  ;;  %v7809_v27 = vpop.f32.mrb[56].mxu1 }
 0x1d5   :  { %9487 = vst [vmem:[#allocation30_spill] sm:$0xff] %v7795_v31  ;;  %v2158_v48 = vpop.f32.mrb[109].mxu0  ;;  %9491 = vst [vmem:[#allocation34_spill] sm:$0xff] %v7809_v27  ;;  %v2726_v33 = vpop.f32.mrb[57].mxu1 }
 0x1d6   :  { %v7802_v41 = vpop.f32.mrb[110].mxu0  ;;  %v7812_v48 = vpop.f32.mrb[58].mxu1  ;;  %v6703_v33 = vld [vmem:[%s9383_s0 + $0x384] ss:$8 sps:$4 sm:$0xff]  }
 0x1d7   :  { %9489 = vst [vmem:[#allocation32_spill] sm:$0xff] %v7802_v41  ;;  %v2161_v45 = vpop.f32.mrb[111].mxu0  ;;  %9492 = vst [vmem:[#allocation35_spill] sm:$0xff] %v7812_v48  ;;  %v2729_v8 = vpop.f32.mrb[59].mxu1 }
 0x1d8   :  { %v7816_v41 = vpop.f32.mrb[60].mxu1 }
 0x1d9   :  { %2371 = vmatmul.mubr.bf16.gmra.mrb[216].mxu0 %v6693_v2  ;;  %9494 = vst [vmem:[#allocation37_spill] sm:$0xff] %v7816_v41  ;;  %v2734_v45 = vpop.f32.mrb[61].mxu1 }
 0x1da   :  { %5928 = vmatprep.mubr.msk.bf16.mxu0 %vm1517_vm0, %v6697_v18  ;;  %v7826_v2 = vpop.f32.mrb[62].mxu1 }
 0x1db   :  { %9496 = vst [vmem:[#allocation39_spill] sm:$0xff] %v7826_v2  ;;  %v2737_v8 = vpop.f32.mrb[63].mxu1  ;;  %v6705_v2 = vld [vmem:[%s9383_s0 + $0x380] ss:$8 sps:$4 sm:$0xff]  }
 0x1dc   :  { %v7814_v16 = vpop.f32.mrb[112].mxu0  ;;  %v7828_v48 = vpop.f32.mrb[64].mxu1 }
 0x1dd   :  { %9493 = vst [vmem:[#allocation36_spill] sm:$0xff] %v7814_v16  ;;  %v2166_v31 = vpop.f32.mrb[113].mxu0  ;;  %9497 = vst [vmem:[#allocation40_spill] sm:$0xff] %v7828_v48  ;;  %v2742_v41 = vpop.f32.mrb[65].mxu1 }
 0x1de   :  { %v7821_v51 = vpop.f32.mrb[114].mxu0  ;;  %v7831_v31 = vpop.f32.mrb[66].mxu1  ;;  %v6709_v41 = vld [vmem:[%s9383_s0 + $0x394] ss:$8 sps:$4 sm:$0xff]  }
 0x1df   :  { %9495 = vst [vmem:[#allocation38_spill] sm:$0xff] %v7821_v51  ;;  %v2169_v18 = vpop.f32.mrb[115].mxu0  ;;  %9498 = vst [vmem:[#allocation41_spill] sm:$0xff] %v7831_v31  ;;  %v2745_v27 = vpop.f32.mrb[67].mxu1 }
 0x1e0   :  { %v7835_v51 = vpop.f32.mrb[68].mxu1 }
 0x1e1   :  { %2379 = vmatmul.mubr.bf16.gmra.mrb[220].mxu0 %v6699_v63  ;;  %9500 = vst [vmem:[#allocation43_spill] sm:$0xff] %v7835_v51  ;;  %v2750_v18 = vpop.f32.mrb[69].mxu1 }
 0x1e2   :  { %5929 = vmatprep.mubr.msk.bf16.mxu0 %vm1517_vm0, %v6703_v33  ;;  %v7845_v63 = vpop.f32.mrb[70].mxu1 }
 0x1e3   :  { %9502 = vst [vmem:[#allocation45_spill] sm:$0xff] %v7845_v63  ;;  %v2753_v27 = vpop.f32.mrb[71].mxu1  ;;  %v6711_v63 = vld [vmem:[%s9383_s0 + $0x390] ss:$8 sps:$4 sm:$0xff]  }
 0x1e4   :  { %v7833_v45 = vpop.f32.mrb[116].mxu0  ;;  %v7847_v31 = vpop.f32.mrb[72].mxu1 }
 0x1e5   :  { %9499 = vst [vmem:[#allocation42_spill] sm:$0xff] %v7833_v45  ;;  %v2174_v16 = vpop.f32.mrb[117].mxu0  ;;  %9503 = vst [vmem:[#allocation46_spill] sm:$0xff] %v7847_v31  ;;  %v2758_v51 = vpop.f32.mrb[73].mxu1 }
 0x1e6   :  { %v7840_v8 = vpop.f32.mrb[118].mxu0  ;;  %v7850_v16 = vpop.f32.mrb[74].mxu1  ;;  %v6715_v51 = vld [vmem:[%s9383_s0 + $0x3a4] ss:$8 sps:$4 sm:$0xff]  }
 0x1e7   :  { %9501 = vst [vmem:[#allocation44_spill] sm:$0xff] %v7840_v8  ;;  %v2177_v33 = vpop.f32.mrb[119].mxu0  ;;  %9504 = vst [vmem:[#allocation47_spill] sm:$0xff] %v7850_v16  ;;  %v2761_v48 = vpop.f32.mrb[75].mxu1 }
 0x1e8   :  { %v7854_v8 = vpop.f32.mrb[76].mxu1 }
 0x1e9   :  { %2387 = vmatmul.mubr.bf16.gmra.mrb[224].mxu0 %v6705_v2  ;;  %9506 = vst [vmem:[#allocation49_spill] sm:$0xff] %v7854_v8  ;;  %v2766_v33 = vpop.f32.mrb[77].mxu1 }
 0x1ea   :  { %5930 = vmatprep.mubr.msk.bf16.mxu0 %vm1517_vm0, %v6709_v41  ;;  %v7864_v2 = vpop.f32.mrb[78].mxu1 }
 0x1eb   :  { %9508 = vst [vmem:[#allocation51_spill] sm:$0xff] %v7864_v2  ;;  %v2769_v48 = vpop.f32.mrb[79].mxu1  ;;  %v6717_v2 = vld [vmem:[%s9383_s0 + $0x3a0] ss:$8 sps:$4 sm:$0xff]  }
 0x1ec   :  { %v7852_v18 = vpop.f32.mrb[120].mxu0  ;;  %v7866_v16 = vpop.f32.mrb[80].mxu1 }
 0x1ed   :  { %9505 = vst [vmem:[#allocation48_spill] sm:$0xff] %v7852_v18  ;;  %v2182_v45 = vpop.f32.mrb[121].mxu0  ;;  %9509 = vst [vmem:[#allocation52_spill] sm:$0xff] %v7866_v16  ;;  %v2774_v8 = vpop.f32.mrb[81].mxu1 }
 0x1ee   :  { %v7859_v27 = vpop.f32.mrb[122].mxu0  ;;  %v7869_v45 = vpop.f32.mrb[82].mxu1  ;;  %v6721_v8 = vld [vmem:[%s9383_s0 + $0x3b4] ss:$8 sps:$4 sm:$0xff]  }
 0x1ef   :  { %9507 = vst [vmem:[#allocation50_spill] sm:$0xff] %v7859_v27  ;;  %v2185_v41 = vpop.f32.mrb[123].mxu0  ;;  %9510 = vst [vmem:[#allocation53_spill] sm:$0xff] %v7869_v45  ;;  %v2777_v31 = vpop.f32.mrb[83].mxu1 }
 0x1f0   :  { %v7873_v27 = vpop.f32.mrb[84].mxu1 }
 0x1f1   :  { %2395 = vmatmul.mubr.bf16.gmra.mrb[228].mxu0 %v6711_v63  ;;  %9512 = vst [vmem:[#allocation55_spill] sm:$0xff] %v7873_v27  ;;  %v2782_v41 = vpop.f32.mrb[85].mxu1 }
 0x1f2   :  { %5931 = vmatprep.mubr.msk.bf16.mxu0 %vm1517_vm0, %v6715_v51  ;;  %v7883_v63 = vpop.f32.mrb[86].mxu1 }
 0x1f3   :  { %9514 = vst [vmem:[#allocation57_spill] sm:$0xff] %v7883_v63  ;;  %v2785_v31 = vpop.f32.mrb[87].mxu1 }
 0x1f4   :  { %v7871_v33 = vpop.f32.mrb[124].mxu0  ;;  %v7885_v45 = vpop.f32.mrb[88].mxu1 }
 0x1f5   :  { %9511 = vst [vmem:[#allocation54_spill] sm:$0xff] %v7871_v33  ;;  %v2190_v18 = vpop.f32.mrb[125].mxu0  ;;  %9515 = vst [vmem:[#allocation58_spill] sm:$0xff] %v7885_v45  ;;  %v2790_v27 = vpop.f32.mrb[89].mxu1  ;;  %v7894_v33 = vsel %vm2963_vm2, %v7293_v49, -inf  ;;  %v7911_v49 = vsel %vm2963_vm2, %v7299_v52, -inf }
 0x1f6   :  { %v7878_v48 = vpop.f32.mrb[126].mxu0  ;;  %v7888_v18 = vpop.f32.mrb[90].mxu1  ;;  %9518 = vst [vmem:[#allocation61_spill] sm:$0xff] %v7894_v33  ;;  %v6723_v27 = vld [vmem:[%s9383_s0 + $0x3b0] ss:$8 sps:$4 sm:$0xff]  }
 0x1f7   :  { %9513 = vst [vmem:[#allocation56_spill] sm:$0xff] %v7878_v48  ;;  %v2193_v51 = vpop.f32.mrb[127].mxu0  ;;  %9516 = vst [vmem:[#allocation59_spill] sm:$0xff] %v7888_v18  ;;  %v2793_v41 = vpop.f32.mrb[91].mxu1 }
 0x1f8   :  { %v7890_v48 = vpop.f32.mrb[92].mxu1 }
 0x1f9   :  { %2403 = vmatmul.mubr.bf16.gmra.mrb[232].mxu0 %v6717_v2  ;;  %9517 = vst [vmem:[#allocation60_spill] sm:$0xff] %v7890_v48  ;;  %v2798_v2 = vpop.f32.mrb[93].mxu1  ;;  %v6727_v48 = vld [vmem:[%s9383_s0 + $0x3c4] ss:$8 sps:$4 sm:$0xff]  }
 0x1fa   :  { %5932 = vmatprep.mubr.msk.bf16.mxu0 %vm1517_vm0, %v6721_v8  ;;  %v7907_v18 = vpop.f32.mrb[94].mxu1  ;;  %v6733_v2 = vld [vmem:[%s9383_s0 + $0x3d4] ss:$8 sps:$4 sm:$0xff]  }
 0x1fb   :  { %9520 = vst [vmem:[#allocation63_spill] sm:$0xff] %v7907_v18  ;;  %v2801_v45 = vpop.f32.mrb[95].mxu1 }
 0x1fc   :  { %v2196_v16 = vpop.f32.mrb[128].mxu0  ;;  %v7918_v8 = vpop.f32.mrb[96].mxu1 }
 0x1fd   :  { %v7897_v51 = vsel %vm2963_vm2, %v2196_v16, -inf  ;;  %v2198_v31 = vpop.f32.mrb[129].mxu0  ;;  %9521 = vst [vmem:[#allocation64_spill] sm:$0xff] %v7918_v8  ;;  %v2806_v63 = vpop.f32.mrb[97].mxu1 }
 0x1fe   :  { %9519 = vst [vmem:[#allocation62_spill] sm:$0xff] %v7897_v51  ;;  %v2199_v41 = vpop.f32.mrb[130].mxu0  ;;  %v7921_v51 = vpop.f32.mrb[98].mxu1  ;;  %v6729_v63 = vld [vmem:[%s9383_s0 + $0x3c0] ss:$8 sps:$4 sm:$0xff]  }
 0x1ff   :  { %v7914_v16 = vsel %vm2963_vm2, %v2199_v41, -inf  ;;  %v2201_v31 = vpop.f32.mrb[131].mxu0  ;;  %9522 = vst [vmem:[#allocation65_spill] sm:$0xff] %v7921_v51  ;;  %v2809_v18 = vpop.f32.mrb[99].mxu1  ;;  %v7927_v41 = vsel %vm2963_vm2, %v7311_v57, -inf  ;;  %v7944_v57 = vsel %vm2963_vm2, %v7317_v60, -inf }
 0x200   :  { %v7923_v52 = vpop.f32.mrb[100].mxu1  ;;  %9524 = vst [vmem:[#allocation67_spill] sm:$0xff] %v7927_v41 }
 0x201   :  { %2411 = vmatmul.mubr.bf16.gmra.mrb[236].mxu0 %v6723_v27  ;;  %9523 = vst [vmem:[#allocation66_spill] sm:$0xff] %v7923_v52  ;;  %v2814_v27 = vpop.f32.mrb[101].mxu1 }
 0x202   :  { %5933 = vmatprep.mubr.msk.bf16.mxu0 %vm1517_vm0, %v6727_v48  ;;  %v7940_v52 = vpop.f32.mrb[102].mxu1  ;;  %v6739_v27 = vld [vmem:[%s9383_s0 + $0x3e4] ss:$8 sps:$4 sm:$0xff]  }
 0x203   :  { %9526 = vst [vmem:[#allocation69_spill] sm:$0xff] %v7940_v52  ;;  %v2817_v51 = vpop.f32.mrb[103].mxu1 }
 0x204   :  { %v2204_v33 = vpop.f32.mrb[132].mxu0  ;;  %v7951_v48 = vpop.f32.mrb[104].mxu1 }
 0x205   :  { %v7930_v45 = vsel %vm2963_vm2, %v2204_v33, -inf  ;;  %v2206_v31 = vpop.f32.mrb[133].mxu0  ;;  %9527 = vst [vmem:[#allocation70_spill] sm:$0xff] %v7951_v48  ;;  %v2822_v8 = vpop.f32.mrb[105].mxu1 }
 0x206   :  { %9525 = vst [vmem:[#allocation68_spill] sm:$0xff] %v7930_v45  ;;  %v2207_v18 = vpop.f32.mrb[134].mxu0  ;;  %v7954_v45 = vpop.f32.mrb[106].mxu1  ;;  %v6735_v8 = vld [vmem:[%s9383_s0 + $0x3d0] ss:$8 sps:$4 sm:$0xff]  }
 0x207   :  { %v7947_v33 = vsel %vm2963_vm2, %v2207_v18, -inf  ;;  %v2209_v31 = vpop.f32.mrb[135].mxu0  ;;  %9528 = vst [vmem:[#allocation71_spill] sm:$0xff] %v7954_v45  ;;  %v2825_v52 = vpop.f32.mrb[107].mxu1  ;;  %v7960_v18 = vsel %vm2963_vm2, %v7329_v1, -inf  ;;  %v7977_v1 = vsel %vm2963_vm2, %v7335_v4, -inf }
 0x208   :  { %v7956_v60 = vpop.f32.mrb[108].mxu1  ;;  %9530 = vst [vmem:[#allocation73_spill] sm:$0xff] %v7960_v18 }
 0x209   :  { %2419 = vmatmul.mubr.bf16.gmra.mrb[240].mxu0 %v6729_v63  ;;  %9529 = vst [vmem:[#allocation72_spill] sm:$0xff] %v7956_v60  ;;  %v2830_v63 = vpop.f32.mrb[109].mxu1 }
 0x20a   :  { %5934 = vmatprep.mubr.msk.bf16.mxu0 %vm1517_vm0, %v6733_v2  ;;  %v7973_v60 = vpop.f32.mrb[110].mxu1  ;;  %v6745_v63 = vld [vmem:[%s9383_s0 + $0x3f4] ss:$8 sps:$4 sm:$0xff]  }
 0x20b   :  { %9532 = vst [vmem:[#allocation75_spill] sm:$0xff] %v7973_v60  ;;  %v2833_v45 = vpop.f32.mrb[111].mxu1 }
 0x20c   :  { %v2212_v41 = vpop.f32.mrb[136].mxu0  ;;  %v7984_v2 = vpop.f32.mrb[112].mxu1 }
 0x20d   :  { %v7963_v51 = vsel %vm2963_vm2, %v2212_v41, -inf  ;;  %v2214_v31 = vpop.f32.mrb[137].mxu0  ;;  %9533 = vst [vmem:[#allocation76_spill] sm:$0xff] %v7984_v2  ;;  %v2838_v48 = vpop.f32.mrb[113].mxu1 }
 0x20e   :  { %9531 = vst [vmem:[#allocation74_spill] sm:$0xff] %v7963_v51  ;;  %v2215_v52 = vpop.f32.mrb[138].mxu0  ;;  %v7987_v51 = vpop.f32.mrb[114].mxu1  ;;  %v6741_v48 = vld [vmem:[%s9383_s0 + $0x3e0] ss:$8 sps:$4 sm:$0xff]  }
 0x20f   :  { %v7980_v41 = vsel %vm2963_vm2, %v2215_v52, -inf  ;;  %v2217_v31 = vpop.f32.mrb[139].mxu0  ;;  %9534 = vst [vmem:[#allocation77_spill] sm:$0xff] %v7987_v51  ;;  %v2841_v60 = vpop.f32.mrb[115].mxu1  ;;  %v7993_v52 = vsel %vm2963_vm2, %v7347_v9, -inf  ;;  %v8010_v9 = vsel %vm2963_vm2, %v7353_v12, -inf }
 0x210   :  { %v7989_v4 = vpop.f32.mrb[116].mxu1  ;;  %9536 = vst [vmem:[#allocation79_spill] sm:$0xff] %v7993_v52 }
 0x211   :  { %2427 = vmatmul.mubr.bf16.gmra.mrb[244].mxu0 %v6735_v8  ;;  %9535 = vst [vmem:[#allocation78_spill] sm:$0xff] %v7989_v4  ;;  %v2846_v8 = vpop.f32.mrb[117].mxu1 }
 0x212   :  { %5935 = vmatprep.mubr.msk.bf16.mxu0 %vm1517_vm0, %v6739_v27  ;;  %v8006_v4 = vpop.f32.mrb[118].mxu1  ;;  %v6753_v8 = vld [vmem:[%s9383_s0 + $0x404] ss:$8 sps:$4 sm:$0xff]  }
 0x213   :  { %9538 = vst [vmem:[#allocation81_spill] sm:$0xff] %v8006_v4  ;;  %v2849_v51 = vpop.f32.mrb[119].mxu1 }
 0x214   :  { %v2220_v18 = vpop.f32.mrb[140].mxu0  ;;  %v8017_v27 = vpop.f32.mrb[120].mxu1 }
 0x215   :  { %v7996_v45 = vsel %vm2963_vm2, %v2220_v18, -inf  ;;  %v2222_v31 = vpop.f32.mrb[141].mxu0  ;;  %9539 = vst [vmem:[#allocation82_spill] sm:$0xff] %v8017_v27  ;;  %v2854_v2 = vpop.f32.mrb[121].mxu1 }
 0x216   :  { %9537 = vst [vmem:[#allocation80_spill] sm:$0xff] %v7996_v45  ;;  %v2223_v60 = vpop.f32.mrb[142].mxu0  ;;  %v8020_v45 = vpop.f32.mrb[122].mxu1  ;;  %v6747_v2 = vld [vmem:[%s9383_s0 + $0x3f0] ss:$8 sps:$4 sm:$0xff]  }
 0x217   :  { %v8013_v18 = vsel %vm2963_vm2, %v2223_v60, -inf  ;;  %v2225_v31 = vpop.f32.mrb[143].mxu0  ;;  %9540 = vst [vmem:[#allocation83_spill] sm:$0xff] %v8020_v45  ;;  %v2857_v4 = vpop.f32.mrb[123].mxu1  ;;  %v8026_v60 = vsel %vm2963_vm2, %v7365_v17, -inf  ;;  %v8043_v17 = vsel %vm2963_vm2, %v7371_v20, -inf }
 0x218   :  { %v8022_v12 = vpop.f32.mrb[124].mxu1  ;;  %9542 = vst [vmem:[#allocation85_spill] sm:$0xff] %v8026_v60  ;;  %v8057_v20 = vsel %vm2963_vm2, %v7383_v25, -inf  ;;  %v8072_v25 = vsel %vm2963_vm2, %v7389_v28, -inf  ;;  %v8086_v28 = vsel %vm2963_vm2, %v7408_v36, -inf  ;;  %v8101_v36 = vsel %vm2963_vm2, %v7412_v38, -inf }
 0x219   :  { %2435 = vmatmul.mubr.bf16.gmra.mrb[248].mxu0 %v6741_v48  ;;  %9541 = vst [vmem:[#allocation84_spill] sm:$0xff] %v8022_v12  ;;  %v2862_v48 = vpop.f32.mrb[125].mxu1  ;;  %9546 = vst [vmem:[#allocation89_spill] sm:$0xff] %v8057_v20  ;;  %v8115_v38 = vsel %vm2963_vm2, %v7427_v44, -inf  ;;  %v8130_v44 = vsel %vm2963_vm2, %v7430_v46, -inf  ;;  %v8144_v46 = vsel %vm2963_vm2, %v7445_v54, -inf }
 0x21a   :  { %5936 = vmatprep.mubr.msk.bf16.mxu0 %vm1517_vm0, %v6745_v63  ;;  %v8039_v12 = vpop.f32.mrb[126].mxu1  ;;  %9548 = vst [vmem:[#allocation91_spill] sm:$0xff] %v8072_v25  ;;  %9550 = vst [vmem:[#allocation93_spill] sm:$0xff] %v8086_v28  ;;  %v8159_v54 = vsel %vm2963_vm2, %v7448_v56, -inf  ;;  %v8173_v56 = vsel %vm2963_vm2, %v7463_v0, -inf  ;;  %v8188_v0 = vsel %vm2963_vm2, %v7466_v3, -inf }
 0x21b   :  { %9544 = vst [vmem:[#allocation87_spill] sm:$0xff] %v8039_v12  ;;  %v2865_v45 = vpop.f32.mrb[127].mxu1  ;;  %9552 = vst [vmem:[#allocation95_spill] sm:$0xff] %v8101_v36  ;;  %v8202_v3 = vsel %vm2963_vm2, %v7478_v10, -inf  ;;  %v8217_v10 = vsel %vm2963_vm2, %v7484_v14, -inf  ;;  %v8231_v14 = vsel %vm2963_vm2, %v7496_v21, -inf }
 0x21c   :  { %v2228_v52 = vpop.f32.mrb[144].mxu0  ;;  %v8050_v63 = vpop.f32.mrb[128].mxu1  ;;  %9554 = vst [vmem:[#allocation97_spill] sm:$0xff] %v8115_v38  ;;  %9556 = vst [vmem:[#allocation99_spill] sm:$0xff] %v8130_v44  ;;  %v8246_v21 = vsel %vm2963_vm2, %v7502_v24, -inf  ;;  %v8260_v24 = vsel %vm2963_vm2, %v7514_v32, -inf }
 0x21d   :  { %v8029_v51 = vsel %vm2963_vm2, %v2228_v52, -inf  ;;  %v2230_v31 = vpop.f32.mrb[145].mxu0  ;;  %v2870_v27 = vpop.f32.mrb[129].mxu1  ;;  %9558 = vst [vmem:[#allocation101_spill] sm:$0xff] %v8144_v46  ;;  %9560 = vst [vmem:[#allocation103_spill] sm:$0xff] %v8159_v54  ;;  %v8275_v32 = vsel %vm2963_vm2, %v7520_v35, -inf }
 0x21e   :  { %9543 = vst [vmem:[#allocation86_spill] sm:$0xff] %v8029_v51  ;;  %v2231_v4 = vpop.f32.mrb[146].mxu0  ;;  %v8053_v51 = vpop.f32.mrb[130].mxu1  ;;  %9562 = vst [vmem:[#allocation105_spill] sm:$0xff] %v8173_v56  ;;  %v8289_v35 = vsel %vm2963_vm2, %v7532_v42, -inf  ;;  %v8304_v42 = vsel %vm2963_vm2, %v7538_v47, -inf }
 0x21f   :  { %v8046_v52 = vsel %vm2963_vm2, %v2231_v4, -inf  ;;  %v2233_v31 = vpop.f32.mrb[147].mxu0  ;;  %v2873_v60 = vpop.f32.mrb[131].mxu1  ;;  %9564 = vst [vmem:[#allocation107_spill] sm:$0xff] %v8188_v0  ;;  %9566 = vst [vmem:[#allocation109_spill] sm:$0xff] %v8202_v3  ;;  %v8318_v47 = vsel %vm2963_vm2, %v7550_v55, -inf }
 0x220   :  { %9545 = vst [vmem:[#allocation88_spill] sm:$0xff] %v8046_v52  ;;  %v6756_v60 = vld [vmem:[%s9383_s0 + $0x414] ss:$8 sps:$4 sm:$0xff]   ;;  %v8079_v48 = vpop.f32.mrb[132].mxu1  ;;  %9568 = vst [vmem:[#allocation111_spill] sm:$0xff] %v8217_v10  ;;  %v8333_v55 = vsel %vm2963_vm2, %v7556_v61, -inf }
 0x221   :  { %2443 = vmatmul.mubr.bf16.gmra.mrb[252].mxu0 %v6747_v2  ;;  %v6751_v2 = vld [vmem:[%s9383_s0 + $0x400] ss:$8 sps:$4 sm:$0xff]   ;;  %9570 = vst [vmem:[#allocation113_spill] sm:$0xff] %v8231_v14  ;;  %9572 = vst [vmem:[#allocation115_spill] sm:$0xff] %v8246_v21  ;;  %v8347_v61 = vsel %vm2963_vm2, %v7568_v6, -inf  ;;  %v8362_v6 = vsel %vm2963_vm2, %v7574_v11, -inf }
 0x222   :  { %5937 = vmatprep.mubr.msk.bf16.mxu0 %vm1517_vm0, %v6753_v8  ;;  %v2878_v8 = vpop.f32.mrb[133].mxu1  ;;  %9574 = vst [vmem:[#allocation117_spill] sm:$0xff] %v8260_v24  ;;  %9576 = vst [vmem:[#allocation119_spill] sm:$0xff] %v8275_v32  ;;  %v8376_v11 = vsel %vm2963_vm2, %v7586_v19, -inf  ;;  %v8391_v19 = vsel %vm2963_vm2, %v7592_v26, -inf }
 0x223   :  { %9578 = vst [vmem:[#allocation121_spill] sm:$0xff] %v8289_v35  ;;  %9580 = vst [vmem:[#allocation123_spill] sm:$0xff] %v8304_v42 }
 0x224   :  { %v2236_v12 = vpop.f32.mrb[148].mxu0  ;;  %9582 = vst [vmem:[#allocation125_spill] sm:$0xff] %v8318_v47  ;;  %9584 = vst [vmem:[#allocation127_spill] sm:$0xff] %v8333_v55 }
 0x225   :  { %v8060_v4 = vsel %vm2963_vm2, %v2236_v12, -inf  ;;  %v2238_v45 = vpop.f32.mrb[149].mxu0  ;;  %9586 = vst [vmem:[#allocation129_spill] sm:$0xff] %v8347_v61  ;;  %9588 = vst [vmem:[#allocation131_spill] sm:$0xff] %v8376_v11 }
 0x226   :  { %9547 = vst [vmem:[#allocation90_spill] sm:$0xff] %v8060_v4  ;;  %v2239_v27 = vpop.f32.mrb[150].mxu0  ;;  %v8082_v4 = vpop.f32.mrb[134].mxu1 }
 0x227   :  { %v8075_v12 = vsel %vm2963_vm2, %v2239_v27, -inf  ;;  %v2241_v31 = vpop.f32.mrb[151].mxu0  ;;  %v2881_v52 = vpop.f32.mrb[135].mxu1 }
 0x228   :  { %9549 = vst [vmem:[#allocation92_spill] sm:$0xff] %v8075_v12  ;;  %v6759_v52 = vld [vmem:[%s9383_s0 + $0x424] ss:$8 sps:$4 sm:$0xff]   ;;  %v8108_v12 = vpop.f32.mrb[136].mxu1 }
 0x229   :  { %2451 = vmatmul.mubr.bf16.gmra.mrb[0].mxu0 %v6751_v2  ;;  %v6754_v2 = vld [vmem:[%s9383_s0 + $0x410] ss:$8 sps:$4 sm:$0xff]  }
 0x22a   :  { %5938 = vmatprep.mubr.msk.bf16.mxu0 %vm1517_vm0, %v6756_v60  ;;  %v2886_v60 = vpop.f32.mrb[137].mxu1 }
 0x22c   :  { %v2244_v20 = vpop.f32.mrb[152].mxu0 }
 0x22d   :  { %v8089_v27 = vsel %vm2963_vm2, %v2244_v20, -inf  ;;  %v2246_v31 = vpop.f32.mrb[153].mxu0 }
 0x22e   :  { %9551 = vst [vmem:[#allocation94_spill] sm:$0xff] %v8089_v27  ;;  %v2247_v8 = vpop.f32.mrb[154].mxu0  ;;  %v8111_v27 = vpop.f32.mrb[138].mxu1 }
 0x22f   :  { %v8104_v20 = vsel %vm2963_vm2, %v2247_v8, -inf  ;;  %v2249_v31 = vpop.f32.mrb[155].mxu0  ;;  %v2889_v25 = vpop.f32.mrb[139].mxu1 }
 0x230   :  { %9553 = vst [vmem:[#allocation96_spill] sm:$0xff] %v8104_v20  ;;  %v6762_v25 = vld [vmem:[%s9383_s0 + $0x434] ss:$8 sps:$4 sm:$0xff]   ;;  %v8137_v20 = vpop.f32.mrb[140].mxu1 }
 0x231   :  { %2459 = vmatmul.mubr.bf16.gmra.mrb[4].mxu0 %v6754_v2  ;;  %v6757_v2 = vld [vmem:[%s9383_s0 + $0x420] ss:$8 sps:$4 sm:$0xff]  }
 0x232   :  { %5939 = vmatprep.mubr.msk.bf16.mxu0 %vm1517_vm0, %v6759_v52  ;;  %v2894_v52 = vpop.f32.mrb[141].mxu1 }
 0x234   :  { %v2252_v28 = vpop.f32.mrb[156].mxu0 }
 0x235   :  { %v8118_v8 = vsel %vm2963_vm2, %v2252_v28, -inf  ;;  %v2254_v31 = vpop.f32.mrb[157].mxu0 }
 0x236   :  { %9555 = vst [vmem:[#allocation98_spill] sm:$0xff] %v8118_v8  ;;  %v2255_v60 = vpop.f32.mrb[158].mxu0  ;;  %v8140_v8 = vpop.f32.mrb[142].mxu1 }
 0x237   :  { %v8133_v28 = vsel %vm2963_vm2, %v2255_v60, -inf  ;;  %v2257_v31 = vpop.f32.mrb[159].mxu0  ;;  %v2897_v36 = vpop.f32.mrb[143].mxu1 }
 0x238   :  { %9557 = vst [vmem:[#allocation100_spill] sm:$0xff] %v8133_v28  ;;  %v6765_v36 = vld [vmem:[%s9383_s0 + $0x444] ss:$8 sps:$4 sm:$0xff]   ;;  %v8166_v28 = vpop.f32.mrb[144].mxu1 }
 0x239   :  { %2467 = vmatmul.mubr.bf16.gmra.mrb[8].mxu0 %v6757_v2  ;;  %v6760_v2 = vld [vmem:[%s9383_s0 + $0x430] ss:$8 sps:$4 sm:$0xff]  }
 0x23a   :  { %5940 = vmatprep.mubr.msk.bf16.mxu0 %vm1517_vm0, %v6762_v25  ;;  %v2902_v25 = vpop.f32.mrb[145].mxu1 }
 0x23c   :  { %v2260_v38 = vpop.f32.mrb[160].mxu0 }
 0x23d   :  { %v8147_v60 = vsel %vm2963_vm2, %v2260_v38, -inf  ;;  %v2262_v31 = vpop.f32.mrb[161].mxu0 }
 0x23e   :  { %9559 = vst [vmem:[#allocation102_spill] sm:$0xff] %v8147_v60  ;;  %v2263_v52 = vpop.f32.mrb[162].mxu0  ;;  %v8169_v60 = vpop.f32.mrb[146].mxu1 }
 0x23f   :  { %v8162_v38 = vsel %vm2963_vm2, %v2263_v52, -inf  ;;  %v2265_v31 = vpop.f32.mrb[163].mxu0  ;;  %v2905_v44 = vpop.f32.mrb[147].mxu1 }
 0x240   :  { %9561 = vst [vmem:[#allocation104_spill] sm:$0xff] %v8162_v38  ;;  %v6768_v44 = vld [vmem:[%s9383_s0 + $0x454] ss:$8 sps:$4 sm:$0xff]   ;;  %v8195_v38 = vpop.f32.mrb[148].mxu1 }
 0x241   :  { %2475 = vmatmul.mubr.bf16.gmra.mrb[12].mxu0 %v6760_v2  ;;  %v6763_v2 = vld [vmem:[%s9383_s0 + $0x440] ss:$8 sps:$4 sm:$0xff]  }
 0x242   :  { %5941 = vmatprep.mubr.msk.bf16.mxu0 %vm1517_vm0, %v6765_v36  ;;  %v2910_v36 = vpop.f32.mrb[149].mxu1 }
 0x244   :  { %v2268_v46 = vpop.f32.mrb[164].mxu0 }
 0x245   :  { %v8176_v52 = vsel %vm2963_vm2, %v2268_v46, -inf  ;;  %v2270_v31 = vpop.f32.mrb[165].mxu0 }
 0x246   :  { %9563 = vst [vmem:[#allocation106_spill] sm:$0xff] %v8176_v52  ;;  %v2271_v25 = vpop.f32.mrb[166].mxu0  ;;  %v8198_v52 = vpop.f32.mrb[150].mxu1 }
 0x247   :  { %v8191_v46 = vsel %vm2963_vm2, %v2271_v25, -inf  ;;  %v2273_v31 = vpop.f32.mrb[167].mxu0  ;;  %v2913_v54 = vpop.f32.mrb[151].mxu1 }
 0x248   :  { %9565 = vst [vmem:[#allocation108_spill] sm:$0xff] %v8191_v46  ;;  %v6771_v54 = vld [vmem:[%s9383_s0 + $0x464] ss:$8 sps:$4 sm:$0xff]   ;;  %v8224_v46 = vpop.f32.mrb[152].mxu1 }
 0x249   :  { %2483 = vmatmul.mubr.bf16.gmra.mrb[16].mxu0 %v6763_v2  ;;  %v6766_v2 = vld [vmem:[%s9383_s0 + $0x450] ss:$8 sps:$4 sm:$0xff]  }
 0x24a   :  { %5942 = vmatprep.mubr.msk.bf16.mxu0 %vm1517_vm0, %v6768_v44  ;;  %v2918_v44 = vpop.f32.mrb[153].mxu1 }
 0x24c   :  { %v2276_v56 = vpop.f32.mrb[168].mxu0 }
 0x24d   :  { %v8205_v25 = vsel %vm2963_vm2, %v2276_v56, -inf  ;;  %v2278_v31 = vpop.f32.mrb[169].mxu0 }
 0x24e   :  { %9567 = vst [vmem:[#allocation110_spill] sm:$0xff] %v8205_v25  ;;  %v2279_v36 = vpop.f32.mrb[170].mxu0  ;;  %v8227_v25 = vpop.f32.mrb[154].mxu1 }
 0x24f   :  { %v8220_v56 = vsel %vm2963_vm2, %v2279_v36, -inf  ;;  %v2281_v31 = vpop.f32.mrb[171].mxu0  ;;  %v2921_v0 = vpop.f32.mrb[155].mxu1 }
 0x250   :  { %9569 = vst [vmem:[#allocation112_spill] sm:$0xff] %v8220_v56  ;;  %v6774_v0 = vld [vmem:[%s9383_s0 + $0x474] ss:$8 sps:$4 sm:$0xff]   ;;  %v8253_v56 = vpop.f32.mrb[156].mxu1 }
 0x251   :  { %2491 = vmatmul.mubr.bf16.gmra.mrb[20].mxu0 %v6766_v2  ;;  %v6769_v2 = vld [vmem:[%s9383_s0 + $0x460] ss:$8 sps:$4 sm:$0xff]  }
 0x252   :  { %5943 = vmatprep.mubr.msk.bf16.mxu0 %vm1517_vm0, %v6771_v54  ;;  %v2926_v54 = vpop.f32.mrb[157].mxu1 }
 0x254   :  { %v2284_v3 = vpop.f32.mrb[172].mxu0 }
 0x255   :  { %v8234_v36 = vsel %vm2963_vm2, %v2284_v3, -inf  ;;  %v2286_v31 = vpop.f32.mrb[173].mxu0 }
 0x256   :  { %9571 = vst [vmem:[#allocation114_spill] sm:$0xff] %v8234_v36  ;;  %v2287_v44 = vpop.f32.mrb[174].mxu0  ;;  %v8256_v36 = vpop.f32.mrb[158].mxu1 }
 0x257   :  { %v8249_v3 = vsel %vm2963_vm2, %v2287_v44, -inf  ;;  %v2289_v31 = vpop.f32.mrb[175].mxu0  ;;  %v2929_v10 = vpop.f32.mrb[159].mxu1 }
 0x258   :  { %9573 = vst [vmem:[#allocation116_spill] sm:$0xff] %v8249_v3  ;;  %v6777_v10 = vld [vmem:[%s9383_s0 + $0x484] ss:$8 sps:$4 sm:$0xff]   ;;  %v8282_v3 = vpop.f32.mrb[160].mxu1 }
 0x259   :  { %2499 = vmatmul.mubr.bf16.gmra.mrb[24].mxu0 %v6769_v2  ;;  %v6772_v2 = vld [vmem:[%s9383_s0 + $0x470] ss:$8 sps:$4 sm:$0xff]  }
 0x25a   :  { %5944 = vmatprep.mubr.msk.bf16.mxu0 %vm1517_vm0, %v6774_v0  ;;  %v2934_v0 = vpop.f32.mrb[161].mxu1 }
 0x25c   :  { %v2292_v14 = vpop.f32.mrb[176].mxu0 }
 0x25d   :  { %v8263_v44 = vsel %vm2963_vm2, %v2292_v14, -inf  ;;  %v2294_v31 = vpop.f32.mrb[177].mxu0 }
 0x25e   :  { %9575 = vst [vmem:[#allocation118_spill] sm:$0xff] %v8263_v44  ;;  %v2295_v54 = vpop.f32.mrb[178].mxu0  ;;  %v8285_v44 = vpop.f32.mrb[162].mxu1 }
 0x25f   :  { %v8278_v14 = vsel %vm2963_vm2, %v2295_v54, -inf  ;;  %v2297_v31 = vpop.f32.mrb[179].mxu0  ;;  %v2937_v21 = vpop.f32.mrb[163].mxu1 }
 0x260   :  { %9577 = vst [vmem:[#allocation120_spill] sm:$0xff] %v8278_v14  ;;  %v6780_v21 = vld [vmem:[%s9383_s0 + $0x494] ss:$8 sps:$4 sm:$0xff]   ;;  %v8311_v14 = vpop.f32.mrb[164].mxu1 }
 0x261   :  { %2507 = vmatmul.mubr.bf16.gmra.mrb[28].mxu0 %v6772_v2  ;;  %v6775_v2 = vld [vmem:[%s9383_s0 + $0x480] ss:$8 sps:$4 sm:$0xff]  }
 0x262   :  { %5945 = vmatprep.mubr.msk.bf16.mxu0 %vm1517_vm0, %v6777_v10  ;;  %v2942_v10 = vpop.f32.mrb[165].mxu1 }
 0x264   :  { %v2300_v24 = vpop.f32.mrb[180].mxu0 }
 0x265   :  { %v8292_v54 = vsel %vm2963_vm2, %v2300_v24, -inf  ;;  %v2302_v31 = vpop.f32.mrb[181].mxu0 }
 0x266   :  { %9579 = vst [vmem:[#allocation122_spill] sm:$0xff] %v8292_v54  ;;  %v2303_v0 = vpop.f32.mrb[182].mxu0  ;;  %v8314_v54 = vpop.f32.mrb[166].mxu1 }
 0x267   :  { %v8307_v24 = vsel %vm2963_vm2, %v2303_v0, -inf  ;;  %v2305_v31 = vpop.f32.mrb[183].mxu0  ;;  %v2945_v32 = vpop.f32.mrb[167].mxu1 }
 0x268   :  { %9581 = vst [vmem:[#allocation124_spill] sm:$0xff] %v8307_v24  ;;  %v6783_v32 = vld [vmem:[%s9383_s0 + $0x4a4] ss:$8 sps:$4 sm:$0xff]   ;;  %v8340_v24 = vpop.f32.mrb[168].mxu1 }
 0x269   :  { %2515 = vmatmul.mubr.bf16.gmra.mrb[32].mxu0 %v6775_v2  ;;  %v6778_v2 = vld [vmem:[%s9383_s0 + $0x490] ss:$8 sps:$4 sm:$0xff]  }
 0x26a   :  { %5946 = vmatprep.mubr.msk.bf16.mxu0 %vm1517_vm0, %v6780_v21  ;;  %v2950_v21 = vpop.f32.mrb[169].mxu1 }
 0x26c   :  { %v2308_v35 = vpop.f32.mrb[184].mxu0 }
 0x26d   :  { %v8321_v0 = vsel %vm2963_vm2, %v2308_v35, -inf  ;;  %v2310_v31 = vpop.f32.mrb[185].mxu0 }
 0x26e   :  { %9583 = vst [vmem:[#allocation126_spill] sm:$0xff] %v8321_v0  ;;  %v2311_v10 = vpop.f32.mrb[186].mxu0  ;;  %v8343_v0 = vpop.f32.mrb[170].mxu1 }
 0x26f   :  { %v8336_v35 = vsel %vm2963_vm2, %v2311_v10, -inf  ;;  %v2313_v31 = vpop.f32.mrb[187].mxu0  ;;  %v2953_v42 = vpop.f32.mrb[171].mxu1 }
 0x270   :  { %9585 = vst [vmem:[#allocation128_spill] sm:$0xff] %v8336_v35  ;;  %v6786_v42 = vld [vmem:[%s9383_s0 + $0x4b4] ss:$8 sps:$4 sm:$0xff]   ;;  %v8369_v35 = vpop.f32.mrb[172].mxu1 }
 0x271   :  { %2523 = vmatmul.mubr.bf16.gmra.mrb[36].mxu0 %v6778_v2  ;;  %v6781_v2 = vld [vmem:[%s9383_s0 + $0x4a0] ss:$8 sps:$4 sm:$0xff]  }
 0x272   :  { %5947 = vmatprep.mubr.msk.bf16.mxu0 %vm1517_vm0, %v6783_v32  ;;  %v2958_v32 = vpop.f32.mrb[173].mxu1 }
 0x274   :  { %v2316_v47 = vpop.f32.mrb[188].mxu0 }
 0x275   :  { %v8350_v10 = vsel %vm2963_vm2, %v2316_v47, -inf  ;;  %v2318_v31 = vpop.f32.mrb[189].mxu0 }
 0x276   :  { %9587 = vst [vmem:[#allocation130_spill] sm:$0xff] %v8350_v10  ;;  %v2319_v21 = vpop.f32.mrb[190].mxu0  ;;  %v8372_v10 = vpop.f32.mrb[174].mxu1 }
 0x277   :  { %v8365_v47 = vsel %vm2963_vm2, %v2319_v21, -inf  ;;  %v2321_v31 = vpop.f32.mrb[191].mxu0  ;;  %v2961_v55 = vpop.f32.mrb[175].mxu1 }
 0x278   :  { %v6789_v55 = vld [vmem:[%s9383_s0 + $0x4c4] ss:$8 sps:$4 sm:$0xff]  }
 0x279   :  { %2531 = vmatmul.mubr.bf16.gmra.mrb[40].mxu0 %v6781_v2  ;;  %v6784_v2 = vld [vmem:[%s9383_s0 + $0x4b0] ss:$8 sps:$4 sm:$0xff]  }
 0x27a   :  { %5948 = vmatprep.mubr.msk.bf16.mxu0 %vm1517_vm0, %v6786_v42 }
 0x27c   :  { %v2324_v61 = vpop.f32.mrb[192].mxu0 }
 0x27d   :  { %v8379_v21 = vsel %vm2963_vm2, %v2324_v61, -inf  ;;  %v2326_v31 = vpop.f32.mrb[193].mxu0 }
 0x27e   :  { %9589 = vst [vmem:[#allocation132_spill] sm:$0xff] %v8379_v21  ;;  %v2327_v32 = vpop.f32.mrb[194].mxu0  ;;  %v8401_v21 = vsel %vm2963_vm2, %v7604_v34, -inf  ;;  %v8416_v34 = vsel %vm2963_vm2, %v7610_v40, -inf }
 0x27f   :  { %v8394_v61 = vsel %vm2963_vm2, %v2327_v32, -inf  ;;  %v2329_v31 = vpop.f32.mrb[195].mxu0  ;;  %v6787_v32 = vld [vmem:[%s9383_s0 + $0x4c0] ss:$8 sps:$4 sm:$0xff]  }
 0x280   :  { %9590 = vst [vmem:[#allocation133_spill] sm:$0xff] %v8394_v61  ;;  %v9593_v61 = vmov 0.0  }
 0x281   :  { %2539 = vmatmul.mubr.bf16.gmra.mrb[44].mxu0 %v6784_v2  ;;  %v6792_v2 = vld [vmem:[%s9383_s0 + $0x4d4] ss:$8 sps:$4 sm:$0xff]   ;;  %6167 = vmatprep.mubr.msk.bf16.mxu1 %vm6859_vm3, %v9593_v61 }
 0x282   :  { %5949 = vmatprep.mubr.msk.bf16.mxu0 %vm1517_vm0, %v6789_v55 }
 0x284   :  { %v2332_v42 = vpop.f32.mrb[196].mxu0 }
 0x285   :  { %v8404_v11 = vsel %vm2963_vm2, %v2332_v42, -inf  ;;  %v2334_v26 = vpop.f32.mrb[197].mxu0 }
 0x286   :  { %9591 = vst [vmem:[#allocation134_spill] sm:$0xff] %v8404_v11  ;;  %v2335_v45 = vpop.f32.mrb[198].mxu0  ;;  %v8428_v11 = vsel %vm2963_vm2, %v7622_v50, -inf  ;;  %v8443_v50 = vsel %vm2963_vm2, %v7628_v58, -inf }
 0x287   :  { %v8419_v42 = vsel %vm2963_vm2, %v2335_v45, -inf  ;;  %v2337_v55 = vpop.f32.mrb[199].mxu0  ;;  %9594 = vst [vmem:[#allocation136_spill] sm:$0xff] %v8428_v11  ;;  %9596 = vst [vmem:[#allocation138_spill] sm:$0xff] %v8443_v50 }
 0x288   :  { %9592 = vst [vmem:[#allocation135_spill] sm:$0xff] %v8419_v42  ;;  %v6790_v55 = vld [vmem:[%s9383_s0 + $0x4d0] ss:$8 sps:$4 sm:$0xff]  }
 0x289   :  { %2547 = vmatmul.mubr.bf16.gmra.mrb[48].mxu0 %v6787_v32 }
 0x28a   :  { %5950 = vmatprep.mubr.msk.bf16.mxu0 %vm1517_vm0, %v6792_v2  ;;  %v6795_v2 = vld [vmem:[%s9383_s0 + $0x4e4] ss:$8 sps:$4 sm:$0xff]  }
 0x28c   :  { %v2340_v31 = vpop.f32.mrb[200].mxu0 }
 0x28d   :  { %v8431_v40 = vsel %vm2963_vm2, %v2340_v31, -inf  ;;  %v2342_v45 = vpop.f32.mrb[201].mxu0 }
 0x28e   :  { %9595 = vst [vmem:[#allocation137_spill] sm:$0xff] %v8431_v40  ;;  %v2343_v26 = vpop.f32.mrb[202].mxu0  ;;  %v8453_v40 = vsel %vm2963_vm2, %v7640_v5, -inf  ;;  %v8468_v5 = vsel %vm2963_vm2, %v7646_v13, -inf  ;;  %v6796_v13 = vld [vmem:[%s9383_s0 + $0x4f0] ss:$8 sps:$4 sm:$0xff]  }
 0x28f   :  { %v8446_v31 = vsel %vm2963_vm2, %v2343_v26, -inf  ;;  %v2345_v45 = vpop.f32.mrb[203].mxu0  ;;  %9598 = vst [vmem:[#allocation140_spill] sm:$0xff] %v8453_v40  ;;  %v6793_v26 = vld [vmem:[%s9383_s0 + $0x4e0] ss:$8 sps:$4 sm:$0xff]  }
 0x290   :  { %9597 = vst [vmem:[#allocation139_spill] sm:$0xff] %v8446_v31 }
 0x291   :  { %2555 = vmatmul.mubr.bf16.gmra.mrb[52].mxu0 %v6790_v55  ;;  %v6798_v55 = vld [vmem:[%s9383_s0 + $0x4f4] ss:$8 sps:$4 sm:$0xff]  }
 0x292   :  { %5951 = vmatprep.mubr.msk.bf16.mxu0 %vm1517_vm0, %v6795_v2 }
 0x294   :  { %v2348_v32 = vpop.f32.mrb[204].mxu0 }
 0x295   :  { %v8456_v11 = vsel %vm2963_vm2, %v2348_v32, -inf  ;;  %v2350_v58 = vpop.f32.mrb[205].mxu0 }
 0x296   :  { %9599 = vst [vmem:[#allocation141_spill] sm:$0xff] %v8456_v11  ;;  %v2351_v42 = vpop.f32.mrb[206].mxu0  ;;  %v3244_v11 = vsel %vm2963_vm2, %v7658_v23, -inf }
 0x297   :  { %v8471_v32 = vsel %vm2963_vm2, %v2351_v42, -inf  ;;  %v2353_v2 = vpop.f32.mrb[207].mxu0 }
 0x298   :  { %9600 = vst [vmem:[#allocation142_spill] sm:$0xff] %v8471_v32  ;;  %v6801_v2 = vld [vmem:[%s9383_s0 + $0x504] ss:$8 sps:$4 sm:$0xff]  }
 0x299   :  { %2563 = vmatmul.mubr.bf16.gmra.mrb[56].mxu0 %v6793_v26  ;;  %v3251_v26 = vsel %vm2963_vm2, %v7664_v30, -inf  ;;  %v3256_v30 = vsel %vm2963_vm2, %v8053_v51, -inf }
 0x29a   :  { %5952 = vmatprep.mubr.msk.bf16.mxu0 %vm1517_vm0, %v6798_v55  ;;  %v3247_v55 = vsel %vm2963_vm2, %v7669_v39, -inf }
 0x29c   :  { %v2356_v45 = vpop.f32.mrb[208].mxu0 }
 0x29d   :  { %v3245_v40 = vsel %vm2963_vm2, %v2356_v45, -inf  ;;  %v2358_v31 = vpop.f32.mrb[209].mxu0 }
 0x29e   :  { %v3246_v42 = vmax.f32 %v3244_v11, %v3245_v40  ;;  %v2359_v50 = vpop.f32.mrb[210].mxu0  ;;  %v3249_v31 = vsel %vm2963_vm2, %v8050_v63, -inf  ;;  %v3254_v11 = vsel %vm2963_vm2, %v7672_v43, -inf  ;;  %v8497_v40 = vld [vmem:[%s9385_s2] ss:$0 sm:$0xff]  ;;  %v3258_v43 = vsel %vm2963_vm2, %v7680_v53, -inf }
 0x29f   :  { %v3252_v23 = vsel %vm2963_vm2, %v2359_v50, -inf  ;;  %v2361_v45 = vpop.f32.mrb[211].mxu0  ;;  %v3261_v53 = vsel %vm2963_vm2, %v7682_v59, -inf }
 0x2a0   :  { %v3253_v58 = vmax.f32 %v3251_v26, %v3252_v23  ;;  %v3248_v32 = vmax.f32 %v3246_v42, %v3247_v55  ;;  %v3265_v45 = vsel %vm2963_vm2, %v7688_v7, -inf  ;;  %v3270_v7 = vsel %vm2963_vm2, %v8082_v4, -inf  ;;  %v6802_v4 = vld [vmem:[%s9383_s0 + $0x510] ss:$8 sps:$4 sm:$0xff]  }
 0x2a1   :  { %2571 = vmatmul.mubr.bf16.gmra.mrb[60].mxu0 %v6796_v13  ;;  %v6799_v13 = vld [vmem:[%s9383_s0 + $0x500] ss:$8 sps:$4 sm:$0xff]  }
 0x2a2   :  { %v3250_v39 = vmax.f32 %v3248_v32, %v3249_v31  ;;  %v3255_v50 = vmax.f32 %v3253_v58, %v3254_v11  ;;  %5953 = vmatprep.mubr.msk.bf16.mxu0 %vm1517_vm0, %v6801_v2  ;;  %v6804_v2 = vld [vmem:[%s9383_s0 + $0x514] ss:$8 sps:$4 sm:$0xff]  }
 0x2a4   :  { %v3459_v63 = vadd.f32 %v8497_v40, %v3250_v39  ;;  %v3257_v26 = vmax.f32 %v3255_v50, %v3256_v30  ;;  %v2364_v42 = vpop.f32.mrb[212].mxu0  ;;  %v3263_v30 = vsel %vm2963_vm2, %v8079_v48, -inf }
 0x2a5   :  { %v3259_v55 = vsel %vm2963_vm2, %v2364_v42, -inf  ;;  %v2366_v23 = vpop.f32.mrb[213].mxu0 }
 0x2a6   :  { %v3460_v51 = vadd.f32 %v8497_v40, %v3257_v26  ;;  %v3260_v32 = vmax.f32 %v3258_v43, %v3259_v55  ;;  %v2367_v58 = vpop.f32.mrb[214].mxu0  ;;  %v3523_v39 = vmax.f32 %v3459_v63, 0.0  ;;  %v3268_v43 = vsel %vm2963_vm2, %v7693_v15, -inf }
 0x2a7   :  { %v3266_v31 = vsel %vm2963_vm2, %v2367_v58, -inf  ;;  %v2369_v11 = vpop.f32.mrb[215].mxu0 }
 0x2a8   :  { %v3524_v50 = vmax.f32 %v3460_v51, 0.0  ;;  %v3267_v26 = vmax.f32 %v3265_v45, %v3266_v31  ;;  %v3262_v42 = vmax.f32 %v3260_v32, %v3261_v53  ;;  %v3272_v51 = vsel %vm2963_vm2, %v7700_v37, -inf }
 0x2a9   :  { %2579 = vmatmul.mubr.bf16.gmra.mrb[64].mxu0 %v6799_v13  ;;  %v3279_v31 = vsel %vm2963_vm2, %v7707_v62, -inf  ;;  %v3275_v37 = vsel %vm2963_vm2, %v7695_v22, -inf  ;;  %v3284_v62 = vsel %vm2963_vm2, %v8111_v27, -inf  ;;  %v6805_v27 = vld [vmem:[%s9383_s0 + $0x520] ss:$8 sps:$4 sm:$0xff]  }
 0x2aa   :  { %v8524_v55 = vpack.c.bf16 %v3524_v50, %v3523_v39  ;;  %v3264_v59 = vmax.f32 %v3262_v42, %v3263_v30  ;;  %v3269_v23 = vmax.f32 %v3267_v26, %v3268_v43  ;;  %5954 = vmatprep.mubr.msk.bf16.mxu0 %vm1517_vm0, %v6804_v2  ;;  %v6807_v2 = vld [vmem:[%s9383_s0 + $0x524] ss:$8 sps:$4 sm:$0xff]   ;;  %v3277_v39 = vsel %vm2963_vm2, %v8108_v12, -inf }
 0x2ac   :  { %v3461_v58 = vadd.f32 %v8497_v40, %v3264_v59  ;;  %v3271_v48 = vmax.f32 %v3269_v23, %v3270_v7  ;;  %v2372_v63 = vpop.f32.mrb[216].mxu0  ;;  %v3282_v7 = vsel %vm2963_vm2, %v7698_v29, -inf }
 0x2ad   :  { %v3273_v32 = vsel %vm2963_vm2, %v2372_v63, -inf  ;;  %v2374_v15 = vpop.f32.mrb[217].mxu0  ;;  %v9601_v63 = vld [vmem:[#allocation6_spill] sm:$0xff] }
 0x2ae   :  { %v3462_v13 = vadd.f32 %v8497_v40, %v3271_v48  ;;  %v3274_v45 = vmax.f32 %v3272_v51, %v3273_v32  ;;  %v2375_v53 = vpop.f32.mrb[218].mxu0  ;;  %v3525_v50 = vmax.f32 %v3461_v58, 0.0  ;;  %v3286_v51 = vsel %vm2963_vm2, %v9601_v63, -inf }
 0x2af   :  { %v3280_v11 = vsel %vm2963_vm2, %v2375_v53, -inf  ;;  %v2377_v30 = vpop.f32.mrb[219].mxu0  ;;  %v9602_v53 = vld [vmem:[#allocation8_spill] sm:$0xff] }
 0x2b0   :  { %v3526_v26 = vmax.f32 %v3462_v13, 0.0  ;;  %v3281_v42 = vmax.f32 %v3279_v31, %v3280_v11  ;;  %v3276_v43 = vmax.f32 %v3274_v45, %v3275_v37  ;;  %v6810_v45 = vld [vmem:[%s9383_s0 + $0x534] ss:$8 sps:$4 sm:$0xff]   ;;  %v9603_v31 = vld [vmem:[#allocation2_spill] sm:$0xff] }
 0x2b1   :  { %2587 = vmatmul.mubr.bf16.gmra.mrb[68].mxu0 %v6802_v4  ;;  %v3289_v37 = vsel %vm2963_vm2, %v9603_v31, -inf }
 0x2b2   :  { %v8549_v59 = vpack.c.bf16 %v3526_v26, %v3525_v50  ;;  %v3278_v22 = vmax.f32 %v3276_v43, %v3277_v39  ;;  %v3283_v23 = vmax.f32 %v3281_v42, %v3282_v7  ;;  %5955 = vmatprep.mubr.msk.bf16.mxu0 %vm1517_vm0, %v6807_v2  ;;  %v3293_v2 = vsel %vm2963_vm2, %v9602_v53, -inf  ;;  %v9604_v7 = vld [vmem:[#allocation3_spill] sm:$0xff]  ;;  %v9606_v53 = vld [vmem:[#allocation14_spill] sm:$0xff] }
 0x2b3   :  { %v3291_v39 = vsel %vm2963_vm2, %v8137_v20, -inf }
 0x2b4   :  { %v3463_v48 = vadd.f32 %v8497_v40, %v3278_v22  ;;  %v3285_v12 = vmax.f32 %v3283_v23, %v3284_v62  ;;  %v2380_v58 = vpop.f32.mrb[220].mxu0  ;;  %v3296_v62 = vsel %vm2963_vm2, %v9604_v7, -inf  ;;  %v3298_v22 = vsel %vm2963_vm2, %v8140_v8, -inf  ;;  %v6808_v8 = vld [vmem:[%s9383_s0 + $0x530] ss:$8 sps:$4 sm:$0xff]  }
 0x2b5   :  { %v3287_v32 = vsel %vm2963_vm2, %v2380_v58, -inf  ;;  %v2382_v29 = vpop.f32.mrb[221].mxu0 }
 0x2b6   :  { %v3464_v15 = vadd.f32 %v8497_v40, %v3285_v12  ;;  %v3288_v4 = vmax.f32 %v3286_v51, %v3287_v32  ;;  %v2383_v13 = vpop.f32.mrb[222].mxu0  ;;  %v3527_v50 = vmax.f32 %v3463_v48, 0.0  ;;  %v9605_v51 = vld [vmem:[#allocation12_spill] sm:$0xff] }
 0x2b7   :  { %v3294_v11 = vsel %vm2963_vm2, %v2383_v13, -inf  ;;  %v2385_v30 = vpop.f32.mrb[223].mxu0  ;;  %v3300_v32 = vsel %vm2963_vm2, %v9605_v51, -inf }
 0x2b8   :  { %v3528_v26 = vmax.f32 %v3464_v15, 0.0  ;;  %v3295_v42 = vmax.f32 %v3293_v2, %v3294_v11  ;;  %v3290_v43 = vmax.f32 %v3288_v4, %v3289_v37  ;;  %v9607_v2 = vld [vmem:[#allocation4_spill] sm:$0xff]  ;;  %v3305_v30 = vsel %vm2963_vm2, %v8166_v28, -inf  ;;  %v9609_v28 = vld [vmem:[#allocation18_spill] sm:$0xff] }
 0x2b9   :  { %2595 = vmatmul.mubr.bf16.gmra.mrb[72].mxu0 %v6805_v27  ;;  %v3303_v31 = vsel %vm2963_vm2, %v9607_v2, -inf }
 0x2ba   :  { %v8574_v23 = vpack.c.bf16 %v3528_v26, %v3527_v50  ;;  %v3292_v12 = vmax.f32 %v3290_v43, %v3291_v39  ;;  %v3297_v58 = vmax.f32 %v3295_v42, %v3296_v62  ;;  %5956 = vmatprep.mubr.msk.bf16.mxu0 %vm1517_vm0, %v6810_v45  ;;  %v3307_v45 = vsel %vm2963_vm2, %v9606_v53, -inf  ;;  %v9608_v43 = vld [vmem:[#allocation5_spill] sm:$0xff] }
 0x2bb   :  { %v3310_v7 = vsel %vm2963_vm2, %v9608_v43, -inf  ;;  %v3312_v62 = vsel %vm2963_vm2, %v8169_v60, -inf }
 0x2bc   :  { %v3465_v63 = vadd.f32 %v8497_v40, %v3292_v12  ;;  %v3299_v20 = vmax.f32 %v3297_v58, %v3298_v22  ;;  %v2388_v48 = vpop.f32.mrb[224].mxu0 }
 0x2bd   :  { %v3301_v29 = vsel %vm2963_vm2, %v2388_v48, -inf  ;;  %v2390_v15 = vpop.f32.mrb[225].mxu0 }
 0x2be   :  { %v3466_v27 = vadd.f32 %v8497_v40, %v3299_v20  ;;  %v3302_v4 = vmax.f32 %v3300_v32, %v3301_v29  ;;  %v2391_v13 = vpop.f32.mrb[226].mxu0  ;;  %v3529_v39 = vmax.f32 %v3465_v63, 0.0  ;;  %v3314_v63 = vsel %vm2963_vm2, %v9609_v28, -inf }
 0x2bf   :  { %v3308_v37 = vsel %vm2963_vm2, %v2391_v13, -inf  ;;  %v2393_v11 = vpop.f32.mrb[227].mxu0  ;;  %v9611_v13 = vld [vmem:[#allocation7_spill] sm:$0xff] }
 0x2c0   :  { %v3530_v50 = vmax.f32 %v3466_v27, 0.0  ;;  %v3309_v26 = vmax.f32 %v3307_v45, %v3308_v37  ;;  %v3304_v42 = vmax.f32 %v3302_v4, %v3303_v31  ;;  %v9610_v4 = vld [vmem:[#allocation20_spill] sm:$0xff]  ;;  %v3317_v53 = vsel %vm2963_vm2, %v9611_v13, -inf }
 0x2c1   :  { %2603 = vmatmul.mubr.bf16.gmra.mrb[76].mxu0 %v6808_v8  ;;  %v3321_v60 = vsel %vm2963_vm2, %v9610_v4, -inf  ;;  %v3319_v31 = vsel %vm2963_vm2, %v8195_v38, -inf  ;;  %v3333_v13 = vsel %vm2963_vm2, %v8224_v46, -inf }
 0x2c2   :  { %v8596_v22 = vpack.c.bf16 %v3530_v50, %v3529_v39  ;;  %v3306_v12 = vmax.f32 %v3304_v42, %v3305_v30  ;;  %v3311_v58 = vmax.f32 %v3309_v26, %v3310_v7  ;;  %v9612_v50 = vld [vmem:[#allocation9_spill] sm:$0xff]  ;;  %v3326_v42 = vsel %vm2963_vm2, %v8198_v52, -inf }
 0x2c3   :  { %v3324_v26 = vsel %vm2963_vm2, %v9612_v50, -inf }
 0x2c4   :  { %v3467_v20 = vadd.f32 %v8497_v40, %v3306_v12  ;;  %v3313_v48 = vmax.f32 %v3311_v58, %v3312_v62  ;;  %v2396_v51 = vpop.f32.mrb[228].mxu0 }
 0x2c5   :  { %v3315_v32 = vsel %vm2963_vm2, %v2396_v51, -inf  ;;  %v2398_v29 = vpop.f32.mrb[229].mxu0  ;;  %v9613_v51 = vld [vmem:[#allocation24_spill] sm:$0xff] }
 0x2c6   :  { %v3468_v15 = vadd.f32 %v8497_v40, %v3313_v48  ;;  %v3316_v8 = vmax.f32 %v3314_v63, %v3315_v32  ;;  %v2399_v27 = vpop.f32.mrb[230].mxu0  ;;  %v3531_v37 = vmax.f32 %v3467_v20, 0.0  ;;  %v3328_v38 = vsel %vm2963_vm2, %v9613_v51, -inf }
 0x2c7   :  { %v3322_v45 = vsel %vm2963_vm2, %v2399_v27, -inf  ;;  %v2401_v2 = vpop.f32.mrb[231].mxu0 }
 0x2c8   :  { %v3532_v11 = vmax.f32 %v3468_v15, 0.0  ;;  %v3323_v30 = vmax.f32 %v3321_v60, %v3322_v45  ;;  %v3318_v39 = vmax.f32 %v3316_v8, %v3317_v53  ;;  %v9614_v15 = vld [vmem:[#allocation26_spill] sm:$0xff] }
 0x2c9   :  { %v3335_v52 = vsel %vm2963_vm2, %v9614_v15, -inf  ;;  %v9615_v8 = vld [vmem:[#allocation10_spill] sm:$0xff] }
 0x2ca   :  { %v8614_v43 = vpack.c.bf16 %v3532_v11, %v3531_v37  ;;  %v3320_v7 = vmax.f32 %v3318_v39, %v3319_v31  ;;  %v3325_v62 = vmax.f32 %v3323_v30, %v3324_v26  ;;  %v3331_v27 = vsel %vm2963_vm2, %v9615_v8, -inf  ;;  %v9616_v37 = vld [vmem:[#allocation11_spill] sm:$0xff] }
 0x2cb   :  { %v3338_v11 = vsel %vm2963_vm2, %v9616_v37, -inf  ;;  %v3340_v30 = vsel %vm2963_vm2, %v8227_v25, -inf }
 0x2cc   :  { %v3469_v12 = vadd.f32 %v8497_v40, %v3320_v7  ;;  %v3327_v58 = vmax.f32 %v3325_v62, %v3326_v42  ;;  %v2404_v48 = vpop.f32.mrb[232].mxu0 }
 0x2cd   :  { %v3329_v20 = vsel %vm2963_vm2, %v2404_v48, -inf  ;;  %v2406_v28 = vpop.f32.mrb[233].mxu0 }
 0x2ce   :  { %v3470_v63 = vadd.f32 %v8497_v40, %v3327_v58  ;;  %v3330_v32 = vmax.f32 %v3328_v38, %v3329_v20  ;;  %v2407_v29 = vpop.f32.mrb[234].mxu0  ;;  %v3533_v53 = vmax.f32 %v3469_v12, 0.0  ;;  %v9617_v58 = vld [vmem:[#allocation30_spill] sm:$0xff]  ;;  %v9618_v28 = vld [vmem:[#allocation32_spill] sm:$0xff] }
 0x2cf   :  { %v3336_v4 = vsel %vm2963_vm2, %v2407_v29, -inf  ;;  %v2409_v60 = vpop.f32.mrb[235].mxu0  ;;  %v3342_v46 = vsel %vm2963_vm2, %v9617_v58, -inf  ;;  %v3349_v25 = vsel %vm2963_vm2, %v9618_v28, -inf  ;;  %v3361_v28 = vsel %vm2963_vm2, %v8282_v3, -inf }
 0x2d0   :  { %v3534_v45 = vmax.f32 %v3470_v63, 0.0  ;;  %v3337_v2 = vmax.f32 %v3335_v52, %v3336_v4  ;;  %v3332_v31 = vmax.f32 %v3330_v32, %v3331_v27  ;;  %v9619_v63 = vld [vmem:[#allocation13_spill] sm:$0xff]  ;;  %v3347_v52 = vsel %vm2963_vm2, %v8253_v56, -inf }
 0x2d1   :  { %v3345_v32 = vsel %vm2963_vm2, %v9619_v63, -inf }
 0x2d2   :  { %v8632_v39 = vpack.c.bf16 %v3534_v45, %v3533_v53  ;;  %v3334_v50 = vmax.f32 %v3332_v31, %v3333_v13  ;;  %v3339_v26 = vmax.f32 %v3337_v2, %v3338_v11  ;;  %v9620_v13 = vld [vmem:[#allocation15_spill] sm:$0xff]  ;;  %v3354_v45 = vsel %vm2963_vm2, %v8256_v36, -inf }
 0x2d3   :  { %v3352_v53 = vsel %vm2963_vm2, %v9620_v13, -inf }
 0x2d4   :  { %v3471_v42 = vadd.f32 %v8497_v40, %v3334_v50  ;;  %v3341_v7 = vmax.f32 %v3339_v26, %v3340_v30  ;;  %v2412_v62 = vpop.f32.mrb[236].mxu0  ;;  %v9621_v26 = vld [vmem:[#allocation36_spill] sm:$0xff] }
 0x2d5   :  { %v3343_v12 = vsel %vm2963_vm2, %v2412_v62, -inf  ;;  %v2414_v48 = vpop.f32.mrb[237].mxu0  ;;  %v3356_v56 = vsel %vm2963_vm2, %v9621_v26, -inf }
 0x2d6   :  { %v3472_v51 = vadd.f32 %v8497_v40, %v3341_v7  ;;  %v3344_v38 = vmax.f32 %v3342_v46, %v3343_v12  ;;  %v2415_v20 = vpop.f32.mrb[238].mxu0  ;;  %v3535_v8 = vmax.f32 %v3471_v42, 0.0  ;;  %v9622_v12 = vld [vmem:[#allocation38_spill] sm:$0xff]  ;;  %v9623_v48 = vld [vmem:[#allocation16_spill] sm:$0xff] }
 0x2d7   :  { %v3350_v29 = vsel %vm2963_vm2, %v2415_v20, -inf  ;;  %v2417_v15 = vpop.f32.mrb[239].mxu0  ;;  %v3363_v36 = vsel %vm2963_vm2, %v9622_v12, -inf }
 0x2d8   :  { %v3536_v27 = vmax.f32 %v3472_v51, 0.0  ;;  %v3351_v4 = vmax.f32 %v3349_v25, %v3350_v29  ;;  %v3346_v60 = vmax.f32 %v3344_v38, %v3345_v32  ;;  %v3359_v51 = vsel %vm2963_vm2, %v9623_v48, -inf  ;;  %v9624_v15 = vld [vmem:[#allocation17_spill] sm:$0xff] }
 0x2da   :  { %v8650_v2 = vpack.c.bf16 %v3536_v27, %v3535_v8  ;;  %v3348_v31 = vmax.f32 %v3346_v60, %v3347_v52  ;;  %v3353_v37 = vmax.f32 %v3351_v4, %v3352_v53  ;;  %v3366_v52 = vsel %vm2963_vm2, %v9624_v15, -inf }
 0x2db   :  { %v3368_v8 = vsel %vm2963_vm2, %v8285_v44, -inf }
 0x2dc   :  { %v3473_v11 = vadd.f32 %v8497_v40, %v3348_v31  ;;  %v3355_v30 = vmax.f32 %v3353_v37, %v3354_v45  ;;  %v2420_v50 = vpop.f32.mrb[240].mxu0  ;;  %v9625_v31 = vld [vmem:[#allocation42_spill] sm:$0xff] }
 0x2dd   :  { %v3357_v42 = vsel %vm2963_vm2, %v2420_v50, -inf  ;;  %v2422_v7 = vpop.f32.mrb[241].mxu0  ;;  %v3370_v3 = vsel %vm2963_vm2, %v9625_v31, -inf  ;;  %v9630_v31 = vld [vmem:[#allocation50_spill] sm:$0xff] }
 0x2de   :  { %v3474_v62 = vadd.f32 %v8497_v40, %v3355_v30  ;;  %v3358_v58 = vmax.f32 %v3356_v56, %v3357_v42  ;;  %v2423_v46 = vpop.f32.mrb[242].mxu0  ;;  %v3537_v25 = vmax.f32 %v3473_v11, 0.0  ;;  %v9626_v56 = vld [vmem:[#allocation44_spill] sm:$0xff]  ;;  %v9627_v42 = vld [vmem:[#allocation19_spill] sm:$0xff] }
 0x2df   :  { %v3364_v38 = vsel %vm2963_vm2, %v2423_v46, -inf  ;;  %v2425_v20 = vpop.f32.mrb[243].mxu0  ;;  %v3377_v44 = vsel %vm2963_vm2, %v9626_v56, -inf  ;;  %v3373_v7 = vsel %vm2963_vm2, %v9627_v42, -inf  ;;  %v3375_v46 = vsel %vm2963_vm2, %v8311_v14, -inf }
 0x2e0   :  { %v3538_v63 = vmax.f32 %v3474_v62, 0.0  ;;  %v3365_v32 = vmax.f32 %v3363_v36, %v3364_v38  ;;  %v3360_v29 = vmax.f32 %v3358_v58, %v3359_v51  ;;  %v9628_v38 = vld [vmem:[#allocation21_spill] sm:$0xff] }
 0x2e1   :  { %v3380_v20 = vsel %vm2963_vm2, %v9628_v38, -inf }
 0x2e2   :  { %v8668_v27 = vpack.c.bf16 %v3538_v63, %v3537_v25  ;;  %v3362_v4 = vmax.f32 %v3360_v29, %v3361_v28  ;;  %v3367_v60 = vmax.f32 %v3365_v32, %v3366_v52  ;;  %v3382_v28 = vsel %vm2963_vm2, %v8314_v54, -inf }
 0x2e3   :  { %v3391_v54 = vsel %vm2963_vm2, %v9630_v31, -inf }
 0x2e4   :  { %v3475_v13 = vadd.f32 %v8497_v40, %v3362_v4  ;;  %v3369_v53 = vmax.f32 %v3367_v60, %v3368_v8  ;;  %v2428_v45 = vpop.f32.mrb[244].mxu0  ;;  %v9629_v8 = vld [vmem:[#allocation48_spill] sm:$0xff] }
 0x2e5   :  { %v3371_v37 = vsel %vm2963_vm2, %v2428_v45, -inf  ;;  %v2430_v11 = vpop.f32.mrb[245].mxu0  ;;  %v3384_v14 = vsel %vm2963_vm2, %v9629_v8, -inf  ;;  %v9635_v8 = vld [vmem:[#allocation25_spill] sm:$0xff] }
 0x2e6   :  { %v3476_v30 = vadd.f32 %v8497_v40, %v3369_v53  ;;  %v3372_v50 = vmax.f32 %v3370_v3, %v3371_v37  ;;  %v2431_v26 = vpop.f32.mrb[246].mxu0  ;;  %v3539_v12 = vmax.f32 %v3475_v13, 0.0  ;;  %v9631_v3 = vld [vmem:[#allocation22_spill] sm:$0xff] }
 0x2e7   :  { %v3378_v62 = vsel %vm2963_vm2, %v2431_v26, -inf  ;;  %v2433_v58 = vpop.f32.mrb[247].mxu0  ;;  %v3387_v37 = vsel %vm2963_vm2, %v9631_v3, -inf  ;;  %v9636_v3 = vld [vmem:[#allocation27_spill] sm:$0xff] }
 0x2e8   :  { %v3540_v36 = vmax.f32 %v3476_v30, 0.0  ;;  %v3379_v48 = vmax.f32 %v3377_v44, %v3378_v62  ;;  %v3374_v51 = vmax.f32 %v3372_v50, %v3373_v7  ;;  %v3389_v50 = vsel %vm2963_vm2, %v8340_v24, -inf  ;;  %v9632_v7 = vld [vmem:[#allocation23_spill] sm:$0xff] }
 0x2e9   :  { %v3394_v62 = vsel %vm2963_vm2, %v9632_v7, -inf  ;;  %v3396_v58 = vsel %vm2963_vm2, %v8343_v0, -inf }
 0x2ea   :  { %v8686_v25 = vpack.c.bf16 %v3540_v36, %v3539_v12  ;;  %v3376_v63 = vmax.f32 %v3374_v51, %v3375_v46  ;;  %v3381_v32 = vmax.f32 %v3379_v48, %v3380_v20  ;;  %v9633_v20 = vld [vmem:[#allocation54_spill] sm:$0xff] }
 0x2eb   :  { %v3398_v24 = vsel %vm2963_vm2, %v9633_v20, -inf }
 0x2ec   :  { %v3477_v29 = vadd.f32 %v8497_v40, %v3376_v63  ;;  %v3383_v15 = vmax.f32 %v3381_v32, %v3382_v28  ;;  %v2436_v52 = vpop.f32.mrb[248].mxu0 }
 0x2ed   :  { %v3385_v4 = vsel %vm2963_vm2, %v2436_v52, -inf  ;;  %v2438_v60 = vpop.f32.mrb[249].mxu0  ;;  %v9634_v52 = vld [vmem:[#allocation56_spill] sm:$0xff] }
 0x2ee   :  { %v3478_v13 = vadd.f32 %v8497_v40, %v3383_v15  ;;  %v3386_v53 = vmax.f32 %v3384_v14, %v3385_v4  ;;  %v2439_v45 = vpop.f32.mrb[250].mxu0  ;;  %v3541_v26 = vmax.f32 %v3477_v29, 0.0  ;;  %v3405_v0 = vsel %vm2963_vm2, %v9634_v52, -inf  ;;  %v9642_v52 = vld [vmem:[#allocation29_spill] sm:$0xff] }
 0x2ef   :  { %v3392_v11 = vsel %vm2963_vm2, %v2439_v45, -inf  ;;  %v2441_v30 = vpop.f32.mrb[251].mxu0  ;;  %v3401_v14 = vsel %vm2963_vm2, %v9635_v8, -inf }
 0x2f0   :  { %v3542_v56 = vmax.f32 %v3478_v13, 0.0  ;;  %v3393_v44 = vmax.f32 %v3391_v54, %v3392_v11  ;;  %v3388_v42 = vmax.f32 %v3386_v53, %v3387_v37  ;;  %v3403_v13 = vsel %vm2963_vm2, %v8369_v35, -inf }
 0x2f1   :  { %v3408_v37 = vsel %vm2963_vm2, %v9636_v3, -inf  ;;  %v3410_v11 = vsel %vm2963_vm2, %v8372_v10, -inf  ;;  %v9643_v3 = vld [vmem:[#allocation67_spill] sm:$0xff] }
 0x2f2   :  { %v8704_v46 = vpack.c.bf16 %v3542_v56, %v3541_v26  ;;  %v3390_v12 = vmax.f32 %v3388_v42, %v3389_v50  ;;  %v3395_v36 = vmax.f32 %v3393_v44, %v3394_v62 }
 0x2f4   :  { %v3479_v48 = vadd.f32 %v8497_v40, %v3390_v12  ;;  %v3397_v51 = vmax.f32 %v3395_v36, %v3396_v58  ;;  %v2444_v38 = vpop.f32.mrb[252].mxu0  ;;  %v9637_v58 = vld [vmem:[#allocation61_spill] sm:$0xff]  ;;  %v9638_v12 = vld [vmem:[#allocation62_spill] sm:$0xff] }
 0x2f5   :  { %v3399_v28 = vsel %vm2963_vm2, %v2444_v38, -inf  ;;  %v2446_v63 = vpop.f32.mrb[253].mxu0  ;;  %v9639_v36 = vmax.f32 %v9637_v58, %v9638_v12  ;;  %v9640_v38 = vld [vmem:[#allocation28_spill] sm:$0xff]  ;;  %v9648_v12 = vld [vmem:[#allocation33_spill] sm:$0xff] }
 0x2f6   :  { %v3480_v32 = vadd.f32 %v8497_v40, %v3397_v51  ;;  %v3400_v29 = vmax.f32 %v3398_v24, %v3399_v28  ;;  %v2447_v15 = vpop.f32.mrb[254].mxu0  ;;  %v3543_v53 = vmax.f32 %v3479_v48, 0.0  ;;  %v2969_v10 = vsel %vm2963_vm2, %v9640_v38, -inf }
 0x2f7   :  { %v3406_v4 = vsel %vm2963_vm2, %v2447_v15, -inf  ;;  %v2449_v60 = vpop.f32.mrb[255].mxu0 }
 0x2f8   :  { %v3544_v45 = vmax.f32 %v3480_v32, 0.0  ;;  %v3407_v31 = vmax.f32 %v3405_v0, %v3406_v4  ;;  %v3402_v54 = vmax.f32 %v3400_v29, %v3401_v14  ;;  %v9641_v29 = vmax.f32 %v7911_v49, %v7914_v16 }
 0x2f9   :  { %v2976_v0 = vsel %vm2963_vm2, %v9642_v52, -inf  ;;  %v9652_v52 = vld [vmem:[#allocation34_spill] sm:$0xff] }
 0x2fa   :  { %v8722_v30 = vpack.c.bf16 %v3544_v45, %v3543_v53  ;;  %v3404_v50 = vmax.f32 %v3402_v54, %v3403_v13  ;;  %v3409_v26 = vmax.f32 %v3407_v31, %v3408_v37  ;;  %v9644_v37 = vld [vmem:[#allocation68_spill] sm:$0xff] }
 0x2fb   :  { %v9645_v49 = vmax.f32 %v9643_v3, %v9644_v37 }
 0x2fc   :  { %v3481_v56 = vadd.f32 %v8497_v40, %v3404_v50  ;;  %v3411_v44 = vmax.f32 %v3409_v26, %v3410_v11  ;;  %v2452_v42 = vpop.f32.mrb[0].mxu0  ;;  %v9646_v50 = vld [vmem:[#allocation31_spill] sm:$0xff] }
 0x2fd   :  { %v2967_v35 = vsel %vm2963_vm2, %v2452_v42, -inf  ;;  %v2454_v7 = vpop.f32.mrb[1].mxu0  ;;  %v2983_v26 = vsel %vm2963_vm2, %v9646_v50, -inf  ;;  %v6811_v42 = vld [vmem:[%s9384_s3 + $0x8] sm:$0xff]  }
 0x2fe   :  { %v3482_v62 = vadd.f32 %v8497_v40, %v3411_v44  ;;  %v2968_v48 = vmax.f32 %v9639_v36, %v2967_v35  ;;  %v2455_v51 = vpop.f32.mrb[2].mxu0  ;;  %v3545_v28 = vmax.f32 %v3481_v56, 0.0  ;;  %v2990_v36 = vsel %vm2963_vm2, %v9648_v12, -inf }
 0x2ff   :  { %v2974_v20 = vsel %vm2963_vm2, %v2455_v51, -inf  ;;  %v2457_v24 = vpop.f32.mrb[3].mxu0 }
 0x300   :  { %v3546_v63 = vmax.f32 %v3482_v62, 0.0  ;;  %v2970_v32 = vmax.f32 %v2968_v48, %v2969_v10  ;;  %v2975_v15 = vmax.f32 %v9641_v29, %v2974_v20  ;;  %v9647_v62 = vmax.f32 %v7944_v57, %v7947_v33 }
 0x302   :  { %v8738_v8 = vpack.c.bf16 %v3546_v63, %v3545_v28  ;;  %v3419_v14 = vadd.f32 %v8497_v40, %v2970_v32  ;;  %v2977_v4 = vmax.f32 %v2975_v15, %v2976_v0  ;;  %v9649_v28 = vld [vmem:[#allocation73_spill] sm:$0xff]  ;;  %v9650_v63 = vld [vmem:[#allocation74_spill] sm:$0xff]  ;;  %v2997_v0 = vsel %vm2963_vm2, %v9652_v52, -inf }
 0x303   :  { %v9651_v32 = vmax.f32 %v9649_v28, %v9650_v63  ;;  %v9661_v52 = vld [vmem:[#allocation85_spill] sm:$0xff] }
 0x304   :  { %v3420_v60 = vadd.f32 %v8497_v40, %v2977_v4  ;;  %v2460_v13 = vpop.f32.mrb[4].mxu0  ;;  %v3483_v31 = vmax.f32 %v3419_v14, 0.0 }
 0x305   :  { %v2981_v53 = vsel %vm2963_vm2, %v2460_v13, -inf  ;;  %v2462_v45 = vpop.f32.mrb[5].mxu0 }
 0x306   :  { %v3484_v54 = vmax.f32 %v3420_v60, 0.0  ;;  %v2982_v16 = vmax.f32 %v9645_v49, %v2981_v53  ;;  %v2463_v11 = vpop.f32.mrb[6].mxu0  ;;  %v6812_v60 = vld [vmem:[%s9384_s3 + $0x10] sm:$0xff]   ;;  %v9653_v45 = vmax.f32 %v7977_v1, %v7980_v41 }
 0x307   :  { %v2988_v56 = vsel %vm2963_vm2, %v2463_v11, -inf  ;;  %v2465_v44 = vpop.f32.mrb[7].mxu0 }
 0x308   :  { %v3547_v35 = vpack.c.bf16 %v3484_v54, %v3483_v31  ;;  %v2984_v7 = vmax.f32 %v2982_v16, %v2983_v26  ;;  %v2989_v58 = vmax.f32 %v9647_v62, %v2988_v56  ;;  %v9654_v54 = vld [vmem:[#allocation35_spill] sm:$0xff]  ;;  %v9656_v44 = vld [vmem:[#allocation80_spill] sm:$0xff]  ;;  %v9658_v62 = vld [vmem:[#allocation37_spill] sm:$0xff] }
 0x309   :  { %v3004_v3 = vsel %vm2963_vm2, %v9654_v54, -inf  ;;  %v9655_v56 = vld [vmem:[#allocation79_spill] sm:$0xff]  ;;  %v6814_v54 = vld [vmem:[%s9384_s3 + $0x20] sm:$0xff]  }
 0x30a   :  { %v3421_v48 = vadd.f32 %v8497_v40, %v2984_v7  ;;  %v2991_v51 = vmax.f32 %v2989_v58, %v2990_v36  ;;  %6168 = vmatmul.mubr.msk.bf16.vlgmr.msra.gmra.mrb[176].mxu1 %vm2963_vm2, %v3547_v35  ;;  %v3011_v58 = vsel %vm2963_vm2, %v9658_v62, -inf  ;;  %v9668_v62 = vld [vmem:[#allocation89_spill] sm:$0xff] }
 0x30b   :  { %6172 = vmatpush3.bf16.msra.mxu1 %v6811_v42  ;;  %6173 = vmatprep.mubr.msk.bf16.mxu1 %vm6859_vm3, %v9593_v61  ;;  %v9657_v42 = vmax.f32 %v9655_v56, %v9656_v44 }
 0x30c   :  { %v3422_v38 = vadd.f32 %v8497_v40, %v2991_v51  ;;  %v2468_v10 = vpop.f32.mrb[8].mxu0  ;;  %6177 = vmatprep.subr.bf16.mxu1 %v9593_v61  ;;  %v3485_v20 = vmax.f32 %v3421_v48, 0.0  ;;  %v6813_v48 = vld [vmem:[%s9384_s3 + $0x18] sm:$0xff]  }
 0x30d   :  { %v2995_v57 = vsel %vm2963_vm2, %v2468_v10, -inf  ;;  %v2470_v33 = vpop.f32.mrb[9].mxu0  ;;  %v9659_v10 = vmax.f32 %v8010_v9, %v8013_v18 }
 0x30e   :  { %v3486_v24 = vmax.f32 %v3422_v38, 0.0  ;;  %v2996_v29 = vmax.f32 %v9651_v32, %v2995_v57  ;;  %v2471_v15 = vpop.f32.mrb[10].mxu0  ;;  %v9660_v33 = vld [vmem:[#allocation39_spill] sm:$0xff] }
 0x30f   :  { %v3002_v14 = vsel %vm2963_vm2, %v2471_v15, -inf  ;;  %v2473_v4 = vpop.f32.mrb[11].mxu0 }
 0x310   :  { %v3548_v13 = vpack.c.bf16 %v3486_v24, %v3485_v20  ;;  %v2998_v53 = vmax.f32 %v2996_v29, %v2997_v0  ;;  %v3003_v31 = vmax.f32 %v9653_v45, %v3002_v14  ;;  %v3018_v20 = vsel %vm2963_vm2, %v9660_v33, -inf  ;;  %v9662_v0 = vld [vmem:[#allocation86_spill] sm:$0xff]  ;;  %v6815_v33 = vld [vmem:[%s9384_s3 + $0x28] sm:$0xff]  }
 0x311   :  { %v9663_v14 = vmax.f32 %v9661_v52, %v9662_v0 }
 0x312   :  { %v3423_v37 = vadd.f32 %v8497_v40, %v2998_v53  ;;  %v3005_v49 = vmax.f32 %v3003_v31, %v3004_v3  ;;  %6174 = vmatmul.mubr.msk.bf16.vlgmr.msra.gmra.mrb[180].mxu1 %vm2963_vm2, %v3548_v13  ;;  %v9664_v13 = vld [vmem:[#allocation40_spill] sm:$0xff] }
 0x313   :  { %6178 = vmatpush3.bf16.msra.mxu1 %v6812_v60  ;;  %6179 = vmatprep.mubr.msk.bf16.mxu1 %vm6859_vm3, %v9593_v61  ;;  %v3025_v53 = vsel %vm2963_vm2, %v9664_v13, -inf }
 0x314   :  { %v3424_v16 = vadd.f32 %v8497_v40, %v3005_v49  ;;  %v2476_v11 = vpop.f32.mrb[12].mxu0  ;;  %6183 = vmatprep.subr.bf16.mxu1 %v9593_v61  ;;  %v3487_v50 = vmax.f32 %v3423_v37, 0.0  ;;  %v9665_v49 = vld [vmem:[#allocation88_spill] sm:$0xff] }
 0x315   :  { %v3009_v1 = vsel %vm2963_vm2, %v2476_v11, -inf  ;;  %v2478_v41 = vpop.f32.mrb[13].mxu0 }
 0x316   :  { %v3488_v26 = vmax.f32 %v3424_v16, 0.0  ;;  %v3010_v35 = vmax.f32 %v9657_v42, %v3009_v1  ;;  %v2479_v7 = vpop.f32.mrb[14].mxu0  ;;  %v9666_v16 = vmax.f32 %v8043_v17, %v9665_v49  ;;  %v9667_v1 = vld [vmem:[#allocation41_spill] sm:$0xff]  ;;  %v9679_v49 = vld [vmem:[#allocation46_spill] sm:$0xff] }
 0x317   :  { %v3016_v12 = vsel %vm2963_vm2, %v2479_v7, -inf  ;;  %v2481_v36 = vpop.f32.mrb[15].mxu0  ;;  %v3032_v41 = vsel %vm2963_vm2, %v9667_v1, -inf }
 0x318   :  { %v3549_v51 = vpack.c.bf16 %v3488_v26, %v3487_v50  ;;  %v3012_v38 = vmax.f32 %v3010_v35, %v3011_v58  ;;  %v3017_v57 = vmax.f32 %v9659_v10, %v3016_v12  ;;  %v9669_v58 = vld [vmem:[#allocation90_spill] sm:$0xff] }
 0x319   :  { %v9670_v12 = vmax.f32 %v9668_v62, %v9669_v58 }
 0x31a   :  { %v3425_v24 = vadd.f32 %v8497_v40, %v3012_v38  ;;  %v3019_v28 = vmax.f32 %v3017_v57, %v3018_v20  ;;  %6180 = vmatmul.mubr.msk.bf16.vlgmr.msra.gmra.mrb[184].mxu1 %vm2963_vm2, %v3549_v51  ;;  %v9671_v51 = vld [vmem:[#allocation43_spill] sm:$0xff] }
 0x31b   :  { %6184 = vmatpush3.bf16.msra.mxu1 %v6813_v48  ;;  %6185 = vmatprep.mubr.msk.bf16.mxu1 %vm6859_vm3, %v9593_v61  ;;  %v3039_v38 = vsel %vm2963_vm2, %v9671_v51, -inf }
 0x31c   :  { %v3426_v63 = vadd.f32 %v8497_v40, %v3019_v28  ;;  %v2484_v32 = vpop.f32.mrb[16].mxu0  ;;  %6189 = vmatprep.subr.bf16.mxu1 %v9593_v61  ;;  %v3489_v29 = vmax.f32 %v3425_v24, 0.0  ;;  %v9672_v28 = vld [vmem:[#allocation91_spill] sm:$0xff] }
 0x31d   :  { %v3023_v9 = vsel %vm2963_vm2, %v2484_v32, -inf  ;;  %v2486_v18 = vpop.f32.mrb[17].mxu0 }
 0x31e   :  { %v3490_v15 = vmax.f32 %v3426_v63, 0.0  ;;  %v3024_v4 = vmax.f32 %v9663_v14, %v3023_v9  ;;  %v2487_v60 = vpop.f32.mrb[18].mxu0  ;;  %v9673_v63 = vld [vmem:[#allocation92_spill] sm:$0xff]  ;;  %v9675_v18 = vld [vmem:[#allocation45_spill] sm:$0xff] }
 0x31f   :  { %v3030_v45 = vsel %vm2963_vm2, %v2487_v60, -inf  ;;  %v2489_v31 = vpop.f32.mrb[19].mxu0  ;;  %v9674_v32 = vmax.f32 %v9672_v28, %v9673_v63  ;;  %v9687_v63 = vld [vmem:[#allocation49_spill] sm:$0xff] }
 0x320   :  { %v3550_v3 = vpack.c.bf16 %v3490_v15, %v3489_v29  ;;  %v3026_v37 = vmax.f32 %v3024_v4, %v3025_v53  ;;  %v3031_v11 = vmax.f32 %v9666_v16, %v3030_v45  ;;  %v3046_v29 = vsel %vm2963_vm2, %v9675_v18, -inf  ;;  %v9676_v45 = vld [vmem:[#allocation93_spill] sm:$0xff]  ;;  %v9677_v31 = vld [vmem:[#allocation94_spill] sm:$0xff] }
 0x321   :  { %v3053_v16 = vsel %vm2963_vm2, %v9679_v49, -inf }
 0x322   :  { %v3427_v50 = vadd.f32 %v8497_v40, %v3026_v37  ;;  %v3033_v26 = vmax.f32 %v3031_v11, %v3032_v41  ;;  %6186 = vmatmul.mubr.msk.bf16.vlgmr.msra.gmra.mrb[188].mxu1 %vm2963_vm2, %v3550_v3  ;;  %v6816_v41 = vld [vmem:[%s9384_s3 + $0x30] sm:$0xff]  }
 0x323   :  { %6190 = vmatpush3.bf16.msra.mxu1 %v6814_v54  ;;  %6191 = vmatprep.mubr.msk.bf16.mxu1 %vm6859_vm3, %v9593_v61  ;;  %v9678_v54 = vmax.f32 %v9676_v45, %v9677_v31 }
 0x324   :  { %v3428_v56 = vadd.f32 %v8497_v40, %v3033_v26  ;;  %v2492_v44 = vpop.f32.mrb[20].mxu0  ;;  %6195 = vmatprep.subr.bf16.mxu1 %v9593_v61  ;;  %v3491_v35 = vmax.f32 %v3427_v50, 0.0 }
 0x325   :  { %v3037_v17 = vsel %vm2963_vm2, %v2492_v44, -inf  ;;  %v2494_v42 = vpop.f32.mrb[21].mxu0  ;;  %v9681_v44 = vld [vmem:[#allocation96_spill] sm:$0xff] }
 0x326   :  { %v3492_v7 = vmax.f32 %v3428_v56, 0.0  ;;  %v3038_v36 = vmax.f32 %v9670_v12, %v3037_v17  ;;  %v2495_v48 = vpop.f32.mrb[22].mxu0  ;;  %v9680_v56 = vld [vmem:[#allocation95_spill] sm:$0xff] }
 0x327   :  { %v3044_v10 = vsel %vm2963_vm2, %v2495_v48, -inf  ;;  %v2497_v57 = vpop.f32.mrb[23].mxu0  ;;  %v9682_v17 = vmax.f32 %v9680_v56, %v9681_v44  ;;  %v9695_v44 = vld [vmem:[#allocation52_spill] sm:$0xff] }
 0x328   :  { %v3551_v20 = vpack.c.bf16 %v3492_v7, %v3491_v35  ;;  %v3040_v24 = vmax.f32 %v3038_v36, %v3039_v38  ;;  %v3045_v9 = vmax.f32 %v9674_v32, %v3044_v10  ;;  %v9683_v35 = vld [vmem:[#allocation47_spill] sm:$0xff]  ;;  %v9684_v57 = vld [vmem:[#allocation97_spill] sm:$0xff]  ;;  %v3067_v32 = vsel %vm2963_vm2, %v9687_v63, -inf }
 0x329   :  { %v3060_v7 = vsel %vm2963_vm2, %v9683_v35, -inf }
 0x32a   :  { %v3429_v15 = vadd.f32 %v8497_v40, %v3040_v24  ;;  %v3047_v52 = vmax.f32 %v3045_v9, %v3046_v29  ;;  %6192 = vmatmul.mubr.msk.bf16.vlgmr.msra.gmra.mrb[192].mxu1 %vm2963_vm2, %v3551_v20  ;;  %v6817_v29 = vld [vmem:[%s9384_s3 + $0x38] sm:$0xff]  }
 0x32b   :  { %6196 = vmatpush3.bf16.msra.mxu1 %v6815_v33  ;;  %6197 = vmatprep.mubr.msk.bf16.mxu1 %vm6859_vm3, %v9593_v61  ;;  %v9685_v33 = vld [vmem:[#allocation98_spill] sm:$0xff] }
 0x32c   :  { %v3430_v0 = vadd.f32 %v8497_v40, %v3047_v52  ;;  %v2500_v14 = vpop.f32.mrb[24].mxu0  ;;  %6201 = vmatprep.subr.bf16.mxu1 %v9593_v61  ;;  %v3493_v13 = vmax.f32 %v3429_v15, 0.0  ;;  %v9686_v20 = vmax.f32 %v9684_v57, %v9685_v33 }
 0x32d   :  { %v3051_v4 = vsel %vm2963_vm2, %v2500_v14, -inf  ;;  %v2502_v60 = vpop.f32.mrb[25].mxu0  ;;  %v9689_v14 = vld [vmem:[#allocation100_spill] sm:$0xff] }
 0x32e   :  { %v3494_v53 = vmax.f32 %v3430_v0, 0.0  ;;  %v3052_v3 = vmax.f32 %v9678_v54, %v3051_v4  ;;  %v2503_v37 = vpop.f32.mrb[26].mxu0  ;;  %v9688_v0 = vld [vmem:[#allocation99_spill] sm:$0xff] }
 0x32f   :  { %v3058_v11 = vsel %vm2963_vm2, %v2503_v37, -inf  ;;  %v2505_v1 = vpop.f32.mrb[27].mxu0  ;;  %v9690_v4 = vmax.f32 %v9688_v0, %v9689_v14  ;;  %v9703_v14 = vld [vmem:[#allocation55_spill] sm:$0xff] }
 0x330   :  { %v3552_v50 = vpack.c.bf16 %v3494_v53, %v3493_v13  ;;  %v3054_v26 = vmax.f32 %v3052_v3, %v3053_v16  ;;  %v3059_v42 = vmax.f32 %v9682_v17, %v3058_v11  ;;  %v9691_v13 = vld [vmem:[#allocation51_spill] sm:$0xff]  ;;  %v9692_v1 = vld [vmem:[#allocation101_spill] sm:$0xff]  ;;  %v3081_v17 = vsel %vm2963_vm2, %v9695_v44, -inf }
 0x331   :  { %v3074_v53 = vsel %vm2963_vm2, %v9691_v13, -inf }
 0x332   :  { %v3431_v62 = vadd.f32 %v8497_v40, %v3054_v26  ;;  %v3061_v58 = vmax.f32 %v3059_v42, %v3060_v7  ;;  %6198 = vmatmul.mubr.msk.bf16.vlgmr.msra.gmra.mrb[196].mxu1 %vm2963_vm2, %v3552_v50  ;;  %v6818_v7 = vld [vmem:[%s9384_s3 + $0x40] sm:$0xff]  }
 0x333   :  { %6202 = vmatpush3.bf16.msra.mxu1 %v6816_v41  ;;  %6203 = vmatprep.mubr.msk.bf16.mxu1 %vm6859_vm3, %v9593_v61  ;;  %v9693_v41 = vld [vmem:[#allocation102_spill] sm:$0xff] }
 0x334   :  { %v3432_v12 = vadd.f32 %v8497_v40, %v3061_v58  ;;  %v2508_v36 = vpop.f32.mrb[28].mxu0  ;;  %6207 = vmatprep.subr.bf16.mxu1 %v9593_v61  ;;  %v3495_v38 = vmax.f32 %v3431_v62, 0.0  ;;  %v9694_v50 = vmax.f32 %v9692_v1, %v9693_v41 }
 0x335   :  { %v3065_v48 = vsel %vm2963_vm2, %v2508_v36, -inf  ;;  %v2510_v51 = vpop.f32.mrb[29].mxu0  ;;  %v9697_v36 = vld [vmem:[#allocation104_spill] sm:$0xff] }
 0x336   :  { %v3496_v10 = vmax.f32 %v3432_v12, 0.0  ;;  %v3066_v24 = vmax.f32 %v9686_v20, %v3065_v48  ;;  %v2511_v28 = vpop.f32.mrb[30].mxu0  ;;  %v9696_v12 = vld [vmem:[#allocation103_spill] sm:$0xff] }
 0x337   :  { %v3072_v9 = vsel %vm2963_vm2, %v2511_v28, -inf  ;;  %v2513_v18 = vpop.f32.mrb[31].mxu0  ;;  %v9698_v48 = vmax.f32 %v9696_v12, %v9697_v36  ;;  %v9711_v36 = vld [vmem:[#allocation58_spill] sm:$0xff] }
 0x338   :  { %v3553_v15 = vpack.c.bf16 %v3496_v10, %v3495_v38  ;;  %v3068_v52 = vmax.f32 %v3066_v24, %v3067_v32  ;;  %v3073_v60 = vmax.f32 %v9690_v4, %v3072_v9  ;;  %v9699_v38 = vld [vmem:[#allocation53_spill] sm:$0xff]  ;;  %v3095_v4 = vsel %vm2963_vm2, %v9703_v14, -inf }
 0x339   :  { %v3088_v10 = vsel %vm2963_vm2, %v9699_v38, -inf  ;;  %v9700_v18 = vld [vmem:[#allocation105_spill] sm:$0xff] }
 0x33a   :  { %v3433_v45 = vadd.f32 %v8497_v40, %v3068_v52  ;;  %v3075_v31 = vmax.f32 %v3073_v60, %v3074_v53  ;;  %6204 = vmatmul.mubr.msk.bf16.vlgmr.msra.gmra.mrb[200].mxu1 %vm2963_vm2, %v3553_v15  ;;  %v6819_v53 = vld [vmem:[%s9384_s3 + $0x48] sm:$0xff]  }
 0x33b   :  { %6208 = vmatpush3.bf16.msra.mxu1 %v6817_v29  ;;  %6209 = vmatprep.mubr.msk.bf16.mxu1 %vm6859_vm3, %v9593_v61  ;;  %v9701_v29 = vld [vmem:[#allocation106_spill] sm:$0xff] }
 0x33c   :  { %v3434_v54 = vadd.f32 %v8497_v40, %v3075_v31  ;;  %v2516_v3 = vpop.f32.mrb[32].mxu0  ;;  %6213 = vmatprep.subr.bf16.mxu1 %v9593_v61  ;;  %v3497_v16 = vmax.f32 %v3433_v45, 0.0  ;;  %v9702_v15 = vmax.f32 %v9700_v18, %v9701_v29 }
 0x33d   :  { %v3079_v37 = vsel %vm2963_vm2, %v2516_v3, -inf  ;;  %v2518_v49 = vpop.f32.mrb[33].mxu0  ;;  %v9705_v3 = vld [vmem:[#allocation108_spill] sm:$0xff] }
 0x33e   :  { %v3498_v11 = vmax.f32 %v3434_v54, 0.0  ;;  %v3080_v26 = vmax.f32 %v9694_v50, %v3079_v37  ;;  %v2519_v56 = vpop.f32.mrb[34].mxu0  ;;  %v9704_v54 = vld [vmem:[#allocation107_spill] sm:$0xff] }
 0x33f   :  { %v3086_v42 = vsel %vm2963_vm2, %v2519_v56, -inf  ;;  %v2521_v35 = vpop.f32.mrb[35].mxu0  ;;  %v9706_v37 = vmax.f32 %v9704_v54, %v9705_v3  ;;  %v9719_v3 = vld [vmem:[#allocation60_spill] sm:$0xff] }
 0x340   :  { %v3554_v62 = vpack.c.bf16 %v3498_v11, %v3497_v16  ;;  %v3082_v58 = vmax.f32 %v3080_v26, %v3081_v17  ;;  %v3087_v51 = vmax.f32 %v9698_v48, %v3086_v42  ;;  %v9707_v16 = vld [vmem:[#allocation57_spill] sm:$0xff]  ;;  %v3109_v48 = vsel %vm2963_vm2, %v9711_v36, -inf }
 0x341   :  { %v3102_v11 = vsel %vm2963_vm2, %v9707_v16, -inf  ;;  %v9708_v35 = vld [vmem:[#allocation109_spill] sm:$0xff] }
 0x342   :  { %v3435_v57 = vadd.f32 %v8497_v40, %v3082_v58  ;;  %v3089_v33 = vmax.f32 %v3087_v51, %v3088_v10  ;;  %6210 = vmatmul.mubr.msk.bf16.vlgmr.msra.gmra.mrb[204].mxu1 %vm2963_vm2, %v3554_v62  ;;  %v6820_v10 = vld [vmem:[%s9384_s3 + $0x50] sm:$0xff]  }
 0x343   :  { %6214 = vmatpush3.bf16.msra.mxu1 %v6818_v7  ;;  %6215 = vmatprep.mubr.msk.bf16.mxu1 %vm6859_vm3, %v9593_v61  ;;  %v9709_v7 = vld [vmem:[#allocation110_spill] sm:$0xff] }
 0x344   :  { %v3436_v20 = vadd.f32 %v8497_v40, %v3089_v33  ;;  %v2524_v24 = vpop.f32.mrb[36].mxu0  ;;  %6219 = vmatprep.subr.bf16.mxu1 %v9593_v61  ;;  %v3499_v32 = vmax.f32 %v3435_v57, 0.0  ;;  %v9710_v62 = vmax.f32 %v9708_v35, %v9709_v7 }
 0x345   :  { %v3093_v28 = vsel %vm2963_vm2, %v2524_v24, -inf  ;;  %v2526_v63 = vpop.f32.mrb[37].mxu0  ;;  %v9713_v24 = vld [vmem:[#allocation112_spill] sm:$0xff] }
 0x346   :  { %v3500_v9 = vmax.f32 %v3436_v20, 0.0  ;;  %v3094_v52 = vmax.f32 %v9702_v15, %v3093_v28  ;;  %v2527_v0 = vpop.f32.mrb[38].mxu0  ;;  %v9712_v20 = vld [vmem:[#allocation111_spill] sm:$0xff] }
 0x347   :  { %v3100_v60 = vsel %vm2963_vm2, %v2527_v0, -inf  ;;  %v2529_v13 = vpop.f32.mrb[39].mxu0  ;;  %v9714_v28 = vmax.f32 %v9712_v20, %v9713_v24  ;;  %v9727_v24 = vld [vmem:[#allocation64_spill] sm:$0xff] }
 0x348   :  { %v3555_v45 = vpack.c.bf16 %v3500_v9, %v3499_v32  ;;  %v3096_v31 = vmax.f32 %v3094_v52, %v3095_v4  ;;  %v3101_v49 = vmax.f32 %v9706_v37, %v3100_v60  ;;  %v9715_v32 = vld [vmem:[#allocation59_spill] sm:$0xff]  ;;  %v9716_v13 = vld [vmem:[#allocation113_spill] sm:$0xff]  ;;  %v3123_v37 = vsel %vm2963_vm2, %v9719_v3, -inf }
 0x349   :  { %v3116_v9 = vsel %vm2963_vm2, %v9715_v32, -inf }
 0x34a   :  { %v3437_v1 = vadd.f32 %v8497_v40, %v3096_v31  ;;  %v3103_v41 = vmax.f32 %v3101_v49, %v3102_v11  ;;  %6216 = vmatmul.mubr.msk.bf16.vlgmr.msra.gmra.mrb[208].mxu1 %vm2963_vm2, %v3555_v45 }
 0x34b   :  { %6220 = vmatpush3.bf16.msra.mxu1 %v6819_v53  ;;  %6221 = vmatprep.mubr.msk.bf16.mxu1 %vm6859_vm3, %v9593_v61  ;;  %v9717_v53 = vld [vmem:[#allocation114_spill] sm:$0xff] }
 0x34c   :  { %v3438_v50 = vadd.f32 %v8497_v40, %v3103_v41  ;;  %v2532_v26 = vpop.f32.mrb[40].mxu0  ;;  %6225 = vmatprep.subr.bf16.mxu1 %v9593_v61  ;;  %v3501_v17 = vmax.f32 %v3437_v1, 0.0  ;;  %v9718_v45 = vmax.f32 %v9716_v13, %v9717_v53  ;;  %v9720_v41 = vld [vmem:[#allocation115_spill] sm:$0xff] }
 0x34d   :  { %v3107_v56 = vsel %vm2963_vm2, %v2532_v26, -inf  ;;  %v2534_v44 = vpop.f32.mrb[41].mxu0 }
 0x34e   :  { %v3502_v42 = vmax.f32 %v3438_v50, 0.0  ;;  %v3108_v58 = vmax.f32 %v9710_v62, %v3107_v56  ;;  %v2535_v12 = vpop.f32.mrb[42].mxu0  ;;  %v9721_v50 = vld [vmem:[#allocation116_spill] sm:$0xff]  ;;  %v9723_v44 = vld [vmem:[#allocation63_spill] sm:$0xff] }
 0x34f   :  { %v3114_v51 = vsel %vm2963_vm2, %v2535_v12, -inf  ;;  %v2537_v38 = vpop.f32.mrb[43].mxu0  ;;  %v9722_v26 = vmax.f32 %v9720_v41, %v9721_v50  ;;  %v9735_v50 = vld [vmem:[#allocation66_spill] sm:$0xff] }
 0x350   :  { %v3556_v57 = vpack.c.bf16 %v3502_v42, %v3501_v17  ;;  %v3110_v33 = vmax.f32 %v3108_v58, %v3109_v48  ;;  %v3115_v63 = vmax.f32 %v9714_v28, %v3114_v51  ;;  %v3130_v17 = vsel %vm2963_vm2, %v9723_v44, -inf  ;;  %v8970_v42 = vld [vmem:[%s9385_s2] ss:$0 sm:$0xff]  ;;  %v9724_v38 = vld [vmem:[#allocation117_spill] sm:$0xff] }
 0x351   :  { %v3137_v28 = vsel %vm2963_vm2, %v9727_v24, -inf }
 0x352   :  { %v3439_v18 = vadd.f32 %v8497_v40, %v3110_v33  ;;  %v3117_v29 = vmax.f32 %v3115_v63, %v3116_v9  ;;  %6222 = vmatmul.mubr.msk.bf16.vlgmr.msra.gmra.mrb[212].mxu1 %vm2963_vm2, %v3556_v57  ;;  %v6822_v9 = vld [vmem:[%s9384_s3 + $0x60] sm:$0xff]  }
 0x353   :  { %6226 = vmatpush3.bf16.msra.mxu1 %v6820_v10  ;;  %6227 = vmatprep.mubr.msk.bf16.mxu1 %vm6859_vm3, %v9593_v61  ;;  %v9725_v10 = vld [vmem:[#allocation118_spill] sm:$0xff] }
 0x354   :  { %v3440_v15 = vadd.f32 %v8497_v40, %v3117_v29  ;;  %v2540_v52 = vpop.f32.mrb[44].mxu0  ;;  %6231 = vmatprep.subr.bf16.mxu1 %v9593_v61  ;;  %v3503_v4 = vmax.f32 %v3439_v18, 0.0  ;;  %v6821_v40 = vld [vmem:[%s9384_s3 + $0x58] sm:$0xff]   ;;  %v9726_v57 = vmax.f32 %v9724_v38, %v9725_v10 }
 0x355   :  { %v3121_v0 = vsel %vm2963_vm2, %v2540_v52, -inf  ;;  %v2542_v14 = vpop.f32.mrb[45].mxu0  ;;  %v9729_v52 = vld [vmem:[#allocation120_spill] sm:$0xff] }
 0x356   :  { %v3504_v60 = vmax.f32 %v3440_v15, 0.0  ;;  %v3122_v31 = vmax.f32 %v9718_v45, %v3121_v0  ;;  %v2543_v54 = vpop.f32.mrb[46].mxu0  ;;  %v9728_v15 = vld [vmem:[#allocation119_spill] sm:$0xff] }
 0x357   :  { %v3128_v49 = vsel %vm2963_vm2, %v2543_v54, -inf  ;;  %v2545_v16 = vpop.f32.mrb[47].mxu0  ;;  %v9730_v0 = vmax.f32 %v9728_v15, %v9729_v52  ;;  %v9743_v52 = vld [vmem:[#allocation70_spill] sm:$0xff] }
 0x358   :  { %v3557_v11 = vpack.c.bf16 %v3504_v60, %v3503_v4  ;;  %v3124_v1 = vmax.f32 %v3122_v31, %v3123_v37  ;;  %v3129_v56 = vmax.f32 %v9722_v26, %v3128_v49  ;;  %v9731_v4 = vld [vmem:[#allocation65_spill] sm:$0xff]  ;;  %v3151_v26 = vsel %vm2963_vm2, %v9735_v50, -inf }
 0x359   :  { %v3144_v60 = vsel %vm2963_vm2, %v9731_v4, -inf  ;;  %v9732_v16 = vld [vmem:[#allocation121_spill] sm:$0xff] }
 0x35a   :  { %v3441_v35 = vadd.f32 %v8970_v42, %v3124_v1  ;;  %v3131_v7 = vmax.f32 %v3129_v56, %v3130_v17  ;;  %6228 = vmatmul.mubr.msk.bf16.vlgmr.msra.gmra.mrb[216].mxu1 %vm2963_vm2, %v3557_v11  ;;  %v6823_v17 = vld [vmem:[%s9384_s3 + $0x68] sm:$0xff]  }
 0x35b   :  { %6232 = vmatpush3.bf16.msra.mxu1 %v6821_v40  ;;  %6233 = vmatprep.mubr.msk.bf16.mxu1 %vm6859_vm3, %v9593_v61  ;;  %v9733_v40 = vld [vmem:[#allocation122_spill] sm:$0xff] }
 0x35c   :  { %v3442_v62 = vadd.f32 %v8970_v42, %v3131_v7  ;;  %v2548_v58 = vpop.f32.mrb[48].mxu0  ;;  %6237 = vmatprep.subr.bf16.mxu1 %v9593_v61  ;;  %v3505_v48 = vmax.f32 %v3441_v35, 0.0  ;;  %v9734_v11 = vmax.f32 %v9732_v16, %v9733_v40 }
 0x35d   :  { %v3135_v12 = vsel %vm2963_vm2, %v2548_v58, -inf  ;;  %v2550_v36 = vpop.f32.mrb[49].mxu0  ;;  %v9737_v58 = vld [vmem:[#allocation124_spill] sm:$0xff] }
 0x35e   :  { %v3506_v51 = vmax.f32 %v3442_v62, 0.0  ;;  %v3136_v33 = vmax.f32 %v9726_v57, %v3135_v12  ;;  %v2551_v20 = vpop.f32.mrb[50].mxu0  ;;  %v9736_v62 = vld [vmem:[#allocation123_spill] sm:$0xff] }
 0x35f   :  { %v3142_v63 = vsel %vm2963_vm2, %v2551_v20, -inf  ;;  %v2553_v32 = vpop.f32.mrb[51].mxu0  ;;  %v9738_v12 = vmax.f32 %v9736_v62, %v9737_v58  ;;  %v9751_v58 = vld [vmem:[#allocation72_spill] sm:$0xff] }
 0x360   :  { %v3558_v18 = vpack.c.bf16 %v3506_v51, %v3505_v48  ;;  %v3138_v29 = vmax.f32 %v3136_v33, %v3137_v28  ;;  %v3143_v14 = vmax.f32 %v9730_v0, %v3142_v63  ;;  %v9739_v48 = vld [vmem:[#allocation69_spill] sm:$0xff]  ;;  %v3165_v0 = vsel %vm2963_vm2, %v9743_v52, -inf  ;;  %v9755_v52 = vld [vmem:[#allocation132_spill] sm:$0xff] }
 0x361   :  { %v3158_v51 = vsel %vm2963_vm2, %v9739_v48, -inf  ;;  %v9740_v32 = vld [vmem:[#allocation125_spill] sm:$0xff] }
 0x362   :  { %v3443_v13 = vadd.f32 %v8970_v42, %v3138_v29  ;;  %v3145_v53 = vmax.f32 %v3143_v14, %v3144_v60  ;;  %6234 = vmatmul.mubr.msk.bf16.vlgmr.msra.gmra.mrb[220].mxu1 %vm2963_vm2, %v3558_v18  ;;  %v6824_v60 = vld [vmem:[%s9384_s3 + $0x70] sm:$0xff]  }
 0x363   :  { %6238 = vmatpush3.bf16.msra.mxu1 %v6822_v9  ;;  %6239 = vmatprep.mubr.msk.bf16.mxu1 %vm6859_vm3, %v9593_v61  ;;  %v9741_v9 = vld [vmem:[#allocation126_spill] sm:$0xff] }
 0x364   :  { %v3444_v45 = vadd.f32 %v8970_v42, %v3145_v53  ;;  %v2556_v31 = vpop.f32.mrb[52].mxu0  ;;  %6243 = vmatprep.subr.bf16.mxu1 %v9593_v61  ;;  %v3507_v37 = vmax.f32 %v3443_v13, 0.0  ;;  %v9742_v18 = vmax.f32 %v9740_v32, %v9741_v9 }
 0x365   :  { %v3149_v54 = vsel %vm2963_vm2, %v2556_v31, -inf  ;;  %v2558_v3 = vpop.f32.mrb[53].mxu0  ;;  %v9745_v31 = vld [vmem:[#allocation128_spill] sm:$0xff] }
 0x366   :  { %v3508_v49 = vmax.f32 %v3444_v45, 0.0  ;;  %v3150_v1 = vmax.f32 %v9734_v11, %v3149_v54  ;;  %v2559_v41 = vpop.f32.mrb[54].mxu0  ;;  %v9744_v45 = vld [vmem:[#allocation127_spill] sm:$0xff] }
 0x367   :  { %v3156_v56 = vsel %vm2963_vm2, %v2559_v41, -inf  ;;  %v2561_v44 = vpop.f32.mrb[55].mxu0  ;;  %v9746_v54 = vmax.f32 %v9744_v45, %v9745_v31  ;;  %v6826_v31 = vld [vmem:[%s9384_s3 + $0x80] sm:$0xff]  }
 0x368   :  { %v3559_v35 = vpack.c.bf16 %v3508_v49, %v3507_v37  ;;  %v3152_v7 = vmax.f32 %v3150_v1, %v3151_v26  ;;  %v3157_v36 = vmax.f32 %v9738_v12, %v3156_v56  ;;  %v9747_v37 = vld [vmem:[#allocation71_spill] sm:$0xff]  ;;  %v9748_v44 = vld [vmem:[#allocation129_spill] sm:$0xff]  ;;  %v3179_v12 = vsel %vm2963_vm2, %v9751_v58, -inf }
 0x369   :  { %v3172_v49 = vsel %vm2963_vm2, %v9747_v37, -inf  ;;  %v9758_v37 = vld [vmem:[#allocation133_spill] sm:$0xff] }
 0x36a   :  { %v3445_v38 = vadd.f32 %v8970_v42, %v3152_v7  ;;  %v3159_v10 = vmax.f32 %v3157_v36, %v3158_v51  ;;  %6240 = vmatmul.mubr.msk.bf16.vlgmr.msra.gmra.mrb[224].mxu1 %vm2963_vm2, %v3559_v35  ;;  %v6825_v51 = vld [vmem:[%s9384_s3 + $0x78] sm:$0xff]  }
 0x36b   :  { %6244 = vmatpush3.bf16.msra.mxu1 %v6823_v17  ;;  %6245 = vmatprep.mubr.msk.bf16.mxu1 %vm6859_vm3, %v9593_v61  ;;  %v9749_v17 = vld [vmem:[#allocation130_spill] sm:$0xff] }
 0x36c   :  { %v3446_v57 = vadd.f32 %v8970_v42, %v3159_v10  ;;  %v2564_v33 = vpop.f32.mrb[56].mxu0  ;;  %6249 = vmatprep.subr.bf16.mxu1 %v9593_v61  ;;  %v3509_v28 = vmax.f32 %v3445_v38, 0.0  ;;  %v9750_v35 = vmax.f32 %v9748_v44, %v9749_v17 }
 0x36d   :  { %v3163_v20 = vsel %vm2963_vm2, %v2564_v33, -inf  ;;  %v2566_v24 = vpop.f32.mrb[57].mxu0 }
 0x36e   :  { %v3510_v63 = vmax.f32 %v3446_v57, 0.0  ;;  %v3164_v29 = vmax.f32 %v9742_v18, %v3163_v20  ;;  %v2567_v15 = vpop.f32.mrb[58].mxu0  ;;  %v9752_v57 = vmax.f32 %v8362_v6, %v8365_v47  ;;  %v9753_v20 = vld [vmem:[#allocation75_spill] sm:$0xff] }
 0x36f   :  { %v3170_v14 = vsel %vm2963_vm2, %v2567_v15, -inf  ;;  %v2569_v4 = vpop.f32.mrb[59].mxu0  ;;  %v3186_v24 = vsel %vm2963_vm2, %v9753_v20, -inf  ;;  %v9754_v15 = vld [vmem:[#allocation131_spill] sm:$0xff] }
 0x370   :  { %v3560_v13 = vpack.c.bf16 %v3510_v63, %v3509_v28  ;;  %v3166_v53 = vmax.f32 %v3164_v29, %v3165_v0  ;;  %v3171_v3 = vmax.f32 %v9746_v54, %v3170_v14  ;;  %v9756_v0 = vmax.f32 %v9754_v15, %v9755_v52  ;;  %v9767_v15 = vld [vmem:[#allocation136_spill] sm:$0xff]  ;;  %v9768_v52 = vld [vmem:[#allocation137_spill] sm:$0xff] }
 0x372   :  { %v3447_v16 = vadd.f32 %v8970_v42, %v3166_v53  ;;  %v3173_v40 = vmax.f32 %v3171_v3, %v3172_v49  ;;  %6246 = vmatmul.mubr.msk.bf16.vlgmr.msra.gmra.mrb[228].mxu1 %vm2963_vm2, %v3560_v13  ;;  %v9759_v49 = vmax.f32 %v8391_v19, %v9758_v37  ;;  %v9771_v37 = vld [vmem:[#allocation138_spill] sm:$0xff] }
 0x373   :  { %6250 = vmatpush3.bf16.msra.mxu1 %v6824_v60  ;;  %6251 = vmatprep.mubr.msk.bf16.mxu1 %vm6859_vm3, %v9593_v61  ;;  %v9757_v60 = vld [vmem:[#allocation76_spill] sm:$0xff] }
 0x374   :  { %v3448_v11 = vadd.f32 %v8970_v42, %v3173_v40  ;;  %v2572_v1 = vpop.f32.mrb[60].mxu0  ;;  %6255 = vmatprep.subr.bf16.mxu1 %v9593_v61  ;;  %v3511_v26 = vmax.f32 %v3447_v16, 0.0  ;;  %v3193_v13 = vsel %vm2963_vm2, %v9757_v60, -inf  ;;  %v9760_v40 = vld [vmem:[#allocation77_spill] sm:$0xff]  ;;  %v9770_v60 = vld [vmem:[#allocation82_spill] sm:$0xff] }
 0x375   :  { %v3177_v41 = vsel %vm2963_vm2, %v2572_v1, -inf  ;;  %v2574_v50 = vpop.f32.mrb[61].mxu0 }
 0x376   :  { %v3512_v56 = vmax.f32 %v3448_v11, 0.0  ;;  %v3178_v7 = vmax.f32 %v9750_v35, %v3177_v41  ;;  %v2575_v62 = vpop.f32.mrb[62].mxu0  ;;  %v3200_v11 = vsel %vm2963_vm2, %v9760_v40, -inf  ;;  %v9761_v35 = vld [vmem:[#allocation134_spill] sm:$0xff] }
 0x377   :  { %v3184_v36 = vsel %vm2963_vm2, %v2575_v62, -inf  ;;  %v2577_v48 = vpop.f32.mrb[63].mxu0 }
 0x378   :  { %v3561_v38 = vpack.c.bf16 %v3512_v56, %v3511_v26  ;;  %v3180_v10 = vmax.f32 %v3178_v7, %v3179_v12  ;;  %v3185_v33 = vmax.f32 %v9752_v57, %v3184_v36  ;;  %v9762_v7 = vmax.f32 %v8401_v21, %v9761_v35  ;;  %v9763_v12 = vld [vmem:[#allocation78_spill] sm:$0xff] }
 0x379   :  { %v3207_v36 = vsel %vm2963_vm2, %v9763_v12, -inf }
 0x37a   :  { %v3449_v28 = vadd.f32 %v8970_v42, %v3180_v10  ;;  %v3187_v63 = vmax.f32 %v3185_v33, %v3186_v24  ;;  %6252 = vmatmul.mubr.msk.bf16.vlgmr.msra.gmra.mrb[232].mxu1 %vm2963_vm2, %v3561_v38  ;;  %v6827_v38 = vld [vmem:[%s9384_s3 + $0x88] sm:$0xff]  }
 0x37b   :  { %6256 = vmatpush3.bf16.msra.mxu1 %v6825_v51  ;;  %6257 = vmatprep.mubr.msk.bf16.mxu1 %vm6859_vm3, %v9593_v61  ;;  %v9764_v33 = vld [vmem:[#allocation135_spill] sm:$0xff] }
 0x37c   :  { %v3450_v32 = vadd.f32 %v8970_v42, %v3187_v63  ;;  %v2580_v9 = vpop.f32.mrb[64].mxu0  ;;  %6261 = vmatprep.subr.bf16.mxu1 %v9593_v61  ;;  %v3513_v18 = vmax.f32 %v3449_v28, 0.0  ;;  %v9765_v20 = vmax.f32 %v8416_v34, %v9764_v33  ;;  %v9766_v28 = vld [vmem:[#allocation81_spill] sm:$0xff] }
 0x37d   :  { %v3191_v6 = vsel %vm2963_vm2, %v2580_v9, -inf  ;;  %v2582_v47 = vpop.f32.mrb[65].mxu0  ;;  %v3214_v21 = vsel %vm2963_vm2, %v9766_v28, -inf }
 0x37e   :  { %v3514_v29 = vmax.f32 %v3450_v32, 0.0  ;;  %v3192_v14 = vmax.f32 %v9756_v0, %v3191_v6  ;;  %v2583_v4 = vpop.f32.mrb[66].mxu0  ;;  %v9769_v0 = vmax.f32 %v9767_v15, %v9768_v52  ;;  %v6832_v15 = vld [vmem:[%s9384_s3 + $0xb0] sm:$0xff]  }
 0x37f   :  { %v3198_v53 = vsel %vm2963_vm2, %v2583_v4, -inf  ;;  %v2585_v45 = vpop.f32.mrb[67].mxu0 }
 0x380   :  { %v3562_v54 = vpack.c.bf16 %v3514_v29, %v3513_v18  ;;  %v3194_v3 = vmax.f32 %v3192_v14, %v3193_v13  ;;  %v3199_v16 = vmax.f32 %v9759_v49, %v3198_v53  ;;  %v3221_v13 = vsel %vm2963_vm2, %v9770_v60, -inf  ;;  %v9772_v49 = vld [vmem:[#allocation139_spill] sm:$0xff] }
 0x382   :  { %v3451_v1 = vadd.f32 %v8970_v42, %v3194_v3  ;;  %v3201_v41 = vmax.f32 %v3199_v16, %v3200_v11  ;;  %6258 = vmatmul.mubr.msk.bf16.vlgmr.msra.gmra.mrb[236].mxu1 %vm2963_vm2, %v3562_v54  ;;  %v9773_v16 = vmax.f32 %v9771_v37, %v9772_v49  ;;  %v9774_v11 = vld [vmem:[#allocation83_spill] sm:$0xff] }
 0x383   :  { %6262 = vmatpush3.bf16.msra.mxu1 %v6826_v31  ;;  %6263 = vmatprep.mubr.msk.bf16.mxu1 %vm6859_vm3, %v9593_v61  ;;  %v6828_v31 = vld [vmem:[%s9384_s3 + $0x90] sm:$0xff]  }
 0x384   :  { %v3452_v50 = vadd.f32 %v8970_v42, %v3201_v41  ;;  %v2588_v26 = vpop.f32.mrb[68].mxu0  ;;  %6267 = vmatprep.subr.bf16.mxu1 %v9593_v61  ;;  %v3515_v44 = vmax.f32 %v3451_v1, 0.0  ;;  %v3228_v1 = vsel %vm2963_vm2, %v9774_v11, -inf }
 0x385   :  { %v3205_v19 = vsel %vm2963_vm2, %v2588_v26, -inf  ;;  %v2590_v56 = vpop.f32.mrb[69].mxu0 }
 0x386   :  { %v3516_v17 = vmax.f32 %v3452_v50, 0.0  ;;  %v3206_v62 = vmax.f32 %v9762_v7, %v3205_v19  ;;  %v2591_v58 = vpop.f32.mrb[70].mxu0  ;;  %v9775_v7 = vld [vmem:[#allocation140_spill] sm:$0xff] }
 0x387   :  { %v3212_v48 = vsel %vm2963_vm2, %v2591_v58, -inf  ;;  %v2593_v51 = vpop.f32.mrb[71].mxu0 }
 0x388   :  { %v3563_v10 = vpack.c.bf16 %v3516_v17, %v3515_v44  ;;  %v3208_v57 = vmax.f32 %v3206_v62, %v3207_v36  ;;  %v3213_v24 = vmax.f32 %v9765_v20, %v3212_v48  ;;  %v9776_v62 = vld [vmem:[#allocation141_spill] sm:$0xff]  ;;  %v9778_v48 = vld [vmem:[#allocation84_spill] sm:$0xff] }
 0x389   :  { %v9777_v58 = vmax.f32 %v9775_v7, %v9776_v62  ;;  %v3235_v51 = vsel %vm2963_vm2, %v9778_v48, -inf  ;;  %v6841_v62 = vld [vmem:[%s9384_s3 + $0xf8] sm:$0xff]  }
 0x38a   :  { %v3453_v63 = vadd.f32 %v8970_v42, %v3208_v57  ;;  %v3215_v32 = vmax.f32 %v3213_v24, %v3214_v21  ;;  %6264 = vmatmul.mubr.msk.bf16.vlgmr.msra.gmra.mrb[240].mxu1 %vm2963_vm2, %v3563_v10  ;;  %v6829_v57 = vld [vmem:[%s9384_s3 + $0x98] sm:$0xff]   ;;  %v9779_v24 = vld [vmem:[#allocation142_spill] sm:$0xff] }
 0x38b   :  { %6268 = vmatpush3.bf16.msra.mxu1 %v6827_v38  ;;  %6269 = vmatprep.mubr.msk.bf16.mxu1 %vm6859_vm3, %v9593_v61  ;;  %v9780_v28 = vmax.f32 %v8468_v5, %v9779_v24  ;;  %v6830_v5 = vld [vmem:[%s9384_s3 + $0xa0] sm:$0xff]  }
 0x38c   :  { %v3454_v9 = vadd.f32 %v8970_v42, %v3215_v32  ;;  %v2596_v6 = vpop.f32.mrb[72].mxu0  ;;  %6273 = vmatprep.subr.bf16.mxu1 %v9593_v61  ;;  %v3517_v18 = vmax.f32 %v3453_v63, 0.0  ;;  %v9781_v63 = vld [vmem:[#allocation87_spill] sm:$0xff] }
 0x38d   :  { %v3219_v34 = vsel %vm2963_vm2, %v2596_v6, -inf  ;;  %v2598_v47 = vpop.f32.mrb[73].mxu0  ;;  %v3242_v32 = vsel %vm2963_vm2, %v9781_v63, -inf }
 0x38e   :  { %v3518_v29 = vmax.f32 %v3454_v9, 0.0  ;;  %v3220_v14 = vmax.f32 %v9769_v0, %v3219_v34  ;;  %v2599_v4 = vpop.f32.mrb[74].mxu0 }
 0x38f   :  { %v3226_v53 = vsel %vm2963_vm2, %v2599_v4, -inf  ;;  %v2601_v45 = vpop.f32.mrb[75].mxu0 }
 0x390   :  { %v3564_v54 = vpack.c.bf16 %v3518_v29, %v3517_v18  ;;  %v3222_v3 = vmax.f32 %v3220_v14, %v3221_v13  ;;  %v3227_v40 = vmax.f32 %v9773_v16, %v3226_v53  ;;  %v6838_v14 = vld [vmem:[%s9384_s3 + $0xe0] sm:$0xff]  }
 0x392   :  { %v3455_v41 = vadd.f32 %v8970_v42, %v3222_v3  ;;  %v3229_v50 = vmax.f32 %v3227_v40, %v3228_v1  ;;  %6270 = vmatmul.mubr.msk.bf16.vlgmr.msra.gmra.mrb[244].mxu1 %vm2963_vm2, %v3564_v54  ;;  %v6839_v54 = vld [vmem:[%s9384_s3 + $0xe8] sm:$0xff]  }
 0x393   :  { %6274 = vmatpush3.bf16.msra.mxu1 %v6828_v31  ;;  %6275 = vmatprep.mubr.msk.bf16.mxu1 %vm6859_vm3, %v9593_v61 }
 0x394   :  { %v3456_v26 = vadd.f32 %v8970_v42, %v3229_v50  ;;  %v2604_v19 = vpop.f32.mrb[76].mxu0  ;;  %6279 = vmatprep.subr.bf16.mxu1 %v9593_v61  ;;  %v3519_v17 = vmax.f32 %v3455_v41, 0.0  ;;  %v6840_v50 = vld [vmem:[%s9384_s3 + $0xf0] sm:$0xff]  }
 0x395   :  { %v3233_v56 = vsel %vm2963_vm2, %v2604_v19, -inf  ;;  %v2606_v44 = vpop.f32.mrb[77].mxu0 }
 0x396   :  { %v3520_v35 = vmax.f32 %v3456_v26, 0.0  ;;  %v3234_v12 = vmax.f32 %v9777_v58, %v3233_v56  ;;  %v2607_v36 = vpop.f32.mrb[78].mxu0 }
 0x397   :  { %v3240_v38 = vsel %vm2963_vm2, %v2607_v36, -inf  ;;  %v2609_v10 = vpop.f32.mrb[79].mxu0 }
 0x398   :  { %v3565_v33 = vpack.c.bf16 %v3520_v35, %v3519_v17  ;;  %v3236_v20 = vmax.f32 %v3234_v12, %v3235_v51  ;;  %v3241_v21 = vmax.f32 %v9780_v28, %v3240_v38 }
 0x39a   :  { %v3457_v9 = vadd.f32 %v8970_v42, %v3236_v20  ;;  %v3243_v6 = vmax.f32 %v3241_v21, %v3242_v32  ;;  %6276 = vmatmul.mubr.msk.bf16.vlgmr.msra.gmra.mrb[248].mxu1 %vm2963_vm2, %v3565_v33 }
 0x39b   :  { %6280 = vmatpush3.bf16.msra.mxu1 %v6829_v57  ;;  %6281 = vmatprep.mubr.msk.bf16.mxu1 %vm6859_vm3, %v9593_v61 }
 0x39c   :  { %v3458_v34 = vadd.f32 %v8970_v42, %v3243_v6  ;;  %6285 = vmatprep.subr.bf16.mxu1 %v9593_v61  ;;  %v3521_v47 = vmax.f32 %v3457_v9, 0.0  ;;  %v6831_v42 = vld [vmem:[%s9384_s3 + $0xa8] sm:$0xff]  }
 0x39e   :  { %v3522_v18 = vmax.f32 %v3458_v34, 0.0 }
 0x3a0   :  { %v3566_v29 = vpack.c.bf16 %v3522_v18, %v3521_v47 }
 0x3a2   :  { %6282 = vmatmul.mubr.msk.bf16.vlgmr.msra.gmra.mrb[252].mxu1 %vm2963_vm2, %v3566_v29 }
 0x3a3   :  { %6286 = vmatpush3.bf16.msra.mxu1 %v6830_v5  ;;  %6287 = vmatprep.mubr.msk.bf16.mxu1 %vm6859_vm3, %v9593_v61 }
 0x3a4   :  { %6291 = vmatprep.subr.bf16.mxu1 %v9593_v61 }
 0x3aa   :  { %6288 = vmatmul.mubr.msk.bf16.vlgmr.msra.gmra.mrb[0].mxu1 %vm2963_vm2, %v8524_v55  ;;  %v6833_v55 = vld [vmem:[%s9384_s3 + $0xb8] sm:$0xff]  }
 0x3ab   :  { %6292 = vmatpush3.bf16.msra.mxu1 %v6831_v42  ;;  %6293 = vmatprep.mubr.msk.bf16.mxu1 %vm6859_vm3, %v9593_v61 }
 0x3ac   :  { %6297 = vmatprep.subr.bf16.mxu1 %v9593_v61 }
 0x3b2   :  { %6294 = vmatmul.mubr.msk.bf16.vlgmr.msra.gmra.mrb[4].mxu1 %vm2963_vm2, %v8549_v59  ;;  %v6834_v59 = vld [vmem:[%s9384_s3 + $0xc0] sm:$0xff]  }
 0x3b3   :  { %6298 = vmatpush3.bf16.msra.mxu1 %v6832_v15  ;;  %6299 = vmatprep.mubr.msk.bf16.mxu1 %vm6859_vm3, %v9593_v61 }
 0x3b4   :  { %6303 = vmatprep.subr.bf16.mxu1 %v9593_v61 }
 0x3ba   :  { %6300 = vmatmul.mubr.msk.bf16.vlgmr.msra.gmra.mrb[8].mxu1 %vm2963_vm2, %v8574_v23  ;;  %v6835_v23 = vld [vmem:[%s9384_s3 + $0xc8] sm:$0xff]  }
 0x3bb   :  { %6304 = vmatpush3.bf16.msra.mxu1 %v6833_v55  ;;  %6305 = vmatprep.mubr.msk.bf16.mxu1 %vm6859_vm3, %v9593_v61 }
 0x3bc   :  { %6309 = vmatprep.subr.bf16.mxu1 %v9593_v61 }
 0x3c2   :  { %6306 = vmatmul.mubr.msk.bf16.vlgmr.msra.gmra.mrb[12].mxu1 %vm2963_vm2, %v8596_v22  ;;  %v6836_v22 = vld [vmem:[%s9384_s3 + $0xd0] sm:$0xff]  }
 0x3c3   :  { %6310 = vmatpush3.bf16.msra.mxu1 %v6834_v59  ;;  %6311 = vmatprep.mubr.msk.bf16.mxu1 %vm6859_vm3, %v9593_v61 }
 0x3c4   :  { %6315 = vmatprep.subr.bf16.mxu1 %v9593_v61 }
 0x3ca   :  { %6312 = vmatmul.mubr.msk.bf16.vlgmr.msra.gmra.mrb[16].mxu1 %vm2963_vm2, %v8614_v43  ;;  %v6837_v43 = vld [vmem:[%s9384_s3 + $0xd8] sm:$0xff]  }
 0x3cb   :  { %6316 = vmatpush3.bf16.msra.mxu1 %v6835_v23  ;;  %6317 = vmatprep.mubr.msk.bf16.mxu1 %vm6859_vm3, %v9593_v61 }
 0x3cc   :  { %6321 = vmatprep.subr.bf16.mxu1 %v9593_v61 }
 0x3d2   :  { %6318 = vmatmul.mubr.msk.bf16.vlgmr.msra.gmra.mrb[20].mxu1 %vm2963_vm2, %v8632_v39 }
 0x3d3   :  { %6322 = vmatpush3.bf16.msra.mxu1 %v6836_v22  ;;  %6323 = vmatprep.mubr.msk.bf16.mxu1 %vm6859_vm3, %v9593_v61 }
 0x3d4   :  { %6327 = vmatprep.subr.bf16.mxu1 %v9593_v61 }
 0x3da   :  { %6324 = vmatmul.mubr.msk.bf16.vlgmr.msra.gmra.mrb[24].mxu1 %vm2963_vm2, %v8650_v2 }
 0x3db   :  { %6328 = vmatpush3.bf16.msra.mxu1 %v6837_v43  ;;  %6329 = vmatprep.mubr.msk.bf16.mxu1 %vm6859_vm3, %v9593_v61 }
 0x3dc   :  { %6333 = vmatprep.subr.bf16.mxu1 %v9593_v61 }
 0x3dd   :  { %v3686_v39 = vpop.f32.mrb[176].mxu1 }
 0x3de   :  { %v6169_v52 = vpop.f32.mrb[177].mxu1  ;;  %v5244_v60 = vsel %vm5243_vm4, %v3686_v39, 0.0 }
 0x3df   :  { %v3689_v0 = vpop.f32.mrb[178].mxu1 }
 0x3e0   :  { %v6170_v4 = vpop.f32.mrb[179].mxu1 }
 0x3e2   :  { %6330 = vmatmul.mubr.msk.bf16.vlgmr.msra.gmra.mrb[28].mxu1 %vm2963_vm2, %v8668_v27  ;;  %v5307_v27 = vsel %vm5243_vm4, %v3689_v0, 0.0 }
 0x3e3   :  { %6334 = vmatpush3.bf16.msra.mxu1 %v6838_v14  ;;  %6335 = vmatprep.mubr.msk.bf16.mxu1 %vm6859_vm3, %v9593_v61 }
 0x3e4   :  { %6339 = vmatprep.subr.bf16.mxu1 %v9593_v61 }
 0x3e5   :  { %v3736_v2 = vpop.f32.mrb[180].mxu1 }
 0x3e6   :  { %v5245_v13 = vsel %vm5243_vm4, %v3736_v2, 0.0  ;;  %v6175_v53 = vpop.f32.mrb[181].mxu1 }
 0x3e7   :  { %v5246_v45 = vadd.f32 %v5245_v13, %v5244_v60  ;;  %v3739_v31 = vpop.f32.mrb[182].mxu1 }
 0x3e8   :  { %v5308_v3 = vsel %vm5243_vm4, %v3739_v31, 0.0  ;;  %v6176_v37 = vpop.f32.mrb[183].mxu1 }
 0x3e9   :  { %v5309_v49 = vadd.f32 %v5308_v3, %v5307_v27 }
 0x3ea   :  { %6336 = vmatmul.mubr.msk.bf16.vlgmr.msra.gmra.mrb[32].mxu1 %vm2963_vm2, %v8686_v25 }
 0x3eb   :  { %6340 = vmatpush3.bf16.msra.mxu1 %v6839_v54  ;;  %6341 = vmatprep.mubr.msk.bf16.mxu1 %vm6859_vm3, %v9593_v61 }
 0x3ec   :  { %6345 = vmatprep.subr.bf16.mxu1 %v9593_v61 }
 0x3ed   :  { %v3786_v16 = vpop.f32.mrb[184].mxu1 }
 0x3ee   :  { %v5247_v40 = vsel %vm5243_vm4, %v3786_v16, 0.0  ;;  %v6181_v11 = vpop.f32.mrb[185].mxu1 }
 0x3ef   :  { %v5248_v1 = vadd.f32 %v5247_v40, %v5246_v45  ;;  %v3789_v41 = vpop.f32.mrb[186].mxu1 }
 0x3f0   :  { %v5310_v26 = vsel %vm5243_vm4, %v3789_v41, 0.0  ;;  %v6182_v19 = vpop.f32.mrb[187].mxu1 }
 0x3f1   :  { %v5311_v25 = vadd.f32 %v5310_v26, %v5309_v49 }
 0x3f2   :  { %6342 = vmatmul.mubr.msk.bf16.vlgmr.msra.gmra.mrb[36].mxu1 %vm2963_vm2, %v8704_v46 }
 0x3f3   :  { %6346 = vmatpush3.bf16.msra.mxu1 %v6840_v50  ;;  %6347 = vmatprep.mubr.msk.bf16.mxu1 %vm6859_vm3, %v9593_v61 }
 0x3f4   :  { %6351 = vmatprep.subr.bf16.mxu1 %v9593_v61 }
 0x3f5   :  { %v3836_v56 = vpop.f32.mrb[188].mxu1 }
 0x3f6   :  { %v5249_v44 = vsel %vm5243_vm4, %v3836_v56, 0.0  ;;  %v6187_v17 = vpop.f32.mrb[189].mxu1 }
 0x3f7   :  { %v5250_v35 = vadd.f32 %v5249_v44, %v5248_v1  ;;  %v3839_v7 = vpop.f32.mrb[190].mxu1 }
 0x3f8   :  { %v5312_v58 = vsel %vm5243_vm4, %v3839_v7, 0.0  ;;  %v6188_v12 = vpop.f32.mrb[191].mxu1 }
 0x3f9   :  { %v5313_v46 = vadd.f32 %v5312_v58, %v5311_v25 }
 0x3fa   :  { %6348 = vmatmul.mubr.msk.bf16.vlgmr.msra.gmra.mrb[40].mxu1 %vm2963_vm2, %v8722_v30 }
 0x3fb   :  { %6352 = vmatpush3.bf16.msra.mxu1 %v6841_v62  ;;  %6353 = vmatprep.mubr.msk.bf16.mxu1 %vm6859_vm3, %v9593_v61 }
 0x3fc   :  { %6357 = vmatprep.subr.bf16.mxu1 %v9593_v61 }
 0x3fd   :  { %v3886_v36 = vpop.f32.mrb[192].mxu1 }
 0x3fe   :  { %v5251_v48 = vsel %vm5243_vm4, %v3886_v36, 0.0  ;;  %v6193_v51 = vpop.f32.mrb[193].mxu1 }
 0x3ff   :  { %v5252_v38 = vadd.f32 %v5251_v48, %v5250_v35  ;;  %v3889_v10 = vpop.f32.mrb[194].mxu1 }
 0x400   :  { %v5314_v57 = vsel %vm5243_vm4, %v3889_v10, 0.0  ;;  %v6194_v33 = vpop.f32.mrb[195].mxu1 }
 0x401   :  { %v5315_v20 = vadd.f32 %v5314_v57, %v5313_v46 }
 0x402   :  { %6354 = vmatmul.mubr.msk.bf16.vlgmr.msra.gmra.mrb[44].mxu1 %vm2963_vm2, %v8738_v8 }
 0x403   :  { %6373 = vmatprep.mubr.msk.bf16.mxu1 %vm6859_vm3, %v9593_v61 }
 0x405   :  { %v3936_v30 = vpop.f32.mrb[196].mxu1 }
 0x406   :  { %v5253_v24 = vsel %vm5243_vm4, %v3936_v30, 0.0  ;;  %v6199_v28 = vpop.f32.mrb[197].mxu1 }
 0x407   :  { %v5254_v21 = vadd.f32 %v5253_v24, %v5252_v38  ;;  %v3939_v63 = vpop.f32.mrb[198].mxu1  ;;  %v6842_v24 = vld [vmem:[%s9386_s5] sm:$0xff]   ;;  %v6843_v28 = vld [vmem:[%s9386_s5 + $0x8] sm:$0xff]  }
 0x408   :  { %v5316_v32 = vsel %vm5243_vm4, %v3939_v63, 0.0  ;;  %v6200_v9 = vpop.f32.mrb[199].mxu1  ;;  %6358 = vmatpush3.bf16.msra.mxu1 %v6842_v24 }
 0x409   :  { %v5317_v6 = vadd.f32 %v5316_v32, %v5315_v20  ;;  %6359 = vmatprep.subr.bf16.mxu1 %v9593_v61 }
 0x40c   :  { %6360 = vmatpush3.bf16.msra.mxu1 %v6843_v28 }
 0x40d   :  { %v3986_v34 = vpop.f32.mrb[200].mxu1  ;;  %6361 = vmatprep.subr.bf16.mxu1 %v9593_v61 }
 0x40e   :  { %v5255_v47 = vsel %vm5243_vm4, %v3986_v34, 0.0  ;;  %v6205_v18 = vpop.f32.mrb[201].mxu1 }
 0x40f   :  { %v5256_v5 = vadd.f32 %v5255_v47, %v5254_v21  ;;  %v3989_v29 = vpop.f32.mrb[202].mxu1  ;;  %v6844_v18 = vld [vmem:[%s9386_s5 + $0x10] sm:$0xff]  }
 0x410   :  { %v5318_v8 = vsel %vm5243_vm4, %v3989_v29, 0.0  ;;  %v6206_v42 = vpop.f32.mrb[203].mxu1  ;;  %6362 = vmatpush3.bf16.msra.mxu1 %v6844_v18  ;;  %v6845_v29 = vld [vmem:[%s9386_s5 + $0x18] sm:$0xff]  }
 0x411   :  { %v5319_v15 = vadd.f32 %v5318_v8, %v5317_v6  ;;  %6363 = vmatprep.subr.bf16.mxu1 %v9593_v61 }
 0x414   :  { %6364 = vmatpush3.bf16.msra.mxu1 %v6845_v29 }
 0x415   :  { %v4036_v55 = vpop.f32.mrb[204].mxu1  ;;  %6365 = vmatprep.subr.bf16.mxu1 %v9593_v61 }
 0x416   :  { %v5257_v59 = vsel %vm5243_vm4, %v4036_v55, 0.0  ;;  %v6211_v23 = vpop.f32.mrb[205].mxu1 }
 0x417   :  { %v5258_v22 = vadd.f32 %v5257_v59, %v5256_v5  ;;  %v4039_v43 = vpop.f32.mrb[206].mxu1 }
 0x418   :  { %v5320_v39 = vsel %vm5243_vm4, %v4039_v43, 0.0  ;;  %v6212_v52 = vpop.f32.mrb[207].mxu1  ;;  %v6846_v43 = vld [vmem:[%s9386_s5 + $0x20] sm:$0xff]  }
 0x419   :  { %v5321_v0 = vadd.f32 %v5320_v39, %v5319_v15  ;;  %6366 = vmatpush3.bf16.msra.mxu1 %v6846_v43  ;;  %v6847_v52 = vld [vmem:[%s9386_s5 + $0x28] sm:$0xff]  }
 0x41a   :  { %6367 = vmatprep.subr.bf16.mxu1 %v9593_v61 }
 0x41d   :  { %v4086_v14 = vpop.f32.mrb[208].mxu1  ;;  %6368 = vmatpush3.bf16.msra.mxu1 %v6847_v52 }
 0x41e   :  { %v5259_v4 = vsel %vm5243_vm4, %v4086_v14, 0.0  ;;  %v6217_v2 = vpop.f32.mrb[209].mxu1  ;;  %6369 = vmatprep.subr.bf16.mxu1 %v9593_v61 }
 0x41f   :  { %v5260_v60 = vadd.f32 %v5259_v4, %v5258_v22  ;;  %v4089_v13 = vpop.f32.mrb[210].mxu1 }
 0x420   :  { %v5322_v53 = vsel %vm5243_vm4, %v4089_v13, 0.0  ;;  %v6218_v45 = vpop.f32.mrb[211].mxu1 }
 0x421   :  { %v5323_v31 = vadd.f32 %v5322_v53, %v5321_v0  ;;  %v6848_v45 = vld [vmem:[%s9386_s5 + $0x30] sm:$0xff]  }
 0x422   :  { %6370 = vmatpush3.bf16.msra.mxu1 %v6848_v45 }
 0x423   :  { %6371 = vmatprep.subr.bf16.mxu1 %v9593_v61 }
 0x425   :  { %v4136_v54 = vpop.f32.mrb[212].mxu1 }
 0x426   :  { %v5261_v27 = vsel %vm5243_vm4, %v4136_v54, 0.0  ;;  %v6223_v3 = vpop.f32.mrb[213].mxu1  ;;  %v6849_v54 = vld [vmem:[%s9386_s5 + $0x38] ss:$0 sps:$4 sm:$0xff]  }
 0x427   :  { %v5262_v37 = vadd.f32 %v5261_v27, %v5260_v60  ;;  %v4139_v49 = vpop.f32.mrb[214].mxu1  ;;  %v5454_v3 = vsel %vm5452_vm5, %v6849_v54, 0 }
 0x428   :  { %v5324_v16 = vsel %vm5243_vm4, %v4139_v49, 0.0  ;;  %v6224_v40 = vpop.f32.mrb[215].mxu1  ;;  %6372 = vmatpush3.bf16.msra.mxu1 %v5454_v3 }
 0x429   :  { %v5325_v11 = vadd.f32 %v5324_v16, %v5323_v31  ;;  %6377 = vmatprep.subr.bf16.mxu1 %v9593_v61 }
 0x42d   :  { %v4186_v1 = vpop.f32.mrb[216].mxu1 }
 0x42e   :  { %v5263_v41 = vsel %vm5243_vm4, %v4186_v1, 0.0  ;;  %v6229_v50 = vpop.f32.mrb[217].mxu1 }
 0x42f   :  { %v5264_v26 = vadd.f32 %v5263_v41, %v5262_v37  ;;  %v4189_v19 = vpop.f32.mrb[218].mxu1 }
 0x430   :  { %v5326_v25 = vsel %vm5243_vm4, %v4189_v19, 0.0  ;;  %v6230_v56 = vpop.f32.mrb[219].mxu1 }
 0x431   :  { %v5327_v44 = vadd.f32 %v5326_v25, %v5325_v11 }
 0x435   :  { %v4236_v17 = vpop.f32.mrb[220].mxu1 }
 0x436   :  { %v5265_v35 = vsel %vm5243_vm4, %v4236_v17, 0.0  ;;  %v6235_v7 = vpop.f32.mrb[221].mxu1 }
 0x437   :  { %v5266_v62 = vadd.f32 %v5265_v35, %v5264_v26  ;;  %v4239_v58 = vpop.f32.mrb[222].mxu1 }
 0x438   :  { %v5328_v12 = vsel %vm5243_vm4, %v4239_v58, 0.0  ;;  %v6236_v46 = vpop.f32.mrb[223].mxu1 }
 0x439   :  { %v5329_v36 = vadd.f32 %v5328_v12, %v5327_v44 }
 0x43d   :  { %v4286_v48 = vpop.f32.mrb[224].mxu1 }
 0x43e   :  { %v5267_v51 = vsel %vm5243_vm4, %v4286_v48, 0.0  ;;  %v6241_v38 = vpop.f32.mrb[225].mxu1 }
 0x43f   :  { %v5268_v10 = vadd.f32 %v5267_v51, %v5266_v62  ;;  %v4289_v57 = vpop.f32.mrb[226].mxu1 }
 0x440   :  { %v5330_v33 = vsel %vm5243_vm4, %v4289_v57, 0.0  ;;  %v6242_v20 = vpop.f32.mrb[227].mxu1 }
 0x441   :  { %v5331_v30 = vadd.f32 %v5330_v33, %v5329_v36 }
 0x445   :  { %v4336_v21 = vpop.f32.mrb[228].mxu1 }
 0x446   :  { %v5269_v63 = vsel %vm5243_vm4, %v4336_v21, 0.0  ;;  %v6247_v32 = vpop.f32.mrb[229].mxu1 }
 0x447   :  { %v5270_v9 = vadd.f32 %v5269_v63, %v5268_v10  ;;  %v4339_v6 = vpop.f32.mrb[230].mxu1 }
 0x448   :  { %v5332_v34 = vsel %vm5243_vm4, %v4339_v6, 0.0  ;;  %v6248_v47 = vpop.f32.mrb[231].mxu1 }
 0x449   :  { %v5333_v5 = vadd.f32 %v5332_v34, %v5331_v30 }
 0x44d   :  { %v4386_v8 = vpop.f32.mrb[232].mxu1 }
 0x44e   :  { %v5271_v42 = vsel %vm5243_vm4, %v4386_v8, 0.0  ;;  %v6253_v15 = vpop.f32.mrb[233].mxu1 }
 0x44f   :  { %v5272_v55 = vadd.f32 %v5271_v42, %v5270_v9  ;;  %v4389_v59 = vpop.f32.mrb[234].mxu1 }
 0x450   :  { %v5334_v23 = vsel %vm5243_vm4, %v4389_v59, 0.0  ;;  %v6254_v22 = vpop.f32.mrb[235].mxu1 }
 0x451   :  { %v5335_v39 = vadd.f32 %v5334_v23, %v5333_v5 }
 0x455   :  { %v4436_v0 = vpop.f32.mrb[236].mxu1 }
 0x456   :  { %v5273_v14 = vsel %vm5243_vm4, %v4436_v0, 0.0  ;;  %v6259_v4 = vpop.f32.mrb[237].mxu1 }
 0x457   :  { %v5274_v2 = vadd.f32 %v5273_v14, %v5272_v55  ;;  %v4439_v60 = vpop.f32.mrb[238].mxu1 }
 0x458   :  { %v5336_v13 = vsel %vm5243_vm4, %v4439_v60, 0.0  ;;  %v6260_v53 = vpop.f32.mrb[239].mxu1 }
 0x459   :  { %v5337_v31 = vadd.f32 %v5336_v13, %v5335_v39 }
 0x45d   :  { %v4486_v27 = vpop.f32.mrb[240].mxu1 }
 0x45e   :  { %v5275_v37 = vsel %vm5243_vm4, %v4486_v27, 0.0  ;;  %v6265_v49 = vpop.f32.mrb[241].mxu1 }
 0x45f   :  { %v5276_v16 = vadd.f32 %v5275_v37, %v5274_v2  ;;  %v4489_v40 = vpop.f32.mrb[242].mxu1 }
 0x460   :  { %v5338_v11 = vsel %vm5243_vm4, %v4489_v40, 0.0  ;;  %v6266_v1 = vpop.f32.mrb[243].mxu1 }
 0x461   :  { %v5339_v41 = vadd.f32 %v5338_v11, %v5337_v31 }
 0x465   :  { %v4536_v50 = vpop.f32.mrb[244].mxu1 }
 0x466   :  { %v5277_v26 = vsel %vm5243_vm4, %v4536_v50, 0.0  ;;  %v6271_v19 = vpop.f32.mrb[245].mxu1 }
 0x467   :  { %v5278_v25 = vadd.f32 %v5277_v26, %v5276_v16  ;;  %v4539_v56 = vpop.f32.mrb[246].mxu1 }
 0x468   :  { %v5340_v44 = vsel %vm5243_vm4, %v4539_v56, 0.0  ;;  %v6272_v17 = vpop.f32.mrb[247].mxu1 }
 0x469   :  { %v5341_v35 = vadd.f32 %v5340_v44, %v5339_v41 }
 0x46d   :  { %v4586_v7 = vpop.f32.mrb[248].mxu1 }
 0x46e   :  { %v5279_v62 = vsel %vm5243_vm4, %v4586_v7, 0.0  ;;  %v6277_v58 = vpop.f32.mrb[249].mxu1 }
 0x46f   :  { %v5280_v12 = vadd.f32 %v5279_v62, %v5278_v25  ;;  %v4589_v46 = vpop.f32.mrb[250].mxu1 }
 0x470   :  { %v5342_v36 = vsel %vm5243_vm4, %v4589_v46, 0.0  ;;  %v6278_v48 = vpop.f32.mrb[251].mxu1 }
 0x471   :  { %v5343_v51 = vadd.f32 %v5342_v36, %v5341_v35 }
 0x475   :  { %v4636_v38 = vpop.f32.mrb[252].mxu1 }
 0x476   :  { %v5281_v10 = vsel %vm5243_vm4, %v4636_v38, 0.0  ;;  %v6283_v57 = vpop.f32.mrb[253].mxu1 }
 0x477   :  { %v5282_v33 = vadd.f32 %v5281_v10, %v5280_v12  ;;  %v4639_v20 = vpop.f32.mrb[254].mxu1 }
 0x478   :  { %v5344_v30 = vsel %vm5243_vm4, %v4639_v20, 0.0  ;;  %v6284_v24 = vpop.f32.mrb[255].mxu1 }
 0x479   :  { %v5345_v28 = vadd.f32 %v5344_v30, %v5343_v51 }
 0x47d   :  { %v4686_v21 = vpop.f32.mrb[0].mxu1 }
 0x47e   :  { %v5283_v63 = vsel %vm5243_vm4, %v4686_v21, 0.0  ;;  %v6289_v32 = vpop.f32.mrb[1].mxu1 }
 0x47f   :  { %v5284_v9 = vadd.f32 %v5283_v63, %v5282_v33  ;;  %v4689_v6 = vpop.f32.mrb[2].mxu1 }
 0x480   :  { %v5346_v34 = vsel %vm5243_vm4, %v4689_v6, 0.0  ;;  %v6290_v47 = vpop.f32.mrb[3].mxu1 }
 0x481   :  { %v5347_v18 = vadd.f32 %v5346_v34, %v5345_v28 }
 0x485   :  { %v4736_v5 = vpop.f32.mrb[4].mxu1 }
 0x486   :  { %v5285_v29 = vsel %vm5243_vm4, %v4736_v5, 0.0  ;;  %v6295_v8 = vpop.f32.mrb[5].mxu1 }
 0x487   :  { %v5286_v42 = vadd.f32 %v5285_v29, %v5284_v9  ;;  %v4739_v15 = vpop.f32.mrb[6].mxu1 }
 0x488   :  { %v5348_v55 = vsel %vm5243_vm4, %v4739_v15, 0.0  ;;  %v6296_v59 = vpop.f32.mrb[7].mxu1 }
 0x489   :  { %v5349_v23 = vadd.f32 %v5348_v55, %v5347_v18 }
 0x48d   :  { %v4786_v22 = vpop.f32.mrb[8].mxu1 }
 0x48e   :  { %v5287_v43 = vsel %vm5243_vm4, %v4786_v22, 0.0  ;;  %v6301_v39 = vpop.f32.mrb[9].mxu1 }
 0x48f   :  { %v5288_v52 = vadd.f32 %v5287_v43, %v5286_v42  ;;  %v4789_v0 = vpop.f32.mrb[10].mxu1 }
 0x490   :  { %v5350_v14 = vsel %vm5243_vm4, %v4789_v0, 0.0  ;;  %v6302_v4 = vpop.f32.mrb[11].mxu1 }
 0x491   :  { %v5351_v2 = vadd.f32 %v5350_v14, %v5349_v23 }
 0x495   :  { %v4836_v60 = vpop.f32.mrb[12].mxu1 }
 0x496   :  { %v5289_v13 = vsel %vm5243_vm4, %v4836_v60, 0.0  ;;  %v6307_v53 = vpop.f32.mrb[13].mxu1 }
 0x497   :  { %v5290_v45 = vadd.f32 %v5289_v13, %v5288_v52  ;;  %v4839_v31 = vpop.f32.mrb[14].mxu1 }
 0x498   :  { %v5352_v54 = vsel %vm5243_vm4, %v4839_v31, 0.0  ;;  %v6308_v27 = vpop.f32.mrb[15].mxu1 }
 0x499   :  { %v5353_v3 = vadd.f32 %v5352_v54, %v5351_v2 }
 0x49d   :  { %v4886_v37 = vpop.f32.mrb[16].mxu1 }
 0x49e   :  { %v5291_v49 = vsel %vm5243_vm4, %v4886_v37, 0.0  ;;  %v6313_v16 = vpop.f32.mrb[17].mxu1 }
 0x49f   :  { %v5292_v40 = vadd.f32 %v5291_v49, %v5290_v45  ;;  %v4889_v11 = vpop.f32.mrb[18].mxu1  ;;  %v6066_v45 = vld [vmem:[%s9388_s4] ss:$0 sm:$0xff] }
 0x4a0   :  { %v5354_v1 = vsel %vm5243_vm4, %v4889_v11, 0.0  ;;  %v6314_v41 = vpop.f32.mrb[19].mxu1 }
 0x4a1   :  { %v5355_v50 = vadd.f32 %v5354_v1, %v5353_v3  ;;  %v6850_v41 = vld [vmem:[%s9387_s7] sm:$0xff]  }
 0x4a5   :  { %v4936_v26 = vpop.f32.mrb[20].mxu1 }
 0x4a6   :  { %v5293_v19 = vsel %vm5243_vm4, %v4936_v26, 0.0  ;;  %v6319_v25 = vpop.f32.mrb[21].mxu1  ;;  %v6851_v26 = vld [vmem:[%s9387_s7 + $0x8] sm:$0xff]  }
 0x4a7   :  { %v5294_v56 = vadd.f32 %v5293_v19, %v5292_v40  ;;  %v4939_v44 = vpop.f32.mrb[22].mxu1  ;;  %v6852_v19 = vld [vmem:[%s9387_s7 + $0x10] sm:$0xff]   ;;  %v6853_v25 = vld [vmem:[%s9387_s7 + $0x18] sm:$0xff]  }
 0x4a8   :  { %v5356_v17 = vsel %vm5243_vm4, %v4939_v44, 0.0  ;;  %v6320_v35 = vpop.f32.mrb[23].mxu1  ;;  %v6855_v44 = vld [vmem:[%s9387_s7 + $0x28] ss:$0 sps:$4 sm:$0x33]  }
 0x4a9   :  { %v5357_v7 = vadd.f32 %v5356_v17, %v5355_v50  ;;  %v5557_v17 = vsel %vm5555_vm6, %v6855_v44, 0  ;;  %v6067_v35 = vld [vmem:[%s9389_s6] ss:$0 sm:$0xff] }
 0x4ad   :  { %v4986_v62 = vpop.f32.mrb[24].mxu1 }
 0x4ae   :  { %v5295_v58 = vsel %vm5243_vm4, %v4986_v62, 0.0  ;;  %v6325_v12 = vpop.f32.mrb[25].mxu1 }
 0x4af   :  { %v5296_v46 = vadd.f32 %v5295_v58, %v5294_v56  ;;  %v4989_v36 = vpop.f32.mrb[26].mxu1  ;;  %v6854_v56 = vld [vmem:[%s9387_s7 + $0x20] sm:$0xff]  }
 0x4b0   :  { %v5358_v48 = vsel %vm5243_vm4, %v4989_v36, 0.0  ;;  %v6326_v51 = vpop.f32.mrb[27].mxu1 }
 0x4b1   :  { %v5359_v38 = vadd.f32 %v5358_v48, %v5357_v7 }
 0x4b5   :  { %v5036_v10 = vpop.f32.mrb[28].mxu1 }
 0x4b6   :  { %v5297_v57 = vsel %vm5243_vm4, %v5036_v10, 0.0  ;;  %v6331_v33 = vpop.f32.mrb[29].mxu1 }
 0x4b7   :  { %v5298_v20 = vadd.f32 %v5297_v57, %v5296_v46  ;;  %v5039_v30 = vpop.f32.mrb[30].mxu1 }
 0x4b8   :  { %v5360_v24 = vsel %vm5243_vm4, %v5039_v30, 0.0  ;;  %v6332_v28 = vpop.f32.mrb[31].mxu1 }
 0x4b9   :  { %v5361_v21 = vadd.f32 %v5360_v24, %v5359_v38  ;;  %v6077_v38 = vld [vmem:[%s9390_s8] ss:$0 sm:$0xff] }
 0x4bd   :  { %v5086_v63 = vpop.f32.mrb[32].mxu1 }
 0x4be   :  { %v5299_v32 = vsel %vm5243_vm4, %v5086_v63, 0.0  ;;  %v6337_v9 = vpop.f32.mrb[33].mxu1 }
 0x4bf   :  { %v5300_v6 = vadd.f32 %v5299_v32, %v5298_v20  ;;  %v5089_v34 = vpop.f32.mrb[34].mxu1 }
 0x4c0   :  { %v5362_v47 = vsel %vm5243_vm4, %v5089_v34, 0.0  ;;  %v6338_v18 = vpop.f32.mrb[35].mxu1 }
 0x4c1   :  { %v5363_v5 = vadd.f32 %v5362_v47, %v5361_v21 }
 0x4c5   :  { %v5136_v29 = vpop.f32.mrb[36].mxu1 }
 0x4c6   :  { %v5301_v8 = vsel %vm5243_vm4, %v5136_v29, 0.0  ;;  %v6343_v42 = vpop.f32.mrb[37].mxu1 }
 0x4c7   :  { %v5302_v15 = vadd.f32 %v5301_v8, %v5300_v6  ;;  %v5139_v55 = vpop.f32.mrb[38].mxu1 }
 0x4c8   :  { %v5364_v59 = vsel %vm5243_vm4, %v5139_v55, 0.0  ;;  %v6344_v23 = vpop.f32.mrb[39].mxu1 }
 0x4c9   :  { %v5365_v22 = vadd.f32 %v5364_v59, %v5363_v5 }
 0x4cd   :  { %v5186_v43 = vpop.f32.mrb[40].mxu1 }
 0x4ce   :  { %v5303_v39 = vsel %vm5243_vm4, %v5186_v43, 0.0  ;;  %v6349_v52 = vpop.f32.mrb[41].mxu1 }
 0x4cf   :  { %v5304_v0 = vadd.f32 %v5303_v39, %v5302_v15  ;;  %v5189_v14 = vpop.f32.mrb[42].mxu1 }
 0x4d0   :  { %v5366_v4 = vsel %vm5243_vm4, %v5189_v14, 0.0  ;;  %v6350_v2 = vpop.f32.mrb[43].mxu1 }
 0x4d1   :  { %v5367_v60 = vadd.f32 %v5366_v4, %v5365_v22 }
 0x4d5   :  { %v5236_v13 = vpop.f32.mrb[44].mxu1 }
 0x4d6   :  { %v5305_v53 = vsel %vm5243_vm4, %v5236_v13, 0.0  ;;  %v6355_v31 = vpop.f32.mrb[45].mxu1 }
 0x4d7   :  { %v5306_v54 = vadd.f32 %v5305_v53, %v5304_v0  ;;  %v5239_v27 = vpop.f32.mrb[46].mxu1 }
 0x4d8   :  { %v5368_v3 = vsel %vm5243_vm4, %v5239_v27, 0.0  ;;  %v6356_v37 = vpop.f32.mrb[47].mxu1 }
 0x4d9   :  { %v5377_v49 = vadd.f32 %v6066_v45, %v5306_v54  ;;  %v5369_v16 = vadd.f32 %v5368_v3, %v5367_v60 }
 0x4db   :  { %v5378_v40 = vadd.f32 %v6066_v45, %v5369_v16  ;;  %v5379_v11 = vmax.f32 %v5377_v49, 0.0 }
 0x4dd   :  { %v5380_v1 = vmax.f32 %v5378_v40, 0.0 }
 0x4df   :  { %v5381_v50 = vpack.c.bf16 %v5380_v1, %v5379_v11 }
 0x4e1   :  { %6374 = vmatmul.mubr.msk.bf16.vlgmr.msra.gmra.mrb[48].mxu1 %vm5243_vm4, %v5381_v50 }
 0x4e2   :  { %6378 = vmatpush3.bf16.msra.mxu1 %v6850_v41  ;;  %6389 = vmatprep.mubr.msk.bf16.mxu1 %vm6859_vm3, %v9593_v61 }
 0x4e3   :  { %6379 = vmatprep.subr.bf16.mxu1 %v9593_v61 }
 0x4e6   :  { %6380 = vmatpush3.bf16.msra.mxu1 %v6851_v26 }
 0x4e7   :  { %6381 = vmatprep.subr.bf16.mxu1 %v9593_v61 }
 0x4ea   :  { %6382 = vmatpush3.bf16.msra.mxu1 %v6852_v19 }
 0x4eb   :  { %6383 = vmatprep.subr.bf16.mxu1 %v9593_v61 }
 0x4ee   :  { %6384 = vmatpush3.bf16.msra.mxu1 %v6853_v25 }
 0x4ef   :  { %6385 = vmatprep.subr.bf16.mxu1 %v9593_v61 }
 0x4f2   :  { %6386 = vmatpush3.bf16.msra.mxu1 %v6854_v56 }
 0x4f3   :  { %6387 = vmatprep.subr.bf16.mxu1 %v9593_v61 }
 0x4f6   :  { %6388 = vmatpush3.bf16.msra.mxu1 %v5557_v17 }
 0x5b4   :  { %v5490_v7 = vpop.f32.mrb[48].mxu1 }
 0x5b5   :  { %v5491_v62 = vadd.f32 %v6067_v35, %v5490_v7  ;;  %v6375_v58 = vpop.f32.mrb[49].mxu1 }
 0x5b6   :  { %v5493_v12 = vpop.f32.mrb[50].mxu1 }
 0x5b7   :  { %v5494_v46 = vadd.f32 %v6067_v35, %v5493_v12  ;;  %v6376_v36 = vpop.f32.mrb[51].mxu1  ;;  %v5497_v48 = vmax.f32 %v5491_v62, 0.0 }
 0x5b9   :  { %v5498_v51 = vmax.f32 %v5494_v46, 0.0 }
 0x5bb   :  { %v5499_v61 = vpack.c.bf16 %v5498_v51, %v5497_v48 }
 0x5bd   :  { %6390 = vmatmul.mubr.msk.bf16.vlgmr.msra.gmra.mrb[52].mxu1 %vm5551_vm7, %v5499_v61 }
 0x690   :  { %v5593_v10 = vpop.f32.mrb[52].mxu1 }
 0x691   :  { %v5594_v57 = vadd.f32 %v6077_v38, %v5593_v10  ;;  %v6391_v33 = vpop.f32.mrb[53].mxu1 }
 0x692   :  { %v5596_v20 = vpop.f32.mrb[54].mxu1 }
 0x693   :  { %5601 = vst.msk [vmem:[%s9391_s9] sm:$0xff] %vm5600_vm8, %v5594_v57  ;;  %v5597_v30 = vadd.f32 %v6077_v38, %v5596_v20  ;;  %v6392_v24 = vpop.f32.mrb[55].mxu1 }
 0x695   :  { %5602 = vst.msk [vmem:[%s9391_s9 + $0x8] sm:$0xff] %vm5600_vm8, %v5597_v30 }

</bundles_post_ra>
